<compile_context>
chip_gen: v5e
topology: v5e:2x2
jax: 0.10.0
libtpu: 0.0.40
codegen_flags: <defaults>
</compile_context>

<pallas_src>
import functools

import jax
import jax.numpy as jnp
from jax.experimental import pallas as pl
from jax.experimental.pallas import tpu as pltpu


# ----------------------------- Pallas kernel --------------------------------

def _convt_bn_relu_kernel(x_ref, w_ref, shift_ref, o_ref):
    # x_ref:     (tm, Cin)     f32 flattened input rows
    # w_ref:     (Cin, ncols)  f32 weight with the BatchNorm scale folded in
    # shift_ref: (1, ncols)    f32 folded BatchNorm shift (+ conv bias)
    # o_ref:     (tm, ncols)   bf16 lane-dense output tile (ncols % 128 == 0)
    acc = jnp.dot(x_ref[...], w_ref[...], preferred_element_type=jnp.float32)
    o_ref[...] = jnp.maximum(acc + shift_ref[...], 0.0).astype(o_ref.dtype)


# ------------------------------- wrapper -------------------------------------

def conv_transpose3d_bn_relu(x, weight, bias, gamma, beta, running_mean,
                             running_var, *, kernel_size, stride, padding,
                             eps=1e-5, tm=1024):
    """Fused ConvTranspose3d + BatchNorm3d(eval) + ReLU.  Returns bf16.

    x: (N, Cin, D, H, W);  weight: (Cin, Cout, kd, kh, kw) [PyTorch layout].
    Requires kernel_size == stride (non-overlapping patch expansion), as in
    the module defaults.  `padding` is handled by cropping the full output.
    """
    n, cin, d, h, w = x.shape
    cout = weight.shape[1]
    kd, kh, kw = kernel_size
    sd, sh, sw = stride
    pd, ph, pw = padding
    assert (kd, kh, kw) == (sd, sh, sw), (
        "only the non-overlapping case kernel_size == stride is lowered")
    # TODO(synk): general (overlapping / dilated) ConvTranspose3d is not lowered.

    m = n * d * h * w
    kkk = kd * kh * kw
    ncols = cout * kkk

    # (N, Cin, D, H, W) -> (M, Cin); rows flatten as (n, d, h, w).  Kept f32:
    # input traffic (Cin=4 per row) is negligible vs. the Cout*k^3 output.
    x_flat = jnp.transpose(x, (0, 2, 3, 4, 1)).reshape(m, cin)
    x_flat = x_flat.astype(jnp.float32)

    # Fold conv bias + eval-mode BatchNorm: scale goes into the weight columns
    # (f32), shift stays a per-column f32 row added to the f32 accumulator.
    # PyTorch ConvTranspose3d weight is (Cin, Cout, kd, kh, kw); the plain
    # reshape flattens columns as (co, a, b, c), matching the output reshape.
    inv_std = jax.lax.rsqrt(running_var.astype(jnp.float32) + eps)
    scale_c = gamma.astype(jnp.float32) * inv_std                       # (Cout,)
    shift_c = (beta.astype(jnp.float32)
               + (bias.astype(jnp.float32)
                  - running_mean.astype(jnp.float32)) * scale_c)        # (Cout,)
    w_mat = (weight.astype(jnp.float32).reshape(cin, ncols)
             * jnp.repeat(scale_c, kkk)[None, :])                       # (Cin, ncols)
    shift_row = jnp.repeat(shift_c, kkk).reshape(1, ncols)              # (1, ncols)

    # Lane-dense output columns: pad to a multiple of 128 (a no-op for the
    # default (1,16,16) kernel where ncols = Cout*256 is already aligned).
    ncols_p = ((ncols + 127) // 128) * 128
    if ncols_p != ncols:
        w_mat = jnp.pad(w_mat, ((0, 0), (0, ncols_p - ncols)))
        shift_row = jnp.pad(shift_row, ((0, 0), (0, ncols_p - ncols)))

    # ---- row-tile selection (perf-review items 3/4/8) ----
    def _round16_up(v):
        return max(16, ((int(v) + 15) // 16) * 16)

    # Pipeline double-buffers the f32 input and bf16 output tiles; weight and
    # shift stay resident.  Budget leaves headroom on v7x's 64 MiB VMEM while
    # still allowing 1024-row tiles (e.g. on v6e's 128 MiB part).
    per_row = 2 * (cin * 4 + ncols_p * 2)
    resident = ncols_p * (cin * 4 + 4)
    vmem_budget = 16 * 1024 * 1024
    fit_rows = max(16, ((vmem_budget - resident) // per_row) // 16 * 16)
    tm_cap = max(16, (min(tm, fit_rows) // 16) * 16)

    # >= 2 (and preferably an even number of) row tiles so the "parallel" grid
    # axis keeps both v7x TensorCores busy and balanced; single tile only when
    # the problem is tiny.
    nt = pl.cdiv(m, tm_cap)
    if nt < 2 and m > 16:
        nt = 2
    if nt > 1 and nt % 2:
        nt += 1
    tm_eff = _round16_up(pl.cdiv(m, nt))

    m_pad = pl.cdiv(m, tm_eff) * tm_eff
    if m_pad != m:
        # Only the small (M, Cin) matrix is padded -- negligible HBM traffic.
        x_flat = jnp.pad(x_flat, ((0, m_pad - m), (0, 0)))

    footprint = tm_eff * per_row + resident
    vmem_limit = int(min(32 * 1024 * 1024,
                         max(16 * 1024 * 1024, 2 * footprint)))

    out = pl.pallas_call(
        _convt_bn_relu_kernel,
        out_shape=jax.ShapeDtypeStruct((m_pad, ncols_p), jnp.bfloat16),
        grid=(m_pad // tm_eff,),
        in_specs=[
            pl.BlockSpec((tm_eff, cin), lambda i: (i, 0)),
            pl.BlockSpec((cin, ncols_p), lambda i: (0, 0)),
            pl.BlockSpec((1, ncols_p), lambda i: (0, 0)),
        ],
        out_specs=pl.BlockSpec((tm_eff, ncols_p), lambda i: (i, 0)),
        compiler_params=pltpu.CompilerParams(
            dimension_semantics=("parallel",),
            vmem_limit_bytes=vmem_limit),
    )(x_flat, w_mat, shift_row)

    out = out[:m, :ncols]
    # Scatter back to NCDHW; runs on the bf16 result (half the traffic of the
    # previous f32 pass) and stays bf16 -- upcast only if a caller needs f32.
    # TODO(synk): fusing this scatter into out_specs requires an in-kernel
    # rows<->lanes relayout (transpose over non-minor dims) that Mosaic does
    # not reliably lower; it therefore remains one bf16 XLA pass.
    out = out.reshape(n, d, h, w, cout, kd, kh, kw)
    out = jnp.transpose(out, (0, 4, 1, 5, 2, 6, 3, 7))
    out = out.reshape(n, cout, d * kd, h * kh, w * kw)
    if pd or ph or pw:
        out = out[:, :, pd: d * kd - pd, ph: h * kh - ph, pw: w * kw - pw]
    return out


def conv_transpose3d_block_forward(x, params, kernel_size=(1, 16, 16),
                                   stride=(1, 16, 16), padding=(0, 0, 0)):
    # TODO(synk): BatchNorm is implemented in eval mode (running statistics);
    # training-mode batch statistics are not computed.
    return conv_transpose3d_bn_relu(
        x, params["weight"], params["bias"], params["gamma"], params["beta"],
        params["running_mean"], params["running_var"],
        kernel_size=kernel_size, stride=stride, padding=padding)


# --------------------------- parameter handling ------------------------------

def init_conv_transpose3d_block_params(key, cin, cout, kernel_size):
    kd, kh, kw = kernel_size
    kw_key, kb_key, kg_key, kbt_key, km_key, kv_key = jax.random.split(key, 6)
    fan_in = cout * kd * kh * kw            # PyTorch fan-in for ConvTranspose3d
    bound = 1.0 / jnp.sqrt(jnp.float32(fan_in))
    weight = jax.random.uniform(kw_key, (cin, cout, kd, kh, kw),
                                jnp.float32, -bound, bound)
    bias = jax.random.uniform(kb_key, (cout,), jnp.float32, -bound, bound)
    # Non-default BatchNorm parameters/statistics so the folding is exercised.
    gamma = jax.random.uniform(kg_key, (cout,), jnp.float32, 0.5, 1.5)
    beta = 0.1 * jax.random.normal(kbt_key, (cout,), jnp.float32)
    running_mean = 0.1 * jax.random.normal(km_key, (cout,), jnp.float32)
    running_var = jax.random.uniform(kv_key, (cout,), jnp.float32, 0.5, 1.5)
    return dict(weight=weight, bias=bias, gamma=gamma, beta=beta,
                running_mean=running_mean, running_var=running_var)


# --------------------------- reference (plain JAX) ----------------------------

def _ref_forward(x, params, kernel_size, stride, padding, eps=1e-5):
    weight, bias = params["weight"], params["bias"]
    kd, kh, kw = kernel_size
    pd, ph, pw = padding
    # ConvTranspose3d == conv with lhs dilation, flipped kernel, swapped I/O.
    rhs = jnp.flip(jnp.transpose(weight, (1, 0, 2, 3, 4)), axis=(2, 3, 4))
    y = jax.lax.conv_general_dilated(
        x, rhs,
        window_strides=(1, 1, 1),
        padding=[(kd - 1 - pd, kd - 1 - pd),
                 (kh - 1 - ph, kh - 1 - ph),
                 (kw - 1 - pw, kw - 1 - pw)],
        lhs_dilation=stride,
        dimension_numbers=("NCDHW", "OIDHW", "NCDHW"))
    y = y + bias[None, :, None, None, None]
    inv = 1.0 / jnp.sqrt(params["running_var"] + eps)
    y = (y - params["running_mean"][None, :, None, None, None]) \
        * (params["gamma"] * inv)[None, :, None, None, None] \
        + params["beta"][None, :, None, None, None]
    return jnp.maximum(y, 0.0)


# ---------------------------------- main --------------------------------------

if __name__ == "__main__":
    key = jax.random.PRNGKey(0)
    kx, kp = jax.random.split(key)

    # Small shapes consistent with the module defaults.
    N, Cin, D, H, W = 2, 4, 8, 8, 8
    Cout = 8
    kernel_size = (1, 16, 16)
    stride = (1, 16, 16)
    padding = (0, 0, 0)

    x = jax.random.normal(kx, (N, Cin, D, H, W), jnp.float32)
    params = init_conv_transpose3d_block_params(kp, Cin, Cout, kernel_size)

    fwd = jax.jit(functools.partial(conv_transpose3d_block_forward,
                                    kernel_size=kernel_size, stride=stride,
                                    padding=padding))
    out = jax.block_until_ready(fwd(x, params))

    ref = _ref_forward(x, params, kernel_size, stride, padding)
    assert out.shape == ref.shape, (out.shape, ref.shape)
    out_f32 = out.astype(jnp.float32)
    max_err = float(jnp.max(jnp.abs(out_f32 - ref)))
    # f32 MXU matmul/accumulation with a final bf16 cast -> small, bounded gap.
    assert jnp.allclose(out_f32, ref, rtol=1e-2, atol=5e-3), max_err

    print("KERNEL_OK")
</pallas_src>

<mosaic_0001>
module attributes {stable_mosaic.version = 11 : i64} {
  func.func @_convt_bn_relu_kernel(%arg0: i32, %arg1: memref<512x4xf32, #tpu.memory_space<vmem>>, %arg2: memref<4x2048xf32, #tpu.memory_space<vmem>>, %arg3: memref<1x2048xf32, #tpu.memory_space<vmem>>, %arg4: memref<512x2048xbf16, #tpu.memory_space<vmem>>) attributes {dimension_semantics = [#tpu.dimension_semantics<parallel>], iteration_bounds = array<i64: 2>, scalar_prefetch = 0 : i64, scratch_operands = 0 : i64, tpu.core_type = #tpu.core_type<tc>, window_params = [{transform_indices = @transform_0, window_bounds = array<i64: 512, 4>}, {pipeline_mode = #tpu.pipeline_mode<synchronous>, transform_indices = @transform_1, window_bounds = array<i64: 4, 2048>}, {pipeline_mode = #tpu.pipeline_mode<synchronous>, transform_indices = @transform_2, window_bounds = array<i64: 1, 2048>}, {transform_indices = @transform_3, window_bounds = array<i64: 512, 2048>}]} {
    %c0 = arith.constant 0 : index
    %c0_0 = arith.constant 0 : index
    %0 = vector.load %arg1[%c0, %c0_0] : memref<512x4xf32, #tpu.memory_space<vmem>>, vector<512x4xf32>
    %c0_1 = arith.constant 0 : index
    %c0_2 = arith.constant 0 : index
    %1 = vector.load %arg2[%c0_1, %c0_2] : memref<4x2048xf32, #tpu.memory_space<vmem>>, vector<4x2048xf32>
    %cst = arith.constant dense<0.000000e+00> : vector<512x2048xf32>
    %2 = tpu.matmul %0, %1, %cst {dimension_numbers = #tpu.dot_dimension_numbers<[1], [0], [0], [1], [0, 0, 1, 1], [], []>} : vector<512x4xf32>, vector<4x2048xf32>, vector<512x2048xf32> -> vector<512x2048xf32>
    %c0_3 = arith.constant 0 : index
    %c0_4 = arith.constant 0 : index
    %3 = vector.load %arg3[%c0_3, %c0_4] : memref<1x2048xf32, #tpu.memory_space<vmem>>, vector<1x2048xf32>
    %4 = vector.broadcast %3 : vector<1x2048xf32> to vector<512x2048xf32>
    %5 = arith.addf %2, %4 : vector<512x2048xf32>
    %cst_5 = arith.constant 0.000000e+00 : f32
    %6 = vector.broadcast %cst_5 : f32 to vector<512x2048xf32>
    %7 = arith.maximumf %5, %6 : vector<512x2048xf32>
    %8 = arith.truncf %7 : vector<512x2048xf32> to vector<512x2048xbf16>
    %c0_6 = arith.constant 0 : index
    %c0_7 = arith.constant 0 : index
    %9 = vector.load %arg4[%c0_6, %c0_7] : memref<512x2048xbf16, #tpu.memory_space<vmem>>, vector<512x2048xbf16>
    tpu.vector_store %arg4[%c0_6, %c0_7], %8 {strides = array<i32>} : memref<512x2048xbf16, #tpu.memory_space<vmem>>, vector<512x2048xbf16>,
    return
  }
  func.func @transform_0(%arg0: i32) -> (i32, i32) {
    %c0_i32 = arith.constant 0 : i32
    %c0_i32_0 = arith.constant 0 : i32
    return %arg0, %c0_i32 : i32, i32
  }
  func.func @transform_1(%arg0: i32) -> (i32, i32) {
    %c0_i32 = arith.constant 0 : i32
    %c0_i32_0 = arith.constant 0 : i32
    %c0_i32_1 = arith.constant 0 : i32
    return %c0_i32, %c0_i32_0 : i32, i32
  }
  func.func @transform_2(%arg0: i32) -> (i32, i32) {
    %c0_i32 = arith.constant 0 : i32
    %c0_i32_0 = arith.constant 0 : i32
    %c0_i32_1 = arith.constant 0 : i32
    return %c0_i32, %c0_i32_0 : i32, i32
  }
  func.func @transform_3(%arg0: i32) -> (i32, i32) {
    %c0_i32 = arith.constant 0 : i32
    %c0_i32_0 = arith.constant 0 : i32
    return %arg0, %c0_i32 : i32, i32
  }
}

</mosaic_0001>

<bundles_post_ra>
// kernel: conv_transpose3d_block_forward.1
= control target key start
LH: loop header
LB: loop body
LE: loop exit
PB: predicated region body
PF: predicated region fallthrough
CT: control target
= control target key end

     0   :  { %s7278_s12 = smov 0   ;;  %s10203_s0 = inlined_call_operand.vmem [shape: f32[1024,4], index: 0, kind: input, shape index: {}]   ;;  %s10204_s1 = inlined_call_operand.vmem [shape: f32[4,2048], index: 1, kind: input, shape index: {}]   ;;  %s10205_s2 = inlined_call_operand.vmem [shape: f32[1,2048], index: 2, kind: input, shape index: {}]   ;;  %s10206_s3 = inlined_call_operand.vmem [shape: bf16[1024,2048], index: 3, kind: output, shape index: {}]  }
   0x1 LB: > { %s5995_s13 = sadd.s32 4294967295, %s7256_s12   ;;  %p5999_p0 = scmp.ge.s32.totalorder %s7256_s12, 1  ;;  %s7256_s12 = sphi %s7278_s12, %s13_s12  }
   0x2   : > { %p138_p1 = scmp.lt.s32.totalorder %s7256_s12, 3 }
   0x4   : > { %p139_p2 = pnand %p5999_p0, %p138_p1 }
   0x5   : > { %s6000_s16 = sshll.u32 (!%p139_p2), %s5995_s13, 6 }
   0x6   : > { %142 = sbr.rel (%p139_p2) target bundleno = 2200 (0x898), region = 32  ;;  %p164_p3 = scmp.lt.s32.totalorder (!%p139_p2), %s6000_s16, 127 }
   0xb   : > { %v241_v0 = vld [vmem:[%s10204_s1 + $0x8] sm:$0xff]  ;;  %v243_v1 = vld [vmem:[%s10204_s1 + $0x18] sm:$0xff]  ;;  %v240_v2 = vld [vmem:[%s10204_s1] sm:$0xff]  ;;  %s10208_s16 = smov (!%p164_p3, %s6000_s16), 127  ;;  %vm512_vm0 = vcmask 1043456   ;;  %vm319_vm1 = vcmask 31744  }
   0xc   : > { %294 = vst [vmem:[#allocation1 + $0x10] ss:$2 sm:$0xff] %v241_v0  ;;  %v242_v3 = vld [vmem:[%s10204_s1 + $0x10] sm:$0xff]  ;;  %s6001_s23 = sshll.u32 %s10208_s16, 3  ;;  %v245_v4 = vld [vmem:[%s10204_s1 + $0x28] sm:$0xff]  ;;  %v247_v6 = vld [vmem:[%s10204_s1 + $0x38] sm:$0xff] }
   0xd   : > { %298 = vst [vmem:[#allocation1 + $0x30] ss:$2 sm:$0xff] %v243_v1  ;;  %s7307_s28 = scalar_lea.vmem %s10203_s0, %s6001_s23  ;;  %v244_v10 = vld [vmem:[%s10204_s1 + $0x20] sm:$0xff]  ;;  %v246_v14 = vld [vmem:[%s10204_s1 + $0x30] sm:$0xff]  ;;  %s7047_s10 = sshll.u32 %s10208_s16, 6 }
   0xe   : > { %292 = vst [vmem:[#allocation1] ss:$2 sm:$0xff] %v240_v2  ;;  %v176_v5 = vld [vmem:[%s7307_s28] sm:$0xff]  ;;  %v177_v17 = vld [vmem:[%s7307_s28 + $0x8] sm:$0xff]  ;;  %v178_v18 = vld [vmem:[%s7307_s28 + $0x10] sm:$0xff]  ;;  %s7428_s14 = scalar_lea.vmem %s10206_s3, %s7047_s10 }
   0xf   : > { %296 = vst [vmem:[#allocation1 + $0x20] ss:$2 sm:$0xff] %v242_v3  ;;  %v179_v19 = vld [vmem:[%s7307_s28 + $0x18] sm:$0xff]  ;;  %v180_v20 = vld [vmem:[%s7307_s28 + $0x20] sm:$0xff]  ;;  %v181_v21 = vld [vmem:[%s7307_s28 + $0x28] sm:$0xff] }
  0x10   : > { %v182_v22 = vld [vmem:[%s7307_s28 + $0x30] sm:$0xff]  ;;  %v183_v23 = vld [vmem:[%s7307_s28 + $0x38] sm:$0xff]  ;;  %v184_v24 = vld [vmem:[%s7307_s28 + $0x40] sm:$0xff] }
  0x11   : > { %v185_v25 = vld [vmem:[%s7307_s28 + $0x48] sm:$0xff]  ;;  %v186_v26 = vld [vmem:[%s7307_s28 + $0x50] sm:$0xff]  ;;  %v187_v27 = vld [vmem:[%s7307_s28 + $0x58] sm:$0xff] }
  0x12   : > { %v188_v28 = vld [vmem:[%s7307_s28 + $0x60] sm:$0xff]  ;;  %v189_v29 = vld [vmem:[%s7307_s28 + $0x68] sm:$0xff]  ;;  %v190_v30 = vld [vmem:[%s7307_s28 + $0x70] sm:$0xff] }
  0x13   : > { %v301_v7 = vld.sshfl [vmem:[#allocation1 + $0x10] sm:$0xff pattern:$0x75316420]  ;;  %v302_v8 = vld.sshfl [vmem:[#allocation1 + $0x18] sm:$0xff pattern:$0x75316420] }
  0x14   : > { %6135 = vmatpush.msk.msra.mxu2 %vm512_vm0, %v301_v7  ;;  %308 = vst [vmem:[#allocation1 + $0x10] ss:$2 sm:$0xff] %v245_v4  ;;  %6200 = vmatpush.msk.msra.mxu3 %vm512_vm0, %v302_v8  ;;  %v305_v9 = vld.sshfl [vmem:[#allocation1 + $0x30] sm:$0xff pattern:$0x75316420]  ;;  %v191_v31 = vld [vmem:[%s7307_s28 + $0x78] sm:$0xff] }
  0x15   : > { %6136 = vmatmul.msk.f32.vlgmr.msra.gmra.mxu2 %vm319_vm1, %v176_v5  ;;  %6201 = vmatmul.msk.f32.vlgmr.msra.gmra.mxu3 %vm319_vm1, %v176_v5  ;;  %v306_v11 = vld.sshfl [vmem:[#allocation1 + $0x38] sm:$0xff pattern:$0x75316420]  ;;  %v299_v12 = vld.sshfl [vmem:[#allocation1] sm:$0xff pattern:$0x75316420] }
  0x16   : > { %6395 = vmatpush.msk.msrb.mxu2 %vm512_vm0, %v305_v9  ;;  %310 = vst [vmem:[#allocation1 + $0x30] ss:$2 sm:$0xff] %v247_v6  ;;  %6460 = vmatpush.msk.msrb.mxu3 %vm512_vm0, %v306_v11  ;;  %v300_v13 = vld.sshfl [vmem:[#allocation1 + $0x8] sm:$0xff pattern:$0x75316420]  ;;  %v248_v32 = vld [vmem:[%s10205_s2] sm:$0xff] }
  0x17   : > { %6005 = vmatpush.msk.msra.mxu0 %vm512_vm0, %v299_v12  ;;  %307 = vst [vmem:[#allocation1] ss:$2 sm:$0xff] %v244_v10  ;;  %6070 = vmatpush.msk.msra.mxu1 %vm512_vm0, %v300_v13  ;;  %v303_v15 = vld.sshfl [vmem:[#allocation1 + $0x20] sm:$0xff pattern:$0x75316420]  ;;  %v7410_v34 = vperm.slane %v248_v32, 0 }
  0x18   : > { %6006 = vmatmul.msk.f32.vlgmr.msra.gmra.mxu0 %vm319_vm1, %v176_v5  ;;  %6071 = vmatmul.msk.f32.vlgmr.msra.gmra.mxu1 %vm319_vm1, %v176_v5  ;;  %v304_v16 = vld.sshfl [vmem:[#allocation1 + $0x28] sm:$0xff pattern:$0x75316420]  ;;  %v192_v33 = vld [vmem:[%s7307_s28 + $0x80] sm:$0xff]  ;;  %v7412_v35 = vperm.slane %v248_v32, 1  ;;  %v7416_v38 = vperm.slane %v248_v32, 2 }
  0x19   : > { %6265 = vmatpush.msk.msrb.mxu0 %vm512_vm0, %v303_v15  ;;  %309 = vst [vmem:[#allocation1 + $0x20] ss:$2 sm:$0xff] %v246_v14  ;;  %6330 = vmatpush.msk.msrb.mxu1 %vm512_vm0, %v304_v16  ;;  %v7418_v39 = vperm.slane %v248_v32, 3  ;;  %v193_v49 = vld [vmem:[%s7307_s28 + $0x88] sm:$0xff]  ;;  %v194_v0 = vld [vmem:[%s7307_s28 + $0x90] sm:$0xff]  ;;  %v195_v15 = vld [vmem:[%s7307_s28 + $0x98] sm:$0xff] }
  0x1d   : > { %6137 = vmatmul.msk.f32.gmra.mxu2 %vm319_vm1, %v177_v17  ;;  %6202 = vmatmul.msk.f32.gmra.mxu3 %vm319_vm1, %v177_v17 }
  0x20   : > { %6007 = vmatmul.msk.f32.gmra.mxu0 %vm319_vm1, %v177_v17  ;;  %6072 = vmatmul.msk.f32.gmra.mxu1 %vm319_vm1, %v177_v17 }
  0x25   : > { %6138 = vmatmul.msk.f32.gmra.mxu2 %vm319_vm1, %v178_v18  ;;  %6203 = vmatmul.msk.f32.gmra.mxu3 %vm319_vm1, %v178_v18 }
  0x28   : > { %6008 = vmatmul.msk.f32.gmra.mxu0 %vm319_vm1, %v178_v18  ;;  %6073 = vmatmul.msk.f32.gmra.mxu1 %vm319_vm1, %v178_v18 }
  0x2d   : > { %6139 = vmatmul.msk.f32.gmra.mxu2 %vm319_vm1, %v179_v19  ;;  %6204 = vmatmul.msk.f32.gmra.mxu3 %vm319_vm1, %v179_v19 }
  0x30   : > { %6009 = vmatmul.msk.f32.gmra.mxu0 %vm319_vm1, %v179_v19  ;;  %6074 = vmatmul.msk.f32.gmra.mxu1 %vm319_vm1, %v179_v19 }
  0x35   : > { %6140 = vmatmul.msk.f32.gmra.mxu2 %vm319_vm1, %v180_v20  ;;  %6205 = vmatmul.msk.f32.gmra.mxu3 %vm319_vm1, %v180_v20 }
  0x38   : > { %6010 = vmatmul.msk.f32.gmra.mxu0 %vm319_vm1, %v180_v20  ;;  %6075 = vmatmul.msk.f32.gmra.mxu1 %vm319_vm1, %v180_v20 }
  0x3d   : > { %6141 = vmatmul.msk.f32.gmra.mxu2 %vm319_vm1, %v181_v21  ;;  %6206 = vmatmul.msk.f32.gmra.mxu3 %vm319_vm1, %v181_v21 }
  0x40   : > { %6011 = vmatmul.msk.f32.gmra.mxu0 %vm319_vm1, %v181_v21  ;;  %6076 = vmatmul.msk.f32.gmra.mxu1 %vm319_vm1, %v181_v21 }
  0x45   : > { %6142 = vmatmul.msk.f32.gmra.mxu2 %vm319_vm1, %v182_v22  ;;  %6207 = vmatmul.msk.f32.gmra.mxu3 %vm319_vm1, %v182_v22 }
  0x48   : > { %6012 = vmatmul.msk.f32.gmra.mxu0 %vm319_vm1, %v182_v22  ;;  %6077 = vmatmul.msk.f32.gmra.mxu1 %vm319_vm1, %v182_v22 }
  0x4d   : > { %6143 = vmatmul.msk.f32.gmra.mxu2 %vm319_vm1, %v183_v23  ;;  %6208 = vmatmul.msk.f32.gmra.mxu3 %vm319_vm1, %v183_v23 }
  0x50   : > { %6013 = vmatmul.msk.f32.gmra.mxu0 %vm319_vm1, %v183_v23  ;;  %6078 = vmatmul.msk.f32.gmra.mxu1 %vm319_vm1, %v183_v23 }
  0x55   : > { %6144 = vmatmul.msk.f32.gmra.mxu2 %vm319_vm1, %v184_v24  ;;  %6209 = vmatmul.msk.f32.gmra.mxu3 %vm319_vm1, %v184_v24 }
  0x58   : > { %6014 = vmatmul.msk.f32.gmra.mxu0 %vm319_vm1, %v184_v24  ;;  %6079 = vmatmul.msk.f32.gmra.mxu1 %vm319_vm1, %v184_v24 }
  0x5d   : > { %6145 = vmatmul.msk.f32.gmra.mxu2 %vm319_vm1, %v185_v25  ;;  %6210 = vmatmul.msk.f32.gmra.mxu3 %vm319_vm1, %v185_v25 }
  0x60   : > { %6015 = vmatmul.msk.f32.gmra.mxu0 %vm319_vm1, %v185_v25  ;;  %6080 = vmatmul.msk.f32.gmra.mxu1 %vm319_vm1, %v185_v25 }
  0x65   : > { %6146 = vmatmul.msk.f32.gmra.mxu2 %vm319_vm1, %v186_v26  ;;  %6211 = vmatmul.msk.f32.gmra.mxu3 %vm319_vm1, %v186_v26 }
  0x68   : > { %6016 = vmatmul.msk.f32.gmra.mxu0 %vm319_vm1, %v186_v26  ;;  %6081 = vmatmul.msk.f32.gmra.mxu1 %vm319_vm1, %v186_v26 }
  0x6d   : > { %6147 = vmatmul.msk.f32.gmra.mxu2 %vm319_vm1, %v187_v27  ;;  %6212 = vmatmul.msk.f32.gmra.mxu3 %vm319_vm1, %v187_v27 }
  0x70   : > { %6017 = vmatmul.msk.f32.gmra.mxu0 %vm319_vm1, %v187_v27  ;;  %6082 = vmatmul.msk.f32.gmra.mxu1 %vm319_vm1, %v187_v27 }
  0x75   : > { %6148 = vmatmul.msk.f32.gmra.mxu2 %vm319_vm1, %v188_v28  ;;  %6213 = vmatmul.msk.f32.gmra.mxu3 %vm319_vm1, %v188_v28 }
  0x78   : > { %6018 = vmatmul.msk.f32.gmra.mxu0 %vm319_vm1, %v188_v28  ;;  %6083 = vmatmul.msk.f32.gmra.mxu1 %vm319_vm1, %v188_v28 }
  0x7d   : > { %6149 = vmatmul.msk.f32.gmra.mxu2 %vm319_vm1, %v189_v29  ;;  %6214 = vmatmul.msk.f32.gmra.mxu3 %vm319_vm1, %v189_v29 }
  0x80   : > { %6019 = vmatmul.msk.f32.gmra.mxu0 %vm319_vm1, %v189_v29  ;;  %6084 = vmatmul.msk.f32.gmra.mxu1 %vm319_vm1, %v189_v29 }
  0x85   : > { %6150 = vmatmul.msk.f32.gmra.mxu2 %vm319_vm1, %v190_v30  ;;  %6215 = vmatmul.msk.f32.gmra.mxu3 %vm319_vm1, %v190_v30 }
  0x88   : > { %6020 = vmatmul.msk.f32.gmra.mxu0 %vm319_vm1, %v190_v30  ;;  %6085 = vmatmul.msk.f32.gmra.mxu1 %vm319_vm1, %v190_v30  ;;  %v196_v30 = vld [vmem:[%s7307_s28 + $0xa0] sm:$0xff] }
  0x8d   : > { %6151 = vmatmul.msk.f32.gmra.mxu2 %vm319_vm1, %v191_v31  ;;  %6216 = vmatmul.msk.f32.gmra.mxu3 %vm319_vm1, %v191_v31 }
  0x90   : > { %6021 = vmatmul.msk.f32.gmra.mxu0 %vm319_vm1, %v191_v31  ;;  %6086 = vmatmul.msk.f32.gmra.mxu1 %vm319_vm1, %v191_v31 }
  0x95   : > { %6152 = vmatmul.msk.f32.gmra.mxu2 %vm319_vm1, %v192_v33  ;;  %6217 = vmatmul.msk.f32.gmra.mxu3 %vm319_vm1, %v192_v33  ;;  %v562_v36 = vpop.f32.mrf.mxu0  ;;  %v771_v37 = vpop.f32.mrf.mxu1 }
  0x96   : > { %v563_v40 = vadd.f32 %v562_v36, %v7410_v34  ;;  %v772_v41 = vadd.f32 %v771_v37, %v7412_v35 }
  0x98   : > { %v3889_v42 = vmax.f32 %v563_v40, 0.0  ;;  %v3890_v43 = vmax.f32 %v772_v41, 0.0  ;;  %v980_v44 = vpop.f32.mrf.mxu2  ;;  %v1189_v45 = vpop.f32.mrf.mxu3  ;;  %6022 = vmatmul.msk.f32.gmra.mxu0 %vm319_vm1, %v192_v33  ;;  %6087 = vmatmul.msk.f32.gmra.mxu1 %vm319_vm1, %v192_v33 }
  0x99   : > { %v981_v46 = vadd.f32 %v980_v44, %v7416_v38  ;;  %v1190_v47 = vadd.f32 %v1189_v45, %v7418_v39 }
  0x9a   : > { %v4913_v48 = vpack.c.bf16 %v3890_v43, %v3889_v42 }
  0x9b   : > { %v3891_v50 = vmax.f32 %v981_v46, 0.0  ;;  %v3892_v51 = vmax.f32 %v1190_v47, 0.0 }
  0x9c   : > { %5425 = vst [vmem:[%s7428_s14] sm:$0xff] %v4913_v48 }
  0x9d   : > { %v4914_v52 = vpack.c.bf16 %v3892_v51, %v3891_v50  ;;  %6153 = vmatmul.msk.f32.gmra.mxu2 %vm319_vm1, %v193_v49  ;;  %6218 = vmatmul.msk.f32.gmra.mxu3 %vm319_vm1, %v193_v49  ;;  %v565_v53 = vpop.f32.mrf.mxu0  ;;  %v774_v54 = vpop.f32.mrf.mxu1 }
  0x9e   : > { %v566_v55 = vadd.f32 %v565_v53, %v7410_v34  ;;  %v775_v56 = vadd.f32 %v774_v54, %v7412_v35 }
  0x9f   : > { %5426 = vst [vmem:[%s7428_s14 + $0x8] sm:$0xff] %v4914_v52 }
  0xa0   : > { %v3905_v57 = vmax.f32 %v566_v55, 0.0  ;;  %v3906_v58 = vmax.f32 %v775_v56, 0.0  ;;  %v983_v59 = vpop.f32.mrf.mxu2  ;;  %v1192_v60 = vpop.f32.mrf.mxu3  ;;  %6023 = vmatmul.msk.f32.gmra.mxu0 %vm319_vm1, %v193_v49  ;;  %6088 = vmatmul.msk.f32.gmra.mxu1 %vm319_vm1, %v193_v49  ;;  %v197_v49 = vld [vmem:[%s7307_s28 + $0xa8] sm:$0xff] }
  0xa1   : > { %v984_v61 = vadd.f32 %v983_v59, %v7416_v38  ;;  %v1193_v62 = vadd.f32 %v1192_v60, %v7418_v39 }
  0xa2   : > { %v4921_v63 = vpack.c.bf16 %v3906_v58, %v3905_v57 }
  0xa3   : > { %v3907_v1 = vmax.f32 %v984_v61, 0.0  ;;  %v3908_v2 = vmax.f32 %v1193_v62, 0.0 }
  0xa4   : > { %5433 = vst [vmem:[%s7428_s14 + $0x40] sm:$0xff] %v4921_v63 }
  0xa5   : > { %v4922_v3 = vpack.c.bf16 %v3908_v2, %v3907_v1  ;;  %6154 = vmatmul.msk.f32.gmra.mxu2 %vm319_vm1, %v194_v0  ;;  %6219 = vmatmul.msk.f32.gmra.mxu3 %vm319_vm1, %v194_v0  ;;  %v568_v4 = vpop.f32.mrf.mxu0  ;;  %v777_v5 = vpop.f32.mrf.mxu1 }
  0xa6   : > { %v569_v6 = vadd.f32 %v568_v4, %v7410_v34  ;;  %v778_v7 = vadd.f32 %v777_v5, %v7412_v35 }
  0xa7   : > { %5434 = vst [vmem:[%s7428_s14 + $0x48] sm:$0xff] %v4922_v3 }
  0xa8   : > { %v3921_v8 = vmax.f32 %v569_v6, 0.0  ;;  %v3922_v9 = vmax.f32 %v778_v7, 0.0  ;;  %v986_v10 = vpop.f32.mrf.mxu2  ;;  %v1195_v11 = vpop.f32.mrf.mxu3  ;;  %6024 = vmatmul.msk.f32.gmra.mxu0 %vm319_vm1, %v194_v0  ;;  %6089 = vmatmul.msk.f32.gmra.mxu1 %vm319_vm1, %v194_v0  ;;  %v198_v0 = vld [vmem:[%s7307_s28 + $0xb0] sm:$0xff] }
  0xa9   : > { %v987_v12 = vadd.f32 %v986_v10, %v7416_v38  ;;  %v1196_v13 = vadd.f32 %v1195_v11, %v7418_v39 }
  0xaa   : > { %v4929_v14 = vpack.c.bf16 %v3922_v9, %v3921_v8 }
  0xab   : > { %v3923_v16 = vmax.f32 %v987_v12, 0.0  ;;  %v3924_v17 = vmax.f32 %v1196_v13, 0.0 }
  0xac   : > { %5441 = vst [vmem:[%s7428_s14 + $0x80] sm:$0xff] %v4929_v14 }
  0xad   : > { %v4930_v18 = vpack.c.bf16 %v3924_v17, %v3923_v16  ;;  %6155 = vmatmul.msk.f32.gmra.mxu2 %vm319_vm1, %v195_v15  ;;  %6220 = vmatmul.msk.f32.gmra.mxu3 %vm319_vm1, %v195_v15  ;;  %v571_v19 = vpop.f32.mrf.mxu0  ;;  %v780_v20 = vpop.f32.mrf.mxu1 }
  0xae   : > { %v572_v21 = vadd.f32 %v571_v19, %v7410_v34  ;;  %v781_v22 = vadd.f32 %v780_v20, %v7412_v35 }
  0xaf   : > { %5442 = vst [vmem:[%s7428_s14 + $0x88] sm:$0xff] %v4930_v18 }
  0xb0   : > { %v3937_v23 = vmax.f32 %v572_v21, 0.0  ;;  %v3938_v24 = vmax.f32 %v781_v22, 0.0  ;;  %v989_v25 = vpop.f32.mrf.mxu2  ;;  %v1198_v26 = vpop.f32.mrf.mxu3  ;;  %6025 = vmatmul.msk.f32.gmra.mxu0 %vm319_vm1, %v195_v15  ;;  %6090 = vmatmul.msk.f32.gmra.mxu1 %vm319_vm1, %v195_v15  ;;  %v199_v15 = vld [vmem:[%s7307_s28 + $0xb8] sm:$0xff] }
  0xb1   : > { %v990_v27 = vadd.f32 %v989_v25, %v7416_v38  ;;  %v1199_v28 = vadd.f32 %v1198_v26, %v7418_v39 }
  0xb2   : > { %v4937_v29 = vpack.c.bf16 %v3938_v24, %v3937_v23 }
  0xb3   : > { %v3939_v31 = vmax.f32 %v990_v27, 0.0  ;;  %v3940_v32 = vmax.f32 %v1199_v28, 0.0 }
  0xb4   : > { %5449 = vst [vmem:[%s7428_s14 + $0xc0] sm:$0xff] %v4937_v29 }
  0xb5   : > { %v4938_v33 = vpack.c.bf16 %v3940_v32, %v3939_v31  ;;  %6156 = vmatmul.msk.f32.gmra.mxu2 %vm319_vm1, %v196_v30  ;;  %6221 = vmatmul.msk.f32.gmra.mxu3 %vm319_vm1, %v196_v30  ;;  %v574_v36 = vpop.f32.mrf.mxu0  ;;  %v783_v37 = vpop.f32.mrf.mxu1 }
  0xb6   : > { %v575_v40 = vadd.f32 %v574_v36, %v7410_v34  ;;  %v784_v41 = vadd.f32 %v783_v37, %v7412_v35 }
  0xb7   : > { %5450 = vst [vmem:[%s7428_s14 + $0xc8] sm:$0xff] %v4938_v33 }
  0xb8   : > { %v3953_v42 = vmax.f32 %v575_v40, 0.0  ;;  %v3954_v43 = vmax.f32 %v784_v41, 0.0  ;;  %v992_v44 = vpop.f32.mrf.mxu2  ;;  %v1201_v45 = vpop.f32.mrf.mxu3  ;;  %6026 = vmatmul.msk.f32.gmra.mxu0 %vm319_vm1, %v196_v30  ;;  %6091 = vmatmul.msk.f32.gmra.mxu1 %vm319_vm1, %v196_v30  ;;  %v200_v30 = vld [vmem:[%s7307_s28 + $0xc0] sm:$0xff] }
  0xb9   : > { %v993_v46 = vadd.f32 %v992_v44, %v7416_v38  ;;  %v1202_v47 = vadd.f32 %v1201_v45, %v7418_v39 }
  0xba   : > { %v4945_v48 = vpack.c.bf16 %v3954_v43, %v3953_v42 }
  0xbb   : > { %v3955_v50 = vmax.f32 %v993_v46, 0.0  ;;  %v3956_v51 = vmax.f32 %v1202_v47, 0.0 }
  0xbc   : > { %5457 = vst [vmem:[%s7428_s14 + $0x100] sm:$0xff] %v4945_v48 }
  0xbd   : > { %v4946_v52 = vpack.c.bf16 %v3956_v51, %v3955_v50  ;;  %6157 = vmatmul.msk.f32.gmra.mxu2 %vm319_vm1, %v197_v49  ;;  %6222 = vmatmul.msk.f32.gmra.mxu3 %vm319_vm1, %v197_v49  ;;  %v577_v53 = vpop.f32.mrf.mxu0  ;;  %v786_v54 = vpop.f32.mrf.mxu1 }
  0xbe   : > { %v578_v55 = vadd.f32 %v577_v53, %v7410_v34  ;;  %v787_v56 = vadd.f32 %v786_v54, %v7412_v35 }
  0xbf   : > { %5458 = vst [vmem:[%s7428_s14 + $0x108] sm:$0xff] %v4946_v52 }
  0xc0   : > { %v3969_v57 = vmax.f32 %v578_v55, 0.0  ;;  %v3970_v58 = vmax.f32 %v787_v56, 0.0  ;;  %v995_v59 = vpop.f32.mrf.mxu2  ;;  %v1204_v60 = vpop.f32.mrf.mxu3  ;;  %6027 = vmatmul.msk.f32.gmra.mxu0 %vm319_vm1, %v197_v49  ;;  %6092 = vmatmul.msk.f32.gmra.mxu1 %vm319_vm1, %v197_v49  ;;  %v201_v49 = vld [vmem:[%s7307_s28 + $0xc8] sm:$0xff] }
  0xc1   : > { %v996_v61 = vadd.f32 %v995_v59, %v7416_v38  ;;  %v1205_v62 = vadd.f32 %v1204_v60, %v7418_v39 }
  0xc2   : > { %v4953_v63 = vpack.c.bf16 %v3970_v58, %v3969_v57 }
  0xc3   : > { %v3971_v1 = vmax.f32 %v996_v61, 0.0  ;;  %v3972_v2 = vmax.f32 %v1205_v62, 0.0 }
  0xc4   : > { %5465 = vst [vmem:[%s7428_s14 + $0x140] sm:$0xff] %v4953_v63 }
  0xc5   : > { %v4954_v3 = vpack.c.bf16 %v3972_v2, %v3971_v1  ;;  %6158 = vmatmul.msk.f32.gmra.mxu2 %vm319_vm1, %v198_v0  ;;  %6223 = vmatmul.msk.f32.gmra.mxu3 %vm319_vm1, %v198_v0  ;;  %v580_v4 = vpop.f32.mrf.mxu0  ;;  %v789_v5 = vpop.f32.mrf.mxu1 }
  0xc6   : > { %v581_v6 = vadd.f32 %v580_v4, %v7410_v34  ;;  %v790_v7 = vadd.f32 %v789_v5, %v7412_v35 }
  0xc7   : > { %5466 = vst [vmem:[%s7428_s14 + $0x148] sm:$0xff] %v4954_v3 }
  0xc8   : > { %v3985_v8 = vmax.f32 %v581_v6, 0.0  ;;  %v3986_v9 = vmax.f32 %v790_v7, 0.0  ;;  %v998_v10 = vpop.f32.mrf.mxu2  ;;  %v1207_v11 = vpop.f32.mrf.mxu3  ;;  %6028 = vmatmul.msk.f32.gmra.mxu0 %vm319_vm1, %v198_v0  ;;  %6093 = vmatmul.msk.f32.gmra.mxu1 %vm319_vm1, %v198_v0  ;;  %v202_v0 = vld [vmem:[%s7307_s28 + $0xd0] sm:$0xff] }
  0xc9   : > { %v999_v12 = vadd.f32 %v998_v10, %v7416_v38  ;;  %v1208_v13 = vadd.f32 %v1207_v11, %v7418_v39 }
  0xca   : > { %v4961_v14 = vpack.c.bf16 %v3986_v9, %v3985_v8 }
  0xcb   : > { %v3987_v16 = vmax.f32 %v999_v12, 0.0  ;;  %v3988_v17 = vmax.f32 %v1208_v13, 0.0 }
  0xcc   : > { %5473 = vst [vmem:[%s7428_s14 + $0x180] sm:$0xff] %v4961_v14 }
  0xcd   : > { %v4962_v18 = vpack.c.bf16 %v3988_v17, %v3987_v16  ;;  %6159 = vmatmul.msk.f32.gmra.mxu2 %vm319_vm1, %v199_v15  ;;  %6224 = vmatmul.msk.f32.gmra.mxu3 %vm319_vm1, %v199_v15  ;;  %v583_v19 = vpop.f32.mrf.mxu0  ;;  %v792_v20 = vpop.f32.mrf.mxu1 }
  0xce   : > { %v584_v21 = vadd.f32 %v583_v19, %v7410_v34  ;;  %v793_v22 = vadd.f32 %v792_v20, %v7412_v35 }
  0xcf   : > { %5474 = vst [vmem:[%s7428_s14 + $0x188] sm:$0xff] %v4962_v18 }
  0xd0   : > { %v4001_v23 = vmax.f32 %v584_v21, 0.0  ;;  %v4002_v24 = vmax.f32 %v793_v22, 0.0  ;;  %v1001_v25 = vpop.f32.mrf.mxu2  ;;  %v1210_v26 = vpop.f32.mrf.mxu3  ;;  %6029 = vmatmul.msk.f32.gmra.mxu0 %vm319_vm1, %v199_v15  ;;  %6094 = vmatmul.msk.f32.gmra.mxu1 %vm319_vm1, %v199_v15  ;;  %v203_v15 = vld [vmem:[%s7307_s28 + $0xd8] sm:$0xff] }
  0xd1   : > { %v1002_v27 = vadd.f32 %v1001_v25, %v7416_v38  ;;  %v1211_v28 = vadd.f32 %v1210_v26, %v7418_v39 }
  0xd2   : > { %v4969_v29 = vpack.c.bf16 %v4002_v24, %v4001_v23 }
  0xd3   : > { %v4003_v31 = vmax.f32 %v1002_v27, 0.0  ;;  %v4004_v32 = vmax.f32 %v1211_v28, 0.0 }
  0xd4   : > { %5481 = vst [vmem:[%s7428_s14 + $0x1c0] sm:$0xff] %v4969_v29 }
  0xd5   : > { %v4970_v33 = vpack.c.bf16 %v4004_v32, %v4003_v31  ;;  %6160 = vmatmul.msk.f32.gmra.mxu2 %vm319_vm1, %v200_v30  ;;  %6225 = vmatmul.msk.f32.gmra.mxu3 %vm319_vm1, %v200_v30  ;;  %v586_v36 = vpop.f32.mrf.mxu0  ;;  %v795_v37 = vpop.f32.mrf.mxu1 }
  0xd6   : > { %v587_v40 = vadd.f32 %v586_v36, %v7410_v34  ;;  %v796_v41 = vadd.f32 %v795_v37, %v7412_v35 }
  0xd7   : > { %5482 = vst [vmem:[%s7428_s14 + $0x1c8] sm:$0xff] %v4970_v33 }
  0xd8   : > { %v4017_v42 = vmax.f32 %v587_v40, 0.0  ;;  %v4018_v43 = vmax.f32 %v796_v41, 0.0  ;;  %v1004_v44 = vpop.f32.mrf.mxu2  ;;  %v1213_v45 = vpop.f32.mrf.mxu3  ;;  %6030 = vmatmul.msk.f32.gmra.mxu0 %vm319_vm1, %v200_v30  ;;  %6095 = vmatmul.msk.f32.gmra.mxu1 %vm319_vm1, %v200_v30  ;;  %v204_v30 = vld [vmem:[%s7307_s28 + $0xe0] sm:$0xff] }
  0xd9   : > { %v1005_v46 = vadd.f32 %v1004_v44, %v7416_v38  ;;  %v1214_v47 = vadd.f32 %v1213_v45, %v7418_v39 }
  0xda   : > { %v4977_v48 = vpack.c.bf16 %v4018_v43, %v4017_v42 }
  0xdb   : > { %v4019_v50 = vmax.f32 %v1005_v46, 0.0  ;;  %v4020_v51 = vmax.f32 %v1214_v47, 0.0 }
  0xdc   : > { %5489 = vst [vmem:[%s7428_s14 + $0x200] sm:$0xff] %v4977_v48 }
  0xdd   : > { %v4978_v52 = vpack.c.bf16 %v4020_v51, %v4019_v50  ;;  %6161 = vmatmul.msk.f32.gmra.mxu2 %vm319_vm1, %v201_v49  ;;  %6226 = vmatmul.msk.f32.gmra.mxu3 %vm319_vm1, %v201_v49  ;;  %v589_v53 = vpop.f32.mrf.mxu0  ;;  %v798_v54 = vpop.f32.mrf.mxu1 }
  0xde   : > { %v590_v55 = vadd.f32 %v589_v53, %v7410_v34  ;;  %v799_v56 = vadd.f32 %v798_v54, %v7412_v35 }
  0xdf   : > { %5490 = vst [vmem:[%s7428_s14 + $0x208] sm:$0xff] %v4978_v52 }
  0xe0   : > { %v4033_v57 = vmax.f32 %v590_v55, 0.0  ;;  %v4034_v58 = vmax.f32 %v799_v56, 0.0  ;;  %v1007_v59 = vpop.f32.mrf.mxu2  ;;  %v1216_v60 = vpop.f32.mrf.mxu3  ;;  %6031 = vmatmul.msk.f32.gmra.mxu0 %vm319_vm1, %v201_v49  ;;  %6096 = vmatmul.msk.f32.gmra.mxu1 %vm319_vm1, %v201_v49  ;;  %v205_v49 = vld [vmem:[%s7307_s28 + $0xe8] sm:$0xff] }
  0xe1   : > { %v1008_v61 = vadd.f32 %v1007_v59, %v7416_v38  ;;  %v1217_v62 = vadd.f32 %v1216_v60, %v7418_v39 }
  0xe2   : > { %v4985_v63 = vpack.c.bf16 %v4034_v58, %v4033_v57 }
  0xe3   : > { %v4035_v1 = vmax.f32 %v1008_v61, 0.0  ;;  %v4036_v2 = vmax.f32 %v1217_v62, 0.0 }
  0xe4   : > { %5497 = vst [vmem:[%s7428_s14 + $0x240] sm:$0xff] %v4985_v63 }
  0xe5   : > { %v4986_v3 = vpack.c.bf16 %v4036_v2, %v4035_v1  ;;  %6162 = vmatmul.msk.f32.gmra.mxu2 %vm319_vm1, %v202_v0  ;;  %6227 = vmatmul.msk.f32.gmra.mxu3 %vm319_vm1, %v202_v0  ;;  %v592_v4 = vpop.f32.mrf.mxu0  ;;  %v801_v5 = vpop.f32.mrf.mxu1 }
  0xe6   : > { %v593_v6 = vadd.f32 %v592_v4, %v7410_v34  ;;  %v802_v7 = vadd.f32 %v801_v5, %v7412_v35 }
  0xe7   : > { %5498 = vst [vmem:[%s7428_s14 + $0x248] sm:$0xff] %v4986_v3 }
  0xe8   : > { %v4049_v8 = vmax.f32 %v593_v6, 0.0  ;;  %v4050_v9 = vmax.f32 %v802_v7, 0.0  ;;  %v1010_v10 = vpop.f32.mrf.mxu2  ;;  %v1219_v11 = vpop.f32.mrf.mxu3  ;;  %6032 = vmatmul.msk.f32.gmra.mxu0 %vm319_vm1, %v202_v0  ;;  %6097 = vmatmul.msk.f32.gmra.mxu1 %vm319_vm1, %v202_v0  ;;  %v206_v0 = vld [vmem:[%s7307_s28 + $0xf0] sm:$0xff] }
  0xe9   : > { %v1011_v12 = vadd.f32 %v1010_v10, %v7416_v38  ;;  %v1220_v13 = vadd.f32 %v1219_v11, %v7418_v39 }
  0xea   : > { %v4993_v14 = vpack.c.bf16 %v4050_v9, %v4049_v8 }
  0xeb   : > { %v4051_v16 = vmax.f32 %v1011_v12, 0.0  ;;  %v4052_v17 = vmax.f32 %v1220_v13, 0.0 }
  0xec   : > { %5505 = vst [vmem:[%s7428_s14 + $0x280] sm:$0xff] %v4993_v14 }
  0xed   : > { %v4994_v18 = vpack.c.bf16 %v4052_v17, %v4051_v16  ;;  %6163 = vmatmul.msk.f32.gmra.mxu2 %vm319_vm1, %v203_v15  ;;  %6228 = vmatmul.msk.f32.gmra.mxu3 %vm319_vm1, %v203_v15  ;;  %v595_v19 = vpop.f32.mrf.mxu0  ;;  %v804_v20 = vpop.f32.mrf.mxu1 }
  0xee   : > { %v596_v21 = vadd.f32 %v595_v19, %v7410_v34  ;;  %v805_v22 = vadd.f32 %v804_v20, %v7412_v35 }
  0xef   : > { %5506 = vst [vmem:[%s7428_s14 + $0x288] sm:$0xff] %v4994_v18 }
  0xf0   : > { %v4065_v23 = vmax.f32 %v596_v21, 0.0  ;;  %v4066_v24 = vmax.f32 %v805_v22, 0.0  ;;  %v1013_v25 = vpop.f32.mrf.mxu2  ;;  %v1222_v26 = vpop.f32.mrf.mxu3  ;;  %6033 = vmatmul.msk.f32.gmra.mxu0 %vm319_vm1, %v203_v15  ;;  %6098 = vmatmul.msk.f32.gmra.mxu1 %vm319_vm1, %v203_v15  ;;  %v207_v15 = vld [vmem:[%s7307_s28 + $0xf8] sm:$0xff] }
  0xf1   : > { %v1014_v27 = vadd.f32 %v1013_v25, %v7416_v38  ;;  %v1223_v28 = vadd.f32 %v1222_v26, %v7418_v39 }
  0xf2   : > { %v5001_v29 = vpack.c.bf16 %v4066_v24, %v4065_v23 }
  0xf3   : > { %v4067_v31 = vmax.f32 %v1014_v27, 0.0  ;;  %v4068_v32 = vmax.f32 %v1223_v28, 0.0 }
  0xf4   : > { %5513 = vst [vmem:[%s7428_s14 + $0x2c0] sm:$0xff] %v5001_v29 }
  0xf5   : > { %v5002_v33 = vpack.c.bf16 %v4068_v32, %v4067_v31  ;;  %6164 = vmatmul.msk.f32.gmra.mxu2 %vm319_vm1, %v204_v30  ;;  %6229 = vmatmul.msk.f32.gmra.mxu3 %vm319_vm1, %v204_v30  ;;  %v598_v36 = vpop.f32.mrf.mxu0  ;;  %v807_v37 = vpop.f32.mrf.mxu1 }
  0xf6   : > { %v599_v40 = vadd.f32 %v598_v36, %v7410_v34  ;;  %v808_v41 = vadd.f32 %v807_v37, %v7412_v35 }
  0xf7   : > { %5514 = vst [vmem:[%s7428_s14 + $0x2c8] sm:$0xff] %v5002_v33 }
  0xf8   : > { %v4081_v42 = vmax.f32 %v599_v40, 0.0  ;;  %v4082_v43 = vmax.f32 %v808_v41, 0.0  ;;  %v1016_v44 = vpop.f32.mrf.mxu2  ;;  %v1225_v45 = vpop.f32.mrf.mxu3  ;;  %6034 = vmatmul.msk.f32.gmra.mxu0 %vm319_vm1, %v204_v30  ;;  %6099 = vmatmul.msk.f32.gmra.mxu1 %vm319_vm1, %v204_v30  ;;  %v208_v30 = vld [vmem:[%s7307_s28 + $0x100] sm:$0xff] }
  0xf9   : > { %v1017_v46 = vadd.f32 %v1016_v44, %v7416_v38  ;;  %v1226_v47 = vadd.f32 %v1225_v45, %v7418_v39 }
  0xfa   : > { %v5009_v48 = vpack.c.bf16 %v4082_v43, %v4081_v42 }
  0xfb   : > { %v4083_v50 = vmax.f32 %v1017_v46, 0.0  ;;  %v4084_v51 = vmax.f32 %v1226_v47, 0.0 }
  0xfc   : > { %5521 = vst [vmem:[%s7428_s14 + $0x300] sm:$0xff] %v5009_v48 }
  0xfd   : > { %v5010_v52 = vpack.c.bf16 %v4084_v51, %v4083_v50  ;;  %6165 = vmatmul.msk.f32.gmra.mxu2 %vm319_vm1, %v205_v49  ;;  %6230 = vmatmul.msk.f32.gmra.mxu3 %vm319_vm1, %v205_v49  ;;  %v601_v53 = vpop.f32.mrf.mxu0  ;;  %v810_v54 = vpop.f32.mrf.mxu1 }
  0xfe   : > { %v602_v55 = vadd.f32 %v601_v53, %v7410_v34  ;;  %v811_v56 = vadd.f32 %v810_v54, %v7412_v35 }
  0xff   : > { %5522 = vst [vmem:[%s7428_s14 + $0x308] sm:$0xff] %v5010_v52 }
 0x100   : > { %v4097_v57 = vmax.f32 %v602_v55, 0.0  ;;  %v4098_v58 = vmax.f32 %v811_v56, 0.0  ;;  %v1019_v59 = vpop.f32.mrf.mxu2  ;;  %v1228_v60 = vpop.f32.mrf.mxu3  ;;  %6035 = vmatmul.msk.f32.gmra.mxu0 %vm319_vm1, %v205_v49  ;;  %6100 = vmatmul.msk.f32.gmra.mxu1 %vm319_vm1, %v205_v49  ;;  %v209_v49 = vld [vmem:[%s7307_s28 + $0x108] sm:$0xff] }
 0x101   : > { %v1020_v61 = vadd.f32 %v1019_v59, %v7416_v38  ;;  %v1229_v62 = vadd.f32 %v1228_v60, %v7418_v39 }
 0x102   : > { %v5017_v63 = vpack.c.bf16 %v4098_v58, %v4097_v57 }
 0x103   : > { %v4099_v1 = vmax.f32 %v1020_v61, 0.0  ;;  %v4100_v2 = vmax.f32 %v1229_v62, 0.0 }
 0x104   : > { %5529 = vst [vmem:[%s7428_s14 + $0x340] sm:$0xff] %v5017_v63 }
 0x105   : > { %v5018_v3 = vpack.c.bf16 %v4100_v2, %v4099_v1  ;;  %6166 = vmatmul.msk.f32.gmra.mxu2 %vm319_vm1, %v206_v0  ;;  %6231 = vmatmul.msk.f32.gmra.mxu3 %vm319_vm1, %v206_v0  ;;  %v604_v4 = vpop.f32.mrf.mxu0  ;;  %v813_v5 = vpop.f32.mrf.mxu1 }
 0x106   : > { %v605_v6 = vadd.f32 %v604_v4, %v7410_v34  ;;  %v814_v7 = vadd.f32 %v813_v5, %v7412_v35 }
 0x107   : > { %5530 = vst [vmem:[%s7428_s14 + $0x348] sm:$0xff] %v5018_v3 }
 0x108   : > { %v4113_v8 = vmax.f32 %v605_v6, 0.0  ;;  %v4114_v9 = vmax.f32 %v814_v7, 0.0  ;;  %v1022_v10 = vpop.f32.mrf.mxu2  ;;  %v1231_v11 = vpop.f32.mrf.mxu3  ;;  %6036 = vmatmul.msk.f32.gmra.mxu0 %vm319_vm1, %v206_v0  ;;  %6101 = vmatmul.msk.f32.gmra.mxu1 %vm319_vm1, %v206_v0  ;;  %v210_v0 = vld [vmem:[%s7307_s28 + $0x110] sm:$0xff] }
 0x109   : > { %v1023_v12 = vadd.f32 %v1022_v10, %v7416_v38  ;;  %v1232_v13 = vadd.f32 %v1231_v11, %v7418_v39 }
 0x10a   : > { %v5025_v14 = vpack.c.bf16 %v4114_v9, %v4113_v8 }
 0x10b   : > { %v4115_v16 = vmax.f32 %v1023_v12, 0.0  ;;  %v4116_v17 = vmax.f32 %v1232_v13, 0.0 }
 0x10c   : > { %5537 = vst [vmem:[%s7428_s14 + $0x380] sm:$0xff] %v5025_v14 }
 0x10d   : > { %v5026_v18 = vpack.c.bf16 %v4116_v17, %v4115_v16  ;;  %6167 = vmatmul.msk.f32.gmra.mxu2 %vm319_vm1, %v207_v15  ;;  %6232 = vmatmul.msk.f32.gmra.mxu3 %vm319_vm1, %v207_v15  ;;  %v607_v19 = vpop.f32.mrf.mxu0  ;;  %v816_v20 = vpop.f32.mrf.mxu1 }
 0x10e   : > { %v608_v21 = vadd.f32 %v607_v19, %v7410_v34  ;;  %v817_v22 = vadd.f32 %v816_v20, %v7412_v35 }
 0x10f   : > { %5538 = vst [vmem:[%s7428_s14 + $0x388] sm:$0xff] %v5026_v18 }
 0x110   : > { %v4129_v23 = vmax.f32 %v608_v21, 0.0  ;;  %v4130_v24 = vmax.f32 %v817_v22, 0.0  ;;  %v1025_v25 = vpop.f32.mrf.mxu2  ;;  %v1234_v26 = vpop.f32.mrf.mxu3  ;;  %6037 = vmatmul.msk.f32.gmra.mxu0 %vm319_vm1, %v207_v15  ;;  %6102 = vmatmul.msk.f32.gmra.mxu1 %vm319_vm1, %v207_v15  ;;  %v211_v15 = vld [vmem:[%s7307_s28 + $0x118] sm:$0xff] }
 0x111   : > { %v1026_v27 = vadd.f32 %v1025_v25, %v7416_v38  ;;  %v1235_v28 = vadd.f32 %v1234_v26, %v7418_v39 }
 0x112   : > { %v5033_v29 = vpack.c.bf16 %v4130_v24, %v4129_v23 }
 0x113   : > { %v4131_v31 = vmax.f32 %v1026_v27, 0.0  ;;  %v4132_v32 = vmax.f32 %v1235_v28, 0.0 }
 0x114   : > { %5545 = vst [vmem:[%s7428_s14 + $0x3c0] sm:$0xff] %v5033_v29 }
 0x115   : > { %v5034_v33 = vpack.c.bf16 %v4132_v32, %v4131_v31  ;;  %6168 = vmatmul.msk.f32.gmra.mxu2 %vm319_vm1, %v208_v30  ;;  %6233 = vmatmul.msk.f32.gmra.mxu3 %vm319_vm1, %v208_v30  ;;  %v610_v36 = vpop.f32.mrf.mxu0  ;;  %v819_v37 = vpop.f32.mrf.mxu1 }
 0x116   : > { %v611_v40 = vadd.f32 %v610_v36, %v7410_v34  ;;  %v820_v41 = vadd.f32 %v819_v37, %v7412_v35 }
 0x117   : > { %5546 = vst [vmem:[%s7428_s14 + $0x3c8] sm:$0xff] %v5034_v33 }
 0x118   : > { %v4145_v42 = vmax.f32 %v611_v40, 0.0  ;;  %v4146_v43 = vmax.f32 %v820_v41, 0.0  ;;  %v1028_v44 = vpop.f32.mrf.mxu2  ;;  %v1237_v45 = vpop.f32.mrf.mxu3  ;;  %6038 = vmatmul.msk.f32.gmra.mxu0 %vm319_vm1, %v208_v30  ;;  %6103 = vmatmul.msk.f32.gmra.mxu1 %vm319_vm1, %v208_v30  ;;  %v212_v30 = vld [vmem:[%s7307_s28 + $0x120] sm:$0xff] }
 0x119   : > { %v1029_v46 = vadd.f32 %v1028_v44, %v7416_v38  ;;  %v1238_v47 = vadd.f32 %v1237_v45, %v7418_v39 }
 0x11a   : > { %v5041_v48 = vpack.c.bf16 %v4146_v43, %v4145_v42 }
 0x11b   : > { %v4147_v50 = vmax.f32 %v1029_v46, 0.0  ;;  %v4148_v51 = vmax.f32 %v1238_v47, 0.0 }
 0x11c   : > { %5553 = vst [vmem:[%s7428_s14 + $0x400] sm:$0xff] %v5041_v48 }
 0x11d   : > { %v5042_v52 = vpack.c.bf16 %v4148_v51, %v4147_v50  ;;  %6169 = vmatmul.msk.f32.gmra.mxu2 %vm319_vm1, %v209_v49  ;;  %6234 = vmatmul.msk.f32.gmra.mxu3 %vm319_vm1, %v209_v49  ;;  %v613_v53 = vpop.f32.mrf.mxu0  ;;  %v822_v54 = vpop.f32.mrf.mxu1 }
 0x11e   : > { %v614_v55 = vadd.f32 %v613_v53, %v7410_v34  ;;  %v823_v56 = vadd.f32 %v822_v54, %v7412_v35 }
 0x11f   : > { %5554 = vst [vmem:[%s7428_s14 + $0x408] sm:$0xff] %v5042_v52 }
 0x120   : > { %v4161_v57 = vmax.f32 %v614_v55, 0.0  ;;  %v4162_v58 = vmax.f32 %v823_v56, 0.0  ;;  %v1031_v59 = vpop.f32.mrf.mxu2  ;;  %v1240_v60 = vpop.f32.mrf.mxu3  ;;  %6039 = vmatmul.msk.f32.gmra.mxu0 %vm319_vm1, %v209_v49  ;;  %6104 = vmatmul.msk.f32.gmra.mxu1 %vm319_vm1, %v209_v49  ;;  %v213_v49 = vld [vmem:[%s7307_s28 + $0x128] sm:$0xff] }
 0x121   : > { %v1032_v61 = vadd.f32 %v1031_v59, %v7416_v38  ;;  %v1241_v62 = vadd.f32 %v1240_v60, %v7418_v39 }
 0x122   : > { %v5049_v63 = vpack.c.bf16 %v4162_v58, %v4161_v57 }
 0x123   : > { %v4163_v1 = vmax.f32 %v1032_v61, 0.0  ;;  %v4164_v2 = vmax.f32 %v1241_v62, 0.0 }
 0x124   : > { %5561 = vst [vmem:[%s7428_s14 + $0x440] sm:$0xff] %v5049_v63 }
 0x125   : > { %v5050_v3 = vpack.c.bf16 %v4164_v2, %v4163_v1  ;;  %6170 = vmatmul.msk.f32.gmra.mxu2 %vm319_vm1, %v210_v0  ;;  %6235 = vmatmul.msk.f32.gmra.mxu3 %vm319_vm1, %v210_v0  ;;  %v616_v4 = vpop.f32.mrf.mxu0  ;;  %v825_v5 = vpop.f32.mrf.mxu1 }
 0x126   : > { %v617_v6 = vadd.f32 %v616_v4, %v7410_v34  ;;  %v826_v7 = vadd.f32 %v825_v5, %v7412_v35 }
 0x127   : > { %5562 = vst [vmem:[%s7428_s14 + $0x448] sm:$0xff] %v5050_v3 }
 0x128   : > { %v4177_v8 = vmax.f32 %v617_v6, 0.0  ;;  %v4178_v9 = vmax.f32 %v826_v7, 0.0  ;;  %v1034_v10 = vpop.f32.mrf.mxu2  ;;  %v1243_v11 = vpop.f32.mrf.mxu3  ;;  %6040 = vmatmul.msk.f32.gmra.mxu0 %vm319_vm1, %v210_v0  ;;  %6105 = vmatmul.msk.f32.gmra.mxu1 %vm319_vm1, %v210_v0  ;;  %v214_v0 = vld [vmem:[%s7307_s28 + $0x130] sm:$0xff] }
 0x129   : > { %v1035_v12 = vadd.f32 %v1034_v10, %v7416_v38  ;;  %v1244_v13 = vadd.f32 %v1243_v11, %v7418_v39 }
 0x12a   : > { %v5057_v14 = vpack.c.bf16 %v4178_v9, %v4177_v8 }
 0x12b   : > { %v4179_v16 = vmax.f32 %v1035_v12, 0.0  ;;  %v4180_v17 = vmax.f32 %v1244_v13, 0.0 }
 0x12c   : > { %5569 = vst [vmem:[%s7428_s14 + $0x480] sm:$0xff] %v5057_v14 }
 0x12d   : > { %v5058_v18 = vpack.c.bf16 %v4180_v17, %v4179_v16  ;;  %6171 = vmatmul.msk.f32.gmra.mxu2 %vm319_vm1, %v211_v15  ;;  %6236 = vmatmul.msk.f32.gmra.mxu3 %vm319_vm1, %v211_v15  ;;  %v619_v19 = vpop.f32.mrf.mxu0  ;;  %v828_v20 = vpop.f32.mrf.mxu1 }
 0x12e   : > { %v620_v21 = vadd.f32 %v619_v19, %v7410_v34  ;;  %v829_v22 = vadd.f32 %v828_v20, %v7412_v35 }
 0x12f   : > { %5570 = vst [vmem:[%s7428_s14 + $0x488] sm:$0xff] %v5058_v18 }
 0x130   : > { %v4193_v23 = vmax.f32 %v620_v21, 0.0  ;;  %v4194_v24 = vmax.f32 %v829_v22, 0.0  ;;  %v1037_v25 = vpop.f32.mrf.mxu2  ;;  %v1246_v26 = vpop.f32.mrf.mxu3  ;;  %6041 = vmatmul.msk.f32.gmra.mxu0 %vm319_vm1, %v211_v15  ;;  %6106 = vmatmul.msk.f32.gmra.mxu1 %vm319_vm1, %v211_v15  ;;  %v215_v15 = vld [vmem:[%s7307_s28 + $0x138] sm:$0xff] }
 0x131   : > { %v1038_v27 = vadd.f32 %v1037_v25, %v7416_v38  ;;  %v1247_v28 = vadd.f32 %v1246_v26, %v7418_v39 }
 0x132   : > { %v5065_v29 = vpack.c.bf16 %v4194_v24, %v4193_v23 }
 0x133   : > { %v4195_v31 = vmax.f32 %v1038_v27, 0.0  ;;  %v4196_v32 = vmax.f32 %v1247_v28, 0.0 }
 0x134   : > { %5577 = vst [vmem:[%s7428_s14 + $0x4c0] sm:$0xff] %v5065_v29 }
 0x135   : > { %v5066_v33 = vpack.c.bf16 %v4196_v32, %v4195_v31  ;;  %6172 = vmatmul.msk.f32.gmra.mxu2 %vm319_vm1, %v212_v30  ;;  %6237 = vmatmul.msk.f32.gmra.mxu3 %vm319_vm1, %v212_v30  ;;  %v622_v36 = vpop.f32.mrf.mxu0  ;;  %v831_v37 = vpop.f32.mrf.mxu1 }
 0x136   : > { %v623_v40 = vadd.f32 %v622_v36, %v7410_v34  ;;  %v832_v41 = vadd.f32 %v831_v37, %v7412_v35 }
 0x137   : > { %5578 = vst [vmem:[%s7428_s14 + $0x4c8] sm:$0xff] %v5066_v33 }
 0x138   : > { %v4209_v42 = vmax.f32 %v623_v40, 0.0  ;;  %v4210_v43 = vmax.f32 %v832_v41, 0.0  ;;  %v1040_v44 = vpop.f32.mrf.mxu2  ;;  %v1249_v45 = vpop.f32.mrf.mxu3  ;;  %6042 = vmatmul.msk.f32.gmra.mxu0 %vm319_vm1, %v212_v30  ;;  %6107 = vmatmul.msk.f32.gmra.mxu1 %vm319_vm1, %v212_v30  ;;  %v216_v30 = vld [vmem:[%s7307_s28 + $0x140] sm:$0xff] }
 0x139   : > { %v1041_v46 = vadd.f32 %v1040_v44, %v7416_v38  ;;  %v1250_v47 = vadd.f32 %v1249_v45, %v7418_v39 }
 0x13a   : > { %v5073_v48 = vpack.c.bf16 %v4210_v43, %v4209_v42 }
 0x13b   : > { %v4211_v50 = vmax.f32 %v1041_v46, 0.0  ;;  %v4212_v51 = vmax.f32 %v1250_v47, 0.0 }
 0x13c   : > { %5585 = vst [vmem:[%s7428_s14 + $0x500] sm:$0xff] %v5073_v48 }
 0x13d   : > { %v5074_v52 = vpack.c.bf16 %v4212_v51, %v4211_v50  ;;  %6173 = vmatmul.msk.f32.gmra.mxu2 %vm319_vm1, %v213_v49  ;;  %6238 = vmatmul.msk.f32.gmra.mxu3 %vm319_vm1, %v213_v49  ;;  %v625_v53 = vpop.f32.mrf.mxu0  ;;  %v834_v54 = vpop.f32.mrf.mxu1 }
 0x13e   : > { %v626_v55 = vadd.f32 %v625_v53, %v7410_v34  ;;  %v835_v56 = vadd.f32 %v834_v54, %v7412_v35 }
 0x13f   : > { %5586 = vst [vmem:[%s7428_s14 + $0x508] sm:$0xff] %v5074_v52 }
 0x140   : > { %v4225_v57 = vmax.f32 %v626_v55, 0.0  ;;  %v4226_v58 = vmax.f32 %v835_v56, 0.0  ;;  %v1043_v59 = vpop.f32.mrf.mxu2  ;;  %v1252_v60 = vpop.f32.mrf.mxu3  ;;  %6043 = vmatmul.msk.f32.gmra.mxu0 %vm319_vm1, %v213_v49  ;;  %6108 = vmatmul.msk.f32.gmra.mxu1 %vm319_vm1, %v213_v49  ;;  %v217_v49 = vld [vmem:[%s7307_s28 + $0x148] sm:$0xff] }
 0x141   : > { %v1044_v61 = vadd.f32 %v1043_v59, %v7416_v38  ;;  %v1253_v62 = vadd.f32 %v1252_v60, %v7418_v39 }
 0x142   : > { %v5081_v63 = vpack.c.bf16 %v4226_v58, %v4225_v57 }
 0x143   : > { %v4227_v1 = vmax.f32 %v1044_v61, 0.0  ;;  %v4228_v2 = vmax.f32 %v1253_v62, 0.0 }
 0x144   : > { %5593 = vst [vmem:[%s7428_s14 + $0x540] sm:$0xff] %v5081_v63 }
 0x145   : > { %v5082_v3 = vpack.c.bf16 %v4228_v2, %v4227_v1  ;;  %6174 = vmatmul.msk.f32.gmra.mxu2 %vm319_vm1, %v214_v0  ;;  %6239 = vmatmul.msk.f32.gmra.mxu3 %vm319_vm1, %v214_v0  ;;  %v628_v4 = vpop.f32.mrf.mxu0  ;;  %v837_v5 = vpop.f32.mrf.mxu1 }
 0x146   : > { %v629_v6 = vadd.f32 %v628_v4, %v7410_v34  ;;  %v838_v7 = vadd.f32 %v837_v5, %v7412_v35 }
 0x147   : > { %5594 = vst [vmem:[%s7428_s14 + $0x548] sm:$0xff] %v5082_v3 }
 0x148   : > { %v4241_v8 = vmax.f32 %v629_v6, 0.0  ;;  %v4242_v9 = vmax.f32 %v838_v7, 0.0  ;;  %v1046_v10 = vpop.f32.mrf.mxu2  ;;  %v1255_v11 = vpop.f32.mrf.mxu3  ;;  %6044 = vmatmul.msk.f32.gmra.mxu0 %vm319_vm1, %v214_v0  ;;  %6109 = vmatmul.msk.f32.gmra.mxu1 %vm319_vm1, %v214_v0  ;;  %v218_v0 = vld [vmem:[%s7307_s28 + $0x150] sm:$0xff] }
 0x149   : > { %v1047_v12 = vadd.f32 %v1046_v10, %v7416_v38  ;;  %v1256_v13 = vadd.f32 %v1255_v11, %v7418_v39 }
 0x14a   : > { %v5089_v14 = vpack.c.bf16 %v4242_v9, %v4241_v8 }
 0x14b   : > { %v4243_v16 = vmax.f32 %v1047_v12, 0.0  ;;  %v4244_v17 = vmax.f32 %v1256_v13, 0.0 }
 0x14c   : > { %5601 = vst [vmem:[%s7428_s14 + $0x580] sm:$0xff] %v5089_v14 }
 0x14d   : > { %v5090_v18 = vpack.c.bf16 %v4244_v17, %v4243_v16  ;;  %6175 = vmatmul.msk.f32.gmra.mxu2 %vm319_vm1, %v215_v15  ;;  %6240 = vmatmul.msk.f32.gmra.mxu3 %vm319_vm1, %v215_v15  ;;  %v631_v19 = vpop.f32.mrf.mxu0  ;;  %v840_v20 = vpop.f32.mrf.mxu1 }
 0x14e   : > { %v632_v21 = vadd.f32 %v631_v19, %v7410_v34  ;;  %v841_v22 = vadd.f32 %v840_v20, %v7412_v35 }
 0x14f   : > { %5602 = vst [vmem:[%s7428_s14 + $0x588] sm:$0xff] %v5090_v18 }
 0x150   : > { %v4257_v23 = vmax.f32 %v632_v21, 0.0  ;;  %v4258_v24 = vmax.f32 %v841_v22, 0.0  ;;  %v1049_v25 = vpop.f32.mrf.mxu2  ;;  %v1258_v26 = vpop.f32.mrf.mxu3  ;;  %6045 = vmatmul.msk.f32.gmra.mxu0 %vm319_vm1, %v215_v15  ;;  %6110 = vmatmul.msk.f32.gmra.mxu1 %vm319_vm1, %v215_v15  ;;  %v219_v15 = vld [vmem:[%s7307_s28 + $0x158] sm:$0xff] }
 0x151   : > { %v1050_v27 = vadd.f32 %v1049_v25, %v7416_v38  ;;  %v1259_v28 = vadd.f32 %v1258_v26, %v7418_v39 }
 0x152   : > { %v5097_v29 = vpack.c.bf16 %v4258_v24, %v4257_v23 }
 0x153   : > { %v4259_v31 = vmax.f32 %v1050_v27, 0.0  ;;  %v4260_v32 = vmax.f32 %v1259_v28, 0.0 }
 0x154   : > { %5609 = vst [vmem:[%s7428_s14 + $0x5c0] sm:$0xff] %v5097_v29 }
 0x155   : > { %v5098_v33 = vpack.c.bf16 %v4260_v32, %v4259_v31  ;;  %6176 = vmatmul.msk.f32.gmra.mxu2 %vm319_vm1, %v216_v30  ;;  %6241 = vmatmul.msk.f32.gmra.mxu3 %vm319_vm1, %v216_v30  ;;  %v634_v36 = vpop.f32.mrf.mxu0  ;;  %v843_v37 = vpop.f32.mrf.mxu1 }
 0x156   : > { %v635_v40 = vadd.f32 %v634_v36, %v7410_v34  ;;  %v844_v41 = vadd.f32 %v843_v37, %v7412_v35 }
 0x157   : > { %5610 = vst [vmem:[%s7428_s14 + $0x5c8] sm:$0xff] %v5098_v33 }
 0x158   : > { %v4273_v42 = vmax.f32 %v635_v40, 0.0  ;;  %v4274_v43 = vmax.f32 %v844_v41, 0.0  ;;  %v1052_v44 = vpop.f32.mrf.mxu2  ;;  %v1261_v45 = vpop.f32.mrf.mxu3  ;;  %6046 = vmatmul.msk.f32.gmra.mxu0 %vm319_vm1, %v216_v30  ;;  %6111 = vmatmul.msk.f32.gmra.mxu1 %vm319_vm1, %v216_v30  ;;  %v220_v30 = vld [vmem:[%s7307_s28 + $0x160] sm:$0xff] }
 0x159   : > { %v1053_v46 = vadd.f32 %v1052_v44, %v7416_v38  ;;  %v1262_v47 = vadd.f32 %v1261_v45, %v7418_v39 }
 0x15a   : > { %v5105_v48 = vpack.c.bf16 %v4274_v43, %v4273_v42 }
 0x15b   : > { %v4275_v50 = vmax.f32 %v1053_v46, 0.0  ;;  %v4276_v51 = vmax.f32 %v1262_v47, 0.0 }
 0x15c   : > { %5617 = vst [vmem:[%s7428_s14 + $0x600] sm:$0xff] %v5105_v48 }
 0x15d   : > { %v5106_v52 = vpack.c.bf16 %v4276_v51, %v4275_v50  ;;  %6177 = vmatmul.msk.f32.gmra.mxu2 %vm319_vm1, %v217_v49  ;;  %6242 = vmatmul.msk.f32.gmra.mxu3 %vm319_vm1, %v217_v49  ;;  %v637_v53 = vpop.f32.mrf.mxu0  ;;  %v846_v54 = vpop.f32.mrf.mxu1 }
 0x15e   : > { %v638_v55 = vadd.f32 %v637_v53, %v7410_v34  ;;  %v847_v56 = vadd.f32 %v846_v54, %v7412_v35 }
 0x15f   : > { %5618 = vst [vmem:[%s7428_s14 + $0x608] sm:$0xff] %v5106_v52 }
 0x160   : > { %v4289_v57 = vmax.f32 %v638_v55, 0.0  ;;  %v4290_v58 = vmax.f32 %v847_v56, 0.0  ;;  %v1055_v59 = vpop.f32.mrf.mxu2  ;;  %v1264_v60 = vpop.f32.mrf.mxu3  ;;  %6047 = vmatmul.msk.f32.gmra.mxu0 %vm319_vm1, %v217_v49  ;;  %6112 = vmatmul.msk.f32.gmra.mxu1 %vm319_vm1, %v217_v49  ;;  %v221_v49 = vld [vmem:[%s7307_s28 + $0x168] sm:$0xff] }
 0x161   : > { %v1056_v61 = vadd.f32 %v1055_v59, %v7416_v38  ;;  %v1265_v62 = vadd.f32 %v1264_v60, %v7418_v39 }
 0x162   : > { %v5113_v63 = vpack.c.bf16 %v4290_v58, %v4289_v57 }
 0x163   : > { %v4291_v1 = vmax.f32 %v1056_v61, 0.0  ;;  %v4292_v2 = vmax.f32 %v1265_v62, 0.0 }
 0x164   : > { %5625 = vst [vmem:[%s7428_s14 + $0x640] sm:$0xff] %v5113_v63 }
 0x165   : > { %v5114_v3 = vpack.c.bf16 %v4292_v2, %v4291_v1  ;;  %6178 = vmatmul.msk.f32.gmra.mxu2 %vm319_vm1, %v218_v0  ;;  %6243 = vmatmul.msk.f32.gmra.mxu3 %vm319_vm1, %v218_v0  ;;  %v640_v4 = vpop.f32.mrf.mxu0  ;;  %v849_v5 = vpop.f32.mrf.mxu1 }
 0x166   : > { %v641_v6 = vadd.f32 %v640_v4, %v7410_v34  ;;  %v850_v7 = vadd.f32 %v849_v5, %v7412_v35 }
 0x167   : > { %5626 = vst [vmem:[%s7428_s14 + $0x648] sm:$0xff] %v5114_v3 }
 0x168   : > { %v4305_v8 = vmax.f32 %v641_v6, 0.0  ;;  %v4306_v9 = vmax.f32 %v850_v7, 0.0  ;;  %v1058_v10 = vpop.f32.mrf.mxu2  ;;  %v1267_v11 = vpop.f32.mrf.mxu3  ;;  %6048 = vmatmul.msk.f32.gmra.mxu0 %vm319_vm1, %v218_v0  ;;  %6113 = vmatmul.msk.f32.gmra.mxu1 %vm319_vm1, %v218_v0  ;;  %v222_v0 = vld [vmem:[%s7307_s28 + $0x170] sm:$0xff] }
 0x169   : > { %v1059_v12 = vadd.f32 %v1058_v10, %v7416_v38  ;;  %v1268_v13 = vadd.f32 %v1267_v11, %v7418_v39 }
 0x16a   : > { %v5121_v14 = vpack.c.bf16 %v4306_v9, %v4305_v8 }
 0x16b   : > { %v4307_v16 = vmax.f32 %v1059_v12, 0.0  ;;  %v4308_v17 = vmax.f32 %v1268_v13, 0.0 }
 0x16c   : > { %5633 = vst [vmem:[%s7428_s14 + $0x680] sm:$0xff] %v5121_v14 }
 0x16d   : > { %v5122_v18 = vpack.c.bf16 %v4308_v17, %v4307_v16  ;;  %6179 = vmatmul.msk.f32.gmra.mxu2 %vm319_vm1, %v219_v15  ;;  %6244 = vmatmul.msk.f32.gmra.mxu3 %vm319_vm1, %v219_v15  ;;  %v643_v19 = vpop.f32.mrf.mxu0  ;;  %v852_v20 = vpop.f32.mrf.mxu1 }
 0x16e   : > { %v644_v21 = vadd.f32 %v643_v19, %v7410_v34  ;;  %v853_v22 = vadd.f32 %v852_v20, %v7412_v35 }
 0x16f   : > { %5634 = vst [vmem:[%s7428_s14 + $0x688] sm:$0xff] %v5122_v18 }
 0x170   : > { %v4321_v23 = vmax.f32 %v644_v21, 0.0  ;;  %v4322_v24 = vmax.f32 %v853_v22, 0.0  ;;  %v1061_v25 = vpop.f32.mrf.mxu2  ;;  %v1270_v26 = vpop.f32.mrf.mxu3  ;;  %6049 = vmatmul.msk.f32.gmra.mxu0 %vm319_vm1, %v219_v15  ;;  %6114 = vmatmul.msk.f32.gmra.mxu1 %vm319_vm1, %v219_v15  ;;  %v223_v15 = vld [vmem:[%s7307_s28 + $0x178] sm:$0xff] }
 0x171   : > { %v1062_v27 = vadd.f32 %v1061_v25, %v7416_v38  ;;  %v1271_v28 = vadd.f32 %v1270_v26, %v7418_v39 }
 0x172   : > { %v5129_v29 = vpack.c.bf16 %v4322_v24, %v4321_v23 }
 0x173   : > { %v4323_v31 = vmax.f32 %v1062_v27, 0.0  ;;  %v4324_v32 = vmax.f32 %v1271_v28, 0.0 }
 0x174   : > { %5641 = vst [vmem:[%s7428_s14 + $0x6c0] sm:$0xff] %v5129_v29 }
 0x175   : > { %v5130_v33 = vpack.c.bf16 %v4324_v32, %v4323_v31  ;;  %6180 = vmatmul.msk.f32.gmra.mxu2 %vm319_vm1, %v220_v30  ;;  %6245 = vmatmul.msk.f32.gmra.mxu3 %vm319_vm1, %v220_v30  ;;  %v646_v36 = vpop.f32.mrf.mxu0  ;;  %v855_v37 = vpop.f32.mrf.mxu1 }
 0x176   : > { %v647_v40 = vadd.f32 %v646_v36, %v7410_v34  ;;  %v856_v41 = vadd.f32 %v855_v37, %v7412_v35 }
 0x177   : > { %5642 = vst [vmem:[%s7428_s14 + $0x6c8] sm:$0xff] %v5130_v33 }
 0x178   : > { %v4337_v42 = vmax.f32 %v647_v40, 0.0  ;;  %v4338_v43 = vmax.f32 %v856_v41, 0.0  ;;  %v1064_v44 = vpop.f32.mrf.mxu2  ;;  %v1273_v45 = vpop.f32.mrf.mxu3  ;;  %6050 = vmatmul.msk.f32.gmra.mxu0 %vm319_vm1, %v220_v30  ;;  %6115 = vmatmul.msk.f32.gmra.mxu1 %vm319_vm1, %v220_v30  ;;  %v224_v30 = vld [vmem:[%s7307_s28 + $0x180] sm:$0xff] }
 0x179   : > { %v1065_v46 = vadd.f32 %v1064_v44, %v7416_v38  ;;  %v1274_v47 = vadd.f32 %v1273_v45, %v7418_v39 }
 0x17a   : > { %v5137_v48 = vpack.c.bf16 %v4338_v43, %v4337_v42 }
 0x17b   : > { %v4339_v50 = vmax.f32 %v1065_v46, 0.0  ;;  %v4340_v51 = vmax.f32 %v1274_v47, 0.0 }
 0x17c   : > { %5649 = vst [vmem:[%s7428_s14 + $0x700] sm:$0xff] %v5137_v48 }
 0x17d   : > { %v5138_v52 = vpack.c.bf16 %v4340_v51, %v4339_v50  ;;  %6181 = vmatmul.msk.f32.gmra.mxu2 %vm319_vm1, %v221_v49  ;;  %6246 = vmatmul.msk.f32.gmra.mxu3 %vm319_vm1, %v221_v49  ;;  %v649_v53 = vpop.f32.mrf.mxu0  ;;  %v858_v54 = vpop.f32.mrf.mxu1 }
 0x17e   : > { %v650_v55 = vadd.f32 %v649_v53, %v7410_v34  ;;  %v859_v56 = vadd.f32 %v858_v54, %v7412_v35 }
 0x17f   : > { %5650 = vst [vmem:[%s7428_s14 + $0x708] sm:$0xff] %v5138_v52 }
 0x180   : > { %v4353_v57 = vmax.f32 %v650_v55, 0.0  ;;  %v4354_v58 = vmax.f32 %v859_v56, 0.0  ;;  %v1067_v59 = vpop.f32.mrf.mxu2  ;;  %v1276_v60 = vpop.f32.mrf.mxu3  ;;  %6051 = vmatmul.msk.f32.gmra.mxu0 %vm319_vm1, %v221_v49  ;;  %6116 = vmatmul.msk.f32.gmra.mxu1 %vm319_vm1, %v221_v49  ;;  %v225_v49 = vld [vmem:[%s7307_s28 + $0x188] sm:$0xff] }
 0x181   : > { %v1068_v61 = vadd.f32 %v1067_v59, %v7416_v38  ;;  %v1277_v62 = vadd.f32 %v1276_v60, %v7418_v39 }
 0x182   : > { %v5145_v63 = vpack.c.bf16 %v4354_v58, %v4353_v57 }
 0x183   : > { %v4355_v1 = vmax.f32 %v1068_v61, 0.0  ;;  %v4356_v2 = vmax.f32 %v1277_v62, 0.0 }
 0x184   : > { %5657 = vst [vmem:[%s7428_s14 + $0x740] sm:$0xff] %v5145_v63 }
 0x185   : > { %v5146_v3 = vpack.c.bf16 %v4356_v2, %v4355_v1  ;;  %6182 = vmatmul.msk.f32.gmra.mxu2 %vm319_vm1, %v222_v0  ;;  %6247 = vmatmul.msk.f32.gmra.mxu3 %vm319_vm1, %v222_v0  ;;  %v652_v4 = vpop.f32.mrf.mxu0  ;;  %v861_v5 = vpop.f32.mrf.mxu1 }
 0x186   : > { %v653_v6 = vadd.f32 %v652_v4, %v7410_v34  ;;  %v862_v7 = vadd.f32 %v861_v5, %v7412_v35 }
 0x187   : > { %5658 = vst [vmem:[%s7428_s14 + $0x748] sm:$0xff] %v5146_v3 }
 0x188   : > { %v4369_v8 = vmax.f32 %v653_v6, 0.0  ;;  %v4370_v9 = vmax.f32 %v862_v7, 0.0  ;;  %v1070_v10 = vpop.f32.mrf.mxu2  ;;  %v1279_v11 = vpop.f32.mrf.mxu3  ;;  %6052 = vmatmul.msk.f32.gmra.mxu0 %vm319_vm1, %v222_v0  ;;  %6117 = vmatmul.msk.f32.gmra.mxu1 %vm319_vm1, %v222_v0  ;;  %v226_v0 = vld [vmem:[%s7307_s28 + $0x190] sm:$0xff] }
 0x189   : > { %v1071_v12 = vadd.f32 %v1070_v10, %v7416_v38  ;;  %v1280_v13 = vadd.f32 %v1279_v11, %v7418_v39 }
 0x18a   : > { %v5153_v14 = vpack.c.bf16 %v4370_v9, %v4369_v8 }
 0x18b   : > { %v4371_v16 = vmax.f32 %v1071_v12, 0.0  ;;  %v4372_v17 = vmax.f32 %v1280_v13, 0.0 }
 0x18c   : > { %5665 = vst [vmem:[%s7428_s14 + $0x780] sm:$0xff] %v5153_v14 }
 0x18d   : > { %v5154_v18 = vpack.c.bf16 %v4372_v17, %v4371_v16  ;;  %6183 = vmatmul.msk.f32.gmra.mxu2 %vm319_vm1, %v223_v15  ;;  %6248 = vmatmul.msk.f32.gmra.mxu3 %vm319_vm1, %v223_v15  ;;  %v655_v19 = vpop.f32.mrf.mxu0  ;;  %v864_v20 = vpop.f32.mrf.mxu1 }
 0x18e   : > { %v656_v21 = vadd.f32 %v655_v19, %v7410_v34  ;;  %v865_v22 = vadd.f32 %v864_v20, %v7412_v35 }
 0x18f   : > { %5666 = vst [vmem:[%s7428_s14 + $0x788] sm:$0xff] %v5154_v18 }
 0x190   : > { %v4385_v23 = vmax.f32 %v656_v21, 0.0  ;;  %v4386_v24 = vmax.f32 %v865_v22, 0.0  ;;  %v1073_v25 = vpop.f32.mrf.mxu2  ;;  %v1282_v26 = vpop.f32.mrf.mxu3  ;;  %6053 = vmatmul.msk.f32.gmra.mxu0 %vm319_vm1, %v223_v15  ;;  %6118 = vmatmul.msk.f32.gmra.mxu1 %vm319_vm1, %v223_v15  ;;  %v227_v15 = vld [vmem:[%s7307_s28 + $0x198] sm:$0xff] }
 0x191   : > { %v1074_v27 = vadd.f32 %v1073_v25, %v7416_v38  ;;  %v1283_v28 = vadd.f32 %v1282_v26, %v7418_v39 }
 0x192   : > { %v5161_v29 = vpack.c.bf16 %v4386_v24, %v4385_v23 }
 0x193   : > { %v4387_v31 = vmax.f32 %v1074_v27, 0.0  ;;  %v4388_v32 = vmax.f32 %v1283_v28, 0.0 }
 0x194   : > { %5673 = vst [vmem:[%s7428_s14 + $0x7c0] sm:$0xff] %v5161_v29 }
 0x195   : > { %v5162_v33 = vpack.c.bf16 %v4388_v32, %v4387_v31  ;;  %6184 = vmatmul.msk.f32.gmra.mxu2 %vm319_vm1, %v224_v30  ;;  %6249 = vmatmul.msk.f32.gmra.mxu3 %vm319_vm1, %v224_v30  ;;  %v658_v36 = vpop.f32.mrf.mxu0  ;;  %v867_v37 = vpop.f32.mrf.mxu1 }
 0x196   : > { %v659_v40 = vadd.f32 %v658_v36, %v7410_v34  ;;  %v868_v41 = vadd.f32 %v867_v37, %v7412_v35 }
 0x197   : > { %5674 = vst [vmem:[%s7428_s14 + $0x7c8] sm:$0xff] %v5162_v33 }
 0x198   : > { %v4401_v42 = vmax.f32 %v659_v40, 0.0  ;;  %v4402_v43 = vmax.f32 %v868_v41, 0.0  ;;  %v1076_v44 = vpop.f32.mrf.mxu2  ;;  %v1285_v45 = vpop.f32.mrf.mxu3  ;;  %6054 = vmatmul.msk.f32.gmra.mxu0 %vm319_vm1, %v224_v30  ;;  %6119 = vmatmul.msk.f32.gmra.mxu1 %vm319_vm1, %v224_v30  ;;  %v228_v30 = vld [vmem:[%s7307_s28 + $0x1a0] sm:$0xff] }
 0x199   : > { %v1077_v46 = vadd.f32 %v1076_v44, %v7416_v38  ;;  %v1286_v47 = vadd.f32 %v1285_v45, %v7418_v39 }
 0x19a   : > { %v5169_v48 = vpack.c.bf16 %v4402_v43, %v4401_v42 }
 0x19b   : > { %v4403_v50 = vmax.f32 %v1077_v46, 0.0  ;;  %v4404_v51 = vmax.f32 %v1286_v47, 0.0 }
 0x19c   : > { %5681 = vst [vmem:[%s7428_s14 + $0x800] sm:$0xff] %v5169_v48 }
 0x19d   : > { %v5170_v52 = vpack.c.bf16 %v4404_v51, %v4403_v50  ;;  %6185 = vmatmul.msk.f32.gmra.mxu2 %vm319_vm1, %v225_v49  ;;  %6250 = vmatmul.msk.f32.gmra.mxu3 %vm319_vm1, %v225_v49  ;;  %v661_v53 = vpop.f32.mrf.mxu0  ;;  %v870_v54 = vpop.f32.mrf.mxu1 }
 0x19e   : > { %v662_v55 = vadd.f32 %v661_v53, %v7410_v34  ;;  %v871_v56 = vadd.f32 %v870_v54, %v7412_v35 }
 0x19f   : > { %5682 = vst [vmem:[%s7428_s14 + $0x808] sm:$0xff] %v5170_v52 }
 0x1a0   : > { %v4417_v57 = vmax.f32 %v662_v55, 0.0  ;;  %v4418_v58 = vmax.f32 %v871_v56, 0.0  ;;  %v1079_v59 = vpop.f32.mrf.mxu2  ;;  %v1288_v60 = vpop.f32.mrf.mxu3  ;;  %6055 = vmatmul.msk.f32.gmra.mxu0 %vm319_vm1, %v225_v49  ;;  %6120 = vmatmul.msk.f32.gmra.mxu1 %vm319_vm1, %v225_v49  ;;  %v229_v49 = vld [vmem:[%s7307_s28 + $0x1a8] sm:$0xff] }
 0x1a1   : > { %v1080_v61 = vadd.f32 %v1079_v59, %v7416_v38  ;;  %v1289_v62 = vadd.f32 %v1288_v60, %v7418_v39 }
 0x1a2   : > { %v5177_v63 = vpack.c.bf16 %v4418_v58, %v4417_v57 }
 0x1a3   : > { %v4419_v1 = vmax.f32 %v1080_v61, 0.0  ;;  %v4420_v2 = vmax.f32 %v1289_v62, 0.0 }
 0x1a4   : > { %5689 = vst [vmem:[%s7428_s14 + $0x840] sm:$0xff] %v5177_v63 }
 0x1a5   : > { %v5178_v3 = vpack.c.bf16 %v4420_v2, %v4419_v1  ;;  %6186 = vmatmul.msk.f32.gmra.mxu2 %vm319_vm1, %v226_v0  ;;  %6251 = vmatmul.msk.f32.gmra.mxu3 %vm319_vm1, %v226_v0  ;;  %v664_v4 = vpop.f32.mrf.mxu0  ;;  %v873_v5 = vpop.f32.mrf.mxu1 }
 0x1a6   : > { %v665_v6 = vadd.f32 %v664_v4, %v7410_v34  ;;  %v874_v7 = vadd.f32 %v873_v5, %v7412_v35 }
 0x1a7   : > { %5690 = vst [vmem:[%s7428_s14 + $0x848] sm:$0xff] %v5178_v3 }
 0x1a8   : > { %v4433_v8 = vmax.f32 %v665_v6, 0.0  ;;  %v4434_v9 = vmax.f32 %v874_v7, 0.0  ;;  %v1082_v10 = vpop.f32.mrf.mxu2  ;;  %v1291_v11 = vpop.f32.mrf.mxu3  ;;  %6056 = vmatmul.msk.f32.gmra.mxu0 %vm319_vm1, %v226_v0  ;;  %6121 = vmatmul.msk.f32.gmra.mxu1 %vm319_vm1, %v226_v0  ;;  %v230_v0 = vld [vmem:[%s7307_s28 + $0x1b0] sm:$0xff] }
 0x1a9   : > { %v1083_v12 = vadd.f32 %v1082_v10, %v7416_v38  ;;  %v1292_v13 = vadd.f32 %v1291_v11, %v7418_v39 }
 0x1aa   : > { %v5185_v14 = vpack.c.bf16 %v4434_v9, %v4433_v8 }
 0x1ab   : > { %v4435_v16 = vmax.f32 %v1083_v12, 0.0  ;;  %v4436_v17 = vmax.f32 %v1292_v13, 0.0 }
 0x1ac   : > { %5697 = vst [vmem:[%s7428_s14 + $0x880] sm:$0xff] %v5185_v14 }
 0x1ad   : > { %v5186_v18 = vpack.c.bf16 %v4436_v17, %v4435_v16  ;;  %6187 = vmatmul.msk.f32.gmra.mxu2 %vm319_vm1, %v227_v15  ;;  %6252 = vmatmul.msk.f32.gmra.mxu3 %vm319_vm1, %v227_v15  ;;  %v667_v19 = vpop.f32.mrf.mxu0  ;;  %v876_v20 = vpop.f32.mrf.mxu1 }
 0x1ae   : > { %v668_v21 = vadd.f32 %v667_v19, %v7410_v34  ;;  %v877_v22 = vadd.f32 %v876_v20, %v7412_v35 }
 0x1af   : > { %5698 = vst [vmem:[%s7428_s14 + $0x888] sm:$0xff] %v5186_v18 }
 0x1b0   : > { %v4449_v23 = vmax.f32 %v668_v21, 0.0  ;;  %v4450_v24 = vmax.f32 %v877_v22, 0.0  ;;  %v1085_v25 = vpop.f32.mrf.mxu2  ;;  %v1294_v26 = vpop.f32.mrf.mxu3  ;;  %6057 = vmatmul.msk.f32.gmra.mxu0 %vm319_vm1, %v227_v15  ;;  %6122 = vmatmul.msk.f32.gmra.mxu1 %vm319_vm1, %v227_v15  ;;  %v231_v15 = vld [vmem:[%s7307_s28 + $0x1b8] sm:$0xff] }
 0x1b1   : > { %v1086_v27 = vadd.f32 %v1085_v25, %v7416_v38  ;;  %v1295_v28 = vadd.f32 %v1294_v26, %v7418_v39 }
 0x1b2   : > { %v5193_v29 = vpack.c.bf16 %v4450_v24, %v4449_v23 }
 0x1b3   : > { %v4451_v31 = vmax.f32 %v1086_v27, 0.0  ;;  %v4452_v32 = vmax.f32 %v1295_v28, 0.0 }
 0x1b4   : > { %5705 = vst [vmem:[%s7428_s14 + $0x8c0] sm:$0xff] %v5193_v29 }
 0x1b5   : > { %v5194_v33 = vpack.c.bf16 %v4452_v32, %v4451_v31  ;;  %6188 = vmatmul.msk.f32.gmra.mxu2 %vm319_vm1, %v228_v30  ;;  %6253 = vmatmul.msk.f32.gmra.mxu3 %vm319_vm1, %v228_v30  ;;  %v670_v36 = vpop.f32.mrf.mxu0  ;;  %v879_v37 = vpop.f32.mrf.mxu1 }
 0x1b6   : > { %v671_v40 = vadd.f32 %v670_v36, %v7410_v34  ;;  %v880_v41 = vadd.f32 %v879_v37, %v7412_v35 }
 0x1b7   : > { %5706 = vst [vmem:[%s7428_s14 + $0x8c8] sm:$0xff] %v5194_v33 }
 0x1b8   : > { %v4465_v42 = vmax.f32 %v671_v40, 0.0  ;;  %v4466_v43 = vmax.f32 %v880_v41, 0.0  ;;  %v1088_v44 = vpop.f32.mrf.mxu2  ;;  %v1297_v45 = vpop.f32.mrf.mxu3  ;;  %6058 = vmatmul.msk.f32.gmra.mxu0 %vm319_vm1, %v228_v30  ;;  %6123 = vmatmul.msk.f32.gmra.mxu1 %vm319_vm1, %v228_v30  ;;  %v232_v30 = vld [vmem:[%s7307_s28 + $0x1c0] sm:$0xff] }
 0x1b9   : > { %v1089_v46 = vadd.f32 %v1088_v44, %v7416_v38  ;;  %v1298_v47 = vadd.f32 %v1297_v45, %v7418_v39 }
 0x1ba   : > { %v5201_v48 = vpack.c.bf16 %v4466_v43, %v4465_v42 }
 0x1bb   : > { %v4467_v50 = vmax.f32 %v1089_v46, 0.0  ;;  %v4468_v51 = vmax.f32 %v1298_v47, 0.0 }
 0x1bc   : > { %5713 = vst [vmem:[%s7428_s14 + $0x900] sm:$0xff] %v5201_v48 }
 0x1bd   : > { %v5202_v52 = vpack.c.bf16 %v4468_v51, %v4467_v50  ;;  %6189 = vmatmul.msk.f32.gmra.mxu2 %vm319_vm1, %v229_v49  ;;  %6254 = vmatmul.msk.f32.gmra.mxu3 %vm319_vm1, %v229_v49  ;;  %v673_v53 = vpop.f32.mrf.mxu0  ;;  %v882_v54 = vpop.f32.mrf.mxu1 }
 0x1be   : > { %v674_v55 = vadd.f32 %v673_v53, %v7410_v34  ;;  %v883_v56 = vadd.f32 %v882_v54, %v7412_v35 }
 0x1bf   : > { %5714 = vst [vmem:[%s7428_s14 + $0x908] sm:$0xff] %v5202_v52 }
 0x1c0   : > { %v4481_v57 = vmax.f32 %v674_v55, 0.0  ;;  %v4482_v58 = vmax.f32 %v883_v56, 0.0  ;;  %v1091_v59 = vpop.f32.mrf.mxu2  ;;  %v1300_v60 = vpop.f32.mrf.mxu3  ;;  %6059 = vmatmul.msk.f32.gmra.mxu0 %vm319_vm1, %v229_v49  ;;  %6124 = vmatmul.msk.f32.gmra.mxu1 %vm319_vm1, %v229_v49  ;;  %v233_v49 = vld [vmem:[%s7307_s28 + $0x1c8] sm:$0xff] }
 0x1c1   : > { %v1092_v61 = vadd.f32 %v1091_v59, %v7416_v38  ;;  %v1301_v62 = vadd.f32 %v1300_v60, %v7418_v39 }
 0x1c2   : > { %v5209_v63 = vpack.c.bf16 %v4482_v58, %v4481_v57 }
 0x1c3   : > { %v4483_v1 = vmax.f32 %v1092_v61, 0.0  ;;  %v4484_v2 = vmax.f32 %v1301_v62, 0.0 }
 0x1c4   : > { %5721 = vst [vmem:[%s7428_s14 + $0x940] sm:$0xff] %v5209_v63 }
 0x1c5   : > { %v5210_v3 = vpack.c.bf16 %v4484_v2, %v4483_v1  ;;  %6190 = vmatmul.msk.f32.gmra.mxu2 %vm319_vm1, %v230_v0  ;;  %6255 = vmatmul.msk.f32.gmra.mxu3 %vm319_vm1, %v230_v0  ;;  %v676_v4 = vpop.f32.mrf.mxu0  ;;  %v885_v5 = vpop.f32.mrf.mxu1 }
 0x1c6   : > { %v677_v6 = vadd.f32 %v676_v4, %v7410_v34  ;;  %v886_v7 = vadd.f32 %v885_v5, %v7412_v35 }
 0x1c7   : > { %5722 = vst [vmem:[%s7428_s14 + $0x948] sm:$0xff] %v5210_v3 }
 0x1c8   : > { %v4497_v8 = vmax.f32 %v677_v6, 0.0  ;;  %v4498_v9 = vmax.f32 %v886_v7, 0.0  ;;  %v1094_v10 = vpop.f32.mrf.mxu2  ;;  %v1303_v11 = vpop.f32.mrf.mxu3  ;;  %6060 = vmatmul.msk.f32.gmra.mxu0 %vm319_vm1, %v230_v0  ;;  %6125 = vmatmul.msk.f32.gmra.mxu1 %vm319_vm1, %v230_v0  ;;  %v234_v0 = vld [vmem:[%s7307_s28 + $0x1d0] sm:$0xff] }
 0x1c9   : > { %v1095_v12 = vadd.f32 %v1094_v10, %v7416_v38  ;;  %v1304_v13 = vadd.f32 %v1303_v11, %v7418_v39 }
 0x1ca   : > { %v5217_v14 = vpack.c.bf16 %v4498_v9, %v4497_v8 }
 0x1cb   : > { %v4499_v16 = vmax.f32 %v1095_v12, 0.0  ;;  %v4500_v17 = vmax.f32 %v1304_v13, 0.0 }
 0x1cc   : > { %5729 = vst [vmem:[%s7428_s14 + $0x980] sm:$0xff] %v5217_v14 }
 0x1cd   : > { %v5218_v18 = vpack.c.bf16 %v4500_v17, %v4499_v16  ;;  %6191 = vmatmul.msk.f32.gmra.mxu2 %vm319_vm1, %v231_v15  ;;  %6256 = vmatmul.msk.f32.gmra.mxu3 %vm319_vm1, %v231_v15  ;;  %v679_v19 = vpop.f32.mrf.mxu0  ;;  %v888_v20 = vpop.f32.mrf.mxu1 }
 0x1ce   : > { %v680_v21 = vadd.f32 %v679_v19, %v7410_v34  ;;  %v889_v22 = vadd.f32 %v888_v20, %v7412_v35 }
 0x1cf   : > { %5730 = vst [vmem:[%s7428_s14 + $0x988] sm:$0xff] %v5218_v18 }
 0x1d0   : > { %v4513_v23 = vmax.f32 %v680_v21, 0.0  ;;  %v4514_v24 = vmax.f32 %v889_v22, 0.0  ;;  %v1097_v25 = vpop.f32.mrf.mxu2  ;;  %v1306_v26 = vpop.f32.mrf.mxu3  ;;  %6061 = vmatmul.msk.f32.gmra.mxu0 %vm319_vm1, %v231_v15  ;;  %6126 = vmatmul.msk.f32.gmra.mxu1 %vm319_vm1, %v231_v15  ;;  %v235_v15 = vld [vmem:[%s7307_s28 + $0x1d8] sm:$0xff] }
 0x1d1   : > { %v1098_v27 = vadd.f32 %v1097_v25, %v7416_v38  ;;  %v1307_v28 = vadd.f32 %v1306_v26, %v7418_v39 }
 0x1d2   : > { %v5225_v29 = vpack.c.bf16 %v4514_v24, %v4513_v23 }
 0x1d3   : > { %v4515_v31 = vmax.f32 %v1098_v27, 0.0  ;;  %v4516_v32 = vmax.f32 %v1307_v28, 0.0 }
 0x1d4   : > { %5737 = vst [vmem:[%s7428_s14 + $0x9c0] sm:$0xff] %v5225_v29 }
 0x1d5   : > { %v5226_v33 = vpack.c.bf16 %v4516_v32, %v4515_v31  ;;  %6192 = vmatmul.msk.f32.gmra.mxu2 %vm319_vm1, %v232_v30  ;;  %6257 = vmatmul.msk.f32.gmra.mxu3 %vm319_vm1, %v232_v30  ;;  %v682_v36 = vpop.f32.mrf.mxu0  ;;  %v891_v37 = vpop.f32.mrf.mxu1 }
 0x1d6   : > { %v683_v40 = vadd.f32 %v682_v36, %v7410_v34  ;;  %v892_v41 = vadd.f32 %v891_v37, %v7412_v35 }
 0x1d7   : > { %5738 = vst [vmem:[%s7428_s14 + $0x9c8] sm:$0xff] %v5226_v33 }
 0x1d8   : > { %v4529_v42 = vmax.f32 %v683_v40, 0.0  ;;  %v4530_v43 = vmax.f32 %v892_v41, 0.0  ;;  %v1100_v44 = vpop.f32.mrf.mxu2  ;;  %v1309_v45 = vpop.f32.mrf.mxu3  ;;  %6062 = vmatmul.msk.f32.gmra.mxu0 %vm319_vm1, %v232_v30  ;;  %6127 = vmatmul.msk.f32.gmra.mxu1 %vm319_vm1, %v232_v30  ;;  %v236_v30 = vld [vmem:[%s7307_s28 + $0x1e0] sm:$0xff] }
 0x1d9   : > { %v1101_v46 = vadd.f32 %v1100_v44, %v7416_v38  ;;  %v1310_v47 = vadd.f32 %v1309_v45, %v7418_v39 }
 0x1da   : > { %v5233_v48 = vpack.c.bf16 %v4530_v43, %v4529_v42  ;;  %v313_v42 = vld.sshfl [vmem:[#allocation1 + $0x10] sm:$0xff pattern:$0x75316420] }
 0x1db   : > { %v4531_v50 = vmax.f32 %v1101_v46, 0.0  ;;  %v4532_v51 = vmax.f32 %v1310_v47, 0.0  ;;  %v314_v47 = vld.sshfl [vmem:[#allocation1 + $0x18] sm:$0xff pattern:$0x75316420]  ;;  %6655 = vmatpush.msk.msra.mxu2 %vm512_vm0, %v313_v42 }
 0x1dc   : > { %5745 = vst [vmem:[%s7428_s14 + $0xa00] sm:$0xff] %v5233_v48  ;;  %6720 = vmatpush.msk.msra.mxu3 %vm512_vm0, %v314_v47 }
 0x1dd   : > { %v5234_v52 = vpack.c.bf16 %v4532_v51, %v4531_v50  ;;  %6193 = vmatmul.msk.f32.gmra.mxu2 %vm319_vm1, %v233_v49  ;;  %6258 = vmatmul.msk.f32.gmra.mxu3 %vm319_vm1, %v233_v49  ;;  %v685_v53 = vpop.f32.mrf.mxu0  ;;  %v894_v54 = vpop.f32.mrf.mxu1  ;;  %v237_v51 = vld [vmem:[%s7307_s28 + $0x1e8] sm:$0xff] }
 0x1de   : > { %v686_v55 = vadd.f32 %v685_v53, %v7410_v34  ;;  %v895_v56 = vadd.f32 %v894_v54, %v7412_v35 }
 0x1df   : > { %5746 = vst [vmem:[%s7428_s14 + $0xa08] sm:$0xff] %v5234_v52 }
 0x1e0   : > { %v4545_v57 = vmax.f32 %v686_v55, 0.0  ;;  %v4546_v58 = vmax.f32 %v895_v56, 0.0  ;;  %v1103_v59 = vpop.f32.mrf.mxu2  ;;  %v1312_v60 = vpop.f32.mrf.mxu3  ;;  %6063 = vmatmul.msk.f32.gmra.mxu0 %vm319_vm1, %v233_v49  ;;  %6128 = vmatmul.msk.f32.gmra.mxu1 %vm319_vm1, %v233_v49 }
 0x1e1   : > { %v1104_v61 = vadd.f32 %v1103_v59, %v7416_v38  ;;  %v1313_v62 = vadd.f32 %v1312_v60, %v7418_v39  ;;  %v311_v59 = vld.sshfl [vmem:[#allocation1] sm:$0xff pattern:$0x75316420] }
 0x1e2   : > { %v5241_v63 = vpack.c.bf16 %v4546_v58, %v4545_v57  ;;  %6525 = vmatpush.msk.msra.mxu0 %vm512_vm0, %v311_v59 }
 0x1e3   : > { %v4547_v1 = vmax.f32 %v1104_v61, 0.0  ;;  %v4548_v2 = vmax.f32 %v1313_v62, 0.0 }
 0x1e4   : > { %5753 = vst [vmem:[%s7428_s14 + $0xa40] sm:$0xff] %v5241_v63 }
 0x1e5   : > { %v5242_v3 = vpack.c.bf16 %v4548_v2, %v4547_v1  ;;  %6194 = vmatmul.msk.f32.gmra.mxu2 %vm319_vm1, %v234_v0  ;;  %6259 = vmatmul.msk.f32.gmra.mxu3 %vm319_vm1, %v234_v0  ;;  %v688_v4 = vpop.f32.mrf.mxu0  ;;  %v897_v5 = vpop.f32.mrf.mxu1 }
 0x1e6   : > { %v689_v6 = vadd.f32 %v688_v4, %v7410_v34  ;;  %v898_v7 = vadd.f32 %v897_v5, %v7412_v35  ;;  %v238_v4 = vld [vmem:[%s7307_s28 + $0x1f0] sm:$0xff] }
 0x1e7   : > { %5754 = vst [vmem:[%s7428_s14 + $0xa48] sm:$0xff] %v5242_v3 }
 0x1e8   : > { %v4561_v8 = vmax.f32 %v689_v6, 0.0  ;;  %v4562_v9 = vmax.f32 %v898_v7, 0.0  ;;  %v1106_v10 = vpop.f32.mrf.mxu2  ;;  %v1315_v11 = vpop.f32.mrf.mxu3  ;;  %6064 = vmatmul.msk.f32.gmra.mxu0 %vm319_vm1, %v234_v0  ;;  %6129 = vmatmul.msk.f32.gmra.mxu1 %vm319_vm1, %v234_v0  ;;  %v312_v0 = vld.sshfl [vmem:[#allocation1 + $0x8] sm:$0xff pattern:$0x75316420] }
 0x1e9   : > { %v1107_v12 = vadd.f32 %v1106_v10, %v7416_v38  ;;  %v1316_v13 = vadd.f32 %v1315_v11, %v7418_v39  ;;  %6590 = vmatpush.msk.msra.mxu1 %vm512_vm0, %v312_v0 }
 0x1ea   : > { %v5249_v14 = vpack.c.bf16 %v4562_v9, %v4561_v8 }
 0x1eb   : > { %v4563_v16 = vmax.f32 %v1107_v12, 0.0  ;;  %v4564_v17 = vmax.f32 %v1316_v13, 0.0 }
 0x1ec   : > { %5761 = vst [vmem:[%s7428_s14 + $0xa80] sm:$0xff] %v5249_v14 }
 0x1ed   : > { %v5250_v18 = vpack.c.bf16 %v4564_v17, %v4563_v16  ;;  %6195 = vmatmul.msk.f32.gmra.mxu2 %vm319_vm1, %v235_v15  ;;  %6260 = vmatmul.msk.f32.gmra.mxu3 %vm319_vm1, %v235_v15  ;;  %v691_v19 = vpop.f32.mrf.mxu0  ;;  %v900_v20 = vpop.f32.mrf.mxu1 }
 0x1ee   : > { %v692_v21 = vadd.f32 %v691_v19, %v7410_v34  ;;  %v901_v22 = vadd.f32 %v900_v20, %v7412_v35  ;;  %v239_v19 = vld [vmem:[%s7307_s28 + $0x1f8] sm:$0xff] }
 0x1ef   : > { %5762 = vst [vmem:[%s7428_s14 + $0xa88] sm:$0xff] %v5250_v18 }
 0x1f0   : > { %v4577_v23 = vmax.f32 %v692_v21, 0.0  ;;  %v4578_v24 = vmax.f32 %v901_v22, 0.0  ;;  %v1109_v25 = vpop.f32.mrf.mxu2  ;;  %v1318_v26 = vpop.f32.mrf.mxu3  ;;  %6065 = vmatmul.msk.f32.gmra.mxu0 %vm319_vm1, %v235_v15  ;;  %6130 = vmatmul.msk.f32.gmra.mxu1 %vm319_vm1, %v235_v15 }
 0x1f1   : > { %v1110_v27 = vadd.f32 %v1109_v25, %v7416_v38  ;;  %v1319_v28 = vadd.f32 %v1318_v26, %v7418_v39 }
 0x1f2   : > { %v5257_v29 = vpack.c.bf16 %v4578_v24, %v4577_v23 }
 0x1f3   : > { %v4579_v31 = vmax.f32 %v1110_v27, 0.0  ;;  %v4580_v32 = vmax.f32 %v1319_v28, 0.0 }
 0x1f4   : > { %5769 = vst [vmem:[%s7428_s14 + $0xac0] sm:$0xff] %v5257_v29 }
 0x1f5   : > { %v5258_v33 = vpack.c.bf16 %v4580_v32, %v4579_v31  ;;  %6196 = vmatmul.msk.f32.gmra.mxu2 %vm319_vm1, %v236_v30  ;;  %6261 = vmatmul.msk.f32.gmra.mxu3 %vm319_vm1, %v236_v30  ;;  %v694_v36 = vpop.f32.mrf.mxu0  ;;  %v903_v37 = vpop.f32.mrf.mxu1 }
 0x1f6   : > { %v695_v40 = vadd.f32 %v694_v36, %v7410_v34  ;;  %v904_v41 = vadd.f32 %v903_v37, %v7412_v35 }
 0x1f7   : > { %5770 = vst [vmem:[%s7428_s14 + $0xac8] sm:$0xff] %v5258_v33 }
 0x1f8   : > { %v4593_v43 = vmax.f32 %v695_v40, 0.0  ;;  %v4594_v44 = vmax.f32 %v904_v41, 0.0  ;;  %v1112_v45 = vpop.f32.mrf.mxu2  ;;  %v1321_v46 = vpop.f32.mrf.mxu3  ;;  %6066 = vmatmul.msk.f32.gmra.mxu0 %vm319_vm1, %v236_v30  ;;  %6131 = vmatmul.msk.f32.gmra.mxu1 %vm319_vm1, %v236_v30  ;;  %v7056_v41 = vld [vmem:[%s7307_s28] sm:$0xff] }
 0x1f9   : > { %v1113_v48 = vadd.f32 %v1112_v45, %v7416_v38  ;;  %v1322_v49 = vadd.f32 %v1321_v46, %v7418_v39 }
 0x1fa   : > { %v5265_v50 = vpack.c.bf16 %v4594_v44, %v4593_v43 }
 0x1fb   : > { %v4595_v52 = vmax.f32 %v1113_v48, 0.0  ;;  %v4596_v53 = vmax.f32 %v1322_v49, 0.0 }
 0x1fc   : > { %5777 = vst [vmem:[%s7428_s14 + $0xb00] sm:$0xff] %v5265_v50 }
 0x1fd   : > { %v5266_v54 = vpack.c.bf16 %v4596_v53, %v4595_v52  ;;  %6197 = vmatmul.msk.f32.gmra.mxu2 %vm319_vm1, %v237_v51  ;;  %6262 = vmatmul.msk.f32.gmra.mxu3 %vm319_vm1, %v237_v51  ;;  %v697_v55 = vpop.f32.mrf.mxu0  ;;  %v906_v56 = vpop.f32.mrf.mxu1 }
 0x1fe   : > { %v698_v57 = vadd.f32 %v697_v55, %v7410_v34  ;;  %v907_v58 = vadd.f32 %v906_v56, %v7412_v35  ;;  %v7057_v56 = vld [vmem:[%s7307_s28 + $0x8] sm:$0xff] }
 0x1ff   : > { %5778 = vst [vmem:[%s7428_s14 + $0xb08] sm:$0xff] %v5266_v54 }
 0x200   : > { %v4609_v60 = vmax.f32 %v698_v57, 0.0  ;;  %v4610_v61 = vmax.f32 %v907_v58, 0.0  ;;  %v1115_v62 = vpop.f32.mrf.mxu2  ;;  %v1324_v63 = vpop.f32.mrf.mxu3  ;;  %6067 = vmatmul.msk.f32.gmra.mxu0 %vm319_vm1, %v237_v51  ;;  %6132 = vmatmul.msk.f32.gmra.mxu1 %vm319_vm1, %v237_v51 }
 0x201   : > { %v1116_v1 = vadd.f32 %v1115_v62, %v7416_v38  ;;  %v1325_v2 = vadd.f32 %v1324_v63, %v7418_v39 }
 0x202   : > { %v5273_v3 = vpack.c.bf16 %v4610_v61, %v4609_v60 }
 0x203   : > { %v4611_v5 = vmax.f32 %v1116_v1, 0.0  ;;  %v4612_v6 = vmax.f32 %v1325_v2, 0.0 }
 0x204   : > { %5785 = vst [vmem:[%s7428_s14 + $0xb40] sm:$0xff] %v5273_v3 }
 0x205   : > { %v5274_v7 = vpack.c.bf16 %v4612_v6, %v4611_v5  ;;  %6198 = vmatmul.msk.f32.gmra.mxu2 %vm319_vm1, %v238_v4  ;;  %6263 = vmatmul.msk.f32.gmra.mxu3 %vm319_vm1, %v238_v4  ;;  %v700_v8 = vpop.f32.mrf.mxu0  ;;  %v909_v9 = vpop.f32.mrf.mxu1 }
 0x206   : > { %v701_v10 = vadd.f32 %v700_v8, %v7410_v34  ;;  %v910_v11 = vadd.f32 %v909_v9, %v7412_v35 }
 0x207   : > { %5786 = vst [vmem:[%s7428_s14 + $0xb48] sm:$0xff] %v5274_v7  ;;  %v7058_v7 = vld [vmem:[%s7307_s28 + $0x10] sm:$0xff] }
 0x208   : > { %v4625_v12 = vmax.f32 %v701_v10, 0.0  ;;  %v4626_v13 = vmax.f32 %v910_v11, 0.0  ;;  %v1118_v14 = vpop.f32.mrf.mxu2  ;;  %v1327_v15 = vpop.f32.mrf.mxu3  ;;  %6068 = vmatmul.msk.f32.gmra.mxu0 %vm319_vm1, %v238_v4  ;;  %6133 = vmatmul.msk.f32.gmra.mxu1 %vm319_vm1, %v238_v4 }
 0x209   : > { %v1119_v16 = vadd.f32 %v1118_v14, %v7416_v38  ;;  %v1328_v17 = vadd.f32 %v1327_v15, %v7418_v39 }
 0x20a   : > { %v5281_v18 = vpack.c.bf16 %v4626_v13, %v4625_v12 }
 0x20b   : > { %v4627_v20 = vmax.f32 %v1119_v16, 0.0  ;;  %v4628_v21 = vmax.f32 %v1328_v17, 0.0 }
 0x20c   : > { %5793 = vst [vmem:[%s7428_s14 + $0xb80] sm:$0xff] %v5281_v18 }
 0x20d   : > { %v5282_v22 = vpack.c.bf16 %v4628_v21, %v4627_v20  ;;  %6199 = vmatmul.msk.f32.gmra.mxu2 %vm319_vm1, %v239_v19  ;;  %6264 = vmatmul.msk.f32.gmra.mxu3 %vm319_vm1, %v239_v19  ;;  %v703_v23 = vpop.f32.mrf.mxu0  ;;  %v912_v24 = vpop.f32.mrf.mxu1 }
 0x20e   : > { %v704_v25 = vadd.f32 %v703_v23, %v7410_v34  ;;  %v913_v26 = vadd.f32 %v912_v24, %v7412_v35 }
 0x20f   : > { %5794 = vst [vmem:[%s7428_s14 + $0xb88] sm:$0xff] %v5282_v22  ;;  %v7059_v22 = vld [vmem:[%s7307_s28 + $0x18] sm:$0xff] }
 0x210   : > { %v4641_v27 = vmax.f32 %v704_v25, 0.0  ;;  %v4642_v28 = vmax.f32 %v913_v26, 0.0  ;;  %v1121_v29 = vpop.f32.mrf.mxu2  ;;  %v1330_v30 = vpop.f32.mrf.mxu3  ;;  %6069 = vmatmul.msk.f32.gmra.mxu0 %vm319_vm1, %v239_v19  ;;  %6134 = vmatmul.msk.f32.gmra.mxu1 %vm319_vm1, %v239_v19 }
 0x211   : > { %v1122_v31 = vadd.f32 %v1121_v29, %v7416_v38  ;;  %v1331_v32 = vadd.f32 %v1330_v30, %v7418_v39 }
 0x212   : > { %v5289_v33 = vpack.c.bf16 %v4642_v28, %v4641_v27 }
 0x213   : > { %v4643_v36 = vmax.f32 %v1122_v31, 0.0  ;;  %v4644_v37 = vmax.f32 %v1331_v32, 0.0 }
 0x214   : > { %5801 = vst [vmem:[%s7428_s14 + $0xbc0] sm:$0xff] %v5289_v33 }
 0x215   : > { %v5290_v40 = vpack.c.bf16 %v4644_v37, %v4643_v36  ;;  %6396 = vmatmul.msk.f32.vlgmr.msrb.gmra.mxu2 %vm319_vm1, %v7056_v41  ;;  %6461 = vmatmul.msk.f32.vlgmr.msrb.gmra.mxu3 %vm319_vm1, %v7056_v41  ;;  %v706_v42 = vpop.f32.mrf.mxu0  ;;  %v915_v43 = vpop.f32.mrf.mxu1 }
 0x216   : > { %v707_v44 = vadd.f32 %v706_v42, %v7410_v34  ;;  %v916_v45 = vadd.f32 %v915_v43, %v7412_v35 }
 0x217   : > { %5802 = vst [vmem:[%s7428_s14 + $0xbc8] sm:$0xff] %v5290_v40 }
 0x218   : > { %v4657_v46 = vmax.f32 %v707_v44, 0.0  ;;  %v4658_v47 = vmax.f32 %v916_v45, 0.0  ;;  %v1124_v48 = vpop.f32.mrf.mxu2  ;;  %v1333_v49 = vpop.f32.mrf.mxu3  ;;  %6266 = vmatmul.msk.f32.vlgmr.msrb.gmra.mxu0 %vm319_vm1, %v7056_v41  ;;  %6331 = vmatmul.msk.f32.vlgmr.msrb.gmra.mxu1 %vm319_vm1, %v7056_v41  ;;  %v7060_v41 = vld [vmem:[%s7307_s28 + $0x20] sm:$0xff] }
 0x219   : > { %v1125_v50 = vadd.f32 %v1124_v48, %v7416_v38  ;;  %v1334_v51 = vadd.f32 %v1333_v49, %v7418_v39 }
 0x21a   : > { %v5297_v52 = vpack.c.bf16 %v4658_v47, %v4657_v46 }
 0x21b   : > { %v4659_v53 = vmax.f32 %v1125_v50, 0.0  ;;  %v4660_v54 = vmax.f32 %v1334_v51, 0.0 }
 0x21c   : > { %5809 = vst [vmem:[%s7428_s14 + $0xc00] sm:$0xff] %v5297_v52 }
 0x21d   : > { %v5298_v55 = vpack.c.bf16 %v4660_v54, %v4659_v53  ;;  %6397 = vmatmul.msk.f32.gmra.mxu2 %vm319_vm1, %v7057_v56  ;;  %6462 = vmatmul.msk.f32.gmra.mxu3 %vm319_vm1, %v7057_v56  ;;  %v709_v57 = vpop.f32.mrf.mxu0  ;;  %v918_v58 = vpop.f32.mrf.mxu1 }
 0x21e   : > { %v710_v59 = vadd.f32 %v709_v57, %v7410_v34  ;;  %v919_v60 = vadd.f32 %v918_v58, %v7412_v35 }
 0x21f   : > { %5810 = vst [vmem:[%s7428_s14 + $0xc08] sm:$0xff] %v5298_v55 }
 0x220   : > { %v4673_v61 = vmax.f32 %v710_v59, 0.0  ;;  %v4674_v62 = vmax.f32 %v919_v60, 0.0  ;;  %v1127_v63 = vpop.f32.mrf.mxu2  ;;  %v1336_v0 = vpop.f32.mrf.mxu3  ;;  %6267 = vmatmul.msk.f32.gmra.mxu0 %vm319_vm1, %v7057_v56  ;;  %6332 = vmatmul.msk.f32.gmra.mxu1 %vm319_vm1, %v7057_v56  ;;  %v7061_v56 = vld [vmem:[%s7307_s28 + $0x28] sm:$0xff] }
 0x221   : > { %v1128_v1 = vadd.f32 %v1127_v63, %v7416_v38  ;;  %v1337_v2 = vadd.f32 %v1336_v0, %v7418_v39 }
 0x222   : > { %v5305_v3 = vpack.c.bf16 %v4674_v62, %v4673_v61 }
 0x223   : > { %v4675_v4 = vmax.f32 %v1128_v1, 0.0  ;;  %v4676_v5 = vmax.f32 %v1337_v2, 0.0 }
 0x224   : > { %5817 = vst [vmem:[%s7428_s14 + $0xc40] sm:$0xff] %v5305_v3 }
 0x225   : > { %v5306_v6 = vpack.c.bf16 %v4676_v5, %v4675_v4  ;;  %6398 = vmatmul.msk.f32.gmra.mxu2 %vm319_vm1, %v7058_v7  ;;  %6463 = vmatmul.msk.f32.gmra.mxu3 %vm319_vm1, %v7058_v7  ;;  %v712_v8 = vpop.f32.mrf.mxu0  ;;  %v921_v9 = vpop.f32.mrf.mxu1 }
 0x226   : > { %v713_v10 = vadd.f32 %v712_v8, %v7410_v34  ;;  %v922_v11 = vadd.f32 %v921_v9, %v7412_v35 }
 0x227   : > { %5818 = vst [vmem:[%s7428_s14 + $0xc48] sm:$0xff] %v5306_v6 }
 0x228   : > { %v4689_v12 = vmax.f32 %v713_v10, 0.0  ;;  %v4690_v13 = vmax.f32 %v922_v11, 0.0  ;;  %v1130_v14 = vpop.f32.mrf.mxu2  ;;  %v1339_v15 = vpop.f32.mrf.mxu3  ;;  %6268 = vmatmul.msk.f32.gmra.mxu0 %vm319_vm1, %v7058_v7  ;;  %6333 = vmatmul.msk.f32.gmra.mxu1 %vm319_vm1, %v7058_v7  ;;  %v7062_v7 = vld [vmem:[%s7307_s28 + $0x30] sm:$0xff] }
 0x229   : > { %v1131_v16 = vadd.f32 %v1130_v14, %v7416_v38  ;;  %v1340_v17 = vadd.f32 %v1339_v15, %v7418_v39 }
 0x22a   : > { %v5313_v18 = vpack.c.bf16 %v4690_v13, %v4689_v12 }
 0x22b   : > { %v4691_v19 = vmax.f32 %v1131_v16, 0.0  ;;  %v4692_v20 = vmax.f32 %v1340_v17, 0.0 }
 0x22c   : > { %5825 = vst [vmem:[%s7428_s14 + $0xc80] sm:$0xff] %v5313_v18 }
 0x22d   : > { %v5314_v21 = vpack.c.bf16 %v4692_v20, %v4691_v19  ;;  %6399 = vmatmul.msk.f32.gmra.mxu2 %vm319_vm1, %v7059_v22  ;;  %6464 = vmatmul.msk.f32.gmra.mxu3 %vm319_vm1, %v7059_v22  ;;  %v715_v23 = vpop.f32.mrf.mxu0  ;;  %v924_v24 = vpop.f32.mrf.mxu1 }
 0x22e   : > { %v716_v25 = vadd.f32 %v715_v23, %v7410_v34  ;;  %v925_v26 = vadd.f32 %v924_v24, %v7412_v35 }
 0x22f   : > { %5826 = vst [vmem:[%s7428_s14 + $0xc88] sm:$0xff] %v5314_v21 }
 0x230   : > { %v4705_v27 = vmax.f32 %v716_v25, 0.0  ;;  %v4706_v28 = vmax.f32 %v925_v26, 0.0  ;;  %v1133_v29 = vpop.f32.mrf.mxu2  ;;  %v1342_v30 = vpop.f32.mrf.mxu3  ;;  %6269 = vmatmul.msk.f32.gmra.mxu0 %vm319_vm1, %v7059_v22  ;;  %6334 = vmatmul.msk.f32.gmra.mxu1 %vm319_vm1, %v7059_v22  ;;  %v7063_v22 = vld [vmem:[%s7307_s28 + $0x38] sm:$0xff] }
 0x231   : > { %v1134_v31 = vadd.f32 %v1133_v29, %v7416_v38  ;;  %v1343_v32 = vadd.f32 %v1342_v30, %v7418_v39 }
 0x232   : > { %v5321_v33 = vpack.c.bf16 %v4706_v28, %v4705_v27 }
 0x233   : > { %v4707_v36 = vmax.f32 %v1134_v31, 0.0  ;;  %v4708_v37 = vmax.f32 %v1343_v32, 0.0 }
 0x234   : > { %5833 = vst [vmem:[%s7428_s14 + $0xcc0] sm:$0xff] %v5321_v33 }
 0x235   : > { %v5322_v40 = vpack.c.bf16 %v4708_v37, %v4707_v36  ;;  %6400 = vmatmul.msk.f32.gmra.mxu2 %vm319_vm1, %v7060_v41  ;;  %6465 = vmatmul.msk.f32.gmra.mxu3 %vm319_vm1, %v7060_v41  ;;  %v718_v42 = vpop.f32.mrf.mxu0  ;;  %v927_v43 = vpop.f32.mrf.mxu1 }
 0x236   : > { %v719_v44 = vadd.f32 %v718_v42, %v7410_v34  ;;  %v928_v45 = vadd.f32 %v927_v43, %v7412_v35 }
 0x237   : > { %5834 = vst [vmem:[%s7428_s14 + $0xcc8] sm:$0xff] %v5322_v40 }
 0x238   : > { %v4721_v46 = vmax.f32 %v719_v44, 0.0  ;;  %v4722_v47 = vmax.f32 %v928_v45, 0.0  ;;  %v1136_v48 = vpop.f32.mrf.mxu2  ;;  %v1345_v49 = vpop.f32.mrf.mxu3  ;;  %6270 = vmatmul.msk.f32.gmra.mxu0 %vm319_vm1, %v7060_v41  ;;  %6335 = vmatmul.msk.f32.gmra.mxu1 %vm319_vm1, %v7060_v41  ;;  %v7064_v41 = vld [vmem:[%s7307_s28 + $0x40] sm:$0xff] }
 0x239   : > { %v1137_v50 = vadd.f32 %v1136_v48, %v7416_v38  ;;  %v1346_v51 = vadd.f32 %v1345_v49, %v7418_v39 }
 0x23a   : > { %v5329_v52 = vpack.c.bf16 %v4722_v47, %v4721_v46 }
 0x23b   : > { %v4723_v53 = vmax.f32 %v1137_v50, 0.0  ;;  %v4724_v54 = vmax.f32 %v1346_v51, 0.0 }
 0x23c   : > { %5841 = vst [vmem:[%s7428_s14 + $0xd00] sm:$0xff] %v5329_v52 }
 0x23d   : > { %v5330_v55 = vpack.c.bf16 %v4724_v54, %v4723_v53  ;;  %6401 = vmatmul.msk.f32.gmra.mxu2 %vm319_vm1, %v7061_v56  ;;  %6466 = vmatmul.msk.f32.gmra.mxu3 %vm319_vm1, %v7061_v56  ;;  %v721_v57 = vpop.f32.mrf.mxu0  ;;  %v930_v58 = vpop.f32.mrf.mxu1 }
 0x23e   : > { %v722_v59 = vadd.f32 %v721_v57, %v7410_v34  ;;  %v931_v60 = vadd.f32 %v930_v58, %v7412_v35 }
 0x23f   : > { %5842 = vst [vmem:[%s7428_s14 + $0xd08] sm:$0xff] %v5330_v55 }
 0x240   : > { %v4737_v61 = vmax.f32 %v722_v59, 0.0  ;;  %v4738_v62 = vmax.f32 %v931_v60, 0.0  ;;  %v1139_v63 = vpop.f32.mrf.mxu2  ;;  %v1348_v0 = vpop.f32.mrf.mxu3  ;;  %6271 = vmatmul.msk.f32.gmra.mxu0 %vm319_vm1, %v7061_v56  ;;  %6336 = vmatmul.msk.f32.gmra.mxu1 %vm319_vm1, %v7061_v56  ;;  %v7065_v56 = vld [vmem:[%s7307_s28 + $0x48] sm:$0xff] }
 0x241   : > { %v1140_v1 = vadd.f32 %v1139_v63, %v7416_v38  ;;  %v1349_v2 = vadd.f32 %v1348_v0, %v7418_v39 }
 0x242   : > { %v5337_v3 = vpack.c.bf16 %v4738_v62, %v4737_v61 }
 0x243   : > { %v4739_v4 = vmax.f32 %v1140_v1, 0.0  ;;  %v4740_v5 = vmax.f32 %v1349_v2, 0.0 }
 0x244   : > { %5849 = vst [vmem:[%s7428_s14 + $0xd40] sm:$0xff] %v5337_v3 }
 0x245   : > { %v5338_v6 = vpack.c.bf16 %v4740_v5, %v4739_v4  ;;  %6402 = vmatmul.msk.f32.gmra.mxu2 %vm319_vm1, %v7062_v7  ;;  %6467 = vmatmul.msk.f32.gmra.mxu3 %vm319_vm1, %v7062_v7  ;;  %v724_v8 = vpop.f32.mrf.mxu0  ;;  %v933_v9 = vpop.f32.mrf.mxu1 }
 0x246   : > { %v725_v10 = vadd.f32 %v724_v8, %v7410_v34  ;;  %v934_v11 = vadd.f32 %v933_v9, %v7412_v35 }
 0x247   : > { %5850 = vst [vmem:[%s7428_s14 + $0xd48] sm:$0xff] %v5338_v6 }
 0x248   : > { %v4753_v12 = vmax.f32 %v725_v10, 0.0  ;;  %v4754_v13 = vmax.f32 %v934_v11, 0.0  ;;  %v1142_v14 = vpop.f32.mrf.mxu2  ;;  %v1351_v15 = vpop.f32.mrf.mxu3  ;;  %6272 = vmatmul.msk.f32.gmra.mxu0 %vm319_vm1, %v7062_v7  ;;  %6337 = vmatmul.msk.f32.gmra.mxu1 %vm319_vm1, %v7062_v7  ;;  %v7066_v7 = vld [vmem:[%s7307_s28 + $0x50] sm:$0xff] }
 0x249   : > { %v1143_v16 = vadd.f32 %v1142_v14, %v7416_v38  ;;  %v1352_v17 = vadd.f32 %v1351_v15, %v7418_v39 }
 0x24a   : > { %v5345_v18 = vpack.c.bf16 %v4754_v13, %v4753_v12 }
 0x24b   : > { %v4755_v19 = vmax.f32 %v1143_v16, 0.0  ;;  %v4756_v20 = vmax.f32 %v1352_v17, 0.0 }
 0x24c   : > { %5857 = vst [vmem:[%s7428_s14 + $0xd80] sm:$0xff] %v5345_v18 }
 0x24d   : > { %v5346_v21 = vpack.c.bf16 %v4756_v20, %v4755_v19  ;;  %6403 = vmatmul.msk.f32.gmra.mxu2 %vm319_vm1, %v7063_v22  ;;  %6468 = vmatmul.msk.f32.gmra.mxu3 %vm319_vm1, %v7063_v22  ;;  %v727_v23 = vpop.f32.mrf.mxu0  ;;  %v936_v24 = vpop.f32.mrf.mxu1 }
 0x24e   : > { %v728_v25 = vadd.f32 %v727_v23, %v7410_v34  ;;  %v937_v26 = vadd.f32 %v936_v24, %v7412_v35 }
 0x24f   : > { %5858 = vst [vmem:[%s7428_s14 + $0xd88] sm:$0xff] %v5346_v21 }
 0x250   : > { %v4769_v27 = vmax.f32 %v728_v25, 0.0  ;;  %v4770_v28 = vmax.f32 %v937_v26, 0.0  ;;  %v1145_v29 = vpop.f32.mrf.mxu2  ;;  %v1354_v30 = vpop.f32.mrf.mxu3  ;;  %6273 = vmatmul.msk.f32.gmra.mxu0 %vm319_vm1, %v7063_v22  ;;  %6338 = vmatmul.msk.f32.gmra.mxu1 %vm319_vm1, %v7063_v22  ;;  %v7067_v22 = vld [vmem:[%s7307_s28 + $0x58] sm:$0xff] }
 0x251   : > { %v1146_v31 = vadd.f32 %v1145_v29, %v7416_v38  ;;  %v1355_v32 = vadd.f32 %v1354_v30, %v7418_v39 }
 0x252   : > { %v5353_v33 = vpack.c.bf16 %v4770_v28, %v4769_v27 }
 0x253   : > { %v4771_v36 = vmax.f32 %v1146_v31, 0.0  ;;  %v4772_v37 = vmax.f32 %v1355_v32, 0.0 }
 0x254   : > { %5865 = vst [vmem:[%s7428_s14 + $0xdc0] sm:$0xff] %v5353_v33 }
 0x255   : > { %v5354_v40 = vpack.c.bf16 %v4772_v37, %v4771_v36  ;;  %6404 = vmatmul.msk.f32.gmra.mxu2 %vm319_vm1, %v7064_v41  ;;  %6469 = vmatmul.msk.f32.gmra.mxu3 %vm319_vm1, %v7064_v41  ;;  %v730_v42 = vpop.f32.mrf.mxu0  ;;  %v939_v43 = vpop.f32.mrf.mxu1 }
 0x256   : > { %v731_v44 = vadd.f32 %v730_v42, %v7410_v34  ;;  %v940_v45 = vadd.f32 %v939_v43, %v7412_v35 }
 0x257   : > { %5866 = vst [vmem:[%s7428_s14 + $0xdc8] sm:$0xff] %v5354_v40 }
 0x258   : > { %v4785_v46 = vmax.f32 %v731_v44, 0.0  ;;  %v4786_v47 = vmax.f32 %v940_v45, 0.0  ;;  %v1148_v48 = vpop.f32.mrf.mxu2  ;;  %v1357_v49 = vpop.f32.mrf.mxu3  ;;  %6274 = vmatmul.msk.f32.gmra.mxu0 %vm319_vm1, %v7064_v41  ;;  %6339 = vmatmul.msk.f32.gmra.mxu1 %vm319_vm1, %v7064_v41  ;;  %v7068_v41 = vld [vmem:[%s7307_s28 + $0x60] sm:$0xff] }
 0x259   : > { %v1149_v50 = vadd.f32 %v1148_v48, %v7416_v38  ;;  %v1358_v51 = vadd.f32 %v1357_v49, %v7418_v39 }
 0x25a   : > { %v5361_v52 = vpack.c.bf16 %v4786_v47, %v4785_v46 }
 0x25b   : > { %v4787_v53 = vmax.f32 %v1149_v50, 0.0  ;;  %v4788_v54 = vmax.f32 %v1358_v51, 0.0 }
 0x25c   : > { %5873 = vst [vmem:[%s7428_s14 + $0xe00] sm:$0xff] %v5361_v52 }
 0x25d   : > { %v5362_v55 = vpack.c.bf16 %v4788_v54, %v4787_v53  ;;  %6405 = vmatmul.msk.f32.gmra.mxu2 %vm319_vm1, %v7065_v56  ;;  %6470 = vmatmul.msk.f32.gmra.mxu3 %vm319_vm1, %v7065_v56  ;;  %v733_v57 = vpop.f32.mrf.mxu0  ;;  %v942_v58 = vpop.f32.mrf.mxu1 }
 0x25e   : > { %v734_v59 = vadd.f32 %v733_v57, %v7410_v34  ;;  %v943_v60 = vadd.f32 %v942_v58, %v7412_v35 }
 0x25f   : > { %5874 = vst [vmem:[%s7428_s14 + $0xe08] sm:$0xff] %v5362_v55 }
 0x260   : > { %v4801_v61 = vmax.f32 %v734_v59, 0.0  ;;  %v4802_v62 = vmax.f32 %v943_v60, 0.0  ;;  %v1151_v63 = vpop.f32.mrf.mxu2  ;;  %v1360_v0 = vpop.f32.mrf.mxu3  ;;  %6275 = vmatmul.msk.f32.gmra.mxu0 %vm319_vm1, %v7065_v56  ;;  %6340 = vmatmul.msk.f32.gmra.mxu1 %vm319_vm1, %v7065_v56  ;;  %v7069_v56 = vld [vmem:[%s7307_s28 + $0x68] sm:$0xff] }
 0x261   : > { %v1152_v1 = vadd.f32 %v1151_v63, %v7416_v38  ;;  %v1361_v2 = vadd.f32 %v1360_v0, %v7418_v39 }
 0x262   : > { %v5369_v3 = vpack.c.bf16 %v4802_v62, %v4801_v61 }
 0x263   : > { %v4803_v4 = vmax.f32 %v1152_v1, 0.0  ;;  %v4804_v5 = vmax.f32 %v1361_v2, 0.0 }
 0x264   : > { %5881 = vst [vmem:[%s7428_s14 + $0xe40] sm:$0xff] %v5369_v3 }
 0x265   : > { %v5370_v6 = vpack.c.bf16 %v4804_v5, %v4803_v4  ;;  %6406 = vmatmul.msk.f32.gmra.mxu2 %vm319_vm1, %v7066_v7  ;;  %6471 = vmatmul.msk.f32.gmra.mxu3 %vm319_vm1, %v7066_v7  ;;  %v736_v8 = vpop.f32.mrf.mxu0  ;;  %v945_v9 = vpop.f32.mrf.mxu1 }
 0x266   : > { %v737_v10 = vadd.f32 %v736_v8, %v7410_v34  ;;  %v946_v11 = vadd.f32 %v945_v9, %v7412_v35 }
 0x267   : > { %5882 = vst [vmem:[%s7428_s14 + $0xe48] sm:$0xff] %v5370_v6 }
 0x268   : > { %v4817_v12 = vmax.f32 %v737_v10, 0.0  ;;  %v4818_v13 = vmax.f32 %v946_v11, 0.0  ;;  %v1154_v14 = vpop.f32.mrf.mxu2  ;;  %v1363_v15 = vpop.f32.mrf.mxu3  ;;  %6276 = vmatmul.msk.f32.gmra.mxu0 %vm319_vm1, %v7066_v7  ;;  %6341 = vmatmul.msk.f32.gmra.mxu1 %vm319_vm1, %v7066_v7  ;;  %v7070_v7 = vld [vmem:[%s7307_s28 + $0x70] sm:$0xff] }
 0x269   : > { %v1155_v16 = vadd.f32 %v1154_v14, %v7416_v38  ;;  %v1364_v17 = vadd.f32 %v1363_v15, %v7418_v39 }
 0x26a   : > { %v5377_v18 = vpack.c.bf16 %v4818_v13, %v4817_v12 }
 0x26b   : > { %v4819_v19 = vmax.f32 %v1155_v16, 0.0  ;;  %v4820_v20 = vmax.f32 %v1364_v17, 0.0 }
 0x26c   : > { %5889 = vst [vmem:[%s7428_s14 + $0xe80] sm:$0xff] %v5377_v18 }
 0x26d   : > { %v5378_v21 = vpack.c.bf16 %v4820_v20, %v4819_v19  ;;  %6407 = vmatmul.msk.f32.gmra.mxu2 %vm319_vm1, %v7067_v22  ;;  %6472 = vmatmul.msk.f32.gmra.mxu3 %vm319_vm1, %v7067_v22  ;;  %v739_v23 = vpop.f32.mrf.mxu0  ;;  %v948_v24 = vpop.f32.mrf.mxu1 }
 0x26e   : > { %v740_v25 = vadd.f32 %v739_v23, %v7410_v34  ;;  %v949_v26 = vadd.f32 %v948_v24, %v7412_v35 }
 0x26f   : > { %5890 = vst [vmem:[%s7428_s14 + $0xe88] sm:$0xff] %v5378_v21 }
 0x270   : > { %v4833_v27 = vmax.f32 %v740_v25, 0.0  ;;  %v4834_v28 = vmax.f32 %v949_v26, 0.0  ;;  %v1157_v29 = vpop.f32.mrf.mxu2  ;;  %v1366_v30 = vpop.f32.mrf.mxu3  ;;  %6277 = vmatmul.msk.f32.gmra.mxu0 %vm319_vm1, %v7067_v22  ;;  %6342 = vmatmul.msk.f32.gmra.mxu1 %vm319_vm1, %v7067_v22  ;;  %v7071_v22 = vld [vmem:[%s7307_s28 + $0x78] sm:$0xff] }
 0x271   : > { %v1158_v31 = vadd.f32 %v1157_v29, %v7416_v38  ;;  %v1367_v32 = vadd.f32 %v1366_v30, %v7418_v39 }
 0x272   : > { %v5385_v33 = vpack.c.bf16 %v4834_v28, %v4833_v27 }
 0x273   : > { %v4835_v36 = vmax.f32 %v1158_v31, 0.0  ;;  %v4836_v37 = vmax.f32 %v1367_v32, 0.0 }
 0x274   : > { %5897 = vst [vmem:[%s7428_s14 + $0xec0] sm:$0xff] %v5385_v33 }
 0x275   : > { %v5386_v40 = vpack.c.bf16 %v4836_v37, %v4835_v36  ;;  %6408 = vmatmul.msk.f32.gmra.mxu2 %vm319_vm1, %v7068_v41  ;;  %6473 = vmatmul.msk.f32.gmra.mxu3 %vm319_vm1, %v7068_v41  ;;  %v742_v42 = vpop.f32.mrf.mxu0  ;;  %v951_v43 = vpop.f32.mrf.mxu1 }
 0x276   : > { %v743_v44 = vadd.f32 %v742_v42, %v7410_v34  ;;  %v952_v45 = vadd.f32 %v951_v43, %v7412_v35  ;;  %v7073_v42 = vld [vmem:[%s7307_s28 + $0x80] sm:$0xff] }
 0x277   : > { %5898 = vst [vmem:[%s7428_s14 + $0xec8] sm:$0xff] %v5386_v40 }
 0x278   : > { %v4849_v46 = vmax.f32 %v743_v44, 0.0  ;;  %v4850_v47 = vmax.f32 %v952_v45, 0.0  ;;  %v1160_v48 = vpop.f32.mrf.mxu2  ;;  %v1369_v49 = vpop.f32.mrf.mxu3  ;;  %6278 = vmatmul.msk.f32.gmra.mxu0 %vm319_vm1, %v7068_v41  ;;  %6343 = vmatmul.msk.f32.gmra.mxu1 %vm319_vm1, %v7068_v41 }
 0x279   : > { %v1161_v50 = vadd.f32 %v1160_v48, %v7416_v38  ;;  %v1370_v51 = vadd.f32 %v1369_v49, %v7418_v39 }
 0x27a   : > { %v5393_v52 = vpack.c.bf16 %v4850_v47, %v4849_v46 }
 0x27b   : > { %v4851_v53 = vmax.f32 %v1161_v50, 0.0  ;;  %v4852_v54 = vmax.f32 %v1370_v51, 0.0 }
 0x27c   : > { %5905 = vst [vmem:[%s7428_s14 + $0xf00] sm:$0xff] %v5393_v52 }
 0x27d   : > { %v5394_v55 = vpack.c.bf16 %v4852_v54, %v4851_v53  ;;  %6409 = vmatmul.msk.f32.gmra.mxu2 %vm319_vm1, %v7069_v56  ;;  %6474 = vmatmul.msk.f32.gmra.mxu3 %vm319_vm1, %v7069_v56  ;;  %v745_v57 = vpop.f32.mrf.mxu0  ;;  %v954_v58 = vpop.f32.mrf.mxu1 }
 0x27e   : > { %v746_v59 = vadd.f32 %v745_v57, %v7410_v34  ;;  %v955_v60 = vadd.f32 %v954_v58, %v7412_v35  ;;  %v7074_v57 = vld [vmem:[%s7307_s28 + $0x88] sm:$0xff] }
 0x27f   : > { %5906 = vst [vmem:[%s7428_s14 + $0xf08] sm:$0xff] %v5394_v55 }
 0x280   : > { %v4865_v61 = vmax.f32 %v746_v59, 0.0  ;;  %v4866_v62 = vmax.f32 %v955_v60, 0.0  ;;  %v1163_v63 = vpop.f32.mrf.mxu2  ;;  %v1372_v0 = vpop.f32.mrf.mxu3  ;;  %6279 = vmatmul.msk.f32.gmra.mxu0 %vm319_vm1, %v7069_v56  ;;  %6344 = vmatmul.msk.f32.gmra.mxu1 %vm319_vm1, %v7069_v56 }
 0x281   : > { %v1164_v1 = vadd.f32 %v1163_v63, %v7416_v38  ;;  %v1373_v2 = vadd.f32 %v1372_v0, %v7418_v39 }
 0x282   : > { %v5401_v3 = vpack.c.bf16 %v4866_v62, %v4865_v61 }
 0x283   : > { %v4867_v4 = vmax.f32 %v1164_v1, 0.0  ;;  %v4868_v5 = vmax.f32 %v1373_v2, 0.0 }
 0x284   : > { %5913 = vst [vmem:[%s7428_s14 + $0xf40] sm:$0xff] %v5401_v3 }
 0x285   : > { %v5402_v6 = vpack.c.bf16 %v4868_v5, %v4867_v4  ;;  %6410 = vmatmul.msk.f32.gmra.mxu2 %vm319_vm1, %v7070_v7  ;;  %6475 = vmatmul.msk.f32.gmra.mxu3 %vm319_vm1, %v7070_v7  ;;  %v748_v8 = vpop.f32.mrf.mxu0  ;;  %v957_v9 = vpop.f32.mrf.mxu1 }
 0x286   : > { %v749_v10 = vadd.f32 %v748_v8, %v7410_v34  ;;  %v958_v11 = vadd.f32 %v957_v9, %v7412_v35  ;;  %v7075_v8 = vld [vmem:[%s7307_s28 + $0x90] sm:$0xff] }
 0x287   : > { %5914 = vst [vmem:[%s7428_s14 + $0xf48] sm:$0xff] %v5402_v6 }
 0x288   : > { %v4881_v12 = vmax.f32 %v749_v10, 0.0  ;;  %v4882_v13 = vmax.f32 %v958_v11, 0.0  ;;  %v1166_v14 = vpop.f32.mrf.mxu2  ;;  %v1375_v15 = vpop.f32.mrf.mxu3  ;;  %6280 = vmatmul.msk.f32.gmra.mxu0 %vm319_vm1, %v7070_v7  ;;  %6345 = vmatmul.msk.f32.gmra.mxu1 %vm319_vm1, %v7070_v7 }
 0x289   : > { %v1167_v16 = vadd.f32 %v1166_v14, %v7416_v38  ;;  %v1376_v17 = vadd.f32 %v1375_v15, %v7418_v39 }
 0x28a   : > { %v5409_v18 = vpack.c.bf16 %v4882_v13, %v4881_v12 }
 0x28b   : > { %v4883_v19 = vmax.f32 %v1167_v16, 0.0  ;;  %v4884_v20 = vmax.f32 %v1376_v17, 0.0 }
 0x28c   : > { %5921 = vst [vmem:[%s7428_s14 + $0xf80] sm:$0xff] %v5409_v18 }
 0x28d   : > { %v5410_v21 = vpack.c.bf16 %v4884_v20, %v4883_v19  ;;  %6411 = vmatmul.msk.f32.gmra.mxu2 %vm319_vm1, %v7071_v22  ;;  %6476 = vmatmul.msk.f32.gmra.mxu3 %vm319_vm1, %v7071_v22  ;;  %v751_v23 = vpop.f32.mrf.mxu0  ;;  %v960_v24 = vpop.f32.mrf.mxu1 }
 0x28e   : > { %v752_v25 = vadd.f32 %v751_v23, %v7410_v34  ;;  %v961_v26 = vadd.f32 %v960_v24, %v7412_v35  ;;  %v7072_v34 = vld [vmem:[%s10205_s2] sm:$0xff]  ;;  %v7076_v23 = vld [vmem:[%s7307_s28 + $0x98] sm:$0xff] }
 0x28f   : > { %5922 = vst [vmem:[%s7428_s14 + $0xf88] sm:$0xff] %v5410_v21  ;;  %v8132_v35 = vperm.slane %v7072_v34, 4  ;;  %v8134_v36 = vperm.slane %v7072_v34, 5  ;;  %v8140_v43 = vperm.slane %v7072_v34, 6  ;;  %v8142_v44 = vperm.slane %v7072_v34, 7 }
 0x290   : > { %v4897_v27 = vmax.f32 %v752_v25, 0.0  ;;  %v4898_v28 = vmax.f32 %v961_v26, 0.0  ;;  %v1169_v29 = vpop.f32.mrf.mxu2  ;;  %v1378_v30 = vpop.f32.mrf.mxu3  ;;  %6281 = vmatmul.msk.f32.gmra.mxu0 %vm319_vm1, %v7071_v22  ;;  %6346 = vmatmul.msk.f32.gmra.mxu1 %vm319_vm1, %v7071_v22 }
 0x291   : > { %v1170_v31 = vadd.f32 %v1169_v29, %v7416_v38  ;;  %v1379_v32 = vadd.f32 %v1378_v30, %v7418_v39 }
 0x292   : > { %v5417_v33 = vpack.c.bf16 %v4898_v28, %v4897_v27 }
 0x293   : > { %v4899_v37 = vmax.f32 %v1170_v31, 0.0  ;;  %v4900_v40 = vmax.f32 %v1379_v32, 0.0 }
 0x294   : > { %5929 = vst [vmem:[%s7428_s14 + $0xfc0] sm:$0xff] %v5417_v33 }
 0x295   : > { %v5418_v41 = vpack.c.bf16 %v4900_v40, %v4899_v37  ;;  %6412 = vmatmul.msk.f32.gmra.mxu2 %vm319_vm1, %v7073_v42  ;;  %6477 = vmatmul.msk.f32.gmra.mxu3 %vm319_vm1, %v7073_v42  ;;  %v1398_v38 = vpop.f32.mrf.mxu0  ;;  %v1607_v39 = vpop.f32.mrf.mxu1 }
 0x296   : > { %v1399_v45 = vadd.f32 %v1398_v38, %v8132_v35  ;;  %v1608_v46 = vadd.f32 %v1607_v39, %v8134_v36 }
 0x297   : > { %5930 = vst [vmem:[%s7428_s14 + $0xfc8] sm:$0xff] %v5418_v41 }
 0x298   : > { %v3893_v47 = vmax.f32 %v1399_v45, 0.0  ;;  %v3894_v48 = vmax.f32 %v1608_v46, 0.0  ;;  %v1816_v49 = vpop.f32.mrf.mxu2  ;;  %v2025_v50 = vpop.f32.mrf.mxu3  ;;  %6282 = vmatmul.msk.f32.gmra.mxu0 %vm319_vm1, %v7073_v42  ;;  %6347 = vmatmul.msk.f32.gmra.mxu1 %vm319_vm1, %v7073_v42  ;;  %v7077_v42 = vld [vmem:[%s7307_s28 + $0xa0] sm:$0xff] }
 0x299   : > { %v1817_v51 = vadd.f32 %v1816_v49, %v8140_v43  ;;  %v2026_v52 = vadd.f32 %v2025_v50, %v8142_v44 }
 0x29a   : > { %v4915_v53 = vpack.c.bf16 %v3894_v48, %v3893_v47 }
 0x29b   : > { %v3895_v54 = vmax.f32 %v1817_v51, 0.0  ;;  %v3896_v55 = vmax.f32 %v2026_v52, 0.0 }
 0x29c   : > { %5427 = vst [vmem:[%s7428_s14 + $0x10] sm:$0xff] %v4915_v53 }
 0x29d   : > { %v4916_v56 = vpack.c.bf16 %v3896_v55, %v3895_v54  ;;  %6413 = vmatmul.msk.f32.gmra.mxu2 %vm319_vm1, %v7074_v57  ;;  %6478 = vmatmul.msk.f32.gmra.mxu3 %vm319_vm1, %v7074_v57  ;;  %v1401_v58 = vpop.f32.mrf.mxu0  ;;  %v1610_v59 = vpop.f32.mrf.mxu1 }
 0x29e   : > { %v1402_v60 = vadd.f32 %v1401_v58, %v8132_v35  ;;  %v1611_v61 = vadd.f32 %v1610_v59, %v8134_v36 }
 0x29f   : > { %5428 = vst [vmem:[%s7428_s14 + $0x18] sm:$0xff] %v4916_v56 }
 0x2a0   : > { %v3909_v62 = vmax.f32 %v1402_v60, 0.0  ;;  %v3910_v63 = vmax.f32 %v1611_v61, 0.0  ;;  %v1819_v0 = vpop.f32.mrf.mxu2  ;;  %v2028_v1 = vpop.f32.mrf.mxu3  ;;  %6283 = vmatmul.msk.f32.gmra.mxu0 %vm319_vm1, %v7074_v57  ;;  %6348 = vmatmul.msk.f32.gmra.mxu1 %vm319_vm1, %v7074_v57  ;;  %v7078_v57 = vld [vmem:[%s7307_s28 + $0xa8] sm:$0xff] }
 0x2a1   : > { %v1820_v2 = vadd.f32 %v1819_v0, %v8140_v43  ;;  %v2029_v3 = vadd.f32 %v2028_v1, %v8142_v44 }
 0x2a2   : > { %v4923_v4 = vpack.c.bf16 %v3910_v63, %v3909_v62 }
 0x2a3   : > { %v3911_v5 = vmax.f32 %v1820_v2, 0.0  ;;  %v3912_v6 = vmax.f32 %v2029_v3, 0.0 }
 0x2a4   : > { %5435 = vst [vmem:[%s7428_s14 + $0x50] sm:$0xff] %v4923_v4 }
 0x2a5   : > { %v4924_v7 = vpack.c.bf16 %v3912_v6, %v3911_v5  ;;  %6414 = vmatmul.msk.f32.gmra.mxu2 %vm319_vm1, %v7075_v8  ;;  %6479 = vmatmul.msk.f32.gmra.mxu3 %vm319_vm1, %v7075_v8  ;;  %v1404_v9 = vpop.f32.mrf.mxu0  ;;  %v1613_v10 = vpop.f32.mrf.mxu1 }
 0x2a6   : > { %v1405_v11 = vadd.f32 %v1404_v9, %v8132_v35  ;;  %v1614_v12 = vadd.f32 %v1613_v10, %v8134_v36 }
 0x2a7   : > { %5436 = vst [vmem:[%s7428_s14 + $0x58] sm:$0xff] %v4924_v7 }
 0x2a8   : > { %v3925_v13 = vmax.f32 %v1405_v11, 0.0  ;;  %v3926_v14 = vmax.f32 %v1614_v12, 0.0  ;;  %v1822_v15 = vpop.f32.mrf.mxu2  ;;  %v2031_v16 = vpop.f32.mrf.mxu3  ;;  %6284 = vmatmul.msk.f32.gmra.mxu0 %vm319_vm1, %v7075_v8  ;;  %6349 = vmatmul.msk.f32.gmra.mxu1 %vm319_vm1, %v7075_v8  ;;  %v7079_v8 = vld [vmem:[%s7307_s28 + $0xb0] sm:$0xff] }
 0x2a9   : > { %v1823_v17 = vadd.f32 %v1822_v15, %v8140_v43  ;;  %v2032_v18 = vadd.f32 %v2031_v16, %v8142_v44 }
 0x2aa   : > { %v4931_v19 = vpack.c.bf16 %v3926_v14, %v3925_v13 }
 0x2ab   : > { %v3927_v20 = vmax.f32 %v1823_v17, 0.0  ;;  %v3928_v21 = vmax.f32 %v2032_v18, 0.0 }
 0x2ac   : > { %5443 = vst [vmem:[%s7428_s14 + $0x90] sm:$0xff] %v4931_v19 }
 0x2ad   : > { %v4932_v22 = vpack.c.bf16 %v3928_v21, %v3927_v20  ;;  %6415 = vmatmul.msk.f32.gmra.mxu2 %vm319_vm1, %v7076_v23  ;;  %6480 = vmatmul.msk.f32.gmra.mxu3 %vm319_vm1, %v7076_v23  ;;  %v1407_v24 = vpop.f32.mrf.mxu0  ;;  %v1616_v25 = vpop.f32.mrf.mxu1 }
 0x2ae   : > { %v1408_v26 = vadd.f32 %v1407_v24, %v8132_v35  ;;  %v1617_v27 = vadd.f32 %v1616_v25, %v8134_v36 }
 0x2af   : > { %5444 = vst [vmem:[%s7428_s14 + $0x98] sm:$0xff] %v4932_v22 }
 0x2b0   : > { %v3941_v28 = vmax.f32 %v1408_v26, 0.0  ;;  %v3942_v29 = vmax.f32 %v1617_v27, 0.0  ;;  %v1825_v30 = vpop.f32.mrf.mxu2  ;;  %v2034_v31 = vpop.f32.mrf.mxu3  ;;  %6285 = vmatmul.msk.f32.gmra.mxu0 %vm319_vm1, %v7076_v23  ;;  %6350 = vmatmul.msk.f32.gmra.mxu1 %vm319_vm1, %v7076_v23  ;;  %v7080_v23 = vld [vmem:[%s7307_s28 + $0xb8] sm:$0xff] }
 0x2b1   : > { %v1826_v32 = vadd.f32 %v1825_v30, %v8140_v43  ;;  %v2035_v33 = vadd.f32 %v2034_v31, %v8142_v44 }
 0x2b2   : > { %v4939_v34 = vpack.c.bf16 %v3942_v29, %v3941_v28 }
 0x2b3   : > { %v3943_v37 = vmax.f32 %v1826_v32, 0.0  ;;  %v3944_v40 = vmax.f32 %v2035_v33, 0.0 }
 0x2b4   : > { %5451 = vst [vmem:[%s7428_s14 + $0xd0] sm:$0xff] %v4939_v34 }
 0x2b5   : > { %v4940_v41 = vpack.c.bf16 %v3944_v40, %v3943_v37  ;;  %6416 = vmatmul.msk.f32.gmra.mxu2 %vm319_vm1, %v7077_v42  ;;  %6481 = vmatmul.msk.f32.gmra.mxu3 %vm319_vm1, %v7077_v42  ;;  %v1410_v38 = vpop.f32.mrf.mxu0  ;;  %v1619_v39 = vpop.f32.mrf.mxu1 }
 0x2b6   : > { %v1411_v45 = vadd.f32 %v1410_v38, %v8132_v35  ;;  %v1620_v46 = vadd.f32 %v1619_v39, %v8134_v36 }
 0x2b7   : > { %5452 = vst [vmem:[%s7428_s14 + $0xd8] sm:$0xff] %v4940_v41 }
 0x2b8   : > { %v3957_v47 = vmax.f32 %v1411_v45, 0.0  ;;  %v3958_v48 = vmax.f32 %v1620_v46, 0.0  ;;  %v1828_v49 = vpop.f32.mrf.mxu2  ;;  %v2037_v50 = vpop.f32.mrf.mxu3  ;;  %6286 = vmatmul.msk.f32.gmra.mxu0 %vm319_vm1, %v7077_v42  ;;  %6351 = vmatmul.msk.f32.gmra.mxu1 %vm319_vm1, %v7077_v42  ;;  %v7081_v42 = vld [vmem:[%s7307_s28 + $0xc0] sm:$0xff] }
 0x2b9   : > { %v1829_v51 = vadd.f32 %v1828_v49, %v8140_v43  ;;  %v2038_v52 = vadd.f32 %v2037_v50, %v8142_v44 }
 0x2ba   : > { %v4947_v53 = vpack.c.bf16 %v3958_v48, %v3957_v47 }
 0x2bb   : > { %v3959_v54 = vmax.f32 %v1829_v51, 0.0  ;;  %v3960_v55 = vmax.f32 %v2038_v52, 0.0 }
 0x2bc   : > { %5459 = vst [vmem:[%s7428_s14 + $0x110] sm:$0xff] %v4947_v53 }
 0x2bd   : > { %v4948_v56 = vpack.c.bf16 %v3960_v55, %v3959_v54  ;;  %6417 = vmatmul.msk.f32.gmra.mxu2 %vm319_vm1, %v7078_v57  ;;  %6482 = vmatmul.msk.f32.gmra.mxu3 %vm319_vm1, %v7078_v57  ;;  %v1413_v58 = vpop.f32.mrf.mxu0  ;;  %v1622_v59 = vpop.f32.mrf.mxu1 }
 0x2be   : > { %v1414_v60 = vadd.f32 %v1413_v58, %v8132_v35  ;;  %v1623_v61 = vadd.f32 %v1622_v59, %v8134_v36 }
 0x2bf   : > { %5460 = vst [vmem:[%s7428_s14 + $0x118] sm:$0xff] %v4948_v56 }
 0x2c0   : > { %v3973_v62 = vmax.f32 %v1414_v60, 0.0  ;;  %v3974_v63 = vmax.f32 %v1623_v61, 0.0  ;;  %v1831_v0 = vpop.f32.mrf.mxu2  ;;  %v2040_v1 = vpop.f32.mrf.mxu3  ;;  %6287 = vmatmul.msk.f32.gmra.mxu0 %vm319_vm1, %v7078_v57  ;;  %6352 = vmatmul.msk.f32.gmra.mxu1 %vm319_vm1, %v7078_v57  ;;  %v7082_v57 = vld [vmem:[%s7307_s28 + $0xc8] sm:$0xff] }
 0x2c1   : > { %v1832_v2 = vadd.f32 %v1831_v0, %v8140_v43  ;;  %v2041_v3 = vadd.f32 %v2040_v1, %v8142_v44 }
 0x2c2   : > { %v4955_v4 = vpack.c.bf16 %v3974_v63, %v3973_v62 }
 0x2c3   : > { %v3975_v5 = vmax.f32 %v1832_v2, 0.0  ;;  %v3976_v6 = vmax.f32 %v2041_v3, 0.0 }
 0x2c4   : > { %5467 = vst [vmem:[%s7428_s14 + $0x150] sm:$0xff] %v4955_v4 }
 0x2c5   : > { %v4956_v7 = vpack.c.bf16 %v3976_v6, %v3975_v5  ;;  %6418 = vmatmul.msk.f32.gmra.mxu2 %vm319_vm1, %v7079_v8  ;;  %6483 = vmatmul.msk.f32.gmra.mxu3 %vm319_vm1, %v7079_v8  ;;  %v1416_v9 = vpop.f32.mrf.mxu0  ;;  %v1625_v10 = vpop.f32.mrf.mxu1 }
 0x2c6   : > { %v1417_v11 = vadd.f32 %v1416_v9, %v8132_v35  ;;  %v1626_v12 = vadd.f32 %v1625_v10, %v8134_v36 }
 0x2c7   : > { %5468 = vst [vmem:[%s7428_s14 + $0x158] sm:$0xff] %v4956_v7 }
 0x2c8   : > { %v3989_v13 = vmax.f32 %v1417_v11, 0.0  ;;  %v3990_v14 = vmax.f32 %v1626_v12, 0.0  ;;  %v1834_v15 = vpop.f32.mrf.mxu2  ;;  %v2043_v16 = vpop.f32.mrf.mxu3  ;;  %6288 = vmatmul.msk.f32.gmra.mxu0 %vm319_vm1, %v7079_v8  ;;  %6353 = vmatmul.msk.f32.gmra.mxu1 %vm319_vm1, %v7079_v8  ;;  %v7083_v8 = vld [vmem:[%s7307_s28 + $0xd0] sm:$0xff] }
 0x2c9   : > { %v1835_v17 = vadd.f32 %v1834_v15, %v8140_v43  ;;  %v2044_v18 = vadd.f32 %v2043_v16, %v8142_v44 }
 0x2ca   : > { %v4963_v19 = vpack.c.bf16 %v3990_v14, %v3989_v13 }
 0x2cb   : > { %v3991_v20 = vmax.f32 %v1835_v17, 0.0  ;;  %v3992_v21 = vmax.f32 %v2044_v18, 0.0 }
 0x2cc   : > { %5475 = vst [vmem:[%s7428_s14 + $0x190] sm:$0xff] %v4963_v19 }
 0x2cd   : > { %v4964_v22 = vpack.c.bf16 %v3992_v21, %v3991_v20  ;;  %6419 = vmatmul.msk.f32.gmra.mxu2 %vm319_vm1, %v7080_v23  ;;  %6484 = vmatmul.msk.f32.gmra.mxu3 %vm319_vm1, %v7080_v23  ;;  %v1419_v24 = vpop.f32.mrf.mxu0  ;;  %v1628_v25 = vpop.f32.mrf.mxu1 }
 0x2ce   : > { %v1420_v26 = vadd.f32 %v1419_v24, %v8132_v35  ;;  %v1629_v27 = vadd.f32 %v1628_v25, %v8134_v36 }
 0x2cf   : > { %5476 = vst [vmem:[%s7428_s14 + $0x198] sm:$0xff] %v4964_v22 }
 0x2d0   : > { %v4005_v28 = vmax.f32 %v1420_v26, 0.0  ;;  %v4006_v29 = vmax.f32 %v1629_v27, 0.0  ;;  %v1837_v30 = vpop.f32.mrf.mxu2  ;;  %v2046_v31 = vpop.f32.mrf.mxu3  ;;  %6289 = vmatmul.msk.f32.gmra.mxu0 %vm319_vm1, %v7080_v23  ;;  %6354 = vmatmul.msk.f32.gmra.mxu1 %vm319_vm1, %v7080_v23  ;;  %v7084_v23 = vld [vmem:[%s7307_s28 + $0xd8] sm:$0xff] }
 0x2d1   : > { %v1838_v32 = vadd.f32 %v1837_v30, %v8140_v43  ;;  %v2047_v33 = vadd.f32 %v2046_v31, %v8142_v44 }
 0x2d2   : > { %v4971_v34 = vpack.c.bf16 %v4006_v29, %v4005_v28 }
 0x2d3   : > { %v4007_v37 = vmax.f32 %v1838_v32, 0.0  ;;  %v4008_v40 = vmax.f32 %v2047_v33, 0.0 }
 0x2d4   : > { %5483 = vst [vmem:[%s7428_s14 + $0x1d0] sm:$0xff] %v4971_v34 }
 0x2d5   : > { %v4972_v41 = vpack.c.bf16 %v4008_v40, %v4007_v37  ;;  %6420 = vmatmul.msk.f32.gmra.mxu2 %vm319_vm1, %v7081_v42  ;;  %6485 = vmatmul.msk.f32.gmra.mxu3 %vm319_vm1, %v7081_v42  ;;  %v1422_v38 = vpop.f32.mrf.mxu0  ;;  %v1631_v39 = vpop.f32.mrf.mxu1 }
 0x2d6   : > { %v1423_v45 = vadd.f32 %v1422_v38, %v8132_v35  ;;  %v1632_v46 = vadd.f32 %v1631_v39, %v8134_v36 }
 0x2d7   : > { %5484 = vst [vmem:[%s7428_s14 + $0x1d8] sm:$0xff] %v4972_v41 }
 0x2d8   : > { %v4021_v47 = vmax.f32 %v1423_v45, 0.0  ;;  %v4022_v48 = vmax.f32 %v1632_v46, 0.0  ;;  %v1840_v49 = vpop.f32.mrf.mxu2  ;;  %v2049_v50 = vpop.f32.mrf.mxu3  ;;  %6290 = vmatmul.msk.f32.gmra.mxu0 %vm319_vm1, %v7081_v42  ;;  %6355 = vmatmul.msk.f32.gmra.mxu1 %vm319_vm1, %v7081_v42  ;;  %v7085_v42 = vld [vmem:[%s7307_s28 + $0xe0] sm:$0xff] }
 0x2d9   : > { %v1841_v51 = vadd.f32 %v1840_v49, %v8140_v43  ;;  %v2050_v52 = vadd.f32 %v2049_v50, %v8142_v44 }
 0x2da   : > { %v4979_v53 = vpack.c.bf16 %v4022_v48, %v4021_v47 }
 0x2db   : > { %v4023_v54 = vmax.f32 %v1841_v51, 0.0  ;;  %v4024_v55 = vmax.f32 %v2050_v52, 0.0 }
 0x2dc   : > { %5491 = vst [vmem:[%s7428_s14 + $0x210] sm:$0xff] %v4979_v53 }
 0x2dd   : > { %v4980_v56 = vpack.c.bf16 %v4024_v55, %v4023_v54  ;;  %6421 = vmatmul.msk.f32.gmra.mxu2 %vm319_vm1, %v7082_v57  ;;  %6486 = vmatmul.msk.f32.gmra.mxu3 %vm319_vm1, %v7082_v57  ;;  %v1425_v58 = vpop.f32.mrf.mxu0  ;;  %v1634_v59 = vpop.f32.mrf.mxu1 }
 0x2de   : > { %v1426_v60 = vadd.f32 %v1425_v58, %v8132_v35  ;;  %v1635_v61 = vadd.f32 %v1634_v59, %v8134_v36 }
 0x2df   : > { %5492 = vst [vmem:[%s7428_s14 + $0x218] sm:$0xff] %v4980_v56 }
 0x2e0   : > { %v4037_v62 = vmax.f32 %v1426_v60, 0.0  ;;  %v4038_v63 = vmax.f32 %v1635_v61, 0.0  ;;  %v1843_v0 = vpop.f32.mrf.mxu2  ;;  %v2052_v1 = vpop.f32.mrf.mxu3  ;;  %6291 = vmatmul.msk.f32.gmra.mxu0 %vm319_vm1, %v7082_v57  ;;  %6356 = vmatmul.msk.f32.gmra.mxu1 %vm319_vm1, %v7082_v57  ;;  %v7086_v57 = vld [vmem:[%s7307_s28 + $0xe8] sm:$0xff] }
 0x2e1   : > { %v1844_v2 = vadd.f32 %v1843_v0, %v8140_v43  ;;  %v2053_v3 = vadd.f32 %v2052_v1, %v8142_v44 }
 0x2e2   : > { %v4987_v4 = vpack.c.bf16 %v4038_v63, %v4037_v62 }
 0x2e3   : > { %v4039_v5 = vmax.f32 %v1844_v2, 0.0  ;;  %v4040_v6 = vmax.f32 %v2053_v3, 0.0 }
 0x2e4   : > { %5499 = vst [vmem:[%s7428_s14 + $0x250] sm:$0xff] %v4987_v4 }
 0x2e5   : > { %v4988_v7 = vpack.c.bf16 %v4040_v6, %v4039_v5  ;;  %6422 = vmatmul.msk.f32.gmra.mxu2 %vm319_vm1, %v7083_v8  ;;  %6487 = vmatmul.msk.f32.gmra.mxu3 %vm319_vm1, %v7083_v8  ;;  %v1428_v9 = vpop.f32.mrf.mxu0  ;;  %v1637_v10 = vpop.f32.mrf.mxu1 }
 0x2e6   : > { %v1429_v11 = vadd.f32 %v1428_v9, %v8132_v35  ;;  %v1638_v12 = vadd.f32 %v1637_v10, %v8134_v36 }
 0x2e7   : > { %5500 = vst [vmem:[%s7428_s14 + $0x258] sm:$0xff] %v4988_v7 }
 0x2e8   : > { %v4053_v13 = vmax.f32 %v1429_v11, 0.0  ;;  %v4054_v14 = vmax.f32 %v1638_v12, 0.0  ;;  %v1846_v15 = vpop.f32.mrf.mxu2  ;;  %v2055_v16 = vpop.f32.mrf.mxu3  ;;  %6292 = vmatmul.msk.f32.gmra.mxu0 %vm319_vm1, %v7083_v8  ;;  %6357 = vmatmul.msk.f32.gmra.mxu1 %vm319_vm1, %v7083_v8  ;;  %v7087_v8 = vld [vmem:[%s7307_s28 + $0xf0] sm:$0xff] }
 0x2e9   : > { %v1847_v17 = vadd.f32 %v1846_v15, %v8140_v43  ;;  %v2056_v18 = vadd.f32 %v2055_v16, %v8142_v44 }
 0x2ea   : > { %v4995_v19 = vpack.c.bf16 %v4054_v14, %v4053_v13 }
 0x2eb   : > { %v4055_v20 = vmax.f32 %v1847_v17, 0.0  ;;  %v4056_v21 = vmax.f32 %v2056_v18, 0.0 }
 0x2ec   : > { %5507 = vst [vmem:[%s7428_s14 + $0x290] sm:$0xff] %v4995_v19 }
 0x2ed   : > { %v4996_v22 = vpack.c.bf16 %v4056_v21, %v4055_v20  ;;  %6423 = vmatmul.msk.f32.gmra.mxu2 %vm319_vm1, %v7084_v23  ;;  %6488 = vmatmul.msk.f32.gmra.mxu3 %vm319_vm1, %v7084_v23  ;;  %v1431_v24 = vpop.f32.mrf.mxu0  ;;  %v1640_v25 = vpop.f32.mrf.mxu1 }
 0x2ee   : > { %v1432_v26 = vadd.f32 %v1431_v24, %v8132_v35  ;;  %v1641_v27 = vadd.f32 %v1640_v25, %v8134_v36 }
 0x2ef   : > { %5508 = vst [vmem:[%s7428_s14 + $0x298] sm:$0xff] %v4996_v22 }
 0x2f0   : > { %v4069_v28 = vmax.f32 %v1432_v26, 0.0  ;;  %v4070_v29 = vmax.f32 %v1641_v27, 0.0  ;;  %v1849_v30 = vpop.f32.mrf.mxu2  ;;  %v2058_v31 = vpop.f32.mrf.mxu3  ;;  %6293 = vmatmul.msk.f32.gmra.mxu0 %vm319_vm1, %v7084_v23  ;;  %6358 = vmatmul.msk.f32.gmra.mxu1 %vm319_vm1, %v7084_v23  ;;  %v7088_v23 = vld [vmem:[%s7307_s28 + $0xf8] sm:$0xff] }
 0x2f1   : > { %v1850_v32 = vadd.f32 %v1849_v30, %v8140_v43  ;;  %v2059_v33 = vadd.f32 %v2058_v31, %v8142_v44 }
 0x2f2   : > { %v5003_v34 = vpack.c.bf16 %v4070_v29, %v4069_v28 }
 0x2f3   : > { %v4071_v37 = vmax.f32 %v1850_v32, 0.0  ;;  %v4072_v40 = vmax.f32 %v2059_v33, 0.0 }
 0x2f4   : > { %5515 = vst [vmem:[%s7428_s14 + $0x2d0] sm:$0xff] %v5003_v34 }
 0x2f5   : > { %v5004_v41 = vpack.c.bf16 %v4072_v40, %v4071_v37  ;;  %6424 = vmatmul.msk.f32.gmra.mxu2 %vm319_vm1, %v7085_v42  ;;  %6489 = vmatmul.msk.f32.gmra.mxu3 %vm319_vm1, %v7085_v42  ;;  %v1434_v38 = vpop.f32.mrf.mxu0  ;;  %v1643_v39 = vpop.f32.mrf.mxu1 }
 0x2f6   : > { %v1435_v45 = vadd.f32 %v1434_v38, %v8132_v35  ;;  %v1644_v46 = vadd.f32 %v1643_v39, %v8134_v36 }
 0x2f7   : > { %5516 = vst [vmem:[%s7428_s14 + $0x2d8] sm:$0xff] %v5004_v41 }
 0x2f8   : > { %v4085_v47 = vmax.f32 %v1435_v45, 0.0  ;;  %v4086_v48 = vmax.f32 %v1644_v46, 0.0  ;;  %v1852_v49 = vpop.f32.mrf.mxu2  ;;  %v2061_v50 = vpop.f32.mrf.mxu3  ;;  %6294 = vmatmul.msk.f32.gmra.mxu0 %vm319_vm1, %v7085_v42  ;;  %6359 = vmatmul.msk.f32.gmra.mxu1 %vm319_vm1, %v7085_v42  ;;  %v7089_v42 = vld [vmem:[%s7307_s28 + $0x100] sm:$0xff] }
 0x2f9   : > { %v1853_v51 = vadd.f32 %v1852_v49, %v8140_v43  ;;  %v2062_v52 = vadd.f32 %v2061_v50, %v8142_v44 }
 0x2fa   : > { %v5011_v53 = vpack.c.bf16 %v4086_v48, %v4085_v47 }
 0x2fb   : > { %v4087_v54 = vmax.f32 %v1853_v51, 0.0  ;;  %v4088_v55 = vmax.f32 %v2062_v52, 0.0 }
 0x2fc   : > { %5523 = vst [vmem:[%s7428_s14 + $0x310] sm:$0xff] %v5011_v53 }
 0x2fd   : > { %v5012_v56 = vpack.c.bf16 %v4088_v55, %v4087_v54  ;;  %6425 = vmatmul.msk.f32.gmra.mxu2 %vm319_vm1, %v7086_v57  ;;  %6490 = vmatmul.msk.f32.gmra.mxu3 %vm319_vm1, %v7086_v57  ;;  %v1437_v58 = vpop.f32.mrf.mxu0  ;;  %v1646_v59 = vpop.f32.mrf.mxu1 }
 0x2fe   : > { %v1438_v60 = vadd.f32 %v1437_v58, %v8132_v35  ;;  %v1647_v61 = vadd.f32 %v1646_v59, %v8134_v36 }
 0x2ff   : > { %5524 = vst [vmem:[%s7428_s14 + $0x318] sm:$0xff] %v5012_v56 }
 0x300   : > { %v4101_v62 = vmax.f32 %v1438_v60, 0.0  ;;  %v4102_v63 = vmax.f32 %v1647_v61, 0.0  ;;  %v1855_v0 = vpop.f32.mrf.mxu2  ;;  %v2064_v1 = vpop.f32.mrf.mxu3  ;;  %6295 = vmatmul.msk.f32.gmra.mxu0 %vm319_vm1, %v7086_v57  ;;  %6360 = vmatmul.msk.f32.gmra.mxu1 %vm319_vm1, %v7086_v57  ;;  %v7090_v57 = vld [vmem:[%s7307_s28 + $0x108] sm:$0xff] }
 0x301   : > { %v1856_v2 = vadd.f32 %v1855_v0, %v8140_v43  ;;  %v2065_v3 = vadd.f32 %v2064_v1, %v8142_v44 }
 0x302   : > { %v5019_v4 = vpack.c.bf16 %v4102_v63, %v4101_v62 }
 0x303   : > { %v4103_v5 = vmax.f32 %v1856_v2, 0.0  ;;  %v4104_v6 = vmax.f32 %v2065_v3, 0.0 }
 0x304   : > { %5531 = vst [vmem:[%s7428_s14 + $0x350] sm:$0xff] %v5019_v4 }
 0x305   : > { %v5020_v7 = vpack.c.bf16 %v4104_v6, %v4103_v5  ;;  %6426 = vmatmul.msk.f32.gmra.mxu2 %vm319_vm1, %v7087_v8  ;;  %6491 = vmatmul.msk.f32.gmra.mxu3 %vm319_vm1, %v7087_v8  ;;  %v1440_v9 = vpop.f32.mrf.mxu0  ;;  %v1649_v10 = vpop.f32.mrf.mxu1 }
 0x306   : > { %v1441_v11 = vadd.f32 %v1440_v9, %v8132_v35  ;;  %v1650_v12 = vadd.f32 %v1649_v10, %v8134_v36 }
 0x307   : > { %5532 = vst [vmem:[%s7428_s14 + $0x358] sm:$0xff] %v5020_v7 }
 0x308   : > { %v4117_v13 = vmax.f32 %v1441_v11, 0.0  ;;  %v4118_v14 = vmax.f32 %v1650_v12, 0.0  ;;  %v1858_v15 = vpop.f32.mrf.mxu2  ;;  %v2067_v16 = vpop.f32.mrf.mxu3  ;;  %6296 = vmatmul.msk.f32.gmra.mxu0 %vm319_vm1, %v7087_v8  ;;  %6361 = vmatmul.msk.f32.gmra.mxu1 %vm319_vm1, %v7087_v8  ;;  %v7091_v8 = vld [vmem:[%s7307_s28 + $0x110] sm:$0xff] }
 0x309   : > { %v1859_v17 = vadd.f32 %v1858_v15, %v8140_v43  ;;  %v2068_v18 = vadd.f32 %v2067_v16, %v8142_v44 }
 0x30a   : > { %v5027_v19 = vpack.c.bf16 %v4118_v14, %v4117_v13 }
 0x30b   : > { %v4119_v20 = vmax.f32 %v1859_v17, 0.0  ;;  %v4120_v21 = vmax.f32 %v2068_v18, 0.0 }
 0x30c   : > { %5539 = vst [vmem:[%s7428_s14 + $0x390] sm:$0xff] %v5027_v19 }
 0x30d   : > { %v5028_v22 = vpack.c.bf16 %v4120_v21, %v4119_v20  ;;  %6427 = vmatmul.msk.f32.gmra.mxu2 %vm319_vm1, %v7088_v23  ;;  %6492 = vmatmul.msk.f32.gmra.mxu3 %vm319_vm1, %v7088_v23  ;;  %v1443_v24 = vpop.f32.mrf.mxu0  ;;  %v1652_v25 = vpop.f32.mrf.mxu1 }
 0x30e   : > { %v1444_v26 = vadd.f32 %v1443_v24, %v8132_v35  ;;  %v1653_v27 = vadd.f32 %v1652_v25, %v8134_v36 }
 0x30f   : > { %5540 = vst [vmem:[%s7428_s14 + $0x398] sm:$0xff] %v5028_v22 }
 0x310   : > { %v4133_v28 = vmax.f32 %v1444_v26, 0.0  ;;  %v4134_v29 = vmax.f32 %v1653_v27, 0.0  ;;  %v1861_v30 = vpop.f32.mrf.mxu2  ;;  %v2070_v31 = vpop.f32.mrf.mxu3  ;;  %6297 = vmatmul.msk.f32.gmra.mxu0 %vm319_vm1, %v7088_v23  ;;  %6362 = vmatmul.msk.f32.gmra.mxu1 %vm319_vm1, %v7088_v23  ;;  %v7092_v23 = vld [vmem:[%s7307_s28 + $0x118] sm:$0xff] }
 0x311   : > { %v1862_v32 = vadd.f32 %v1861_v30, %v8140_v43  ;;  %v2071_v33 = vadd.f32 %v2070_v31, %v8142_v44 }
 0x312   : > { %v5035_v34 = vpack.c.bf16 %v4134_v29, %v4133_v28 }
 0x313   : > { %v4135_v37 = vmax.f32 %v1862_v32, 0.0  ;;  %v4136_v40 = vmax.f32 %v2071_v33, 0.0 }
 0x314   : > { %5547 = vst [vmem:[%s7428_s14 + $0x3d0] sm:$0xff] %v5035_v34 }
 0x315   : > { %v5036_v41 = vpack.c.bf16 %v4136_v40, %v4135_v37  ;;  %6428 = vmatmul.msk.f32.gmra.mxu2 %vm319_vm1, %v7089_v42  ;;  %6493 = vmatmul.msk.f32.gmra.mxu3 %vm319_vm1, %v7089_v42  ;;  %v1446_v38 = vpop.f32.mrf.mxu0  ;;  %v1655_v39 = vpop.f32.mrf.mxu1 }
 0x316   : > { %v1447_v45 = vadd.f32 %v1446_v38, %v8132_v35  ;;  %v1656_v46 = vadd.f32 %v1655_v39, %v8134_v36 }
 0x317   : > { %5548 = vst [vmem:[%s7428_s14 + $0x3d8] sm:$0xff] %v5036_v41 }
 0x318   : > { %v4149_v47 = vmax.f32 %v1447_v45, 0.0  ;;  %v4150_v48 = vmax.f32 %v1656_v46, 0.0  ;;  %v1864_v49 = vpop.f32.mrf.mxu2  ;;  %v2073_v50 = vpop.f32.mrf.mxu3  ;;  %6298 = vmatmul.msk.f32.gmra.mxu0 %vm319_vm1, %v7089_v42  ;;  %6363 = vmatmul.msk.f32.gmra.mxu1 %vm319_vm1, %v7089_v42  ;;  %v7093_v42 = vld [vmem:[%s7307_s28 + $0x120] sm:$0xff] }
 0x319   : > { %v1865_v51 = vadd.f32 %v1864_v49, %v8140_v43  ;;  %v2074_v52 = vadd.f32 %v2073_v50, %v8142_v44 }
 0x31a   : > { %v5043_v53 = vpack.c.bf16 %v4150_v48, %v4149_v47 }
 0x31b   : > { %v4151_v54 = vmax.f32 %v1865_v51, 0.0  ;;  %v4152_v55 = vmax.f32 %v2074_v52, 0.0 }
 0x31c   : > { %5555 = vst [vmem:[%s7428_s14 + $0x410] sm:$0xff] %v5043_v53 }
 0x31d   : > { %v5044_v56 = vpack.c.bf16 %v4152_v55, %v4151_v54  ;;  %6429 = vmatmul.msk.f32.gmra.mxu2 %vm319_vm1, %v7090_v57  ;;  %6494 = vmatmul.msk.f32.gmra.mxu3 %vm319_vm1, %v7090_v57  ;;  %v1449_v58 = vpop.f32.mrf.mxu0  ;;  %v1658_v59 = vpop.f32.mrf.mxu1 }
 0x31e   : > { %v1450_v60 = vadd.f32 %v1449_v58, %v8132_v35  ;;  %v1659_v61 = vadd.f32 %v1658_v59, %v8134_v36 }
 0x31f   : > { %5556 = vst [vmem:[%s7428_s14 + $0x418] sm:$0xff] %v5044_v56 }
 0x320   : > { %v4165_v62 = vmax.f32 %v1450_v60, 0.0  ;;  %v4166_v63 = vmax.f32 %v1659_v61, 0.0  ;;  %v1867_v0 = vpop.f32.mrf.mxu2  ;;  %v2076_v1 = vpop.f32.mrf.mxu3  ;;  %6299 = vmatmul.msk.f32.gmra.mxu0 %vm319_vm1, %v7090_v57  ;;  %6364 = vmatmul.msk.f32.gmra.mxu1 %vm319_vm1, %v7090_v57  ;;  %v7094_v57 = vld [vmem:[%s7307_s28 + $0x128] sm:$0xff] }
 0x321   : > { %v1868_v2 = vadd.f32 %v1867_v0, %v8140_v43  ;;  %v2077_v3 = vadd.f32 %v2076_v1, %v8142_v44 }
 0x322   : > { %v5051_v4 = vpack.c.bf16 %v4166_v63, %v4165_v62 }
 0x323   : > { %v4167_v5 = vmax.f32 %v1868_v2, 0.0  ;;  %v4168_v6 = vmax.f32 %v2077_v3, 0.0 }
 0x324   : > { %5563 = vst [vmem:[%s7428_s14 + $0x450] sm:$0xff] %v5051_v4 }
 0x325   : > { %v5052_v7 = vpack.c.bf16 %v4168_v6, %v4167_v5  ;;  %6430 = vmatmul.msk.f32.gmra.mxu2 %vm319_vm1, %v7091_v8  ;;  %6495 = vmatmul.msk.f32.gmra.mxu3 %vm319_vm1, %v7091_v8  ;;  %v1452_v9 = vpop.f32.mrf.mxu0  ;;  %v1661_v10 = vpop.f32.mrf.mxu1 }
 0x326   : > { %v1453_v11 = vadd.f32 %v1452_v9, %v8132_v35  ;;  %v1662_v12 = vadd.f32 %v1661_v10, %v8134_v36 }
 0x327   : > { %5564 = vst [vmem:[%s7428_s14 + $0x458] sm:$0xff] %v5052_v7 }
 0x328   : > { %v4181_v13 = vmax.f32 %v1453_v11, 0.0  ;;  %v4182_v14 = vmax.f32 %v1662_v12, 0.0  ;;  %v1870_v15 = vpop.f32.mrf.mxu2  ;;  %v2079_v16 = vpop.f32.mrf.mxu3  ;;  %6300 = vmatmul.msk.f32.gmra.mxu0 %vm319_vm1, %v7091_v8  ;;  %6365 = vmatmul.msk.f32.gmra.mxu1 %vm319_vm1, %v7091_v8  ;;  %v7095_v8 = vld [vmem:[%s7307_s28 + $0x130] sm:$0xff] }
 0x329   : > { %v1871_v17 = vadd.f32 %v1870_v15, %v8140_v43  ;;  %v2080_v18 = vadd.f32 %v2079_v16, %v8142_v44 }
 0x32a   : > { %v5059_v19 = vpack.c.bf16 %v4182_v14, %v4181_v13 }
 0x32b   : > { %v4183_v20 = vmax.f32 %v1871_v17, 0.0  ;;  %v4184_v21 = vmax.f32 %v2080_v18, 0.0 }
 0x32c   : > { %5571 = vst [vmem:[%s7428_s14 + $0x490] sm:$0xff] %v5059_v19 }
 0x32d   : > { %v5060_v22 = vpack.c.bf16 %v4184_v21, %v4183_v20  ;;  %6431 = vmatmul.msk.f32.gmra.mxu2 %vm319_vm1, %v7092_v23  ;;  %6496 = vmatmul.msk.f32.gmra.mxu3 %vm319_vm1, %v7092_v23  ;;  %v1455_v24 = vpop.f32.mrf.mxu0  ;;  %v1664_v25 = vpop.f32.mrf.mxu1 }
 0x32e   : > { %v1456_v26 = vadd.f32 %v1455_v24, %v8132_v35  ;;  %v1665_v27 = vadd.f32 %v1664_v25, %v8134_v36 }
 0x32f   : > { %5572 = vst [vmem:[%s7428_s14 + $0x498] sm:$0xff] %v5060_v22 }
 0x330   : > { %v4197_v28 = vmax.f32 %v1456_v26, 0.0  ;;  %v4198_v29 = vmax.f32 %v1665_v27, 0.0  ;;  %v1873_v30 = vpop.f32.mrf.mxu2  ;;  %v2082_v31 = vpop.f32.mrf.mxu3  ;;  %6301 = vmatmul.msk.f32.gmra.mxu0 %vm319_vm1, %v7092_v23  ;;  %6366 = vmatmul.msk.f32.gmra.mxu1 %vm319_vm1, %v7092_v23  ;;  %v7096_v23 = vld [vmem:[%s7307_s28 + $0x138] sm:$0xff] }
 0x331   : > { %v1874_v32 = vadd.f32 %v1873_v30, %v8140_v43  ;;  %v2083_v33 = vadd.f32 %v2082_v31, %v8142_v44 }
 0x332   : > { %v5067_v34 = vpack.c.bf16 %v4198_v29, %v4197_v28 }
 0x333   : > { %v4199_v37 = vmax.f32 %v1874_v32, 0.0  ;;  %v4200_v40 = vmax.f32 %v2083_v33, 0.0 }
 0x334   : > { %5579 = vst [vmem:[%s7428_s14 + $0x4d0] sm:$0xff] %v5067_v34 }
 0x335   : > { %v5068_v41 = vpack.c.bf16 %v4200_v40, %v4199_v37  ;;  %6432 = vmatmul.msk.f32.gmra.mxu2 %vm319_vm1, %v7093_v42  ;;  %6497 = vmatmul.msk.f32.gmra.mxu3 %vm319_vm1, %v7093_v42  ;;  %v1458_v38 = vpop.f32.mrf.mxu0  ;;  %v1667_v39 = vpop.f32.mrf.mxu1 }
 0x336   : > { %v1459_v45 = vadd.f32 %v1458_v38, %v8132_v35  ;;  %v1668_v46 = vadd.f32 %v1667_v39, %v8134_v36 }
 0x337   : > { %5580 = vst [vmem:[%s7428_s14 + $0x4d8] sm:$0xff] %v5068_v41 }
 0x338   : > { %v4213_v47 = vmax.f32 %v1459_v45, 0.0  ;;  %v4214_v48 = vmax.f32 %v1668_v46, 0.0  ;;  %v1876_v49 = vpop.f32.mrf.mxu2  ;;  %v2085_v50 = vpop.f32.mrf.mxu3  ;;  %6302 = vmatmul.msk.f32.gmra.mxu0 %vm319_vm1, %v7093_v42  ;;  %6367 = vmatmul.msk.f32.gmra.mxu1 %vm319_vm1, %v7093_v42  ;;  %v7097_v42 = vld [vmem:[%s7307_s28 + $0x140] sm:$0xff] }
 0x339   : > { %v1877_v51 = vadd.f32 %v1876_v49, %v8140_v43  ;;  %v2086_v52 = vadd.f32 %v2085_v50, %v8142_v44 }
 0x33a   : > { %v5075_v53 = vpack.c.bf16 %v4214_v48, %v4213_v47 }
 0x33b   : > { %v4215_v54 = vmax.f32 %v1877_v51, 0.0  ;;  %v4216_v55 = vmax.f32 %v2086_v52, 0.0 }
 0x33c   : > { %5587 = vst [vmem:[%s7428_s14 + $0x510] sm:$0xff] %v5075_v53 }
 0x33d   : > { %v5076_v56 = vpack.c.bf16 %v4216_v55, %v4215_v54  ;;  %6433 = vmatmul.msk.f32.gmra.mxu2 %vm319_vm1, %v7094_v57  ;;  %6498 = vmatmul.msk.f32.gmra.mxu3 %vm319_vm1, %v7094_v57  ;;  %v1461_v58 = vpop.f32.mrf.mxu0  ;;  %v1670_v59 = vpop.f32.mrf.mxu1 }
 0x33e   : > { %v1462_v60 = vadd.f32 %v1461_v58, %v8132_v35  ;;  %v1671_v61 = vadd.f32 %v1670_v59, %v8134_v36 }
 0x33f   : > { %5588 = vst [vmem:[%s7428_s14 + $0x518] sm:$0xff] %v5076_v56 }
 0x340   : > { %v4229_v62 = vmax.f32 %v1462_v60, 0.0  ;;  %v4230_v63 = vmax.f32 %v1671_v61, 0.0  ;;  %v1879_v0 = vpop.f32.mrf.mxu2  ;;  %v2088_v1 = vpop.f32.mrf.mxu3  ;;  %6303 = vmatmul.msk.f32.gmra.mxu0 %vm319_vm1, %v7094_v57  ;;  %6368 = vmatmul.msk.f32.gmra.mxu1 %vm319_vm1, %v7094_v57  ;;  %v7098_v57 = vld [vmem:[%s7307_s28 + $0x148] sm:$0xff] }
 0x341   : > { %v1880_v2 = vadd.f32 %v1879_v0, %v8140_v43  ;;  %v2089_v3 = vadd.f32 %v2088_v1, %v8142_v44 }
 0x342   : > { %v5083_v4 = vpack.c.bf16 %v4230_v63, %v4229_v62 }
 0x343   : > { %v4231_v5 = vmax.f32 %v1880_v2, 0.0  ;;  %v4232_v6 = vmax.f32 %v2089_v3, 0.0 }
 0x344   : > { %5595 = vst [vmem:[%s7428_s14 + $0x550] sm:$0xff] %v5083_v4 }
 0x345   : > { %v5084_v7 = vpack.c.bf16 %v4232_v6, %v4231_v5  ;;  %6434 = vmatmul.msk.f32.gmra.mxu2 %vm319_vm1, %v7095_v8  ;;  %6499 = vmatmul.msk.f32.gmra.mxu3 %vm319_vm1, %v7095_v8  ;;  %v1464_v9 = vpop.f32.mrf.mxu0  ;;  %v1673_v10 = vpop.f32.mrf.mxu1 }
 0x346   : > { %v1465_v11 = vadd.f32 %v1464_v9, %v8132_v35  ;;  %v1674_v12 = vadd.f32 %v1673_v10, %v8134_v36 }
 0x347   : > { %5596 = vst [vmem:[%s7428_s14 + $0x558] sm:$0xff] %v5084_v7 }
 0x348   : > { %v4245_v13 = vmax.f32 %v1465_v11, 0.0  ;;  %v4246_v14 = vmax.f32 %v1674_v12, 0.0  ;;  %v1882_v15 = vpop.f32.mrf.mxu2  ;;  %v2091_v16 = vpop.f32.mrf.mxu3  ;;  %6304 = vmatmul.msk.f32.gmra.mxu0 %vm319_vm1, %v7095_v8  ;;  %6369 = vmatmul.msk.f32.gmra.mxu1 %vm319_vm1, %v7095_v8  ;;  %v7099_v8 = vld [vmem:[%s7307_s28 + $0x150] sm:$0xff] }
 0x349   : > { %v1883_v17 = vadd.f32 %v1882_v15, %v8140_v43  ;;  %v2092_v18 = vadd.f32 %v2091_v16, %v8142_v44 }
 0x34a   : > { %v5091_v19 = vpack.c.bf16 %v4246_v14, %v4245_v13 }
 0x34b   : > { %v4247_v20 = vmax.f32 %v1883_v17, 0.0  ;;  %v4248_v21 = vmax.f32 %v2092_v18, 0.0 }
 0x34c   : > { %5603 = vst [vmem:[%s7428_s14 + $0x590] sm:$0xff] %v5091_v19 }
 0x34d   : > { %v5092_v22 = vpack.c.bf16 %v4248_v21, %v4247_v20  ;;  %6435 = vmatmul.msk.f32.gmra.mxu2 %vm319_vm1, %v7096_v23  ;;  %6500 = vmatmul.msk.f32.gmra.mxu3 %vm319_vm1, %v7096_v23  ;;  %v1467_v24 = vpop.f32.mrf.mxu0  ;;  %v1676_v25 = vpop.f32.mrf.mxu1 }
 0x34e   : > { %v1468_v26 = vadd.f32 %v1467_v24, %v8132_v35  ;;  %v1677_v27 = vadd.f32 %v1676_v25, %v8134_v36 }
 0x34f   : > { %5604 = vst [vmem:[%s7428_s14 + $0x598] sm:$0xff] %v5092_v22 }
 0x350   : > { %v4261_v28 = vmax.f32 %v1468_v26, 0.0  ;;  %v4262_v29 = vmax.f32 %v1677_v27, 0.0  ;;  %v1885_v30 = vpop.f32.mrf.mxu2  ;;  %v2094_v31 = vpop.f32.mrf.mxu3  ;;  %6305 = vmatmul.msk.f32.gmra.mxu0 %vm319_vm1, %v7096_v23  ;;  %6370 = vmatmul.msk.f32.gmra.mxu1 %vm319_vm1, %v7096_v23  ;;  %v7100_v23 = vld [vmem:[%s7307_s28 + $0x158] sm:$0xff] }
 0x351   : > { %v1886_v32 = vadd.f32 %v1885_v30, %v8140_v43  ;;  %v2095_v33 = vadd.f32 %v2094_v31, %v8142_v44 }
 0x352   : > { %v5099_v34 = vpack.c.bf16 %v4262_v29, %v4261_v28 }
 0x353   : > { %v4263_v37 = vmax.f32 %v1886_v32, 0.0  ;;  %v4264_v40 = vmax.f32 %v2095_v33, 0.0 }
 0x354   : > { %5611 = vst [vmem:[%s7428_s14 + $0x5d0] sm:$0xff] %v5099_v34 }
 0x355   : > { %v5100_v41 = vpack.c.bf16 %v4264_v40, %v4263_v37  ;;  %6436 = vmatmul.msk.f32.gmra.mxu2 %vm319_vm1, %v7097_v42  ;;  %6501 = vmatmul.msk.f32.gmra.mxu3 %vm319_vm1, %v7097_v42  ;;  %v1470_v38 = vpop.f32.mrf.mxu0  ;;  %v1679_v39 = vpop.f32.mrf.mxu1 }
 0x356   : > { %v1471_v45 = vadd.f32 %v1470_v38, %v8132_v35  ;;  %v1680_v46 = vadd.f32 %v1679_v39, %v8134_v36 }
 0x357   : > { %5612 = vst [vmem:[%s7428_s14 + $0x5d8] sm:$0xff] %v5100_v41 }
 0x358   : > { %v4277_v47 = vmax.f32 %v1471_v45, 0.0  ;;  %v4278_v48 = vmax.f32 %v1680_v46, 0.0  ;;  %v1888_v49 = vpop.f32.mrf.mxu2  ;;  %v2097_v50 = vpop.f32.mrf.mxu3  ;;  %6306 = vmatmul.msk.f32.gmra.mxu0 %vm319_vm1, %v7097_v42  ;;  %6371 = vmatmul.msk.f32.gmra.mxu1 %vm319_vm1, %v7097_v42  ;;  %v7101_v42 = vld [vmem:[%s7307_s28 + $0x160] sm:$0xff] }
 0x359   : > { %v1889_v51 = vadd.f32 %v1888_v49, %v8140_v43  ;;  %v2098_v52 = vadd.f32 %v2097_v50, %v8142_v44 }
 0x35a   : > { %v5107_v53 = vpack.c.bf16 %v4278_v48, %v4277_v47 }
 0x35b   : > { %v4279_v54 = vmax.f32 %v1889_v51, 0.0  ;;  %v4280_v55 = vmax.f32 %v2098_v52, 0.0 }
 0x35c   : > { %5619 = vst [vmem:[%s7428_s14 + $0x610] sm:$0xff] %v5107_v53 }
 0x35d   : > { %v5108_v56 = vpack.c.bf16 %v4280_v55, %v4279_v54  ;;  %6437 = vmatmul.msk.f32.gmra.mxu2 %vm319_vm1, %v7098_v57  ;;  %6502 = vmatmul.msk.f32.gmra.mxu3 %vm319_vm1, %v7098_v57  ;;  %v1473_v58 = vpop.f32.mrf.mxu0  ;;  %v1682_v59 = vpop.f32.mrf.mxu1 }
 0x35e   : > { %v1474_v60 = vadd.f32 %v1473_v58, %v8132_v35  ;;  %v1683_v61 = vadd.f32 %v1682_v59, %v8134_v36 }
 0x35f   : > { %5620 = vst [vmem:[%s7428_s14 + $0x618] sm:$0xff] %v5108_v56 }
 0x360   : > { %v4293_v62 = vmax.f32 %v1474_v60, 0.0  ;;  %v4294_v63 = vmax.f32 %v1683_v61, 0.0  ;;  %v1891_v0 = vpop.f32.mrf.mxu2  ;;  %v2100_v1 = vpop.f32.mrf.mxu3  ;;  %6307 = vmatmul.msk.f32.gmra.mxu0 %vm319_vm1, %v7098_v57  ;;  %6372 = vmatmul.msk.f32.gmra.mxu1 %vm319_vm1, %v7098_v57  ;;  %v7102_v57 = vld [vmem:[%s7307_s28 + $0x168] sm:$0xff] }
 0x361   : > { %v1892_v2 = vadd.f32 %v1891_v0, %v8140_v43  ;;  %v2101_v3 = vadd.f32 %v2100_v1, %v8142_v44 }
 0x362   : > { %v5115_v4 = vpack.c.bf16 %v4294_v63, %v4293_v62 }
 0x363   : > { %v4295_v5 = vmax.f32 %v1892_v2, 0.0  ;;  %v4296_v6 = vmax.f32 %v2101_v3, 0.0 }
 0x364   : > { %5627 = vst [vmem:[%s7428_s14 + $0x650] sm:$0xff] %v5115_v4 }
 0x365   : > { %v5116_v7 = vpack.c.bf16 %v4296_v6, %v4295_v5  ;;  %6438 = vmatmul.msk.f32.gmra.mxu2 %vm319_vm1, %v7099_v8  ;;  %6503 = vmatmul.msk.f32.gmra.mxu3 %vm319_vm1, %v7099_v8  ;;  %v1476_v9 = vpop.f32.mrf.mxu0  ;;  %v1685_v10 = vpop.f32.mrf.mxu1 }
 0x366   : > { %v1477_v11 = vadd.f32 %v1476_v9, %v8132_v35  ;;  %v1686_v12 = vadd.f32 %v1685_v10, %v8134_v36 }
 0x367   : > { %5628 = vst [vmem:[%s7428_s14 + $0x658] sm:$0xff] %v5116_v7 }
 0x368   : > { %v4309_v13 = vmax.f32 %v1477_v11, 0.0  ;;  %v4310_v14 = vmax.f32 %v1686_v12, 0.0  ;;  %v1894_v15 = vpop.f32.mrf.mxu2  ;;  %v2103_v16 = vpop.f32.mrf.mxu3  ;;  %6308 = vmatmul.msk.f32.gmra.mxu0 %vm319_vm1, %v7099_v8  ;;  %6373 = vmatmul.msk.f32.gmra.mxu1 %vm319_vm1, %v7099_v8  ;;  %v7103_v8 = vld [vmem:[%s7307_s28 + $0x170] sm:$0xff] }
 0x369   : > { %v1895_v17 = vadd.f32 %v1894_v15, %v8140_v43  ;;  %v2104_v18 = vadd.f32 %v2103_v16, %v8142_v44 }
 0x36a   : > { %v5123_v19 = vpack.c.bf16 %v4310_v14, %v4309_v13 }
 0x36b   : > { %v4311_v20 = vmax.f32 %v1895_v17, 0.0  ;;  %v4312_v21 = vmax.f32 %v2104_v18, 0.0 }
 0x36c   : > { %5635 = vst [vmem:[%s7428_s14 + $0x690] sm:$0xff] %v5123_v19 }
 0x36d   : > { %v5124_v22 = vpack.c.bf16 %v4312_v21, %v4311_v20  ;;  %6439 = vmatmul.msk.f32.gmra.mxu2 %vm319_vm1, %v7100_v23  ;;  %6504 = vmatmul.msk.f32.gmra.mxu3 %vm319_vm1, %v7100_v23  ;;  %v1479_v24 = vpop.f32.mrf.mxu0  ;;  %v1688_v25 = vpop.f32.mrf.mxu1 }
 0x36e   : > { %v1480_v26 = vadd.f32 %v1479_v24, %v8132_v35  ;;  %v1689_v27 = vadd.f32 %v1688_v25, %v8134_v36 }
 0x36f   : > { %5636 = vst [vmem:[%s7428_s14 + $0x698] sm:$0xff] %v5124_v22 }
 0x370   : > { %v4325_v28 = vmax.f32 %v1480_v26, 0.0  ;;  %v4326_v29 = vmax.f32 %v1689_v27, 0.0  ;;  %v1897_v30 = vpop.f32.mrf.mxu2  ;;  %v2106_v31 = vpop.f32.mrf.mxu3  ;;  %6309 = vmatmul.msk.f32.gmra.mxu0 %vm319_vm1, %v7100_v23  ;;  %6374 = vmatmul.msk.f32.gmra.mxu1 %vm319_vm1, %v7100_v23  ;;  %v7104_v23 = vld [vmem:[%s7307_s28 + $0x178] sm:$0xff] }
 0x371   : > { %v1898_v32 = vadd.f32 %v1897_v30, %v8140_v43  ;;  %v2107_v33 = vadd.f32 %v2106_v31, %v8142_v44 }
 0x372   : > { %v5131_v34 = vpack.c.bf16 %v4326_v29, %v4325_v28 }
 0x373   : > { %v4327_v37 = vmax.f32 %v1898_v32, 0.0  ;;  %v4328_v40 = vmax.f32 %v2107_v33, 0.0 }
 0x374   : > { %5643 = vst [vmem:[%s7428_s14 + $0x6d0] sm:$0xff] %v5131_v34 }
 0x375   : > { %v5132_v41 = vpack.c.bf16 %v4328_v40, %v4327_v37  ;;  %6440 = vmatmul.msk.f32.gmra.mxu2 %vm319_vm1, %v7101_v42  ;;  %6505 = vmatmul.msk.f32.gmra.mxu3 %vm319_vm1, %v7101_v42  ;;  %v1482_v38 = vpop.f32.mrf.mxu0  ;;  %v1691_v39 = vpop.f32.mrf.mxu1 }
 0x376   : > { %v1483_v45 = vadd.f32 %v1482_v38, %v8132_v35  ;;  %v1692_v46 = vadd.f32 %v1691_v39, %v8134_v36 }
 0x377   : > { %5644 = vst [vmem:[%s7428_s14 + $0x6d8] sm:$0xff] %v5132_v41 }
 0x378   : > { %v4341_v47 = vmax.f32 %v1483_v45, 0.0  ;;  %v4342_v48 = vmax.f32 %v1692_v46, 0.0  ;;  %v1900_v49 = vpop.f32.mrf.mxu2  ;;  %v2109_v50 = vpop.f32.mrf.mxu3  ;;  %6310 = vmatmul.msk.f32.gmra.mxu0 %vm319_vm1, %v7101_v42  ;;  %6375 = vmatmul.msk.f32.gmra.mxu1 %vm319_vm1, %v7101_v42  ;;  %v7105_v42 = vld [vmem:[%s7307_s28 + $0x180] sm:$0xff] }
 0x379   : > { %v1901_v51 = vadd.f32 %v1900_v49, %v8140_v43  ;;  %v2110_v52 = vadd.f32 %v2109_v50, %v8142_v44 }
 0x37a   : > { %v5139_v53 = vpack.c.bf16 %v4342_v48, %v4341_v47 }
 0x37b   : > { %v4343_v54 = vmax.f32 %v1901_v51, 0.0  ;;  %v4344_v55 = vmax.f32 %v2110_v52, 0.0 }
 0x37c   : > { %5651 = vst [vmem:[%s7428_s14 + $0x710] sm:$0xff] %v5139_v53 }
 0x37d   : > { %v5140_v56 = vpack.c.bf16 %v4344_v55, %v4343_v54  ;;  %6441 = vmatmul.msk.f32.gmra.mxu2 %vm319_vm1, %v7102_v57  ;;  %6506 = vmatmul.msk.f32.gmra.mxu3 %vm319_vm1, %v7102_v57  ;;  %v1485_v58 = vpop.f32.mrf.mxu0  ;;  %v1694_v59 = vpop.f32.mrf.mxu1 }
 0x37e   : > { %v1486_v60 = vadd.f32 %v1485_v58, %v8132_v35  ;;  %v1695_v61 = vadd.f32 %v1694_v59, %v8134_v36 }
 0x37f   : > { %5652 = vst [vmem:[%s7428_s14 + $0x718] sm:$0xff] %v5140_v56 }
 0x380   : > { %v4357_v62 = vmax.f32 %v1486_v60, 0.0  ;;  %v4358_v63 = vmax.f32 %v1695_v61, 0.0  ;;  %v1903_v0 = vpop.f32.mrf.mxu2  ;;  %v2112_v1 = vpop.f32.mrf.mxu3  ;;  %6311 = vmatmul.msk.f32.gmra.mxu0 %vm319_vm1, %v7102_v57  ;;  %6376 = vmatmul.msk.f32.gmra.mxu1 %vm319_vm1, %v7102_v57  ;;  %v7106_v57 = vld [vmem:[%s7307_s28 + $0x188] sm:$0xff] }
 0x381   : > { %v1904_v2 = vadd.f32 %v1903_v0, %v8140_v43  ;;  %v2113_v3 = vadd.f32 %v2112_v1, %v8142_v44 }
 0x382   : > { %v5147_v4 = vpack.c.bf16 %v4358_v63, %v4357_v62 }
 0x383   : > { %v4359_v5 = vmax.f32 %v1904_v2, 0.0  ;;  %v4360_v6 = vmax.f32 %v2113_v3, 0.0 }
 0x384   : > { %5659 = vst [vmem:[%s7428_s14 + $0x750] sm:$0xff] %v5147_v4 }
 0x385   : > { %v5148_v7 = vpack.c.bf16 %v4360_v6, %v4359_v5  ;;  %6442 = vmatmul.msk.f32.gmra.mxu2 %vm319_vm1, %v7103_v8  ;;  %6507 = vmatmul.msk.f32.gmra.mxu3 %vm319_vm1, %v7103_v8  ;;  %v1488_v9 = vpop.f32.mrf.mxu0  ;;  %v1697_v10 = vpop.f32.mrf.mxu1 }
 0x386   : > { %v1489_v11 = vadd.f32 %v1488_v9, %v8132_v35  ;;  %v1698_v12 = vadd.f32 %v1697_v10, %v8134_v36 }
 0x387   : > { %5660 = vst [vmem:[%s7428_s14 + $0x758] sm:$0xff] %v5148_v7 }
 0x388   : > { %v4373_v13 = vmax.f32 %v1489_v11, 0.0  ;;  %v4374_v14 = vmax.f32 %v1698_v12, 0.0  ;;  %v1906_v15 = vpop.f32.mrf.mxu2  ;;  %v2115_v16 = vpop.f32.mrf.mxu3  ;;  %6312 = vmatmul.msk.f32.gmra.mxu0 %vm319_vm1, %v7103_v8  ;;  %6377 = vmatmul.msk.f32.gmra.mxu1 %vm319_vm1, %v7103_v8  ;;  %v7107_v8 = vld [vmem:[%s7307_s28 + $0x190] sm:$0xff] }
 0x389   : > { %v1907_v17 = vadd.f32 %v1906_v15, %v8140_v43  ;;  %v2116_v18 = vadd.f32 %v2115_v16, %v8142_v44 }
 0x38a   : > { %v5155_v19 = vpack.c.bf16 %v4374_v14, %v4373_v13 }
 0x38b   : > { %v4375_v20 = vmax.f32 %v1907_v17, 0.0  ;;  %v4376_v21 = vmax.f32 %v2116_v18, 0.0 }
 0x38c   : > { %5667 = vst [vmem:[%s7428_s14 + $0x790] sm:$0xff] %v5155_v19 }
 0x38d   : > { %v5156_v22 = vpack.c.bf16 %v4376_v21, %v4375_v20  ;;  %6443 = vmatmul.msk.f32.gmra.mxu2 %vm319_vm1, %v7104_v23  ;;  %6508 = vmatmul.msk.f32.gmra.mxu3 %vm319_vm1, %v7104_v23  ;;  %v1491_v24 = vpop.f32.mrf.mxu0  ;;  %v1700_v25 = vpop.f32.mrf.mxu1 }
 0x38e   : > { %v1492_v26 = vadd.f32 %v1491_v24, %v8132_v35  ;;  %v1701_v27 = vadd.f32 %v1700_v25, %v8134_v36 }
 0x38f   : > { %5668 = vst [vmem:[%s7428_s14 + $0x798] sm:$0xff] %v5156_v22 }
 0x390   : > { %v4389_v28 = vmax.f32 %v1492_v26, 0.0  ;;  %v4390_v29 = vmax.f32 %v1701_v27, 0.0  ;;  %v1909_v30 = vpop.f32.mrf.mxu2  ;;  %v2118_v31 = vpop.f32.mrf.mxu3  ;;  %6313 = vmatmul.msk.f32.gmra.mxu0 %vm319_vm1, %v7104_v23  ;;  %6378 = vmatmul.msk.f32.gmra.mxu1 %vm319_vm1, %v7104_v23  ;;  %v7108_v23 = vld [vmem:[%s7307_s28 + $0x198] sm:$0xff] }
 0x391   : > { %v1910_v32 = vadd.f32 %v1909_v30, %v8140_v43  ;;  %v2119_v33 = vadd.f32 %v2118_v31, %v8142_v44 }
 0x392   : > { %v5163_v34 = vpack.c.bf16 %v4390_v29, %v4389_v28 }
 0x393   : > { %v4391_v37 = vmax.f32 %v1910_v32, 0.0  ;;  %v4392_v40 = vmax.f32 %v2119_v33, 0.0 }
 0x394   : > { %5675 = vst [vmem:[%s7428_s14 + $0x7d0] sm:$0xff] %v5163_v34 }
 0x395   : > { %v5164_v41 = vpack.c.bf16 %v4392_v40, %v4391_v37  ;;  %6444 = vmatmul.msk.f32.gmra.mxu2 %vm319_vm1, %v7105_v42  ;;  %6509 = vmatmul.msk.f32.gmra.mxu3 %vm319_vm1, %v7105_v42  ;;  %v1494_v38 = vpop.f32.mrf.mxu0  ;;  %v1703_v39 = vpop.f32.mrf.mxu1 }
 0x396   : > { %v1495_v45 = vadd.f32 %v1494_v38, %v8132_v35  ;;  %v1704_v46 = vadd.f32 %v1703_v39, %v8134_v36 }
 0x397   : > { %5676 = vst [vmem:[%s7428_s14 + $0x7d8] sm:$0xff] %v5164_v41 }
 0x398   : > { %v4405_v47 = vmax.f32 %v1495_v45, 0.0  ;;  %v4406_v48 = vmax.f32 %v1704_v46, 0.0  ;;  %v1912_v49 = vpop.f32.mrf.mxu2  ;;  %v2121_v50 = vpop.f32.mrf.mxu3  ;;  %6314 = vmatmul.msk.f32.gmra.mxu0 %vm319_vm1, %v7105_v42  ;;  %6379 = vmatmul.msk.f32.gmra.mxu1 %vm319_vm1, %v7105_v42  ;;  %v7109_v42 = vld [vmem:[%s7307_s28 + $0x1a0] sm:$0xff] }
 0x399   : > { %v1913_v51 = vadd.f32 %v1912_v49, %v8140_v43  ;;  %v2122_v52 = vadd.f32 %v2121_v50, %v8142_v44 }
 0x39a   : > { %v5171_v53 = vpack.c.bf16 %v4406_v48, %v4405_v47 }
 0x39b   : > { %v4407_v54 = vmax.f32 %v1913_v51, 0.0  ;;  %v4408_v55 = vmax.f32 %v2122_v52, 0.0 }
 0x39c   : > { %5683 = vst [vmem:[%s7428_s14 + $0x810] sm:$0xff] %v5171_v53 }
 0x39d   : > { %v5172_v56 = vpack.c.bf16 %v4408_v55, %v4407_v54  ;;  %6445 = vmatmul.msk.f32.gmra.mxu2 %vm319_vm1, %v7106_v57  ;;  %6510 = vmatmul.msk.f32.gmra.mxu3 %vm319_vm1, %v7106_v57  ;;  %v1497_v58 = vpop.f32.mrf.mxu0  ;;  %v1706_v59 = vpop.f32.mrf.mxu1 }
 0x39e   : > { %v1498_v60 = vadd.f32 %v1497_v58, %v8132_v35  ;;  %v1707_v61 = vadd.f32 %v1706_v59, %v8134_v36 }
 0x39f   : > { %5684 = vst [vmem:[%s7428_s14 + $0x818] sm:$0xff] %v5172_v56 }
 0x3a0   : > { %v4421_v62 = vmax.f32 %v1498_v60, 0.0  ;;  %v4422_v63 = vmax.f32 %v1707_v61, 0.0  ;;  %v1915_v0 = vpop.f32.mrf.mxu2  ;;  %v2124_v1 = vpop.f32.mrf.mxu3  ;;  %6315 = vmatmul.msk.f32.gmra.mxu0 %vm319_vm1, %v7106_v57  ;;  %6380 = vmatmul.msk.f32.gmra.mxu1 %vm319_vm1, %v7106_v57  ;;  %v7110_v57 = vld [vmem:[%s7307_s28 + $0x1a8] sm:$0xff] }
 0x3a1   : > { %v1916_v2 = vadd.f32 %v1915_v0, %v8140_v43  ;;  %v2125_v3 = vadd.f32 %v2124_v1, %v8142_v44 }
 0x3a2   : > { %v5179_v4 = vpack.c.bf16 %v4422_v63, %v4421_v62 }
 0x3a3   : > { %v4423_v5 = vmax.f32 %v1916_v2, 0.0  ;;  %v4424_v6 = vmax.f32 %v2125_v3, 0.0 }
 0x3a4   : > { %5691 = vst [vmem:[%s7428_s14 + $0x850] sm:$0xff] %v5179_v4 }
 0x3a5   : > { %v5180_v7 = vpack.c.bf16 %v4424_v6, %v4423_v5  ;;  %6446 = vmatmul.msk.f32.gmra.mxu2 %vm319_vm1, %v7107_v8  ;;  %6511 = vmatmul.msk.f32.gmra.mxu3 %vm319_vm1, %v7107_v8  ;;  %v1500_v9 = vpop.f32.mrf.mxu0  ;;  %v1709_v10 = vpop.f32.mrf.mxu1 }
 0x3a6   : > { %v1501_v11 = vadd.f32 %v1500_v9, %v8132_v35  ;;  %v1710_v12 = vadd.f32 %v1709_v10, %v8134_v36 }
 0x3a7   : > { %5692 = vst [vmem:[%s7428_s14 + $0x858] sm:$0xff] %v5180_v7 }
 0x3a8   : > { %v4437_v13 = vmax.f32 %v1501_v11, 0.0  ;;  %v4438_v14 = vmax.f32 %v1710_v12, 0.0  ;;  %v1918_v15 = vpop.f32.mrf.mxu2  ;;  %v2127_v16 = vpop.f32.mrf.mxu3  ;;  %6316 = vmatmul.msk.f32.gmra.mxu0 %vm319_vm1, %v7107_v8  ;;  %6381 = vmatmul.msk.f32.gmra.mxu1 %vm319_vm1, %v7107_v8  ;;  %v7111_v8 = vld [vmem:[%s7307_s28 + $0x1b0] sm:$0xff] }
 0x3a9   : > { %v1919_v17 = vadd.f32 %v1918_v15, %v8140_v43  ;;  %v2128_v18 = vadd.f32 %v2127_v16, %v8142_v44 }
 0x3aa   : > { %v5187_v19 = vpack.c.bf16 %v4438_v14, %v4437_v13 }
 0x3ab   : > { %v4439_v20 = vmax.f32 %v1919_v17, 0.0  ;;  %v4440_v21 = vmax.f32 %v2128_v18, 0.0 }
 0x3ac   : > { %5699 = vst [vmem:[%s7428_s14 + $0x890] sm:$0xff] %v5187_v19 }
 0x3ad   : > { %v5188_v22 = vpack.c.bf16 %v4440_v21, %v4439_v20  ;;  %6447 = vmatmul.msk.f32.gmra.mxu2 %vm319_vm1, %v7108_v23  ;;  %6512 = vmatmul.msk.f32.gmra.mxu3 %vm319_vm1, %v7108_v23  ;;  %v1503_v24 = vpop.f32.mrf.mxu0  ;;  %v1712_v25 = vpop.f32.mrf.mxu1 }
 0x3ae   : > { %v1504_v26 = vadd.f32 %v1503_v24, %v8132_v35  ;;  %v1713_v27 = vadd.f32 %v1712_v25, %v8134_v36 }
 0x3af   : > { %5700 = vst [vmem:[%s7428_s14 + $0x898] sm:$0xff] %v5188_v22 }
 0x3b0   : > { %v4453_v28 = vmax.f32 %v1504_v26, 0.0  ;;  %v4454_v29 = vmax.f32 %v1713_v27, 0.0  ;;  %v1921_v30 = vpop.f32.mrf.mxu2  ;;  %v2130_v31 = vpop.f32.mrf.mxu3  ;;  %6317 = vmatmul.msk.f32.gmra.mxu0 %vm319_vm1, %v7108_v23  ;;  %6382 = vmatmul.msk.f32.gmra.mxu1 %vm319_vm1, %v7108_v23  ;;  %v7112_v23 = vld [vmem:[%s7307_s28 + $0x1b8] sm:$0xff] }
 0x3b1   : > { %v1922_v32 = vadd.f32 %v1921_v30, %v8140_v43  ;;  %v2131_v33 = vadd.f32 %v2130_v31, %v8142_v44 }
 0x3b2   : > { %v5195_v34 = vpack.c.bf16 %v4454_v29, %v4453_v28 }
 0x3b3   : > { %v4455_v37 = vmax.f32 %v1922_v32, 0.0  ;;  %v4456_v40 = vmax.f32 %v2131_v33, 0.0 }
 0x3b4   : > { %5707 = vst [vmem:[%s7428_s14 + $0x8d0] sm:$0xff] %v5195_v34 }
 0x3b5   : > { %v5196_v41 = vpack.c.bf16 %v4456_v40, %v4455_v37  ;;  %6448 = vmatmul.msk.f32.gmra.mxu2 %vm319_vm1, %v7109_v42  ;;  %6513 = vmatmul.msk.f32.gmra.mxu3 %vm319_vm1, %v7109_v42  ;;  %v1506_v38 = vpop.f32.mrf.mxu0  ;;  %v1715_v39 = vpop.f32.mrf.mxu1 }
 0x3b6   : > { %v1507_v45 = vadd.f32 %v1506_v38, %v8132_v35  ;;  %v1716_v46 = vadd.f32 %v1715_v39, %v8134_v36 }
 0x3b7   : > { %5708 = vst [vmem:[%s7428_s14 + $0x8d8] sm:$0xff] %v5196_v41 }
 0x3b8   : > { %v4469_v47 = vmax.f32 %v1507_v45, 0.0  ;;  %v4470_v48 = vmax.f32 %v1716_v46, 0.0  ;;  %v1924_v49 = vpop.f32.mrf.mxu2  ;;  %v2133_v50 = vpop.f32.mrf.mxu3  ;;  %6318 = vmatmul.msk.f32.gmra.mxu0 %vm319_vm1, %v7109_v42  ;;  %6383 = vmatmul.msk.f32.gmra.mxu1 %vm319_vm1, %v7109_v42  ;;  %v7113_v42 = vld [vmem:[%s7307_s28 + $0x1c0] sm:$0xff] }
 0x3b9   : > { %v1925_v51 = vadd.f32 %v1924_v49, %v8140_v43  ;;  %v2134_v52 = vadd.f32 %v2133_v50, %v8142_v44 }
 0x3ba   : > { %v5203_v53 = vpack.c.bf16 %v4470_v48, %v4469_v47 }
 0x3bb   : > { %v4471_v54 = vmax.f32 %v1925_v51, 0.0  ;;  %v4472_v55 = vmax.f32 %v2134_v52, 0.0 }
 0x3bc   : > { %5715 = vst [vmem:[%s7428_s14 + $0x910] sm:$0xff] %v5203_v53 }
 0x3bd   : > { %v5204_v56 = vpack.c.bf16 %v4472_v55, %v4471_v54  ;;  %6449 = vmatmul.msk.f32.gmra.mxu2 %vm319_vm1, %v7110_v57  ;;  %6514 = vmatmul.msk.f32.gmra.mxu3 %vm319_vm1, %v7110_v57  ;;  %v1509_v58 = vpop.f32.mrf.mxu0  ;;  %v1718_v59 = vpop.f32.mrf.mxu1 }
 0x3be   : > { %v1510_v60 = vadd.f32 %v1509_v58, %v8132_v35  ;;  %v1719_v61 = vadd.f32 %v1718_v59, %v8134_v36 }
 0x3bf   : > { %5716 = vst [vmem:[%s7428_s14 + $0x918] sm:$0xff] %v5204_v56 }
 0x3c0   : > { %v4485_v62 = vmax.f32 %v1510_v60, 0.0  ;;  %v4486_v63 = vmax.f32 %v1719_v61, 0.0  ;;  %v1927_v0 = vpop.f32.mrf.mxu2  ;;  %v2136_v1 = vpop.f32.mrf.mxu3  ;;  %6319 = vmatmul.msk.f32.gmra.mxu0 %vm319_vm1, %v7110_v57  ;;  %6384 = vmatmul.msk.f32.gmra.mxu1 %vm319_vm1, %v7110_v57  ;;  %v7114_v57 = vld [vmem:[%s7307_s28 + $0x1c8] sm:$0xff] }
 0x3c1   : > { %v1928_v2 = vadd.f32 %v1927_v0, %v8140_v43  ;;  %v2137_v3 = vadd.f32 %v2136_v1, %v8142_v44 }
 0x3c2   : > { %v5211_v4 = vpack.c.bf16 %v4486_v63, %v4485_v62 }
 0x3c3   : > { %v4487_v5 = vmax.f32 %v1928_v2, 0.0  ;;  %v4488_v6 = vmax.f32 %v2137_v3, 0.0 }
 0x3c4   : > { %5723 = vst [vmem:[%s7428_s14 + $0x950] sm:$0xff] %v5211_v4 }
 0x3c5   : > { %v5212_v7 = vpack.c.bf16 %v4488_v6, %v4487_v5  ;;  %6450 = vmatmul.msk.f32.gmra.mxu2 %vm319_vm1, %v7111_v8  ;;  %6515 = vmatmul.msk.f32.gmra.mxu3 %vm319_vm1, %v7111_v8  ;;  %v1512_v9 = vpop.f32.mrf.mxu0  ;;  %v1721_v10 = vpop.f32.mrf.mxu1 }
 0x3c6   : > { %v1513_v11 = vadd.f32 %v1512_v9, %v8132_v35  ;;  %v1722_v12 = vadd.f32 %v1721_v10, %v8134_v36 }
 0x3c7   : > { %5724 = vst [vmem:[%s7428_s14 + $0x958] sm:$0xff] %v5212_v7 }
 0x3c8   : > { %v4501_v13 = vmax.f32 %v1513_v11, 0.0  ;;  %v4502_v14 = vmax.f32 %v1722_v12, 0.0  ;;  %v1930_v15 = vpop.f32.mrf.mxu2  ;;  %v2139_v16 = vpop.f32.mrf.mxu3  ;;  %6320 = vmatmul.msk.f32.gmra.mxu0 %vm319_vm1, %v7111_v8  ;;  %6385 = vmatmul.msk.f32.gmra.mxu1 %vm319_vm1, %v7111_v8  ;;  %v7115_v8 = vld [vmem:[%s7307_s28 + $0x1d0] sm:$0xff] }
 0x3c9   : > { %v1931_v17 = vadd.f32 %v1930_v15, %v8140_v43  ;;  %v2140_v18 = vadd.f32 %v2139_v16, %v8142_v44 }
 0x3ca   : > { %v5219_v19 = vpack.c.bf16 %v4502_v14, %v4501_v13 }
 0x3cb   : > { %v4503_v20 = vmax.f32 %v1931_v17, 0.0  ;;  %v4504_v21 = vmax.f32 %v2140_v18, 0.0 }
 0x3cc   : > { %5731 = vst [vmem:[%s7428_s14 + $0x990] sm:$0xff] %v5219_v19 }
 0x3cd   : > { %v5220_v22 = vpack.c.bf16 %v4504_v21, %v4503_v20  ;;  %6451 = vmatmul.msk.f32.gmra.mxu2 %vm319_vm1, %v7112_v23  ;;  %6516 = vmatmul.msk.f32.gmra.mxu3 %vm319_vm1, %v7112_v23  ;;  %v1515_v24 = vpop.f32.mrf.mxu0  ;;  %v1724_v25 = vpop.f32.mrf.mxu1 }
 0x3ce   : > { %v1516_v26 = vadd.f32 %v1515_v24, %v8132_v35  ;;  %v1725_v27 = vadd.f32 %v1724_v25, %v8134_v36 }
 0x3cf   : > { %5732 = vst [vmem:[%s7428_s14 + $0x998] sm:$0xff] %v5220_v22 }
 0x3d0   : > { %v4517_v28 = vmax.f32 %v1516_v26, 0.0  ;;  %v4518_v29 = vmax.f32 %v1725_v27, 0.0  ;;  %v1933_v30 = vpop.f32.mrf.mxu2  ;;  %v2142_v31 = vpop.f32.mrf.mxu3  ;;  %6321 = vmatmul.msk.f32.gmra.mxu0 %vm319_vm1, %v7112_v23  ;;  %6386 = vmatmul.msk.f32.gmra.mxu1 %vm319_vm1, %v7112_v23  ;;  %v7116_v23 = vld [vmem:[%s7307_s28 + $0x1d8] sm:$0xff] }
 0x3d1   : > { %v1934_v32 = vadd.f32 %v1933_v30, %v8140_v43  ;;  %v2143_v33 = vadd.f32 %v2142_v31, %v8142_v44 }
 0x3d2   : > { %v5227_v34 = vpack.c.bf16 %v4518_v29, %v4517_v28 }
 0x3d3   : > { %v4519_v37 = vmax.f32 %v1934_v32, 0.0  ;;  %v4520_v40 = vmax.f32 %v2143_v33, 0.0 }
 0x3d4   : > { %5739 = vst [vmem:[%s7428_s14 + $0x9d0] sm:$0xff] %v5227_v34 }
 0x3d5   : > { %v5228_v41 = vpack.c.bf16 %v4520_v40, %v4519_v37  ;;  %6452 = vmatmul.msk.f32.gmra.mxu2 %vm319_vm1, %v7113_v42  ;;  %6517 = vmatmul.msk.f32.gmra.mxu3 %vm319_vm1, %v7113_v42  ;;  %v1518_v38 = vpop.f32.mrf.mxu0  ;;  %v1727_v39 = vpop.f32.mrf.mxu1 }
 0x3d6   : > { %v1519_v45 = vadd.f32 %v1518_v38, %v8132_v35  ;;  %v1728_v46 = vadd.f32 %v1727_v39, %v8134_v36 }
 0x3d7   : > { %5740 = vst [vmem:[%s7428_s14 + $0x9d8] sm:$0xff] %v5228_v41 }
 0x3d8   : > { %v4533_v47 = vmax.f32 %v1519_v45, 0.0  ;;  %v4534_v48 = vmax.f32 %v1728_v46, 0.0  ;;  %v1936_v49 = vpop.f32.mrf.mxu2  ;;  %v2145_v50 = vpop.f32.mrf.mxu3  ;;  %6322 = vmatmul.msk.f32.gmra.mxu0 %vm319_vm1, %v7113_v42  ;;  %6387 = vmatmul.msk.f32.gmra.mxu1 %vm319_vm1, %v7113_v42  ;;  %v7117_v42 = vld [vmem:[%s7307_s28 + $0x1e0] sm:$0xff] }
 0x3d9   : > { %v1937_v51 = vadd.f32 %v1936_v49, %v8140_v43  ;;  %v2146_v52 = vadd.f32 %v2145_v50, %v8142_v44 }
 0x3da   : > { %v5235_v53 = vpack.c.bf16 %v4534_v48, %v4533_v47  ;;  %v317_v47 = vld.sshfl [vmem:[#allocation1 + $0x30] sm:$0xff pattern:$0x75316420] }
 0x3db   : > { %v4535_v54 = vmax.f32 %v1937_v51, 0.0  ;;  %v4536_v55 = vmax.f32 %v2146_v52, 0.0  ;;  %v318_v52 = vld.sshfl [vmem:[#allocation1 + $0x38] sm:$0xff pattern:$0x75316420]  ;;  %6915 = vmatpush.msk.msrb.mxu2 %vm512_vm0, %v317_v47 }
 0x3dc   : > { %5747 = vst [vmem:[%s7428_s14 + $0xa10] sm:$0xff] %v5235_v53  ;;  %6980 = vmatpush.msk.msrb.mxu3 %vm512_vm0, %v318_v52 }
 0x3dd   : > { %v5236_v56 = vpack.c.bf16 %v4536_v55, %v4535_v54  ;;  %6453 = vmatmul.msk.f32.gmra.mxu2 %vm319_vm1, %v7114_v57  ;;  %6518 = vmatmul.msk.f32.gmra.mxu3 %vm319_vm1, %v7114_v57  ;;  %v1521_v58 = vpop.f32.mrf.mxu0  ;;  %v1730_v59 = vpop.f32.mrf.mxu1 }
 0x3de   : > { %v1522_v60 = vadd.f32 %v1521_v58, %v8132_v35  ;;  %v1731_v61 = vadd.f32 %v1730_v59, %v8134_v36  ;;  %v7118_v59 = vld [vmem:[%s7307_s28 + $0x1e8] sm:$0xff] }
 0x3df   : > { %5748 = vst [vmem:[%s7428_s14 + $0xa18] sm:$0xff] %v5236_v56 }
 0x3e0   : > { %v4549_v62 = vmax.f32 %v1522_v60, 0.0  ;;  %v4550_v63 = vmax.f32 %v1731_v61, 0.0  ;;  %v1939_v0 = vpop.f32.mrf.mxu2  ;;  %v2148_v1 = vpop.f32.mrf.mxu3  ;;  %6323 = vmatmul.msk.f32.gmra.mxu0 %vm319_vm1, %v7114_v57  ;;  %6388 = vmatmul.msk.f32.gmra.mxu1 %vm319_vm1, %v7114_v57 }
 0x3e1   : > { %v1940_v2 = vadd.f32 %v1939_v0, %v8140_v43  ;;  %v2149_v3 = vadd.f32 %v2148_v1, %v8142_v44  ;;  %v315_v0 = vld.sshfl [vmem:[#allocation1 + $0x20] sm:$0xff pattern:$0x75316420] }
 0x3e2   : > { %v5243_v4 = vpack.c.bf16 %v4550_v63, %v4549_v62  ;;  %6785 = vmatpush.msk.msrb.mxu0 %vm512_vm0, %v315_v0 }
 0x3e3   : > { %v4551_v5 = vmax.f32 %v1940_v2, 0.0  ;;  %v4552_v6 = vmax.f32 %v2149_v3, 0.0 }
 0x3e4   : > { %5755 = vst [vmem:[%s7428_s14 + $0xa50] sm:$0xff] %v5243_v4 }
 0x3e5   : > { %v5244_v7 = vpack.c.bf16 %v4552_v6, %v4551_v5  ;;  %6454 = vmatmul.msk.f32.gmra.mxu2 %vm319_vm1, %v7115_v8  ;;  %6519 = vmatmul.msk.f32.gmra.mxu3 %vm319_vm1, %v7115_v8  ;;  %v1524_v9 = vpop.f32.mrf.mxu0  ;;  %v1733_v10 = vpop.f32.mrf.mxu1  ;;  %v316_v5 = vld.sshfl [vmem:[#allocation1 + $0x28] sm:$0xff pattern:$0x75316420] }
 0x3e6   : > { %v1525_v11 = vadd.f32 %v1524_v9, %v8132_v35  ;;  %v1734_v12 = vadd.f32 %v1733_v10, %v8134_v36  ;;  %6850 = vmatpush.msk.msrb.mxu1 %vm512_vm0, %v316_v5 }
 0x3e7   : > { %5756 = vst [vmem:[%s7428_s14 + $0xa58] sm:$0xff] %v5244_v7 }
 0x3e8   : > { %v4565_v13 = vmax.f32 %v1525_v11, 0.0  ;;  %v4566_v14 = vmax.f32 %v1734_v12, 0.0  ;;  %v1942_v15 = vpop.f32.mrf.mxu2  ;;  %v2151_v16 = vpop.f32.mrf.mxu3  ;;  %6324 = vmatmul.msk.f32.gmra.mxu0 %vm319_vm1, %v7115_v8  ;;  %6389 = vmatmul.msk.f32.gmra.mxu1 %vm319_vm1, %v7115_v8  ;;  %v7119_v12 = vld [vmem:[%s7307_s28 + $0x1f0] sm:$0xff] }
 0x3e9   : > { %v1943_v17 = vadd.f32 %v1942_v15, %v8140_v43  ;;  %v2152_v18 = vadd.f32 %v2151_v16, %v8142_v44 }
 0x3ea   : > { %v5251_v19 = vpack.c.bf16 %v4566_v14, %v4565_v13 }
 0x3eb   : > { %v4567_v20 = vmax.f32 %v1943_v17, 0.0  ;;  %v4568_v21 = vmax.f32 %v2152_v18, 0.0 }
 0x3ec   : > { %5763 = vst [vmem:[%s7428_s14 + $0xa90] sm:$0xff] %v5251_v19 }
 0x3ed   : > { %v5252_v22 = vpack.c.bf16 %v4568_v21, %v4567_v20  ;;  %6455 = vmatmul.msk.f32.gmra.mxu2 %vm319_vm1, %v7116_v23  ;;  %6520 = vmatmul.msk.f32.gmra.mxu3 %vm319_vm1, %v7116_v23  ;;  %v1527_v24 = vpop.f32.mrf.mxu0  ;;  %v1736_v25 = vpop.f32.mrf.mxu1 }
 0x3ee   : > { %v1528_v26 = vadd.f32 %v1527_v24, %v8132_v35  ;;  %v1737_v27 = vadd.f32 %v1736_v25, %v8134_v36 }
 0x3ef   : > { %5764 = vst [vmem:[%s7428_s14 + $0xa98] sm:$0xff] %v5252_v22 }
 0x3f0   : > { %v4581_v28 = vmax.f32 %v1528_v26, 0.0  ;;  %v4582_v29 = vmax.f32 %v1737_v27, 0.0  ;;  %v1945_v30 = vpop.f32.mrf.mxu2  ;;  %v2154_v31 = vpop.f32.mrf.mxu3  ;;  %6325 = vmatmul.msk.f32.gmra.mxu0 %vm319_vm1, %v7116_v23  ;;  %6390 = vmatmul.msk.f32.gmra.mxu1 %vm319_vm1, %v7116_v23  ;;  %v7120_v27 = vld [vmem:[%s7307_s28 + $0x1f8] sm:$0xff] }
 0x3f1   : > { %v1946_v32 = vadd.f32 %v1945_v30, %v8140_v43  ;;  %v2155_v33 = vadd.f32 %v2154_v31, %v8142_v44 }
 0x3f2   : > { %v5259_v34 = vpack.c.bf16 %v4582_v29, %v4581_v28 }
 0x3f3   : > { %v4583_v37 = vmax.f32 %v1946_v32, 0.0  ;;  %v4584_v40 = vmax.f32 %v2155_v33, 0.0 }
 0x3f4   : > { %5771 = vst [vmem:[%s7428_s14 + $0xad0] sm:$0xff] %v5259_v34 }
 0x3f5   : > { %v5260_v41 = vpack.c.bf16 %v4584_v40, %v4583_v37  ;;  %6456 = vmatmul.msk.f32.gmra.mxu2 %vm319_vm1, %v7117_v42  ;;  %6521 = vmatmul.msk.f32.gmra.mxu3 %vm319_vm1, %v7117_v42  ;;  %v1530_v38 = vpop.f32.mrf.mxu0  ;;  %v1739_v39 = vpop.f32.mrf.mxu1 }
 0x3f6   : > { %v1531_v45 = vadd.f32 %v1530_v38, %v8132_v35  ;;  %v1740_v46 = vadd.f32 %v1739_v39, %v8134_v36 }
 0x3f7   : > { %5772 = vst [vmem:[%s7428_s14 + $0xad8] sm:$0xff] %v5260_v41 }
 0x3f8   : > { %v4597_v48 = vmax.f32 %v1531_v45, 0.0  ;;  %v4598_v49 = vmax.f32 %v1740_v46, 0.0  ;;  %v1948_v50 = vpop.f32.mrf.mxu2  ;;  %v2157_v51 = vpop.f32.mrf.mxu3  ;;  %6326 = vmatmul.msk.f32.gmra.mxu0 %vm319_vm1, %v7117_v42  ;;  %6391 = vmatmul.msk.f32.gmra.mxu1 %vm319_vm1, %v7117_v42  ;;  %v7121_v46 = vld [vmem:[%s7307_s28] sm:$0xff] }
 0x3f9   : > { %v1949_v53 = vadd.f32 %v1948_v50, %v8140_v43  ;;  %v2158_v54 = vadd.f32 %v2157_v51, %v8142_v44 }
 0x3fa   : > { %v5267_v55 = vpack.c.bf16 %v4598_v49, %v4597_v48 }
 0x3fb   : > { %v4599_v56 = vmax.f32 %v1949_v53, 0.0  ;;  %v4600_v57 = vmax.f32 %v2158_v54, 0.0 }
 0x3fc   : > { %5779 = vst [vmem:[%s7428_s14 + $0xb10] sm:$0xff] %v5267_v55 }
 0x3fd   : > { %v5268_v58 = vpack.c.bf16 %v4600_v57, %v4599_v56  ;;  %6457 = vmatmul.msk.f32.gmra.mxu2 %vm319_vm1, %v7118_v59  ;;  %6522 = vmatmul.msk.f32.gmra.mxu3 %vm319_vm1, %v7118_v59  ;;  %v1533_v60 = vpop.f32.mrf.mxu0  ;;  %v1742_v61 = vpop.f32.mrf.mxu1 }
 0x3fe   : > { %v1534_v62 = vadd.f32 %v1533_v60, %v8132_v35  ;;  %v1743_v63 = vadd.f32 %v1742_v61, %v8134_v36  ;;  %v7122_v61 = vld [vmem:[%s7307_s28 + $0x8] sm:$0xff] }
 0x3ff   : > { %5780 = vst [vmem:[%s7428_s14 + $0xb18] sm:$0xff] %v5268_v58 }
 0x400   : > { %v4613_v1 = vmax.f32 %v1534_v62, 0.0  ;;  %v4614_v2 = vmax.f32 %v1743_v63, 0.0  ;;  %v1951_v3 = vpop.f32.mrf.mxu2  ;;  %v2160_v4 = vpop.f32.mrf.mxu3  ;;  %6327 = vmatmul.msk.f32.gmra.mxu0 %vm319_vm1, %v7118_v59  ;;  %6392 = vmatmul.msk.f32.gmra.mxu1 %vm319_vm1, %v7118_v59 }
 0x401   : > { %v1952_v6 = vadd.f32 %v1951_v3, %v8140_v43  ;;  %v2161_v7 = vadd.f32 %v2160_v4, %v8142_v44 }
 0x402   : > { %v5275_v8 = vpack.c.bf16 %v4614_v2, %v4613_v1 }
 0x403   : > { %v4615_v9 = vmax.f32 %v1952_v6, 0.0  ;;  %v4616_v10 = vmax.f32 %v2161_v7, 0.0 }
 0x404   : > { %5787 = vst [vmem:[%s7428_s14 + $0xb50] sm:$0xff] %v5275_v8 }
 0x405   : > { %v5276_v11 = vpack.c.bf16 %v4616_v10, %v4615_v9  ;;  %6458 = vmatmul.msk.f32.gmra.mxu2 %vm319_vm1, %v7119_v12  ;;  %6523 = vmatmul.msk.f32.gmra.mxu3 %vm319_vm1, %v7119_v12  ;;  %v1536_v13 = vpop.f32.mrf.mxu0  ;;  %v1745_v14 = vpop.f32.mrf.mxu1 }
 0x406   : > { %v1537_v15 = vadd.f32 %v1536_v13, %v8132_v35  ;;  %v1746_v16 = vadd.f32 %v1745_v14, %v8134_v36 }
 0x407   : > { %5788 = vst [vmem:[%s7428_s14 + $0xb58] sm:$0xff] %v5276_v11 }
 0x408   : > { %v4629_v17 = vmax.f32 %v1537_v15, 0.0  ;;  %v4630_v18 = vmax.f32 %v1746_v16, 0.0  ;;  %v1954_v19 = vpop.f32.mrf.mxu2  ;;  %v2163_v20 = vpop.f32.mrf.mxu3  ;;  %6328 = vmatmul.msk.f32.gmra.mxu0 %vm319_vm1, %v7119_v12  ;;  %6393 = vmatmul.msk.f32.gmra.mxu1 %vm319_vm1, %v7119_v12  ;;  %v7123_v12 = vld [vmem:[%s7307_s28 + $0x10] sm:$0xff] }
 0x409   : > { %v1955_v21 = vadd.f32 %v1954_v19, %v8140_v43  ;;  %v2164_v22 = vadd.f32 %v2163_v20, %v8142_v44 }
 0x40a   : > { %v5283_v23 = vpack.c.bf16 %v4630_v18, %v4629_v17 }
 0x40b   : > { %v4631_v24 = vmax.f32 %v1955_v21, 0.0  ;;  %v4632_v25 = vmax.f32 %v2164_v22, 0.0 }
 0x40c   : > { %5795 = vst [vmem:[%s7428_s14 + $0xb90] sm:$0xff] %v5283_v23 }
 0x40d   : > { %v5284_v26 = vpack.c.bf16 %v4632_v25, %v4631_v24  ;;  %6459 = vmatmul.msk.f32.gmra.mxu2 %vm319_vm1, %v7120_v27  ;;  %6524 = vmatmul.msk.f32.gmra.mxu3 %vm319_vm1, %v7120_v27  ;;  %v1539_v28 = vpop.f32.mrf.mxu0  ;;  %v1748_v29 = vpop.f32.mrf.mxu1 }
 0x40e   : > { %v1540_v30 = vadd.f32 %v1539_v28, %v8132_v35  ;;  %v1749_v31 = vadd.f32 %v1748_v29, %v8134_v36 }
 0x40f   : > { %5796 = vst [vmem:[%s7428_s14 + $0xb98] sm:$0xff] %v5284_v26 }
 0x410   : > { %v4645_v32 = vmax.f32 %v1540_v30, 0.0  ;;  %v4646_v33 = vmax.f32 %v1749_v31, 0.0  ;;  %v1957_v34 = vpop.f32.mrf.mxu2  ;;  %v2166_v37 = vpop.f32.mrf.mxu3  ;;  %6329 = vmatmul.msk.f32.gmra.mxu0 %vm319_vm1, %v7120_v27  ;;  %6394 = vmatmul.msk.f32.gmra.mxu1 %vm319_vm1, %v7120_v27  ;;  %v7124_v27 = vld [vmem:[%s7307_s28 + $0x18] sm:$0xff] }
 0x411   : > { %v1958_v40 = vadd.f32 %v1957_v34, %v8140_v43  ;;  %v2167_v41 = vadd.f32 %v2166_v37, %v8142_v44 }
 0x412   : > { %v5291_v42 = vpack.c.bf16 %v4646_v33, %v4645_v32 }
 0x413   : > { %v4647_v38 = vmax.f32 %v1958_v40, 0.0  ;;  %v4648_v39 = vmax.f32 %v2167_v41, 0.0 }
 0x414   : > { %5803 = vst [vmem:[%s7428_s14 + $0xbd0] sm:$0xff] %v5291_v42 }
 0x415   : > { %v5292_v45 = vpack.c.bf16 %v4648_v39, %v4647_v38  ;;  %6656 = vmatmul.msk.f32.vlgmr.msra.gmra.mxu2 %vm319_vm1, %v7121_v46  ;;  %6721 = vmatmul.msk.f32.vlgmr.msra.gmra.mxu3 %vm319_vm1, %v7121_v46  ;;  %v1542_v47 = vpop.f32.mrf.mxu0  ;;  %v1751_v48 = vpop.f32.mrf.mxu1 }
 0x416   : > { %v1543_v49 = vadd.f32 %v1542_v47, %v8132_v35  ;;  %v1752_v50 = vadd.f32 %v1751_v48, %v8134_v36 }
 0x417   : > { %5804 = vst [vmem:[%s7428_s14 + $0xbd8] sm:$0xff] %v5292_v45 }
 0x418   : > { %v4661_v51 = vmax.f32 %v1543_v49, 0.0  ;;  %v4662_v52 = vmax.f32 %v1752_v50, 0.0  ;;  %v1960_v53 = vpop.f32.mrf.mxu2  ;;  %v2169_v54 = vpop.f32.mrf.mxu3  ;;  %6526 = vmatmul.msk.f32.vlgmr.msra.gmra.mxu0 %vm319_vm1, %v7121_v46  ;;  %6591 = vmatmul.msk.f32.vlgmr.msra.gmra.mxu1 %vm319_vm1, %v7121_v46  ;;  %v7125_v46 = vld [vmem:[%s7307_s28 + $0x20] sm:$0xff] }
 0x419   : > { %v1961_v55 = vadd.f32 %v1960_v53, %v8140_v43  ;;  %v2170_v56 = vadd.f32 %v2169_v54, %v8142_v44 }
 0x41a   : > { %v5299_v57 = vpack.c.bf16 %v4662_v52, %v4661_v51 }
 0x41b   : > { %v4663_v58 = vmax.f32 %v1961_v55, 0.0  ;;  %v4664_v59 = vmax.f32 %v2170_v56, 0.0 }
 0x41c   : > { %5811 = vst [vmem:[%s7428_s14 + $0xc10] sm:$0xff] %v5299_v57 }
 0x41d   : > { %v5300_v60 = vpack.c.bf16 %v4664_v59, %v4663_v58  ;;  %6657 = vmatmul.msk.f32.gmra.mxu2 %vm319_vm1, %v7122_v61  ;;  %6722 = vmatmul.msk.f32.gmra.mxu3 %vm319_vm1, %v7122_v61  ;;  %v1545_v62 = vpop.f32.mrf.mxu0  ;;  %v1754_v63 = vpop.f32.mrf.mxu1 }
 0x41e   : > { %v1546_v0 = vadd.f32 %v1545_v62, %v8132_v35  ;;  %v1755_v1 = vadd.f32 %v1754_v63, %v8134_v36 }
 0x41f   : > { %5812 = vst [vmem:[%s7428_s14 + $0xc18] sm:$0xff] %v5300_v60 }
 0x420   : > { %v4677_v2 = vmax.f32 %v1546_v0, 0.0  ;;  %v4678_v3 = vmax.f32 %v1755_v1, 0.0  ;;  %v1963_v4 = vpop.f32.mrf.mxu2  ;;  %v2172_v5 = vpop.f32.mrf.mxu3  ;;  %6527 = vmatmul.msk.f32.gmra.mxu0 %vm319_vm1, %v7122_v61  ;;  %6592 = vmatmul.msk.f32.gmra.mxu1 %vm319_vm1, %v7122_v61  ;;  %v7126_v61 = vld [vmem:[%s7307_s28 + $0x28] sm:$0xff] }
 0x421   : > { %v1964_v6 = vadd.f32 %v1963_v4, %v8140_v43  ;;  %v2173_v7 = vadd.f32 %v2172_v5, %v8142_v44 }
 0x422   : > { %v5307_v8 = vpack.c.bf16 %v4678_v3, %v4677_v2 }
 0x423   : > { %v4679_v9 = vmax.f32 %v1964_v6, 0.0  ;;  %v4680_v10 = vmax.f32 %v2173_v7, 0.0 }
 0x424   : > { %5819 = vst [vmem:[%s7428_s14 + $0xc50] sm:$0xff] %v5307_v8 }
 0x425   : > { %v5308_v11 = vpack.c.bf16 %v4680_v10, %v4679_v9  ;;  %6658 = vmatmul.msk.f32.gmra.mxu2 %vm319_vm1, %v7123_v12  ;;  %6723 = vmatmul.msk.f32.gmra.mxu3 %vm319_vm1, %v7123_v12  ;;  %v1548_v13 = vpop.f32.mrf.mxu0  ;;  %v1757_v14 = vpop.f32.mrf.mxu1 }
 0x426   : > { %v1549_v15 = vadd.f32 %v1548_v13, %v8132_v35  ;;  %v1758_v16 = vadd.f32 %v1757_v14, %v8134_v36 }
 0x427   : > { %5820 = vst [vmem:[%s7428_s14 + $0xc58] sm:$0xff] %v5308_v11 }
 0x428   : > { %v4693_v17 = vmax.f32 %v1549_v15, 0.0  ;;  %v4694_v18 = vmax.f32 %v1758_v16, 0.0  ;;  %v1966_v19 = vpop.f32.mrf.mxu2  ;;  %v2175_v20 = vpop.f32.mrf.mxu3  ;;  %6528 = vmatmul.msk.f32.gmra.mxu0 %vm319_vm1, %v7123_v12  ;;  %6593 = vmatmul.msk.f32.gmra.mxu1 %vm319_vm1, %v7123_v12  ;;  %v7127_v12 = vld [vmem:[%s7307_s28 + $0x30] sm:$0xff] }
 0x429   : > { %v1967_v21 = vadd.f32 %v1966_v19, %v8140_v43  ;;  %v2176_v22 = vadd.f32 %v2175_v20, %v8142_v44 }
 0x42a   : > { %v5315_v23 = vpack.c.bf16 %v4694_v18, %v4693_v17 }
 0x42b   : > { %v4695_v24 = vmax.f32 %v1967_v21, 0.0  ;;  %v4696_v25 = vmax.f32 %v2176_v22, 0.0 }
 0x42c   : > { %5827 = vst [vmem:[%s7428_s14 + $0xc90] sm:$0xff] %v5315_v23 }
 0x42d   : > { %v5316_v26 = vpack.c.bf16 %v4696_v25, %v4695_v24  ;;  %6659 = vmatmul.msk.f32.gmra.mxu2 %vm319_vm1, %v7124_v27  ;;  %6724 = vmatmul.msk.f32.gmra.mxu3 %vm319_vm1, %v7124_v27  ;;  %v1551_v28 = vpop.f32.mrf.mxu0  ;;  %v1760_v29 = vpop.f32.mrf.mxu1 }
 0x42e   : > { %v1552_v30 = vadd.f32 %v1551_v28, %v8132_v35  ;;  %v1761_v31 = vadd.f32 %v1760_v29, %v8134_v36 }
 0x42f   : > { %5828 = vst [vmem:[%s7428_s14 + $0xc98] sm:$0xff] %v5316_v26 }
 0x430   : > { %v4709_v32 = vmax.f32 %v1552_v30, 0.0  ;;  %v4710_v33 = vmax.f32 %v1761_v31, 0.0  ;;  %v1969_v34 = vpop.f32.mrf.mxu2  ;;  %v2178_v37 = vpop.f32.mrf.mxu3  ;;  %6529 = vmatmul.msk.f32.gmra.mxu0 %vm319_vm1, %v7124_v27  ;;  %6594 = vmatmul.msk.f32.gmra.mxu1 %vm319_vm1, %v7124_v27  ;;  %v7128_v27 = vld [vmem:[%s7307_s28 + $0x38] sm:$0xff] }
 0x431   : > { %v1970_v40 = vadd.f32 %v1969_v34, %v8140_v43  ;;  %v2179_v41 = vadd.f32 %v2178_v37, %v8142_v44 }
 0x432   : > { %v5323_v42 = vpack.c.bf16 %v4710_v33, %v4709_v32 }
 0x433   : > { %v4711_v38 = vmax.f32 %v1970_v40, 0.0  ;;  %v4712_v39 = vmax.f32 %v2179_v41, 0.0 }
 0x434   : > { %5835 = vst [vmem:[%s7428_s14 + $0xcd0] sm:$0xff] %v5323_v42 }
 0x435   : > { %v5324_v45 = vpack.c.bf16 %v4712_v39, %v4711_v38  ;;  %6660 = vmatmul.msk.f32.gmra.mxu2 %vm319_vm1, %v7125_v46  ;;  %6725 = vmatmul.msk.f32.gmra.mxu3 %vm319_vm1, %v7125_v46  ;;  %v1554_v47 = vpop.f32.mrf.mxu0  ;;  %v1763_v48 = vpop.f32.mrf.mxu1 }
 0x436   : > { %v1555_v49 = vadd.f32 %v1554_v47, %v8132_v35  ;;  %v1764_v50 = vadd.f32 %v1763_v48, %v8134_v36 }
 0x437   : > { %5836 = vst [vmem:[%s7428_s14 + $0xcd8] sm:$0xff] %v5324_v45 }
 0x438   : > { %v4725_v51 = vmax.f32 %v1555_v49, 0.0  ;;  %v4726_v52 = vmax.f32 %v1764_v50, 0.0  ;;  %v1972_v53 = vpop.f32.mrf.mxu2  ;;  %v2181_v54 = vpop.f32.mrf.mxu3  ;;  %6530 = vmatmul.msk.f32.gmra.mxu0 %vm319_vm1, %v7125_v46  ;;  %6595 = vmatmul.msk.f32.gmra.mxu1 %vm319_vm1, %v7125_v46  ;;  %v7129_v46 = vld [vmem:[%s7307_s28 + $0x40] sm:$0xff] }
 0x439   : > { %v1973_v55 = vadd.f32 %v1972_v53, %v8140_v43  ;;  %v2182_v56 = vadd.f32 %v2181_v54, %v8142_v44 }
 0x43a   : > { %v5331_v57 = vpack.c.bf16 %v4726_v52, %v4725_v51 }
 0x43b   : > { %v4727_v58 = vmax.f32 %v1973_v55, 0.0  ;;  %v4728_v59 = vmax.f32 %v2182_v56, 0.0 }
 0x43c   : > { %5843 = vst [vmem:[%s7428_s14 + $0xd10] sm:$0xff] %v5331_v57 }
 0x43d   : > { %v5332_v60 = vpack.c.bf16 %v4728_v59, %v4727_v58  ;;  %6661 = vmatmul.msk.f32.gmra.mxu2 %vm319_vm1, %v7126_v61  ;;  %6726 = vmatmul.msk.f32.gmra.mxu3 %vm319_vm1, %v7126_v61  ;;  %v1557_v62 = vpop.f32.mrf.mxu0  ;;  %v1766_v63 = vpop.f32.mrf.mxu1 }
 0x43e   : > { %v1558_v0 = vadd.f32 %v1557_v62, %v8132_v35  ;;  %v1767_v1 = vadd.f32 %v1766_v63, %v8134_v36 }
 0x43f   : > { %5844 = vst [vmem:[%s7428_s14 + $0xd18] sm:$0xff] %v5332_v60 }
 0x440   : > { %v4741_v2 = vmax.f32 %v1558_v0, 0.0  ;;  %v4742_v3 = vmax.f32 %v1767_v1, 0.0  ;;  %v1975_v4 = vpop.f32.mrf.mxu2  ;;  %v2184_v5 = vpop.f32.mrf.mxu3  ;;  %6531 = vmatmul.msk.f32.gmra.mxu0 %vm319_vm1, %v7126_v61  ;;  %6596 = vmatmul.msk.f32.gmra.mxu1 %vm319_vm1, %v7126_v61  ;;  %v7130_v61 = vld [vmem:[%s7307_s28 + $0x48] sm:$0xff] }
 0x441   : > { %v1976_v6 = vadd.f32 %v1975_v4, %v8140_v43  ;;  %v2185_v7 = vadd.f32 %v2184_v5, %v8142_v44 }
 0x442   : > { %v5339_v8 = vpack.c.bf16 %v4742_v3, %v4741_v2 }
 0x443   : > { %v4743_v9 = vmax.f32 %v1976_v6, 0.0  ;;  %v4744_v10 = vmax.f32 %v2185_v7, 0.0 }
 0x444   : > { %5851 = vst [vmem:[%s7428_s14 + $0xd50] sm:$0xff] %v5339_v8 }
 0x445   : > { %v5340_v11 = vpack.c.bf16 %v4744_v10, %v4743_v9  ;;  %6662 = vmatmul.msk.f32.gmra.mxu2 %vm319_vm1, %v7127_v12  ;;  %6727 = vmatmul.msk.f32.gmra.mxu3 %vm319_vm1, %v7127_v12  ;;  %v1560_v13 = vpop.f32.mrf.mxu0  ;;  %v1769_v14 = vpop.f32.mrf.mxu1 }
 0x446   : > { %v1561_v15 = vadd.f32 %v1560_v13, %v8132_v35  ;;  %v1770_v16 = vadd.f32 %v1769_v14, %v8134_v36 }
 0x447   : > { %5852 = vst [vmem:[%s7428_s14 + $0xd58] sm:$0xff] %v5340_v11 }
 0x448   : > { %v4757_v17 = vmax.f32 %v1561_v15, 0.0  ;;  %v4758_v18 = vmax.f32 %v1770_v16, 0.0  ;;  %v1978_v19 = vpop.f32.mrf.mxu2  ;;  %v2187_v20 = vpop.f32.mrf.mxu3  ;;  %6532 = vmatmul.msk.f32.gmra.mxu0 %vm319_vm1, %v7127_v12  ;;  %6597 = vmatmul.msk.f32.gmra.mxu1 %vm319_vm1, %v7127_v12  ;;  %v7131_v12 = vld [vmem:[%s7307_s28 + $0x50] sm:$0xff] }
 0x449   : > { %v1979_v21 = vadd.f32 %v1978_v19, %v8140_v43  ;;  %v2188_v22 = vadd.f32 %v2187_v20, %v8142_v44 }
 0x44a   : > { %v5347_v23 = vpack.c.bf16 %v4758_v18, %v4757_v17 }
 0x44b   : > { %v4759_v24 = vmax.f32 %v1979_v21, 0.0  ;;  %v4760_v25 = vmax.f32 %v2188_v22, 0.0 }
 0x44c   : > { %5859 = vst [vmem:[%s7428_s14 + $0xd90] sm:$0xff] %v5347_v23 }
 0x44d   : > { %v5348_v26 = vpack.c.bf16 %v4760_v25, %v4759_v24  ;;  %6663 = vmatmul.msk.f32.gmra.mxu2 %vm319_vm1, %v7128_v27  ;;  %6728 = vmatmul.msk.f32.gmra.mxu3 %vm319_vm1, %v7128_v27  ;;  %v1563_v28 = vpop.f32.mrf.mxu0  ;;  %v1772_v29 = vpop.f32.mrf.mxu1 }
 0x44e   : > { %v1564_v30 = vadd.f32 %v1563_v28, %v8132_v35  ;;  %v1773_v31 = vadd.f32 %v1772_v29, %v8134_v36 }
 0x44f   : > { %5860 = vst [vmem:[%s7428_s14 + $0xd98] sm:$0xff] %v5348_v26 }
 0x450   : > { %v4773_v32 = vmax.f32 %v1564_v30, 0.0  ;;  %v4774_v33 = vmax.f32 %v1773_v31, 0.0  ;;  %v1981_v34 = vpop.f32.mrf.mxu2  ;;  %v2190_v37 = vpop.f32.mrf.mxu3  ;;  %6533 = vmatmul.msk.f32.gmra.mxu0 %vm319_vm1, %v7128_v27  ;;  %6598 = vmatmul.msk.f32.gmra.mxu1 %vm319_vm1, %v7128_v27  ;;  %v7132_v27 = vld [vmem:[%s7307_s28 + $0x58] sm:$0xff] }
 0x451   : > { %v1982_v40 = vadd.f32 %v1981_v34, %v8140_v43  ;;  %v2191_v41 = vadd.f32 %v2190_v37, %v8142_v44 }
 0x452   : > { %v5355_v42 = vpack.c.bf16 %v4774_v33, %v4773_v32 }
 0x453   : > { %v4775_v38 = vmax.f32 %v1982_v40, 0.0  ;;  %v4776_v39 = vmax.f32 %v2191_v41, 0.0 }
 0x454   : > { %5867 = vst [vmem:[%s7428_s14 + $0xdd0] sm:$0xff] %v5355_v42 }
 0x455   : > { %v5356_v45 = vpack.c.bf16 %v4776_v39, %v4775_v38  ;;  %6664 = vmatmul.msk.f32.gmra.mxu2 %vm319_vm1, %v7129_v46  ;;  %6729 = vmatmul.msk.f32.gmra.mxu3 %vm319_vm1, %v7129_v46  ;;  %v1566_v47 = vpop.f32.mrf.mxu0  ;;  %v1775_v48 = vpop.f32.mrf.mxu1 }
 0x456   : > { %v1567_v49 = vadd.f32 %v1566_v47, %v8132_v35  ;;  %v1776_v50 = vadd.f32 %v1775_v48, %v8134_v36 }
 0x457   : > { %5868 = vst [vmem:[%s7428_s14 + $0xdd8] sm:$0xff] %v5356_v45 }
 0x458   : > { %v4789_v51 = vmax.f32 %v1567_v49, 0.0  ;;  %v4790_v52 = vmax.f32 %v1776_v50, 0.0  ;;  %v1984_v53 = vpop.f32.mrf.mxu2  ;;  %v2193_v54 = vpop.f32.mrf.mxu3  ;;  %6534 = vmatmul.msk.f32.gmra.mxu0 %vm319_vm1, %v7129_v46  ;;  %6599 = vmatmul.msk.f32.gmra.mxu1 %vm319_vm1, %v7129_v46  ;;  %v7133_v46 = vld [vmem:[%s7307_s28 + $0x60] sm:$0xff] }
 0x459   : > { %v1985_v55 = vadd.f32 %v1984_v53, %v8140_v43  ;;  %v2194_v56 = vadd.f32 %v2193_v54, %v8142_v44 }
 0x45a   : > { %v5363_v57 = vpack.c.bf16 %v4790_v52, %v4789_v51 }
 0x45b   : > { %v4791_v58 = vmax.f32 %v1985_v55, 0.0  ;;  %v4792_v59 = vmax.f32 %v2194_v56, 0.0 }
 0x45c   : > { %5875 = vst [vmem:[%s7428_s14 + $0xe10] sm:$0xff] %v5363_v57 }
 0x45d   : > { %v5364_v60 = vpack.c.bf16 %v4792_v59, %v4791_v58  ;;  %6665 = vmatmul.msk.f32.gmra.mxu2 %vm319_vm1, %v7130_v61  ;;  %6730 = vmatmul.msk.f32.gmra.mxu3 %vm319_vm1, %v7130_v61  ;;  %v1569_v62 = vpop.f32.mrf.mxu0  ;;  %v1778_v63 = vpop.f32.mrf.mxu1 }
 0x45e   : > { %v1570_v0 = vadd.f32 %v1569_v62, %v8132_v35  ;;  %v1779_v1 = vadd.f32 %v1778_v63, %v8134_v36 }
 0x45f   : > { %5876 = vst [vmem:[%s7428_s14 + $0xe18] sm:$0xff] %v5364_v60 }
 0x460   : > { %v4805_v2 = vmax.f32 %v1570_v0, 0.0  ;;  %v4806_v3 = vmax.f32 %v1779_v1, 0.0  ;;  %v1987_v4 = vpop.f32.mrf.mxu2  ;;  %v2196_v5 = vpop.f32.mrf.mxu3  ;;  %6535 = vmatmul.msk.f32.gmra.mxu0 %vm319_vm1, %v7130_v61  ;;  %6600 = vmatmul.msk.f32.gmra.mxu1 %vm319_vm1, %v7130_v61  ;;  %v7134_v61 = vld [vmem:[%s7307_s28 + $0x68] sm:$0xff] }
 0x461   : > { %v1988_v6 = vadd.f32 %v1987_v4, %v8140_v43  ;;  %v2197_v7 = vadd.f32 %v2196_v5, %v8142_v44 }
 0x462   : > { %v5371_v8 = vpack.c.bf16 %v4806_v3, %v4805_v2 }
 0x463   : > { %v4807_v9 = vmax.f32 %v1988_v6, 0.0  ;;  %v4808_v10 = vmax.f32 %v2197_v7, 0.0 }
 0x464   : > { %5883 = vst [vmem:[%s7428_s14 + $0xe50] sm:$0xff] %v5371_v8 }
 0x465   : > { %v5372_v11 = vpack.c.bf16 %v4808_v10, %v4807_v9  ;;  %6666 = vmatmul.msk.f32.gmra.mxu2 %vm319_vm1, %v7131_v12  ;;  %6731 = vmatmul.msk.f32.gmra.mxu3 %vm319_vm1, %v7131_v12  ;;  %v1572_v13 = vpop.f32.mrf.mxu0  ;;  %v1781_v14 = vpop.f32.mrf.mxu1 }
 0x466   : > { %v1573_v15 = vadd.f32 %v1572_v13, %v8132_v35  ;;  %v1782_v16 = vadd.f32 %v1781_v14, %v8134_v36 }
 0x467   : > { %5884 = vst [vmem:[%s7428_s14 + $0xe58] sm:$0xff] %v5372_v11 }
 0x468   : > { %v4821_v17 = vmax.f32 %v1573_v15, 0.0  ;;  %v4822_v18 = vmax.f32 %v1782_v16, 0.0  ;;  %v1990_v19 = vpop.f32.mrf.mxu2  ;;  %v2199_v20 = vpop.f32.mrf.mxu3  ;;  %6536 = vmatmul.msk.f32.gmra.mxu0 %vm319_vm1, %v7131_v12  ;;  %6601 = vmatmul.msk.f32.gmra.mxu1 %vm319_vm1, %v7131_v12  ;;  %v7135_v12 = vld [vmem:[%s7307_s28 + $0x70] sm:$0xff] }
 0x469   : > { %v1991_v21 = vadd.f32 %v1990_v19, %v8140_v43  ;;  %v2200_v22 = vadd.f32 %v2199_v20, %v8142_v44 }
 0x46a   : > { %v5379_v23 = vpack.c.bf16 %v4822_v18, %v4821_v17 }
 0x46b   : > { %v4823_v24 = vmax.f32 %v1991_v21, 0.0  ;;  %v4824_v25 = vmax.f32 %v2200_v22, 0.0 }
 0x46c   : > { %5891 = vst [vmem:[%s7428_s14 + $0xe90] sm:$0xff] %v5379_v23 }
 0x46d   : > { %v5380_v26 = vpack.c.bf16 %v4824_v25, %v4823_v24  ;;  %6667 = vmatmul.msk.f32.gmra.mxu2 %vm319_vm1, %v7132_v27  ;;  %6732 = vmatmul.msk.f32.gmra.mxu3 %vm319_vm1, %v7132_v27  ;;  %v1575_v28 = vpop.f32.mrf.mxu0  ;;  %v1784_v29 = vpop.f32.mrf.mxu1 }
 0x46e   : > { %v1576_v30 = vadd.f32 %v1575_v28, %v8132_v35  ;;  %v1785_v31 = vadd.f32 %v1784_v29, %v8134_v36 }
 0x46f   : > { %5892 = vst [vmem:[%s7428_s14 + $0xe98] sm:$0xff] %v5380_v26 }
 0x470   : > { %v4837_v32 = vmax.f32 %v1576_v30, 0.0  ;;  %v4838_v33 = vmax.f32 %v1785_v31, 0.0  ;;  %v1993_v34 = vpop.f32.mrf.mxu2  ;;  %v2202_v37 = vpop.f32.mrf.mxu3  ;;  %6537 = vmatmul.msk.f32.gmra.mxu0 %vm319_vm1, %v7132_v27  ;;  %6602 = vmatmul.msk.f32.gmra.mxu1 %vm319_vm1, %v7132_v27  ;;  %v7136_v27 = vld [vmem:[%s7307_s28 + $0x78] sm:$0xff] }
 0x471   : > { %v1994_v40 = vadd.f32 %v1993_v34, %v8140_v43  ;;  %v2203_v41 = vadd.f32 %v2202_v37, %v8142_v44 }
 0x472   : > { %v5387_v42 = vpack.c.bf16 %v4838_v33, %v4837_v32  ;;  %v249_v32 = vld [vmem:[%s10205_s2 + $0x8] sm:$0xff] }
 0x473   : > { %v4839_v38 = vmax.f32 %v1994_v40, 0.0  ;;  %v4840_v39 = vmax.f32 %v2203_v41, 0.0 }
 0x474   : > { %5899 = vst [vmem:[%s7428_s14 + $0xed0] sm:$0xff] %v5387_v42  ;;  %v8851_v42 = vperm.slane %v249_v32, 0 }
 0x475   : > { %v5388_v45 = vpack.c.bf16 %v4840_v39, %v4839_v38  ;;  %6668 = vmatmul.msk.f32.gmra.mxu2 %vm319_vm1, %v7133_v46  ;;  %6733 = vmatmul.msk.f32.gmra.mxu3 %vm319_vm1, %v7133_v46  ;;  %v1578_v47 = vpop.f32.mrf.mxu0  ;;  %v1787_v48 = vpop.f32.mrf.mxu1  ;;  %v8853_v38 = vperm.slane %v249_v32, 1 }
 0x476   : > { %v1579_v49 = vadd.f32 %v1578_v47, %v8132_v35  ;;  %v1788_v50 = vadd.f32 %v1787_v48, %v8134_v36  ;;  %v7137_v47 = vld [vmem:[%s7307_s28 + $0x80] sm:$0xff] }
 0x477   : > { %5900 = vst [vmem:[%s7428_s14 + $0xed8] sm:$0xff] %v5388_v45 }
 0x478   : > { %v4853_v51 = vmax.f32 %v1579_v49, 0.0  ;;  %v4854_v52 = vmax.f32 %v1788_v50, 0.0  ;;  %v1996_v53 = vpop.f32.mrf.mxu2  ;;  %v2205_v54 = vpop.f32.mrf.mxu3  ;;  %6538 = vmatmul.msk.f32.gmra.mxu0 %vm319_vm1, %v7133_v46  ;;  %6603 = vmatmul.msk.f32.gmra.mxu1 %vm319_vm1, %v7133_v46 }
 0x479   : > { %v1997_v55 = vadd.f32 %v1996_v53, %v8140_v43  ;;  %v2206_v56 = vadd.f32 %v2205_v54, %v8142_v44 }
 0x47a   : > { %v5395_v57 = vpack.c.bf16 %v4854_v52, %v4853_v51 }
 0x47b   : > { %v4855_v58 = vmax.f32 %v1997_v55, 0.0  ;;  %v4856_v59 = vmax.f32 %v2206_v56, 0.0 }
 0x47c   : > { %5907 = vst [vmem:[%s7428_s14 + $0xf10] sm:$0xff] %v5395_v57 }
 0x47d   : > { %v5396_v60 = vpack.c.bf16 %v4856_v59, %v4855_v58  ;;  %6669 = vmatmul.msk.f32.gmra.mxu2 %vm319_vm1, %v7134_v61  ;;  %6734 = vmatmul.msk.f32.gmra.mxu3 %vm319_vm1, %v7134_v61  ;;  %v1581_v62 = vpop.f32.mrf.mxu0  ;;  %v1790_v63 = vpop.f32.mrf.mxu1 }
 0x47e   : > { %v1582_v0 = vadd.f32 %v1581_v62, %v8132_v35  ;;  %v1791_v1 = vadd.f32 %v1790_v63, %v8134_v36  ;;  %v7138_v62 = vld [vmem:[%s7307_s28 + $0x88] sm:$0xff] }
 0x47f   : > { %5908 = vst [vmem:[%s7428_s14 + $0xf18] sm:$0xff] %v5396_v60 }
 0x480   : > { %v4869_v2 = vmax.f32 %v1582_v0, 0.0  ;;  %v4870_v3 = vmax.f32 %v1791_v1, 0.0  ;;  %v1999_v4 = vpop.f32.mrf.mxu2  ;;  %v2208_v5 = vpop.f32.mrf.mxu3  ;;  %6539 = vmatmul.msk.f32.gmra.mxu0 %vm319_vm1, %v7134_v61  ;;  %6604 = vmatmul.msk.f32.gmra.mxu1 %vm319_vm1, %v7134_v61 }
 0x481   : > { %v2000_v6 = vadd.f32 %v1999_v4, %v8140_v43  ;;  %v2209_v7 = vadd.f32 %v2208_v5, %v8142_v44 }
 0x482   : > { %v5403_v8 = vpack.c.bf16 %v4870_v3, %v4869_v2 }
 0x483   : > { %v4871_v9 = vmax.f32 %v2000_v6, 0.0  ;;  %v4872_v10 = vmax.f32 %v2209_v7, 0.0 }
 0x484   : > { %5915 = vst [vmem:[%s7428_s14 + $0xf50] sm:$0xff] %v5403_v8 }
 0x485   : > { %v5404_v11 = vpack.c.bf16 %v4872_v10, %v4871_v9  ;;  %6670 = vmatmul.msk.f32.gmra.mxu2 %vm319_vm1, %v7135_v12  ;;  %6735 = vmatmul.msk.f32.gmra.mxu3 %vm319_vm1, %v7135_v12  ;;  %v1584_v13 = vpop.f32.mrf.mxu0  ;;  %v1793_v14 = vpop.f32.mrf.mxu1 }
 0x486   : > { %v1585_v15 = vadd.f32 %v1584_v13, %v8132_v35  ;;  %v1794_v16 = vadd.f32 %v1793_v14, %v8134_v36  ;;  %v7139_v13 = vld [vmem:[%s7307_s28 + $0x90] sm:$0xff] }
 0x487   : > { %5916 = vst [vmem:[%s7428_s14 + $0xf58] sm:$0xff] %v5404_v11 }
 0x488   : > { %v4885_v17 = vmax.f32 %v1585_v15, 0.0  ;;  %v4886_v18 = vmax.f32 %v1794_v16, 0.0  ;;  %v2002_v19 = vpop.f32.mrf.mxu2  ;;  %v2211_v20 = vpop.f32.mrf.mxu3  ;;  %6540 = vmatmul.msk.f32.gmra.mxu0 %vm319_vm1, %v7135_v12  ;;  %6605 = vmatmul.msk.f32.gmra.mxu1 %vm319_vm1, %v7135_v12 }
 0x489   : > { %v2003_v21 = vadd.f32 %v2002_v19, %v8140_v43  ;;  %v2212_v22 = vadd.f32 %v2211_v20, %v8142_v44 }
 0x48a   : > { %v5411_v23 = vpack.c.bf16 %v4886_v18, %v4885_v17 }
 0x48b   : > { %v4887_v24 = vmax.f32 %v2003_v21, 0.0  ;;  %v4888_v25 = vmax.f32 %v2212_v22, 0.0 }
 0x48c   : > { %5923 = vst [vmem:[%s7428_s14 + $0xf90] sm:$0xff] %v5411_v23 }
 0x48d   : > { %v5412_v26 = vpack.c.bf16 %v4888_v25, %v4887_v24  ;;  %6671 = vmatmul.msk.f32.gmra.mxu2 %vm319_vm1, %v7136_v27  ;;  %6736 = vmatmul.msk.f32.gmra.mxu3 %vm319_vm1, %v7136_v27  ;;  %v1587_v28 = vpop.f32.mrf.mxu0  ;;  %v1796_v29 = vpop.f32.mrf.mxu1 }
 0x48e   : > { %v1588_v30 = vadd.f32 %v1587_v28, %v8132_v35  ;;  %v1797_v31 = vadd.f32 %v1796_v29, %v8134_v36  ;;  %v7140_v28 = vld [vmem:[%s7307_s28 + $0x98] sm:$0xff] }
 0x48f   : > { %5924 = vst [vmem:[%s7428_s14 + $0xf98] sm:$0xff] %v5412_v26 }
 0x490   : > { %v4901_v33 = vmax.f32 %v1588_v30, 0.0  ;;  %v4902_v34 = vmax.f32 %v1797_v31, 0.0  ;;  %v2005_v37 = vpop.f32.mrf.mxu2  ;;  %v2214_v40 = vpop.f32.mrf.mxu3  ;;  %6541 = vmatmul.msk.f32.gmra.mxu0 %vm319_vm1, %v7136_v27  ;;  %6606 = vmatmul.msk.f32.gmra.mxu1 %vm319_vm1, %v7136_v27 }
 0x491   : > { %v2006_v41 = vadd.f32 %v2005_v37, %v8140_v43  ;;  %v2215_v35 = vadd.f32 %v2214_v40, %v8142_v44  ;;  %v8859_v43 = vperm.slane %v249_v32, 2  ;;  %v8861_v44 = vperm.slane %v249_v32, 3 }
 0x492   : > { %v5419_v36 = vpack.c.bf16 %v4902_v34, %v4901_v33 }
 0x493   : > { %v4903_v39 = vmax.f32 %v2006_v41, 0.0  ;;  %v4904_v45 = vmax.f32 %v2215_v35, 0.0 }
 0x494   : > { %5931 = vst [vmem:[%s7428_s14 + $0xfd0] sm:$0xff] %v5419_v36 }
 0x495   : > { %v5420_v46 = vpack.c.bf16 %v4904_v45, %v4903_v39  ;;  %6672 = vmatmul.msk.f32.gmra.mxu2 %vm319_vm1, %v7137_v47  ;;  %6737 = vmatmul.msk.f32.gmra.mxu3 %vm319_vm1, %v7137_v47  ;;  %v2234_v48 = vpop.f32.mrf.mxu0  ;;  %v2443_v49 = vpop.f32.mrf.mxu1 }
 0x496   : > { %v2235_v50 = vadd.f32 %v2234_v48, %v8851_v42  ;;  %v2444_v51 = vadd.f32 %v2443_v49, %v8853_v38 }
 0x497   : > { %5932 = vst [vmem:[%s7428_s14 + $0xfd8] sm:$0xff] %v5420_v46 }
 0x498   : > { %v3897_v52 = vmax.f32 %v2235_v50, 0.0  ;;  %v3898_v53 = vmax.f32 %v2444_v51, 0.0  ;;  %v2652_v54 = vpop.f32.mrf.mxu2  ;;  %v2861_v55 = vpop.f32.mrf.mxu3  ;;  %6542 = vmatmul.msk.f32.gmra.mxu0 %vm319_vm1, %v7137_v47  ;;  %6607 = vmatmul.msk.f32.gmra.mxu1 %vm319_vm1, %v7137_v47  ;;  %v7141_v47 = vld [vmem:[%s7307_s28 + $0xa0] sm:$0xff] }
 0x499   : > { %v2653_v56 = vadd.f32 %v2652_v54, %v8859_v43  ;;  %v2862_v57 = vadd.f32 %v2861_v55, %v8861_v44 }
 0x49a   : > { %v4917_v58 = vpack.c.bf16 %v3898_v53, %v3897_v52 }
 0x49b   : > { %v3899_v59 = vmax.f32 %v2653_v56, 0.0  ;;  %v3900_v60 = vmax.f32 %v2862_v57, 0.0 }
 0x49c   : > { %5429 = vst [vmem:[%s7428_s14 + $0x20] sm:$0xff] %v4917_v58 }
 0x49d   : > { %v4918_v61 = vpack.c.bf16 %v3900_v60, %v3899_v59  ;;  %6673 = vmatmul.msk.f32.gmra.mxu2 %vm319_vm1, %v7138_v62  ;;  %6738 = vmatmul.msk.f32.gmra.mxu3 %vm319_vm1, %v7138_v62  ;;  %v2237_v63 = vpop.f32.mrf.mxu0  ;;  %v2446_v0 = vpop.f32.mrf.mxu1 }
 0x49e   : > { %v2238_v1 = vadd.f32 %v2237_v63, %v8851_v42  ;;  %v2447_v2 = vadd.f32 %v2446_v0, %v8853_v38 }
 0x49f   : > { %5430 = vst [vmem:[%s7428_s14 + $0x28] sm:$0xff] %v4918_v61 }
 0x4a0   : > { %v3913_v3 = vmax.f32 %v2238_v1, 0.0  ;;  %v3914_v4 = vmax.f32 %v2447_v2, 0.0  ;;  %v2655_v5 = vpop.f32.mrf.mxu2  ;;  %v2864_v6 = vpop.f32.mrf.mxu3  ;;  %6543 = vmatmul.msk.f32.gmra.mxu0 %vm319_vm1, %v7138_v62  ;;  %6608 = vmatmul.msk.f32.gmra.mxu1 %vm319_vm1, %v7138_v62  ;;  %v7142_v62 = vld [vmem:[%s7307_s28 + $0xa8] sm:$0xff] }
 0x4a1   : > { %v2656_v7 = vadd.f32 %v2655_v5, %v8859_v43  ;;  %v2865_v8 = vadd.f32 %v2864_v6, %v8861_v44 }
 0x4a2   : > { %v4925_v9 = vpack.c.bf16 %v3914_v4, %v3913_v3 }
 0x4a3   : > { %v3915_v10 = vmax.f32 %v2656_v7, 0.0  ;;  %v3916_v11 = vmax.f32 %v2865_v8, 0.0 }
 0x4a4   : > { %5437 = vst [vmem:[%s7428_s14 + $0x60] sm:$0xff] %v4925_v9 }
 0x4a5   : > { %v4926_v12 = vpack.c.bf16 %v3916_v11, %v3915_v10  ;;  %6674 = vmatmul.msk.f32.gmra.mxu2 %vm319_vm1, %v7139_v13  ;;  %6739 = vmatmul.msk.f32.gmra.mxu3 %vm319_vm1, %v7139_v13  ;;  %v2240_v14 = vpop.f32.mrf.mxu0  ;;  %v2449_v15 = vpop.f32.mrf.mxu1 }
 0x4a6   : > { %v2241_v16 = vadd.f32 %v2240_v14, %v8851_v42  ;;  %v2450_v17 = vadd.f32 %v2449_v15, %v8853_v38 }
 0x4a7   : > { %5438 = vst [vmem:[%s7428_s14 + $0x68] sm:$0xff] %v4926_v12 }
 0x4a8   : > { %v3929_v18 = vmax.f32 %v2241_v16, 0.0  ;;  %v3930_v19 = vmax.f32 %v2450_v17, 0.0  ;;  %v2658_v20 = vpop.f32.mrf.mxu2  ;;  %v2867_v21 = vpop.f32.mrf.mxu3  ;;  %6544 = vmatmul.msk.f32.gmra.mxu0 %vm319_vm1, %v7139_v13  ;;  %6609 = vmatmul.msk.f32.gmra.mxu1 %vm319_vm1, %v7139_v13  ;;  %v7143_v13 = vld [vmem:[%s7307_s28 + $0xb0] sm:$0xff] }
 0x4a9   : > { %v2659_v22 = vadd.f32 %v2658_v20, %v8859_v43  ;;  %v2868_v23 = vadd.f32 %v2867_v21, %v8861_v44 }
 0x4aa   : > { %v4933_v24 = vpack.c.bf16 %v3930_v19, %v3929_v18 }
 0x4ab   : > { %v3931_v25 = vmax.f32 %v2659_v22, 0.0  ;;  %v3932_v26 = vmax.f32 %v2868_v23, 0.0 }
 0x4ac   : > { %5445 = vst [vmem:[%s7428_s14 + $0xa0] sm:$0xff] %v4933_v24 }
 0x4ad   : > { %v4934_v27 = vpack.c.bf16 %v3932_v26, %v3931_v25  ;;  %6675 = vmatmul.msk.f32.gmra.mxu2 %vm319_vm1, %v7140_v28  ;;  %6740 = vmatmul.msk.f32.gmra.mxu3 %vm319_vm1, %v7140_v28  ;;  %v2243_v29 = vpop.f32.mrf.mxu0  ;;  %v2452_v30 = vpop.f32.mrf.mxu1 }
 0x4ae   : > { %v2244_v31 = vadd.f32 %v2243_v29, %v8851_v42  ;;  %v2453_v32 = vadd.f32 %v2452_v30, %v8853_v38 }
 0x4af   : > { %5446 = vst [vmem:[%s7428_s14 + $0xa8] sm:$0xff] %v4934_v27 }
 0x4b0   : > { %v3945_v33 = vmax.f32 %v2244_v31, 0.0  ;;  %v3946_v34 = vmax.f32 %v2453_v32, 0.0  ;;  %v2661_v37 = vpop.f32.mrf.mxu2  ;;  %v2870_v40 = vpop.f32.mrf.mxu3  ;;  %6545 = vmatmul.msk.f32.gmra.mxu0 %vm319_vm1, %v7140_v28  ;;  %6610 = vmatmul.msk.f32.gmra.mxu1 %vm319_vm1, %v7140_v28  ;;  %v7144_v28 = vld [vmem:[%s7307_s28 + $0xb8] sm:$0xff] }
 0x4b1   : > { %v2662_v41 = vadd.f32 %v2661_v37, %v8859_v43  ;;  %v2871_v35 = vadd.f32 %v2870_v40, %v8861_v44 }
 0x4b2   : > { %v4941_v36 = vpack.c.bf16 %v3946_v34, %v3945_v33 }
 0x4b3   : > { %v3947_v39 = vmax.f32 %v2662_v41, 0.0  ;;  %v3948_v45 = vmax.f32 %v2871_v35, 0.0 }
 0x4b4   : > { %5453 = vst [vmem:[%s7428_s14 + $0xe0] sm:$0xff] %v4941_v36 }
 0x4b5   : > { %v4942_v46 = vpack.c.bf16 %v3948_v45, %v3947_v39  ;;  %6676 = vmatmul.msk.f32.gmra.mxu2 %vm319_vm1, %v7141_v47  ;;  %6741 = vmatmul.msk.f32.gmra.mxu3 %vm319_vm1, %v7141_v47  ;;  %v2246_v48 = vpop.f32.mrf.mxu0  ;;  %v2455_v49 = vpop.f32.mrf.mxu1 }
 0x4b6   : > { %v2247_v50 = vadd.f32 %v2246_v48, %v8851_v42  ;;  %v2456_v51 = vadd.f32 %v2455_v49, %v8853_v38 }
 0x4b7   : > { %5454 = vst [vmem:[%s7428_s14 + $0xe8] sm:$0xff] %v4942_v46 }
 0x4b8   : > { %v3961_v52 = vmax.f32 %v2247_v50, 0.0  ;;  %v3962_v53 = vmax.f32 %v2456_v51, 0.0  ;;  %v2664_v54 = vpop.f32.mrf.mxu2  ;;  %v2873_v55 = vpop.f32.mrf.mxu3  ;;  %6546 = vmatmul.msk.f32.gmra.mxu0 %vm319_vm1, %v7141_v47  ;;  %6611 = vmatmul.msk.f32.gmra.mxu1 %vm319_vm1, %v7141_v47  ;;  %v7145_v47 = vld [vmem:[%s7307_s28 + $0xc0] sm:$0xff] }
 0x4b9   : > { %v2665_v56 = vadd.f32 %v2664_v54, %v8859_v43  ;;  %v2874_v57 = vadd.f32 %v2873_v55, %v8861_v44 }
 0x4ba   : > { %v4949_v58 = vpack.c.bf16 %v3962_v53, %v3961_v52 }
 0x4bb   : > { %v3963_v59 = vmax.f32 %v2665_v56, 0.0  ;;  %v3964_v60 = vmax.f32 %v2874_v57, 0.0 }
 0x4bc   : > { %5461 = vst [vmem:[%s7428_s14 + $0x120] sm:$0xff] %v4949_v58 }
 0x4bd   : > { %v4950_v61 = vpack.c.bf16 %v3964_v60, %v3963_v59  ;;  %6677 = vmatmul.msk.f32.gmra.mxu2 %vm319_vm1, %v7142_v62  ;;  %6742 = vmatmul.msk.f32.gmra.mxu3 %vm319_vm1, %v7142_v62  ;;  %v2249_v63 = vpop.f32.mrf.mxu0  ;;  %v2458_v0 = vpop.f32.mrf.mxu1 }
 0x4be   : > { %v2250_v1 = vadd.f32 %v2249_v63, %v8851_v42  ;;  %v2459_v2 = vadd.f32 %v2458_v0, %v8853_v38 }
 0x4bf   : > { %5462 = vst [vmem:[%s7428_s14 + $0x128] sm:$0xff] %v4950_v61 }
 0x4c0   : > { %v3977_v3 = vmax.f32 %v2250_v1, 0.0  ;;  %v3978_v4 = vmax.f32 %v2459_v2, 0.0  ;;  %v2667_v5 = vpop.f32.mrf.mxu2  ;;  %v2876_v6 = vpop.f32.mrf.mxu3  ;;  %6547 = vmatmul.msk.f32.gmra.mxu0 %vm319_vm1, %v7142_v62  ;;  %6612 = vmatmul.msk.f32.gmra.mxu1 %vm319_vm1, %v7142_v62  ;;  %v7146_v62 = vld [vmem:[%s7307_s28 + $0xc8] sm:$0xff] }
 0x4c1   : > { %v2668_v7 = vadd.f32 %v2667_v5, %v8859_v43  ;;  %v2877_v8 = vadd.f32 %v2876_v6, %v8861_v44 }
 0x4c2   : > { %v4957_v9 = vpack.c.bf16 %v3978_v4, %v3977_v3 }
 0x4c3   : > { %v3979_v10 = vmax.f32 %v2668_v7, 0.0  ;;  %v3980_v11 = vmax.f32 %v2877_v8, 0.0 }
 0x4c4   : > { %5469 = vst [vmem:[%s7428_s14 + $0x160] sm:$0xff] %v4957_v9 }
 0x4c5   : > { %v4958_v12 = vpack.c.bf16 %v3980_v11, %v3979_v10  ;;  %6678 = vmatmul.msk.f32.gmra.mxu2 %vm319_vm1, %v7143_v13  ;;  %6743 = vmatmul.msk.f32.gmra.mxu3 %vm319_vm1, %v7143_v13  ;;  %v2252_v14 = vpop.f32.mrf.mxu0  ;;  %v2461_v15 = vpop.f32.mrf.mxu1 }
 0x4c6   : > { %v2253_v16 = vadd.f32 %v2252_v14, %v8851_v42  ;;  %v2462_v17 = vadd.f32 %v2461_v15, %v8853_v38 }
 0x4c7   : > { %5470 = vst [vmem:[%s7428_s14 + $0x168] sm:$0xff] %v4958_v12 }
 0x4c8   : > { %v3993_v18 = vmax.f32 %v2253_v16, 0.0  ;;  %v3994_v19 = vmax.f32 %v2462_v17, 0.0  ;;  %v2670_v20 = vpop.f32.mrf.mxu2  ;;  %v2879_v21 = vpop.f32.mrf.mxu3  ;;  %6548 = vmatmul.msk.f32.gmra.mxu0 %vm319_vm1, %v7143_v13  ;;  %6613 = vmatmul.msk.f32.gmra.mxu1 %vm319_vm1, %v7143_v13  ;;  %v7147_v13 = vld [vmem:[%s7307_s28 + $0xd0] sm:$0xff] }
 0x4c9   : > { %v2671_v22 = vadd.f32 %v2670_v20, %v8859_v43  ;;  %v2880_v23 = vadd.f32 %v2879_v21, %v8861_v44 }
 0x4ca   : > { %v4965_v24 = vpack.c.bf16 %v3994_v19, %v3993_v18 }
 0x4cb   : > { %v3995_v25 = vmax.f32 %v2671_v22, 0.0  ;;  %v3996_v26 = vmax.f32 %v2880_v23, 0.0 }
 0x4cc   : > { %5477 = vst [vmem:[%s7428_s14 + $0x1a0] sm:$0xff] %v4965_v24 }
 0x4cd   : > { %v4966_v27 = vpack.c.bf16 %v3996_v26, %v3995_v25  ;;  %6679 = vmatmul.msk.f32.gmra.mxu2 %vm319_vm1, %v7144_v28  ;;  %6744 = vmatmul.msk.f32.gmra.mxu3 %vm319_vm1, %v7144_v28  ;;  %v2255_v29 = vpop.f32.mrf.mxu0  ;;  %v2464_v30 = vpop.f32.mrf.mxu1 }
 0x4ce   : > { %v2256_v31 = vadd.f32 %v2255_v29, %v8851_v42  ;;  %v2465_v32 = vadd.f32 %v2464_v30, %v8853_v38 }
 0x4cf   : > { %5478 = vst [vmem:[%s7428_s14 + $0x1a8] sm:$0xff] %v4966_v27 }
 0x4d0   : > { %v4009_v33 = vmax.f32 %v2256_v31, 0.0  ;;  %v4010_v34 = vmax.f32 %v2465_v32, 0.0  ;;  %v2673_v37 = vpop.f32.mrf.mxu2  ;;  %v2882_v40 = vpop.f32.mrf.mxu3  ;;  %6549 = vmatmul.msk.f32.gmra.mxu0 %vm319_vm1, %v7144_v28  ;;  %6614 = vmatmul.msk.f32.gmra.mxu1 %vm319_vm1, %v7144_v28  ;;  %v7148_v28 = vld [vmem:[%s7307_s28 + $0xd8] sm:$0xff] }
 0x4d1   : > { %v2674_v41 = vadd.f32 %v2673_v37, %v8859_v43  ;;  %v2883_v35 = vadd.f32 %v2882_v40, %v8861_v44 }
 0x4d2   : > { %v4973_v36 = vpack.c.bf16 %v4010_v34, %v4009_v33 }
 0x4d3   : > { %v4011_v39 = vmax.f32 %v2674_v41, 0.0  ;;  %v4012_v45 = vmax.f32 %v2883_v35, 0.0 }
 0x4d4   : > { %5485 = vst [vmem:[%s7428_s14 + $0x1e0] sm:$0xff] %v4973_v36 }
 0x4d5   : > { %v4974_v46 = vpack.c.bf16 %v4012_v45, %v4011_v39  ;;  %6680 = vmatmul.msk.f32.gmra.mxu2 %vm319_vm1, %v7145_v47  ;;  %6745 = vmatmul.msk.f32.gmra.mxu3 %vm319_vm1, %v7145_v47  ;;  %v2258_v48 = vpop.f32.mrf.mxu0  ;;  %v2467_v49 = vpop.f32.mrf.mxu1 }
 0x4d6   : > { %v2259_v50 = vadd.f32 %v2258_v48, %v8851_v42  ;;  %v2468_v51 = vadd.f32 %v2467_v49, %v8853_v38 }
 0x4d7   : > { %5486 = vst [vmem:[%s7428_s14 + $0x1e8] sm:$0xff] %v4974_v46 }
 0x4d8   : > { %v4025_v52 = vmax.f32 %v2259_v50, 0.0  ;;  %v4026_v53 = vmax.f32 %v2468_v51, 0.0  ;;  %v2676_v54 = vpop.f32.mrf.mxu2  ;;  %v2885_v55 = vpop.f32.mrf.mxu3  ;;  %6550 = vmatmul.msk.f32.gmra.mxu0 %vm319_vm1, %v7145_v47  ;;  %6615 = vmatmul.msk.f32.gmra.mxu1 %vm319_vm1, %v7145_v47  ;;  %v7149_v47 = vld [vmem:[%s7307_s28 + $0xe0] sm:$0xff] }
 0x4d9   : > { %v2677_v56 = vadd.f32 %v2676_v54, %v8859_v43  ;;  %v2886_v57 = vadd.f32 %v2885_v55, %v8861_v44 }
 0x4da   : > { %v4981_v58 = vpack.c.bf16 %v4026_v53, %v4025_v52 }
 0x4db   : > { %v4027_v59 = vmax.f32 %v2677_v56, 0.0  ;;  %v4028_v60 = vmax.f32 %v2886_v57, 0.0 }
 0x4dc   : > { %5493 = vst [vmem:[%s7428_s14 + $0x220] sm:$0xff] %v4981_v58 }
 0x4dd   : > { %v4982_v61 = vpack.c.bf16 %v4028_v60, %v4027_v59  ;;  %6681 = vmatmul.msk.f32.gmra.mxu2 %vm319_vm1, %v7146_v62  ;;  %6746 = vmatmul.msk.f32.gmra.mxu3 %vm319_vm1, %v7146_v62  ;;  %v2261_v63 = vpop.f32.mrf.mxu0  ;;  %v2470_v0 = vpop.f32.mrf.mxu1 }
 0x4de   : > { %v2262_v1 = vadd.f32 %v2261_v63, %v8851_v42  ;;  %v2471_v2 = vadd.f32 %v2470_v0, %v8853_v38 }
 0x4df   : > { %5494 = vst [vmem:[%s7428_s14 + $0x228] sm:$0xff] %v4982_v61 }
 0x4e0   : > { %v4041_v3 = vmax.f32 %v2262_v1, 0.0  ;;  %v4042_v4 = vmax.f32 %v2471_v2, 0.0  ;;  %v2679_v5 = vpop.f32.mrf.mxu2  ;;  %v2888_v6 = vpop.f32.mrf.mxu3  ;;  %6551 = vmatmul.msk.f32.gmra.mxu0 %vm319_vm1, %v7146_v62  ;;  %6616 = vmatmul.msk.f32.gmra.mxu1 %vm319_vm1, %v7146_v62  ;;  %v7150_v62 = vld [vmem:[%s7307_s28 + $0xe8] sm:$0xff] }
 0x4e1   : > { %v2680_v7 = vadd.f32 %v2679_v5, %v8859_v43  ;;  %v2889_v8 = vadd.f32 %v2888_v6, %v8861_v44 }
 0x4e2   : > { %v4989_v9 = vpack.c.bf16 %v4042_v4, %v4041_v3 }
 0x4e3   : > { %v4043_v10 = vmax.f32 %v2680_v7, 0.0  ;;  %v4044_v11 = vmax.f32 %v2889_v8, 0.0 }
 0x4e4   : > { %5501 = vst [vmem:[%s7428_s14 + $0x260] sm:$0xff] %v4989_v9 }
 0x4e5   : > { %v4990_v12 = vpack.c.bf16 %v4044_v11, %v4043_v10  ;;  %6682 = vmatmul.msk.f32.gmra.mxu2 %vm319_vm1, %v7147_v13  ;;  %6747 = vmatmul.msk.f32.gmra.mxu3 %vm319_vm1, %v7147_v13  ;;  %v2264_v14 = vpop.f32.mrf.mxu0  ;;  %v2473_v15 = vpop.f32.mrf.mxu1 }
 0x4e6   : > { %v2265_v16 = vadd.f32 %v2264_v14, %v8851_v42  ;;  %v2474_v17 = vadd.f32 %v2473_v15, %v8853_v38 }
 0x4e7   : > { %5502 = vst [vmem:[%s7428_s14 + $0x268] sm:$0xff] %v4990_v12 }
 0x4e8   : > { %v4057_v18 = vmax.f32 %v2265_v16, 0.0  ;;  %v4058_v19 = vmax.f32 %v2474_v17, 0.0  ;;  %v2682_v20 = vpop.f32.mrf.mxu2  ;;  %v2891_v21 = vpop.f32.mrf.mxu3  ;;  %6552 = vmatmul.msk.f32.gmra.mxu0 %vm319_vm1, %v7147_v13  ;;  %6617 = vmatmul.msk.f32.gmra.mxu1 %vm319_vm1, %v7147_v13  ;;  %v7151_v13 = vld [vmem:[%s7307_s28 + $0xf0] sm:$0xff] }
 0x4e9   : > { %v2683_v22 = vadd.f32 %v2682_v20, %v8859_v43  ;;  %v2892_v23 = vadd.f32 %v2891_v21, %v8861_v44 }
 0x4ea   : > { %v4997_v24 = vpack.c.bf16 %v4058_v19, %v4057_v18 }
 0x4eb   : > { %v4059_v25 = vmax.f32 %v2683_v22, 0.0  ;;  %v4060_v26 = vmax.f32 %v2892_v23, 0.0 }
 0x4ec   : > { %5509 = vst [vmem:[%s7428_s14 + $0x2a0] sm:$0xff] %v4997_v24 }
 0x4ed   : > { %v4998_v27 = vpack.c.bf16 %v4060_v26, %v4059_v25  ;;  %6683 = vmatmul.msk.f32.gmra.mxu2 %vm319_vm1, %v7148_v28  ;;  %6748 = vmatmul.msk.f32.gmra.mxu3 %vm319_vm1, %v7148_v28  ;;  %v2267_v29 = vpop.f32.mrf.mxu0  ;;  %v2476_v30 = vpop.f32.mrf.mxu1 }
 0x4ee   : > { %v2268_v31 = vadd.f32 %v2267_v29, %v8851_v42  ;;  %v2477_v32 = vadd.f32 %v2476_v30, %v8853_v38 }
 0x4ef   : > { %5510 = vst [vmem:[%s7428_s14 + $0x2a8] sm:$0xff] %v4998_v27 }
 0x4f0   : > { %v4073_v33 = vmax.f32 %v2268_v31, 0.0  ;;  %v4074_v34 = vmax.f32 %v2477_v32, 0.0  ;;  %v2685_v37 = vpop.f32.mrf.mxu2  ;;  %v2894_v40 = vpop.f32.mrf.mxu3  ;;  %6553 = vmatmul.msk.f32.gmra.mxu0 %vm319_vm1, %v7148_v28  ;;  %6618 = vmatmul.msk.f32.gmra.mxu1 %vm319_vm1, %v7148_v28  ;;  %v7152_v28 = vld [vmem:[%s7307_s28 + $0xf8] sm:$0xff] }
 0x4f1   : > { %v2686_v41 = vadd.f32 %v2685_v37, %v8859_v43  ;;  %v2895_v35 = vadd.f32 %v2894_v40, %v8861_v44 }
 0x4f2   : > { %v5005_v36 = vpack.c.bf16 %v4074_v34, %v4073_v33 }
 0x4f3   : > { %v4075_v39 = vmax.f32 %v2686_v41, 0.0  ;;  %v4076_v45 = vmax.f32 %v2895_v35, 0.0 }
 0x4f4   : > { %5517 = vst [vmem:[%s7428_s14 + $0x2e0] sm:$0xff] %v5005_v36 }
 0x4f5   : > { %v5006_v46 = vpack.c.bf16 %v4076_v45, %v4075_v39  ;;  %6684 = vmatmul.msk.f32.gmra.mxu2 %vm319_vm1, %v7149_v47  ;;  %6749 = vmatmul.msk.f32.gmra.mxu3 %vm319_vm1, %v7149_v47  ;;  %v2270_v48 = vpop.f32.mrf.mxu0  ;;  %v2479_v49 = vpop.f32.mrf.mxu1 }
 0x4f6   : > { %v2271_v50 = vadd.f32 %v2270_v48, %v8851_v42  ;;  %v2480_v51 = vadd.f32 %v2479_v49, %v8853_v38 }
 0x4f7   : > { %5518 = vst [vmem:[%s7428_s14 + $0x2e8] sm:$0xff] %v5006_v46 }
 0x4f8   : > { %v4089_v52 = vmax.f32 %v2271_v50, 0.0  ;;  %v4090_v53 = vmax.f32 %v2480_v51, 0.0  ;;  %v2688_v54 = vpop.f32.mrf.mxu2  ;;  %v2897_v55 = vpop.f32.mrf.mxu3  ;;  %6554 = vmatmul.msk.f32.gmra.mxu0 %vm319_vm1, %v7149_v47  ;;  %6619 = vmatmul.msk.f32.gmra.mxu1 %vm319_vm1, %v7149_v47  ;;  %v7153_v47 = vld [vmem:[%s7307_s28 + $0x100] sm:$0xff] }
 0x4f9   : > { %v2689_v56 = vadd.f32 %v2688_v54, %v8859_v43  ;;  %v2898_v57 = vadd.f32 %v2897_v55, %v8861_v44 }
 0x4fa   : > { %v5013_v58 = vpack.c.bf16 %v4090_v53, %v4089_v52 }
 0x4fb   : > { %v4091_v59 = vmax.f32 %v2689_v56, 0.0  ;;  %v4092_v60 = vmax.f32 %v2898_v57, 0.0 }
 0x4fc   : > { %5525 = vst [vmem:[%s7428_s14 + $0x320] sm:$0xff] %v5013_v58 }
 0x4fd   : > { %v5014_v61 = vpack.c.bf16 %v4092_v60, %v4091_v59  ;;  %6685 = vmatmul.msk.f32.gmra.mxu2 %vm319_vm1, %v7150_v62  ;;  %6750 = vmatmul.msk.f32.gmra.mxu3 %vm319_vm1, %v7150_v62  ;;  %v2273_v63 = vpop.f32.mrf.mxu0  ;;  %v2482_v0 = vpop.f32.mrf.mxu1 }
 0x4fe   : > { %v2274_v1 = vadd.f32 %v2273_v63, %v8851_v42  ;;  %v2483_v2 = vadd.f32 %v2482_v0, %v8853_v38 }
 0x4ff   : > { %5526 = vst [vmem:[%s7428_s14 + $0x328] sm:$0xff] %v5014_v61 }
 0x500   : > { %v4105_v3 = vmax.f32 %v2274_v1, 0.0  ;;  %v4106_v4 = vmax.f32 %v2483_v2, 0.0  ;;  %v2691_v5 = vpop.f32.mrf.mxu2  ;;  %v2900_v6 = vpop.f32.mrf.mxu3  ;;  %6555 = vmatmul.msk.f32.gmra.mxu0 %vm319_vm1, %v7150_v62  ;;  %6620 = vmatmul.msk.f32.gmra.mxu1 %vm319_vm1, %v7150_v62  ;;  %v7154_v62 = vld [vmem:[%s7307_s28 + $0x108] sm:$0xff] }
 0x501   : > { %v2692_v7 = vadd.f32 %v2691_v5, %v8859_v43  ;;  %v2901_v8 = vadd.f32 %v2900_v6, %v8861_v44 }
 0x502   : > { %v5021_v9 = vpack.c.bf16 %v4106_v4, %v4105_v3 }
 0x503   : > { %v4107_v10 = vmax.f32 %v2692_v7, 0.0  ;;  %v4108_v11 = vmax.f32 %v2901_v8, 0.0 }
 0x504   : > { %5533 = vst [vmem:[%s7428_s14 + $0x360] sm:$0xff] %v5021_v9 }
 0x505   : > { %v5022_v12 = vpack.c.bf16 %v4108_v11, %v4107_v10  ;;  %6686 = vmatmul.msk.f32.gmra.mxu2 %vm319_vm1, %v7151_v13  ;;  %6751 = vmatmul.msk.f32.gmra.mxu3 %vm319_vm1, %v7151_v13  ;;  %v2276_v14 = vpop.f32.mrf.mxu0  ;;  %v2485_v15 = vpop.f32.mrf.mxu1 }
 0x506   : > { %v2277_v16 = vadd.f32 %v2276_v14, %v8851_v42  ;;  %v2486_v17 = vadd.f32 %v2485_v15, %v8853_v38 }
 0x507   : > { %5534 = vst [vmem:[%s7428_s14 + $0x368] sm:$0xff] %v5022_v12 }
 0x508   : > { %v4121_v18 = vmax.f32 %v2277_v16, 0.0  ;;  %v4122_v19 = vmax.f32 %v2486_v17, 0.0  ;;  %v2694_v20 = vpop.f32.mrf.mxu2  ;;  %v2903_v21 = vpop.f32.mrf.mxu3  ;;  %6556 = vmatmul.msk.f32.gmra.mxu0 %vm319_vm1, %v7151_v13  ;;  %6621 = vmatmul.msk.f32.gmra.mxu1 %vm319_vm1, %v7151_v13  ;;  %v7155_v13 = vld [vmem:[%s7307_s28 + $0x110] sm:$0xff] }
 0x509   : > { %v2695_v22 = vadd.f32 %v2694_v20, %v8859_v43  ;;  %v2904_v23 = vadd.f32 %v2903_v21, %v8861_v44 }
 0x50a   : > { %v5029_v24 = vpack.c.bf16 %v4122_v19, %v4121_v18 }
 0x50b   : > { %v4123_v25 = vmax.f32 %v2695_v22, 0.0  ;;  %v4124_v26 = vmax.f32 %v2904_v23, 0.0 }
 0x50c   : > { %5541 = vst [vmem:[%s7428_s14 + $0x3a0] sm:$0xff] %v5029_v24 }
 0x50d   : > { %v5030_v27 = vpack.c.bf16 %v4124_v26, %v4123_v25  ;;  %6687 = vmatmul.msk.f32.gmra.mxu2 %vm319_vm1, %v7152_v28  ;;  %6752 = vmatmul.msk.f32.gmra.mxu3 %vm319_vm1, %v7152_v28  ;;  %v2279_v29 = vpop.f32.mrf.mxu0  ;;  %v2488_v30 = vpop.f32.mrf.mxu1 }
 0x50e   : > { %v2280_v31 = vadd.f32 %v2279_v29, %v8851_v42  ;;  %v2489_v32 = vadd.f32 %v2488_v30, %v8853_v38 }
 0x50f   : > { %5542 = vst [vmem:[%s7428_s14 + $0x3a8] sm:$0xff] %v5030_v27 }
 0x510   : > { %v4137_v33 = vmax.f32 %v2280_v31, 0.0  ;;  %v4138_v34 = vmax.f32 %v2489_v32, 0.0  ;;  %v2697_v37 = vpop.f32.mrf.mxu2  ;;  %v2906_v40 = vpop.f32.mrf.mxu3  ;;  %6557 = vmatmul.msk.f32.gmra.mxu0 %vm319_vm1, %v7152_v28  ;;  %6622 = vmatmul.msk.f32.gmra.mxu1 %vm319_vm1, %v7152_v28  ;;  %v7156_v28 = vld [vmem:[%s7307_s28 + $0x118] sm:$0xff] }
 0x511   : > { %v2698_v41 = vadd.f32 %v2697_v37, %v8859_v43  ;;  %v2907_v35 = vadd.f32 %v2906_v40, %v8861_v44 }
 0x512   : > { %v5037_v36 = vpack.c.bf16 %v4138_v34, %v4137_v33 }
 0x513   : > { %v4139_v39 = vmax.f32 %v2698_v41, 0.0  ;;  %v4140_v45 = vmax.f32 %v2907_v35, 0.0 }
 0x514   : > { %5549 = vst [vmem:[%s7428_s14 + $0x3e0] sm:$0xff] %v5037_v36 }
 0x515   : > { %v5038_v46 = vpack.c.bf16 %v4140_v45, %v4139_v39  ;;  %6688 = vmatmul.msk.f32.gmra.mxu2 %vm319_vm1, %v7153_v47  ;;  %6753 = vmatmul.msk.f32.gmra.mxu3 %vm319_vm1, %v7153_v47  ;;  %v2282_v48 = vpop.f32.mrf.mxu0  ;;  %v2491_v49 = vpop.f32.mrf.mxu1 }
 0x516   : > { %v2283_v50 = vadd.f32 %v2282_v48, %v8851_v42  ;;  %v2492_v51 = vadd.f32 %v2491_v49, %v8853_v38 }
 0x517   : > { %5550 = vst [vmem:[%s7428_s14 + $0x3e8] sm:$0xff] %v5038_v46 }
 0x518   : > { %v4153_v52 = vmax.f32 %v2283_v50, 0.0  ;;  %v4154_v53 = vmax.f32 %v2492_v51, 0.0  ;;  %v2700_v54 = vpop.f32.mrf.mxu2  ;;  %v2909_v55 = vpop.f32.mrf.mxu3  ;;  %6558 = vmatmul.msk.f32.gmra.mxu0 %vm319_vm1, %v7153_v47  ;;  %6623 = vmatmul.msk.f32.gmra.mxu1 %vm319_vm1, %v7153_v47  ;;  %v7157_v47 = vld [vmem:[%s7307_s28 + $0x120] sm:$0xff] }
 0x519   : > { %v2701_v56 = vadd.f32 %v2700_v54, %v8859_v43  ;;  %v2910_v57 = vadd.f32 %v2909_v55, %v8861_v44 }
 0x51a   : > { %v5045_v58 = vpack.c.bf16 %v4154_v53, %v4153_v52 }
 0x51b   : > { %v4155_v59 = vmax.f32 %v2701_v56, 0.0  ;;  %v4156_v60 = vmax.f32 %v2910_v57, 0.0 }
 0x51c   : > { %5557 = vst [vmem:[%s7428_s14 + $0x420] sm:$0xff] %v5045_v58 }
 0x51d   : > { %v5046_v61 = vpack.c.bf16 %v4156_v60, %v4155_v59  ;;  %6689 = vmatmul.msk.f32.gmra.mxu2 %vm319_vm1, %v7154_v62  ;;  %6754 = vmatmul.msk.f32.gmra.mxu3 %vm319_vm1, %v7154_v62  ;;  %v2285_v63 = vpop.f32.mrf.mxu0  ;;  %v2494_v0 = vpop.f32.mrf.mxu1 }
 0x51e   : > { %v2286_v1 = vadd.f32 %v2285_v63, %v8851_v42  ;;  %v2495_v2 = vadd.f32 %v2494_v0, %v8853_v38 }
 0x51f   : > { %5558 = vst [vmem:[%s7428_s14 + $0x428] sm:$0xff] %v5046_v61 }
 0x520   : > { %v4169_v3 = vmax.f32 %v2286_v1, 0.0  ;;  %v4170_v4 = vmax.f32 %v2495_v2, 0.0  ;;  %v2703_v5 = vpop.f32.mrf.mxu2  ;;  %v2912_v6 = vpop.f32.mrf.mxu3  ;;  %6559 = vmatmul.msk.f32.gmra.mxu0 %vm319_vm1, %v7154_v62  ;;  %6624 = vmatmul.msk.f32.gmra.mxu1 %vm319_vm1, %v7154_v62  ;;  %v7158_v62 = vld [vmem:[%s7307_s28 + $0x128] sm:$0xff] }
 0x521   : > { %v2704_v7 = vadd.f32 %v2703_v5, %v8859_v43  ;;  %v2913_v8 = vadd.f32 %v2912_v6, %v8861_v44 }
 0x522   : > { %v5053_v9 = vpack.c.bf16 %v4170_v4, %v4169_v3 }
 0x523   : > { %v4171_v10 = vmax.f32 %v2704_v7, 0.0  ;;  %v4172_v11 = vmax.f32 %v2913_v8, 0.0 }
 0x524   : > { %5565 = vst [vmem:[%s7428_s14 + $0x460] sm:$0xff] %v5053_v9 }
 0x525   : > { %v5054_v12 = vpack.c.bf16 %v4172_v11, %v4171_v10  ;;  %6690 = vmatmul.msk.f32.gmra.mxu2 %vm319_vm1, %v7155_v13  ;;  %6755 = vmatmul.msk.f32.gmra.mxu3 %vm319_vm1, %v7155_v13  ;;  %v2288_v14 = vpop.f32.mrf.mxu0  ;;  %v2497_v15 = vpop.f32.mrf.mxu1 }
 0x526   : > { %v2289_v16 = vadd.f32 %v2288_v14, %v8851_v42  ;;  %v2498_v17 = vadd.f32 %v2497_v15, %v8853_v38 }
 0x527   : > { %5566 = vst [vmem:[%s7428_s14 + $0x468] sm:$0xff] %v5054_v12 }
 0x528   : > { %v4185_v18 = vmax.f32 %v2289_v16, 0.0  ;;  %v4186_v19 = vmax.f32 %v2498_v17, 0.0  ;;  %v2706_v20 = vpop.f32.mrf.mxu2  ;;  %v2915_v21 = vpop.f32.mrf.mxu3  ;;  %6560 = vmatmul.msk.f32.gmra.mxu0 %vm319_vm1, %v7155_v13  ;;  %6625 = vmatmul.msk.f32.gmra.mxu1 %vm319_vm1, %v7155_v13  ;;  %v7159_v13 = vld [vmem:[%s7307_s28 + $0x130] sm:$0xff] }
 0x529   : > { %v2707_v22 = vadd.f32 %v2706_v20, %v8859_v43  ;;  %v2916_v23 = vadd.f32 %v2915_v21, %v8861_v44 }
 0x52a   : > { %v5061_v24 = vpack.c.bf16 %v4186_v19, %v4185_v18 }
 0x52b   : > { %v4187_v25 = vmax.f32 %v2707_v22, 0.0  ;;  %v4188_v26 = vmax.f32 %v2916_v23, 0.0 }
 0x52c   : > { %5573 = vst [vmem:[%s7428_s14 + $0x4a0] sm:$0xff] %v5061_v24 }
 0x52d   : > { %v5062_v27 = vpack.c.bf16 %v4188_v26, %v4187_v25  ;;  %6691 = vmatmul.msk.f32.gmra.mxu2 %vm319_vm1, %v7156_v28  ;;  %6756 = vmatmul.msk.f32.gmra.mxu3 %vm319_vm1, %v7156_v28  ;;  %v2291_v29 = vpop.f32.mrf.mxu0  ;;  %v2500_v30 = vpop.f32.mrf.mxu1 }
 0x52e   : > { %v2292_v31 = vadd.f32 %v2291_v29, %v8851_v42  ;;  %v2501_v32 = vadd.f32 %v2500_v30, %v8853_v38 }
 0x52f   : > { %5574 = vst [vmem:[%s7428_s14 + $0x4a8] sm:$0xff] %v5062_v27 }
 0x530   : > { %v4201_v33 = vmax.f32 %v2292_v31, 0.0  ;;  %v4202_v34 = vmax.f32 %v2501_v32, 0.0  ;;  %v2709_v37 = vpop.f32.mrf.mxu2  ;;  %v2918_v40 = vpop.f32.mrf.mxu3  ;;  %6561 = vmatmul.msk.f32.gmra.mxu0 %vm319_vm1, %v7156_v28  ;;  %6626 = vmatmul.msk.f32.gmra.mxu1 %vm319_vm1, %v7156_v28  ;;  %v7160_v28 = vld [vmem:[%s7307_s28 + $0x138] sm:$0xff] }
 0x531   : > { %v2710_v41 = vadd.f32 %v2709_v37, %v8859_v43  ;;  %v2919_v35 = vadd.f32 %v2918_v40, %v8861_v44 }
 0x532   : > { %v5069_v36 = vpack.c.bf16 %v4202_v34, %v4201_v33 }
 0x533   : > { %v4203_v39 = vmax.f32 %v2710_v41, 0.0  ;;  %v4204_v45 = vmax.f32 %v2919_v35, 0.0 }
 0x534   : > { %5581 = vst [vmem:[%s7428_s14 + $0x4e0] sm:$0xff] %v5069_v36 }
 0x535   : > { %v5070_v46 = vpack.c.bf16 %v4204_v45, %v4203_v39  ;;  %6692 = vmatmul.msk.f32.gmra.mxu2 %vm319_vm1, %v7157_v47  ;;  %6757 = vmatmul.msk.f32.gmra.mxu3 %vm319_vm1, %v7157_v47  ;;  %v2294_v48 = vpop.f32.mrf.mxu0  ;;  %v2503_v49 = vpop.f32.mrf.mxu1 }
 0x536   : > { %v2295_v50 = vadd.f32 %v2294_v48, %v8851_v42  ;;  %v2504_v51 = vadd.f32 %v2503_v49, %v8853_v38 }
 0x537   : > { %5582 = vst [vmem:[%s7428_s14 + $0x4e8] sm:$0xff] %v5070_v46 }
 0x538   : > { %v4217_v52 = vmax.f32 %v2295_v50, 0.0  ;;  %v4218_v53 = vmax.f32 %v2504_v51, 0.0  ;;  %v2712_v54 = vpop.f32.mrf.mxu2  ;;  %v2921_v55 = vpop.f32.mrf.mxu3  ;;  %6562 = vmatmul.msk.f32.gmra.mxu0 %vm319_vm1, %v7157_v47  ;;  %6627 = vmatmul.msk.f32.gmra.mxu1 %vm319_vm1, %v7157_v47  ;;  %v7161_v47 = vld [vmem:[%s7307_s28 + $0x140] sm:$0xff] }
 0x539   : > { %v2713_v56 = vadd.f32 %v2712_v54, %v8859_v43  ;;  %v2922_v57 = vadd.f32 %v2921_v55, %v8861_v44 }
 0x53a   : > { %v5077_v58 = vpack.c.bf16 %v4218_v53, %v4217_v52 }
 0x53b   : > { %v4219_v59 = vmax.f32 %v2713_v56, 0.0  ;;  %v4220_v60 = vmax.f32 %v2922_v57, 0.0 }
 0x53c   : > { %5589 = vst [vmem:[%s7428_s14 + $0x520] sm:$0xff] %v5077_v58 }
 0x53d   : > { %v5078_v61 = vpack.c.bf16 %v4220_v60, %v4219_v59  ;;  %6693 = vmatmul.msk.f32.gmra.mxu2 %vm319_vm1, %v7158_v62  ;;  %6758 = vmatmul.msk.f32.gmra.mxu3 %vm319_vm1, %v7158_v62  ;;  %v2297_v63 = vpop.f32.mrf.mxu0  ;;  %v2506_v0 = vpop.f32.mrf.mxu1 }
 0x53e   : > { %v2298_v1 = vadd.f32 %v2297_v63, %v8851_v42  ;;  %v2507_v2 = vadd.f32 %v2506_v0, %v8853_v38 }
 0x53f   : > { %5590 = vst [vmem:[%s7428_s14 + $0x528] sm:$0xff] %v5078_v61 }
 0x540   : > { %v4233_v3 = vmax.f32 %v2298_v1, 0.0  ;;  %v4234_v4 = vmax.f32 %v2507_v2, 0.0  ;;  %v2715_v5 = vpop.f32.mrf.mxu2  ;;  %v2924_v6 = vpop.f32.mrf.mxu3  ;;  %6563 = vmatmul.msk.f32.gmra.mxu0 %vm319_vm1, %v7158_v62  ;;  %6628 = vmatmul.msk.f32.gmra.mxu1 %vm319_vm1, %v7158_v62  ;;  %v7162_v62 = vld [vmem:[%s7307_s28 + $0x148] sm:$0xff] }
 0x541   : > { %v2716_v7 = vadd.f32 %v2715_v5, %v8859_v43  ;;  %v2925_v8 = vadd.f32 %v2924_v6, %v8861_v44 }
 0x542   : > { %v5085_v9 = vpack.c.bf16 %v4234_v4, %v4233_v3 }
 0x543   : > { %v4235_v10 = vmax.f32 %v2716_v7, 0.0  ;;  %v4236_v11 = vmax.f32 %v2925_v8, 0.0 }
 0x544   : > { %5597 = vst [vmem:[%s7428_s14 + $0x560] sm:$0xff] %v5085_v9 }
 0x545   : > { %v5086_v12 = vpack.c.bf16 %v4236_v11, %v4235_v10  ;;  %6694 = vmatmul.msk.f32.gmra.mxu2 %vm319_vm1, %v7159_v13  ;;  %6759 = vmatmul.msk.f32.gmra.mxu3 %vm319_vm1, %v7159_v13  ;;  %v2300_v14 = vpop.f32.mrf.mxu0  ;;  %v2509_v15 = vpop.f32.mrf.mxu1 }
 0x546   : > { %v2301_v16 = vadd.f32 %v2300_v14, %v8851_v42  ;;  %v2510_v17 = vadd.f32 %v2509_v15, %v8853_v38 }
 0x547   : > { %5598 = vst [vmem:[%s7428_s14 + $0x568] sm:$0xff] %v5086_v12 }
 0x548   : > { %v4249_v18 = vmax.f32 %v2301_v16, 0.0  ;;  %v4250_v19 = vmax.f32 %v2510_v17, 0.0  ;;  %v2718_v20 = vpop.f32.mrf.mxu2  ;;  %v2927_v21 = vpop.f32.mrf.mxu3  ;;  %6564 = vmatmul.msk.f32.gmra.mxu0 %vm319_vm1, %v7159_v13  ;;  %6629 = vmatmul.msk.f32.gmra.mxu1 %vm319_vm1, %v7159_v13  ;;  %v7163_v13 = vld [vmem:[%s7307_s28 + $0x150] sm:$0xff] }
 0x549   : > { %v2719_v22 = vadd.f32 %v2718_v20, %v8859_v43  ;;  %v2928_v23 = vadd.f32 %v2927_v21, %v8861_v44 }
 0x54a   : > { %v5093_v24 = vpack.c.bf16 %v4250_v19, %v4249_v18 }
 0x54b   : > { %v4251_v25 = vmax.f32 %v2719_v22, 0.0  ;;  %v4252_v26 = vmax.f32 %v2928_v23, 0.0 }
 0x54c   : > { %5605 = vst [vmem:[%s7428_s14 + $0x5a0] sm:$0xff] %v5093_v24 }
 0x54d   : > { %v5094_v27 = vpack.c.bf16 %v4252_v26, %v4251_v25  ;;  %6695 = vmatmul.msk.f32.gmra.mxu2 %vm319_vm1, %v7160_v28  ;;  %6760 = vmatmul.msk.f32.gmra.mxu3 %vm319_vm1, %v7160_v28  ;;  %v2303_v29 = vpop.f32.mrf.mxu0  ;;  %v2512_v30 = vpop.f32.mrf.mxu1 }
 0x54e   : > { %v2304_v31 = vadd.f32 %v2303_v29, %v8851_v42  ;;  %v2513_v32 = vadd.f32 %v2512_v30, %v8853_v38 }
 0x54f   : > { %5606 = vst [vmem:[%s7428_s14 + $0x5a8] sm:$0xff] %v5094_v27 }
 0x550   : > { %v4265_v33 = vmax.f32 %v2304_v31, 0.0  ;;  %v4266_v34 = vmax.f32 %v2513_v32, 0.0  ;;  %v2721_v37 = vpop.f32.mrf.mxu2  ;;  %v2930_v40 = vpop.f32.mrf.mxu3  ;;  %6565 = vmatmul.msk.f32.gmra.mxu0 %vm319_vm1, %v7160_v28  ;;  %6630 = vmatmul.msk.f32.gmra.mxu1 %vm319_vm1, %v7160_v28  ;;  %v7164_v28 = vld [vmem:[%s7307_s28 + $0x158] sm:$0xff] }
 0x551   : > { %v2722_v41 = vadd.f32 %v2721_v37, %v8859_v43  ;;  %v2931_v35 = vadd.f32 %v2930_v40, %v8861_v44 }
 0x552   : > { %v5101_v36 = vpack.c.bf16 %v4266_v34, %v4265_v33 }
 0x553   : > { %v4267_v39 = vmax.f32 %v2722_v41, 0.0  ;;  %v4268_v45 = vmax.f32 %v2931_v35, 0.0 }
 0x554   : > { %5613 = vst [vmem:[%s7428_s14 + $0x5e0] sm:$0xff] %v5101_v36 }
 0x555   : > { %v5102_v46 = vpack.c.bf16 %v4268_v45, %v4267_v39  ;;  %6696 = vmatmul.msk.f32.gmra.mxu2 %vm319_vm1, %v7161_v47  ;;  %6761 = vmatmul.msk.f32.gmra.mxu3 %vm319_vm1, %v7161_v47  ;;  %v2306_v48 = vpop.f32.mrf.mxu0  ;;  %v2515_v49 = vpop.f32.mrf.mxu1 }
 0x556   : > { %v2307_v50 = vadd.f32 %v2306_v48, %v8851_v42  ;;  %v2516_v51 = vadd.f32 %v2515_v49, %v8853_v38 }
 0x557   : > { %5614 = vst [vmem:[%s7428_s14 + $0x5e8] sm:$0xff] %v5102_v46 }
 0x558   : > { %v4281_v52 = vmax.f32 %v2307_v50, 0.0  ;;  %v4282_v53 = vmax.f32 %v2516_v51, 0.0  ;;  %v2724_v54 = vpop.f32.mrf.mxu2  ;;  %v2933_v55 = vpop.f32.mrf.mxu3  ;;  %6566 = vmatmul.msk.f32.gmra.mxu0 %vm319_vm1, %v7161_v47  ;;  %6631 = vmatmul.msk.f32.gmra.mxu1 %vm319_vm1, %v7161_v47  ;;  %v7165_v47 = vld [vmem:[%s7307_s28 + $0x160] sm:$0xff] }
 0x559   : > { %v2725_v56 = vadd.f32 %v2724_v54, %v8859_v43  ;;  %v2934_v57 = vadd.f32 %v2933_v55, %v8861_v44 }
 0x55a   : > { %v5109_v58 = vpack.c.bf16 %v4282_v53, %v4281_v52 }
 0x55b   : > { %v4283_v59 = vmax.f32 %v2725_v56, 0.0  ;;  %v4284_v60 = vmax.f32 %v2934_v57, 0.0 }
 0x55c   : > { %5621 = vst [vmem:[%s7428_s14 + $0x620] sm:$0xff] %v5109_v58 }
 0x55d   : > { %v5110_v61 = vpack.c.bf16 %v4284_v60, %v4283_v59  ;;  %6697 = vmatmul.msk.f32.gmra.mxu2 %vm319_vm1, %v7162_v62  ;;  %6762 = vmatmul.msk.f32.gmra.mxu3 %vm319_vm1, %v7162_v62  ;;  %v2309_v63 = vpop.f32.mrf.mxu0  ;;  %v2518_v0 = vpop.f32.mrf.mxu1 }
 0x55e   : > { %v2310_v1 = vadd.f32 %v2309_v63, %v8851_v42  ;;  %v2519_v2 = vadd.f32 %v2518_v0, %v8853_v38 }
 0x55f   : > { %5622 = vst [vmem:[%s7428_s14 + $0x628] sm:$0xff] %v5110_v61 }
 0x560   : > { %v4297_v3 = vmax.f32 %v2310_v1, 0.0  ;;  %v4298_v4 = vmax.f32 %v2519_v2, 0.0  ;;  %v2727_v5 = vpop.f32.mrf.mxu2  ;;  %v2936_v6 = vpop.f32.mrf.mxu3  ;;  %6567 = vmatmul.msk.f32.gmra.mxu0 %vm319_vm1, %v7162_v62  ;;  %6632 = vmatmul.msk.f32.gmra.mxu1 %vm319_vm1, %v7162_v62  ;;  %v7166_v62 = vld [vmem:[%s7307_s28 + $0x168] sm:$0xff] }
 0x561   : > { %v2728_v7 = vadd.f32 %v2727_v5, %v8859_v43  ;;  %v2937_v8 = vadd.f32 %v2936_v6, %v8861_v44 }
 0x562   : > { %v5117_v9 = vpack.c.bf16 %v4298_v4, %v4297_v3 }
 0x563   : > { %v4299_v10 = vmax.f32 %v2728_v7, 0.0  ;;  %v4300_v11 = vmax.f32 %v2937_v8, 0.0 }
 0x564   : > { %5629 = vst [vmem:[%s7428_s14 + $0x660] sm:$0xff] %v5117_v9 }
 0x565   : > { %v5118_v12 = vpack.c.bf16 %v4300_v11, %v4299_v10  ;;  %6698 = vmatmul.msk.f32.gmra.mxu2 %vm319_vm1, %v7163_v13  ;;  %6763 = vmatmul.msk.f32.gmra.mxu3 %vm319_vm1, %v7163_v13  ;;  %v2312_v14 = vpop.f32.mrf.mxu0  ;;  %v2521_v15 = vpop.f32.mrf.mxu1 }
 0x566   : > { %v2313_v16 = vadd.f32 %v2312_v14, %v8851_v42  ;;  %v2522_v17 = vadd.f32 %v2521_v15, %v8853_v38 }
 0x567   : > { %5630 = vst [vmem:[%s7428_s14 + $0x668] sm:$0xff] %v5118_v12 }
 0x568   : > { %v4313_v18 = vmax.f32 %v2313_v16, 0.0  ;;  %v4314_v19 = vmax.f32 %v2522_v17, 0.0  ;;  %v2730_v20 = vpop.f32.mrf.mxu2  ;;  %v2939_v21 = vpop.f32.mrf.mxu3  ;;  %6568 = vmatmul.msk.f32.gmra.mxu0 %vm319_vm1, %v7163_v13  ;;  %6633 = vmatmul.msk.f32.gmra.mxu1 %vm319_vm1, %v7163_v13  ;;  %v7167_v13 = vld [vmem:[%s7307_s28 + $0x170] sm:$0xff] }
 0x569   : > { %v2731_v22 = vadd.f32 %v2730_v20, %v8859_v43  ;;  %v2940_v23 = vadd.f32 %v2939_v21, %v8861_v44 }
 0x56a   : > { %v5125_v24 = vpack.c.bf16 %v4314_v19, %v4313_v18 }
 0x56b   : > { %v4315_v25 = vmax.f32 %v2731_v22, 0.0  ;;  %v4316_v26 = vmax.f32 %v2940_v23, 0.0 }
 0x56c   : > { %5637 = vst [vmem:[%s7428_s14 + $0x6a0] sm:$0xff] %v5125_v24 }
 0x56d   : > { %v5126_v27 = vpack.c.bf16 %v4316_v26, %v4315_v25  ;;  %6699 = vmatmul.msk.f32.gmra.mxu2 %vm319_vm1, %v7164_v28  ;;  %6764 = vmatmul.msk.f32.gmra.mxu3 %vm319_vm1, %v7164_v28  ;;  %v2315_v29 = vpop.f32.mrf.mxu0  ;;  %v2524_v30 = vpop.f32.mrf.mxu1 }
 0x56e   : > { %v2316_v31 = vadd.f32 %v2315_v29, %v8851_v42  ;;  %v2525_v32 = vadd.f32 %v2524_v30, %v8853_v38 }
 0x56f   : > { %5638 = vst [vmem:[%s7428_s14 + $0x6a8] sm:$0xff] %v5126_v27 }
 0x570   : > { %v4329_v33 = vmax.f32 %v2316_v31, 0.0  ;;  %v4330_v34 = vmax.f32 %v2525_v32, 0.0  ;;  %v2733_v37 = vpop.f32.mrf.mxu2  ;;  %v2942_v40 = vpop.f32.mrf.mxu3  ;;  %6569 = vmatmul.msk.f32.gmra.mxu0 %vm319_vm1, %v7164_v28  ;;  %6634 = vmatmul.msk.f32.gmra.mxu1 %vm319_vm1, %v7164_v28  ;;  %v7168_v28 = vld [vmem:[%s7307_s28 + $0x178] sm:$0xff] }
 0x571   : > { %v2734_v41 = vadd.f32 %v2733_v37, %v8859_v43  ;;  %v2943_v35 = vadd.f32 %v2942_v40, %v8861_v44 }
 0x572   : > { %v5133_v36 = vpack.c.bf16 %v4330_v34, %v4329_v33 }
 0x573   : > { %v4331_v39 = vmax.f32 %v2734_v41, 0.0  ;;  %v4332_v45 = vmax.f32 %v2943_v35, 0.0 }
 0x574   : > { %5645 = vst [vmem:[%s7428_s14 + $0x6e0] sm:$0xff] %v5133_v36 }
 0x575   : > { %v5134_v46 = vpack.c.bf16 %v4332_v45, %v4331_v39  ;;  %6700 = vmatmul.msk.f32.gmra.mxu2 %vm319_vm1, %v7165_v47  ;;  %6765 = vmatmul.msk.f32.gmra.mxu3 %vm319_vm1, %v7165_v47  ;;  %v2318_v48 = vpop.f32.mrf.mxu0  ;;  %v2527_v49 = vpop.f32.mrf.mxu1 }
 0x576   : > { %v2319_v50 = vadd.f32 %v2318_v48, %v8851_v42  ;;  %v2528_v51 = vadd.f32 %v2527_v49, %v8853_v38 }
 0x577   : > { %5646 = vst [vmem:[%s7428_s14 + $0x6e8] sm:$0xff] %v5134_v46 }
 0x578   : > { %v4345_v52 = vmax.f32 %v2319_v50, 0.0  ;;  %v4346_v53 = vmax.f32 %v2528_v51, 0.0  ;;  %v2736_v54 = vpop.f32.mrf.mxu2  ;;  %v2945_v55 = vpop.f32.mrf.mxu3  ;;  %6570 = vmatmul.msk.f32.gmra.mxu0 %vm319_vm1, %v7165_v47  ;;  %6635 = vmatmul.msk.f32.gmra.mxu1 %vm319_vm1, %v7165_v47  ;;  %v7169_v47 = vld [vmem:[%s7307_s28 + $0x180] sm:$0xff] }
 0x579   : > { %v2737_v56 = vadd.f32 %v2736_v54, %v8859_v43  ;;  %v2946_v57 = vadd.f32 %v2945_v55, %v8861_v44 }
 0x57a   : > { %v5141_v58 = vpack.c.bf16 %v4346_v53, %v4345_v52 }
 0x57b   : > { %v4347_v59 = vmax.f32 %v2737_v56, 0.0  ;;  %v4348_v60 = vmax.f32 %v2946_v57, 0.0 }
 0x57c   : > { %5653 = vst [vmem:[%s7428_s14 + $0x720] sm:$0xff] %v5141_v58 }
 0x57d   : > { %v5142_v61 = vpack.c.bf16 %v4348_v60, %v4347_v59  ;;  %6701 = vmatmul.msk.f32.gmra.mxu2 %vm319_vm1, %v7166_v62  ;;  %6766 = vmatmul.msk.f32.gmra.mxu3 %vm319_vm1, %v7166_v62  ;;  %v2321_v63 = vpop.f32.mrf.mxu0  ;;  %v2530_v0 = vpop.f32.mrf.mxu1 }
 0x57e   : > { %v2322_v1 = vadd.f32 %v2321_v63, %v8851_v42  ;;  %v2531_v2 = vadd.f32 %v2530_v0, %v8853_v38 }
 0x57f   : > { %5654 = vst [vmem:[%s7428_s14 + $0x728] sm:$0xff] %v5142_v61 }
 0x580   : > { %v4361_v3 = vmax.f32 %v2322_v1, 0.0  ;;  %v4362_v4 = vmax.f32 %v2531_v2, 0.0  ;;  %v2739_v5 = vpop.f32.mrf.mxu2  ;;  %v2948_v6 = vpop.f32.mrf.mxu3  ;;  %6571 = vmatmul.msk.f32.gmra.mxu0 %vm319_vm1, %v7166_v62  ;;  %6636 = vmatmul.msk.f32.gmra.mxu1 %vm319_vm1, %v7166_v62  ;;  %v7170_v62 = vld [vmem:[%s7307_s28 + $0x188] sm:$0xff] }
 0x581   : > { %v2740_v7 = vadd.f32 %v2739_v5, %v8859_v43  ;;  %v2949_v8 = vadd.f32 %v2948_v6, %v8861_v44 }
 0x582   : > { %v5149_v9 = vpack.c.bf16 %v4362_v4, %v4361_v3 }
 0x583   : > { %v4363_v10 = vmax.f32 %v2740_v7, 0.0  ;;  %v4364_v11 = vmax.f32 %v2949_v8, 0.0 }
 0x584   : > { %5661 = vst [vmem:[%s7428_s14 + $0x760] sm:$0xff] %v5149_v9 }
 0x585   : > { %v5150_v12 = vpack.c.bf16 %v4364_v11, %v4363_v10  ;;  %6702 = vmatmul.msk.f32.gmra.mxu2 %vm319_vm1, %v7167_v13  ;;  %6767 = vmatmul.msk.f32.gmra.mxu3 %vm319_vm1, %v7167_v13  ;;  %v2324_v14 = vpop.f32.mrf.mxu0  ;;  %v2533_v15 = vpop.f32.mrf.mxu1 }
 0x586   : > { %v2325_v16 = vadd.f32 %v2324_v14, %v8851_v42  ;;  %v2534_v17 = vadd.f32 %v2533_v15, %v8853_v38 }
 0x587   : > { %5662 = vst [vmem:[%s7428_s14 + $0x768] sm:$0xff] %v5150_v12 }
 0x588   : > { %v4377_v18 = vmax.f32 %v2325_v16, 0.0  ;;  %v4378_v19 = vmax.f32 %v2534_v17, 0.0  ;;  %v2742_v20 = vpop.f32.mrf.mxu2  ;;  %v2951_v21 = vpop.f32.mrf.mxu3  ;;  %6572 = vmatmul.msk.f32.gmra.mxu0 %vm319_vm1, %v7167_v13  ;;  %6637 = vmatmul.msk.f32.gmra.mxu1 %vm319_vm1, %v7167_v13  ;;  %v7171_v13 = vld [vmem:[%s7307_s28 + $0x190] sm:$0xff] }
 0x589   : > { %v2743_v22 = vadd.f32 %v2742_v20, %v8859_v43  ;;  %v2952_v23 = vadd.f32 %v2951_v21, %v8861_v44 }
 0x58a   : > { %v5157_v24 = vpack.c.bf16 %v4378_v19, %v4377_v18 }
 0x58b   : > { %v4379_v25 = vmax.f32 %v2743_v22, 0.0  ;;  %v4380_v26 = vmax.f32 %v2952_v23, 0.0 }
 0x58c   : > { %5669 = vst [vmem:[%s7428_s14 + $0x7a0] sm:$0xff] %v5157_v24 }
 0x58d   : > { %v5158_v27 = vpack.c.bf16 %v4380_v26, %v4379_v25  ;;  %6703 = vmatmul.msk.f32.gmra.mxu2 %vm319_vm1, %v7168_v28  ;;  %6768 = vmatmul.msk.f32.gmra.mxu3 %vm319_vm1, %v7168_v28  ;;  %v2327_v29 = vpop.f32.mrf.mxu0  ;;  %v2536_v30 = vpop.f32.mrf.mxu1 }
 0x58e   : > { %v2328_v31 = vadd.f32 %v2327_v29, %v8851_v42  ;;  %v2537_v32 = vadd.f32 %v2536_v30, %v8853_v38 }
 0x58f   : > { %5670 = vst [vmem:[%s7428_s14 + $0x7a8] sm:$0xff] %v5158_v27 }
 0x590   : > { %v4393_v33 = vmax.f32 %v2328_v31, 0.0  ;;  %v4394_v34 = vmax.f32 %v2537_v32, 0.0  ;;  %v2745_v37 = vpop.f32.mrf.mxu2  ;;  %v2954_v40 = vpop.f32.mrf.mxu3  ;;  %6573 = vmatmul.msk.f32.gmra.mxu0 %vm319_vm1, %v7168_v28  ;;  %6638 = vmatmul.msk.f32.gmra.mxu1 %vm319_vm1, %v7168_v28  ;;  %v7172_v28 = vld [vmem:[%s7307_s28 + $0x198] sm:$0xff] }
 0x591   : > { %v2746_v41 = vadd.f32 %v2745_v37, %v8859_v43  ;;  %v2955_v35 = vadd.f32 %v2954_v40, %v8861_v44 }
 0x592   : > { %v5165_v36 = vpack.c.bf16 %v4394_v34, %v4393_v33 }
 0x593   : > { %v4395_v39 = vmax.f32 %v2746_v41, 0.0  ;;  %v4396_v45 = vmax.f32 %v2955_v35, 0.0 }
 0x594   : > { %5677 = vst [vmem:[%s7428_s14 + $0x7e0] sm:$0xff] %v5165_v36 }
 0x595   : > { %v5166_v46 = vpack.c.bf16 %v4396_v45, %v4395_v39  ;;  %6704 = vmatmul.msk.f32.gmra.mxu2 %vm319_vm1, %v7169_v47  ;;  %6769 = vmatmul.msk.f32.gmra.mxu3 %vm319_vm1, %v7169_v47  ;;  %v2330_v48 = vpop.f32.mrf.mxu0  ;;  %v2539_v49 = vpop.f32.mrf.mxu1 }
 0x596   : > { %v2331_v50 = vadd.f32 %v2330_v48, %v8851_v42  ;;  %v2540_v51 = vadd.f32 %v2539_v49, %v8853_v38 }
 0x597   : > { %5678 = vst [vmem:[%s7428_s14 + $0x7e8] sm:$0xff] %v5166_v46 }
 0x598   : > { %v4409_v52 = vmax.f32 %v2331_v50, 0.0  ;;  %v4410_v53 = vmax.f32 %v2540_v51, 0.0  ;;  %v2748_v54 = vpop.f32.mrf.mxu2  ;;  %v2957_v55 = vpop.f32.mrf.mxu3  ;;  %6574 = vmatmul.msk.f32.gmra.mxu0 %vm319_vm1, %v7169_v47  ;;  %6639 = vmatmul.msk.f32.gmra.mxu1 %vm319_vm1, %v7169_v47  ;;  %v7173_v47 = vld [vmem:[%s7307_s28 + $0x1a0] sm:$0xff] }
 0x599   : > { %v2749_v56 = vadd.f32 %v2748_v54, %v8859_v43  ;;  %v2958_v57 = vadd.f32 %v2957_v55, %v8861_v44 }
 0x59a   : > { %v5173_v58 = vpack.c.bf16 %v4410_v53, %v4409_v52 }
 0x59b   : > { %v4411_v59 = vmax.f32 %v2749_v56, 0.0  ;;  %v4412_v60 = vmax.f32 %v2958_v57, 0.0 }
 0x59c   : > { %5685 = vst [vmem:[%s7428_s14 + $0x820] sm:$0xff] %v5173_v58 }
 0x59d   : > { %v5174_v61 = vpack.c.bf16 %v4412_v60, %v4411_v59  ;;  %6705 = vmatmul.msk.f32.gmra.mxu2 %vm319_vm1, %v7170_v62  ;;  %6770 = vmatmul.msk.f32.gmra.mxu3 %vm319_vm1, %v7170_v62  ;;  %v2333_v63 = vpop.f32.mrf.mxu0  ;;  %v2542_v0 = vpop.f32.mrf.mxu1 }
 0x59e   : > { %v2334_v1 = vadd.f32 %v2333_v63, %v8851_v42  ;;  %v2543_v2 = vadd.f32 %v2542_v0, %v8853_v38 }
 0x59f   : > { %5686 = vst [vmem:[%s7428_s14 + $0x828] sm:$0xff] %v5174_v61 }
 0x5a0   : > { %v4425_v3 = vmax.f32 %v2334_v1, 0.0  ;;  %v4426_v4 = vmax.f32 %v2543_v2, 0.0  ;;  %v2751_v5 = vpop.f32.mrf.mxu2  ;;  %v2960_v6 = vpop.f32.mrf.mxu3  ;;  %6575 = vmatmul.msk.f32.gmra.mxu0 %vm319_vm1, %v7170_v62  ;;  %6640 = vmatmul.msk.f32.gmra.mxu1 %vm319_vm1, %v7170_v62  ;;  %v7174_v62 = vld [vmem:[%s7307_s28 + $0x1a8] sm:$0xff] }
 0x5a1   : > { %v2752_v7 = vadd.f32 %v2751_v5, %v8859_v43  ;;  %v2961_v8 = vadd.f32 %v2960_v6, %v8861_v44 }
 0x5a2   : > { %v5181_v9 = vpack.c.bf16 %v4426_v4, %v4425_v3 }
 0x5a3   : > { %v4427_v10 = vmax.f32 %v2752_v7, 0.0  ;;  %v4428_v11 = vmax.f32 %v2961_v8, 0.0 }
 0x5a4   : > { %5693 = vst [vmem:[%s7428_s14 + $0x860] sm:$0xff] %v5181_v9 }
 0x5a5   : > { %v5182_v12 = vpack.c.bf16 %v4428_v11, %v4427_v10  ;;  %6706 = vmatmul.msk.f32.gmra.mxu2 %vm319_vm1, %v7171_v13  ;;  %6771 = vmatmul.msk.f32.gmra.mxu3 %vm319_vm1, %v7171_v13  ;;  %v2336_v14 = vpop.f32.mrf.mxu0  ;;  %v2545_v15 = vpop.f32.mrf.mxu1 }
 0x5a6   : > { %v2337_v16 = vadd.f32 %v2336_v14, %v8851_v42  ;;  %v2546_v17 = vadd.f32 %v2545_v15, %v8853_v38 }
 0x5a7   : > { %5694 = vst [vmem:[%s7428_s14 + $0x868] sm:$0xff] %v5182_v12 }
 0x5a8   : > { %v4441_v18 = vmax.f32 %v2337_v16, 0.0  ;;  %v4442_v19 = vmax.f32 %v2546_v17, 0.0  ;;  %v2754_v20 = vpop.f32.mrf.mxu2  ;;  %v2963_v21 = vpop.f32.mrf.mxu3  ;;  %6576 = vmatmul.msk.f32.gmra.mxu0 %vm319_vm1, %v7171_v13  ;;  %6641 = vmatmul.msk.f32.gmra.mxu1 %vm319_vm1, %v7171_v13  ;;  %v7175_v13 = vld [vmem:[%s7307_s28 + $0x1b0] sm:$0xff] }
 0x5a9   : > { %v2755_v22 = vadd.f32 %v2754_v20, %v8859_v43  ;;  %v2964_v23 = vadd.f32 %v2963_v21, %v8861_v44 }
 0x5aa   : > { %v5189_v24 = vpack.c.bf16 %v4442_v19, %v4441_v18 }
 0x5ab   : > { %v4443_v25 = vmax.f32 %v2755_v22, 0.0  ;;  %v4444_v26 = vmax.f32 %v2964_v23, 0.0 }
 0x5ac   : > { %5701 = vst [vmem:[%s7428_s14 + $0x8a0] sm:$0xff] %v5189_v24 }
 0x5ad   : > { %v5190_v27 = vpack.c.bf16 %v4444_v26, %v4443_v25  ;;  %6707 = vmatmul.msk.f32.gmra.mxu2 %vm319_vm1, %v7172_v28  ;;  %6772 = vmatmul.msk.f32.gmra.mxu3 %vm319_vm1, %v7172_v28  ;;  %v2339_v29 = vpop.f32.mrf.mxu0  ;;  %v2548_v30 = vpop.f32.mrf.mxu1 }
 0x5ae   : > { %v2340_v31 = vadd.f32 %v2339_v29, %v8851_v42  ;;  %v2549_v32 = vadd.f32 %v2548_v30, %v8853_v38 }
 0x5af   : > { %5702 = vst [vmem:[%s7428_s14 + $0x8a8] sm:$0xff] %v5190_v27 }
 0x5b0   : > { %v4457_v33 = vmax.f32 %v2340_v31, 0.0  ;;  %v4458_v34 = vmax.f32 %v2549_v32, 0.0  ;;  %v2757_v37 = vpop.f32.mrf.mxu2  ;;  %v2966_v40 = vpop.f32.mrf.mxu3  ;;  %6577 = vmatmul.msk.f32.gmra.mxu0 %vm319_vm1, %v7172_v28  ;;  %6642 = vmatmul.msk.f32.gmra.mxu1 %vm319_vm1, %v7172_v28  ;;  %v7176_v28 = vld [vmem:[%s7307_s28 + $0x1b8] sm:$0xff] }
 0x5b1   : > { %v2758_v41 = vadd.f32 %v2757_v37, %v8859_v43  ;;  %v2967_v35 = vadd.f32 %v2966_v40, %v8861_v44 }
 0x5b2   : > { %v5197_v36 = vpack.c.bf16 %v4458_v34, %v4457_v33 }
 0x5b3   : > { %v4459_v39 = vmax.f32 %v2758_v41, 0.0  ;;  %v4460_v45 = vmax.f32 %v2967_v35, 0.0 }
 0x5b4   : > { %5709 = vst [vmem:[%s7428_s14 + $0x8e0] sm:$0xff] %v5197_v36 }
 0x5b5   : > { %v5198_v46 = vpack.c.bf16 %v4460_v45, %v4459_v39  ;;  %6708 = vmatmul.msk.f32.gmra.mxu2 %vm319_vm1, %v7173_v47  ;;  %6773 = vmatmul.msk.f32.gmra.mxu3 %vm319_vm1, %v7173_v47  ;;  %v2342_v48 = vpop.f32.mrf.mxu0  ;;  %v2551_v49 = vpop.f32.mrf.mxu1 }
 0x5b6   : > { %v2343_v50 = vadd.f32 %v2342_v48, %v8851_v42  ;;  %v2552_v51 = vadd.f32 %v2551_v49, %v8853_v38 }
 0x5b7   : > { %5710 = vst [vmem:[%s7428_s14 + $0x8e8] sm:$0xff] %v5198_v46 }
 0x5b8   : > { %v4473_v52 = vmax.f32 %v2343_v50, 0.0  ;;  %v4474_v53 = vmax.f32 %v2552_v51, 0.0  ;;  %v2760_v54 = vpop.f32.mrf.mxu2  ;;  %v2969_v55 = vpop.f32.mrf.mxu3  ;;  %6578 = vmatmul.msk.f32.gmra.mxu0 %vm319_vm1, %v7173_v47  ;;  %6643 = vmatmul.msk.f32.gmra.mxu1 %vm319_vm1, %v7173_v47  ;;  %v7177_v47 = vld [vmem:[%s7307_s28 + $0x1c0] sm:$0xff] }
 0x5b9   : > { %v2761_v56 = vadd.f32 %v2760_v54, %v8859_v43  ;;  %v2970_v57 = vadd.f32 %v2969_v55, %v8861_v44 }
 0x5ba   : > { %v5205_v58 = vpack.c.bf16 %v4474_v53, %v4473_v52 }
 0x5bb   : > { %v4475_v59 = vmax.f32 %v2761_v56, 0.0  ;;  %v4476_v60 = vmax.f32 %v2970_v57, 0.0 }
 0x5bc   : > { %5717 = vst [vmem:[%s7428_s14 + $0x920] sm:$0xff] %v5205_v58 }
 0x5bd   : > { %v5206_v61 = vpack.c.bf16 %v4476_v60, %v4475_v59  ;;  %6709 = vmatmul.msk.f32.gmra.mxu2 %vm319_vm1, %v7174_v62  ;;  %6774 = vmatmul.msk.f32.gmra.mxu3 %vm319_vm1, %v7174_v62  ;;  %v2345_v63 = vpop.f32.mrf.mxu0  ;;  %v2554_v0 = vpop.f32.mrf.mxu1 }
 0x5be   : > { %v2346_v1 = vadd.f32 %v2345_v63, %v8851_v42  ;;  %v2555_v2 = vadd.f32 %v2554_v0, %v8853_v38 }
 0x5bf   : > { %5718 = vst [vmem:[%s7428_s14 + $0x928] sm:$0xff] %v5206_v61 }
 0x5c0   : > { %v4489_v3 = vmax.f32 %v2346_v1, 0.0  ;;  %v4490_v4 = vmax.f32 %v2555_v2, 0.0  ;;  %v2763_v5 = vpop.f32.mrf.mxu2  ;;  %v2972_v6 = vpop.f32.mrf.mxu3  ;;  %6579 = vmatmul.msk.f32.gmra.mxu0 %vm319_vm1, %v7174_v62  ;;  %6644 = vmatmul.msk.f32.gmra.mxu1 %vm319_vm1, %v7174_v62  ;;  %v7178_v62 = vld [vmem:[%s7307_s28 + $0x1c8] sm:$0xff] }
 0x5c1   : > { %v2764_v7 = vadd.f32 %v2763_v5, %v8859_v43  ;;  %v2973_v8 = vadd.f32 %v2972_v6, %v8861_v44 }
 0x5c2   : > { %v5213_v9 = vpack.c.bf16 %v4490_v4, %v4489_v3 }
 0x5c3   : > { %v4491_v10 = vmax.f32 %v2764_v7, 0.0  ;;  %v4492_v11 = vmax.f32 %v2973_v8, 0.0 }
 0x5c4   : > { %5725 = vst [vmem:[%s7428_s14 + $0x960] sm:$0xff] %v5213_v9 }
 0x5c5   : > { %v5214_v12 = vpack.c.bf16 %v4492_v11, %v4491_v10  ;;  %6710 = vmatmul.msk.f32.gmra.mxu2 %vm319_vm1, %v7175_v13  ;;  %6775 = vmatmul.msk.f32.gmra.mxu3 %vm319_vm1, %v7175_v13  ;;  %v2348_v14 = vpop.f32.mrf.mxu0  ;;  %v2557_v15 = vpop.f32.mrf.mxu1 }
 0x5c6   : > { %v2349_v16 = vadd.f32 %v2348_v14, %v8851_v42  ;;  %v2558_v17 = vadd.f32 %v2557_v15, %v8853_v38 }
 0x5c7   : > { %5726 = vst [vmem:[%s7428_s14 + $0x968] sm:$0xff] %v5214_v12 }
 0x5c8   : > { %v4505_v18 = vmax.f32 %v2349_v16, 0.0  ;;  %v4506_v19 = vmax.f32 %v2558_v17, 0.0  ;;  %v2766_v20 = vpop.f32.mrf.mxu2  ;;  %v2975_v21 = vpop.f32.mrf.mxu3  ;;  %6580 = vmatmul.msk.f32.gmra.mxu0 %vm319_vm1, %v7175_v13  ;;  %6645 = vmatmul.msk.f32.gmra.mxu1 %vm319_vm1, %v7175_v13  ;;  %v7179_v13 = vld [vmem:[%s7307_s28 + $0x1d0] sm:$0xff] }
 0x5c9   : > { %v2767_v22 = vadd.f32 %v2766_v20, %v8859_v43  ;;  %v2976_v23 = vadd.f32 %v2975_v21, %v8861_v44 }
 0x5ca   : > { %v5221_v24 = vpack.c.bf16 %v4506_v19, %v4505_v18 }
 0x5cb   : > { %v4507_v25 = vmax.f32 %v2767_v22, 0.0  ;;  %v4508_v26 = vmax.f32 %v2976_v23, 0.0 }
 0x5cc   : > { %5733 = vst [vmem:[%s7428_s14 + $0x9a0] sm:$0xff] %v5221_v24 }
 0x5cd   : > { %v5222_v27 = vpack.c.bf16 %v4508_v26, %v4507_v25  ;;  %6711 = vmatmul.msk.f32.gmra.mxu2 %vm319_vm1, %v7176_v28  ;;  %6776 = vmatmul.msk.f32.gmra.mxu3 %vm319_vm1, %v7176_v28  ;;  %v2351_v29 = vpop.f32.mrf.mxu0  ;;  %v2560_v30 = vpop.f32.mrf.mxu1 }
 0x5ce   : > { %v2352_v31 = vadd.f32 %v2351_v29, %v8851_v42  ;;  %v2561_v32 = vadd.f32 %v2560_v30, %v8853_v38 }
 0x5cf   : > { %5734 = vst [vmem:[%s7428_s14 + $0x9a8] sm:$0xff] %v5222_v27 }
 0x5d0   : > { %v4521_v33 = vmax.f32 %v2352_v31, 0.0  ;;  %v4522_v34 = vmax.f32 %v2561_v32, 0.0  ;;  %v2769_v37 = vpop.f32.mrf.mxu2  ;;  %v2978_v40 = vpop.f32.mrf.mxu3  ;;  %6581 = vmatmul.msk.f32.gmra.mxu0 %vm319_vm1, %v7176_v28  ;;  %6646 = vmatmul.msk.f32.gmra.mxu1 %vm319_vm1, %v7176_v28  ;;  %v7180_v28 = vld [vmem:[%s7307_s28 + $0x1d8] sm:$0xff] }
 0x5d1   : > { %v2770_v41 = vadd.f32 %v2769_v37, %v8859_v43  ;;  %v2979_v35 = vadd.f32 %v2978_v40, %v8861_v44 }
 0x5d2   : > { %v5229_v36 = vpack.c.bf16 %v4522_v34, %v4521_v33 }
 0x5d3   : > { %v4523_v39 = vmax.f32 %v2770_v41, 0.0  ;;  %v4524_v45 = vmax.f32 %v2979_v35, 0.0 }
 0x5d4   : > { %5741 = vst [vmem:[%s7428_s14 + $0x9e0] sm:$0xff] %v5229_v36 }
 0x5d5   : > { %v5230_v46 = vpack.c.bf16 %v4524_v45, %v4523_v39  ;;  %6712 = vmatmul.msk.f32.gmra.mxu2 %vm319_vm1, %v7177_v47  ;;  %6777 = vmatmul.msk.f32.gmra.mxu3 %vm319_vm1, %v7177_v47  ;;  %v2354_v48 = vpop.f32.mrf.mxu0  ;;  %v2563_v49 = vpop.f32.mrf.mxu1 }
 0x5d6   : > { %v2355_v50 = vadd.f32 %v2354_v48, %v8851_v42  ;;  %v2564_v51 = vadd.f32 %v2563_v49, %v8853_v38 }
 0x5d7   : > { %5742 = vst [vmem:[%s7428_s14 + $0x9e8] sm:$0xff] %v5230_v46 }
 0x5d8   : > { %v4537_v52 = vmax.f32 %v2355_v50, 0.0  ;;  %v4538_v53 = vmax.f32 %v2564_v51, 0.0  ;;  %v2772_v54 = vpop.f32.mrf.mxu2  ;;  %v2981_v55 = vpop.f32.mrf.mxu3  ;;  %6582 = vmatmul.msk.f32.gmra.mxu0 %vm319_vm1, %v7177_v47  ;;  %6647 = vmatmul.msk.f32.gmra.mxu1 %vm319_vm1, %v7177_v47  ;;  %v7181_v47 = vld [vmem:[%s7307_s28 + $0x1e0] sm:$0xff] }
 0x5d9   : > { %v2773_v56 = vadd.f32 %v2772_v54, %v8859_v43  ;;  %v2982_v57 = vadd.f32 %v2981_v55, %v8861_v44 }
 0x5da   : > { %v5237_v58 = vpack.c.bf16 %v4538_v53, %v4537_v52 }
 0x5db   : > { %v4539_v59 = vmax.f32 %v2773_v56, 0.0  ;;  %v4540_v60 = vmax.f32 %v2982_v57, 0.0 }
 0x5dc   : > { %5749 = vst [vmem:[%s7428_s14 + $0xa20] sm:$0xff] %v5237_v58 }
 0x5dd   : > { %v5238_v61 = vpack.c.bf16 %v4540_v60, %v4539_v59  ;;  %6713 = vmatmul.msk.f32.gmra.mxu2 %vm319_vm1, %v7178_v62  ;;  %6778 = vmatmul.msk.f32.gmra.mxu3 %vm319_vm1, %v7178_v62  ;;  %v2357_v63 = vpop.f32.mrf.mxu0  ;;  %v2566_v0 = vpop.f32.mrf.mxu1 }
 0x5de   : > { %v2358_v1 = vadd.f32 %v2357_v63, %v8851_v42  ;;  %v2567_v2 = vadd.f32 %v2566_v0, %v8853_v38 }
 0x5df   : > { %5750 = vst [vmem:[%s7428_s14 + $0xa28] sm:$0xff] %v5238_v61 }
 0x5e0   : > { %v4553_v3 = vmax.f32 %v2358_v1, 0.0  ;;  %v4554_v4 = vmax.f32 %v2567_v2, 0.0  ;;  %v2775_v5 = vpop.f32.mrf.mxu2  ;;  %v2984_v6 = vpop.f32.mrf.mxu3  ;;  %6583 = vmatmul.msk.f32.gmra.mxu0 %vm319_vm1, %v7178_v62  ;;  %6648 = vmatmul.msk.f32.gmra.mxu1 %vm319_vm1, %v7178_v62  ;;  %v7182_v62 = vld [vmem:[%s7307_s28 + $0x1e8] sm:$0xff] }
 0x5e1   : > { %v2776_v7 = vadd.f32 %v2775_v5, %v8859_v43  ;;  %v2985_v8 = vadd.f32 %v2984_v6, %v8861_v44 }
 0x5e2   : > { %v5245_v9 = vpack.c.bf16 %v4554_v4, %v4553_v3 }
 0x5e3   : > { %v4555_v10 = vmax.f32 %v2776_v7, 0.0  ;;  %v4556_v11 = vmax.f32 %v2985_v8, 0.0 }
 0x5e4   : > { %5757 = vst [vmem:[%s7428_s14 + $0xa60] sm:$0xff] %v5245_v9 }
 0x5e5   : > { %v5246_v12 = vpack.c.bf16 %v4556_v11, %v4555_v10  ;;  %6714 = vmatmul.msk.f32.gmra.mxu2 %vm319_vm1, %v7179_v13  ;;  %6779 = vmatmul.msk.f32.gmra.mxu3 %vm319_vm1, %v7179_v13  ;;  %v2360_v14 = vpop.f32.mrf.mxu0  ;;  %v2569_v15 = vpop.f32.mrf.mxu1 }
 0x5e6   : > { %v2361_v16 = vadd.f32 %v2360_v14, %v8851_v42  ;;  %v2570_v17 = vadd.f32 %v2569_v15, %v8853_v38 }
 0x5e7   : > { %5758 = vst [vmem:[%s7428_s14 + $0xa68] sm:$0xff] %v5246_v12 }
 0x5e8   : > { %v4569_v18 = vmax.f32 %v2361_v16, 0.0  ;;  %v4570_v19 = vmax.f32 %v2570_v17, 0.0  ;;  %v2778_v20 = vpop.f32.mrf.mxu2  ;;  %v2987_v21 = vpop.f32.mrf.mxu3  ;;  %6584 = vmatmul.msk.f32.gmra.mxu0 %vm319_vm1, %v7179_v13  ;;  %6649 = vmatmul.msk.f32.gmra.mxu1 %vm319_vm1, %v7179_v13  ;;  %v7183_v13 = vld [vmem:[%s7307_s28 + $0x1f0] sm:$0xff] }
 0x5e9   : > { %v2779_v22 = vadd.f32 %v2778_v20, %v8859_v43  ;;  %v2988_v23 = vadd.f32 %v2987_v21, %v8861_v44 }
 0x5ea   : > { %v5253_v24 = vpack.c.bf16 %v4570_v19, %v4569_v18 }
 0x5eb   : > { %v4571_v25 = vmax.f32 %v2779_v22, 0.0  ;;  %v4572_v26 = vmax.f32 %v2988_v23, 0.0 }
 0x5ec   : > { %5765 = vst [vmem:[%s7428_s14 + $0xaa0] sm:$0xff] %v5253_v24 }
 0x5ed   : > { %v5254_v27 = vpack.c.bf16 %v4572_v26, %v4571_v25  ;;  %6715 = vmatmul.msk.f32.gmra.mxu2 %vm319_vm1, %v7180_v28  ;;  %6780 = vmatmul.msk.f32.gmra.mxu3 %vm319_vm1, %v7180_v28  ;;  %v2363_v29 = vpop.f32.mrf.mxu0  ;;  %v2572_v30 = vpop.f32.mrf.mxu1 }
 0x5ee   : > { %v2364_v31 = vadd.f32 %v2363_v29, %v8851_v42  ;;  %v2573_v32 = vadd.f32 %v2572_v30, %v8853_v38 }
 0x5ef   : > { %5766 = vst [vmem:[%s7428_s14 + $0xaa8] sm:$0xff] %v5254_v27 }
 0x5f0   : > { %v4585_v33 = vmax.f32 %v2364_v31, 0.0  ;;  %v4586_v34 = vmax.f32 %v2573_v32, 0.0  ;;  %v2781_v37 = vpop.f32.mrf.mxu2  ;;  %v2990_v40 = vpop.f32.mrf.mxu3  ;;  %6585 = vmatmul.msk.f32.gmra.mxu0 %vm319_vm1, %v7180_v28  ;;  %6650 = vmatmul.msk.f32.gmra.mxu1 %vm319_vm1, %v7180_v28  ;;  %v7184_v28 = vld [vmem:[%s7307_s28 + $0x1f8] sm:$0xff] }
 0x5f1   : > { %v2782_v41 = vadd.f32 %v2781_v37, %v8859_v43  ;;  %v2991_v35 = vadd.f32 %v2990_v40, %v8861_v44 }
 0x5f2   : > { %v5261_v36 = vpack.c.bf16 %v4586_v34, %v4585_v33 }
 0x5f3   : > { %v4587_v39 = vmax.f32 %v2782_v41, 0.0  ;;  %v4588_v45 = vmax.f32 %v2991_v35, 0.0 }
 0x5f4   : > { %5773 = vst [vmem:[%s7428_s14 + $0xae0] sm:$0xff] %v5261_v36 }
 0x5f5   : > { %v5262_v46 = vpack.c.bf16 %v4588_v45, %v4587_v39  ;;  %6716 = vmatmul.msk.f32.gmra.mxu2 %vm319_vm1, %v7181_v47  ;;  %6781 = vmatmul.msk.f32.gmra.mxu3 %vm319_vm1, %v7181_v47  ;;  %v2366_v48 = vpop.f32.mrf.mxu0  ;;  %v2575_v49 = vpop.f32.mrf.mxu1 }
 0x5f6   : > { %v2367_v50 = vadd.f32 %v2366_v48, %v8851_v42  ;;  %v2576_v51 = vadd.f32 %v2575_v49, %v8853_v38 }
 0x5f7   : > { %5774 = vst [vmem:[%s7428_s14 + $0xae8] sm:$0xff] %v5262_v46 }
 0x5f8   : > { %v4601_v52 = vmax.f32 %v2367_v50, 0.0  ;;  %v4602_v53 = vmax.f32 %v2576_v51, 0.0  ;;  %v2784_v54 = vpop.f32.mrf.mxu2  ;;  %v2993_v55 = vpop.f32.mrf.mxu3  ;;  %6586 = vmatmul.msk.f32.gmra.mxu0 %vm319_vm1, %v7181_v47  ;;  %6651 = vmatmul.msk.f32.gmra.mxu1 %vm319_vm1, %v7181_v47  ;;  %v7185_v47 = vld [vmem:[%s7307_s28] sm:$0xff] }
 0x5f9   : > { %v2785_v56 = vadd.f32 %v2784_v54, %v8859_v43  ;;  %v2994_v57 = vadd.f32 %v2993_v55, %v8861_v44 }
 0x5fa   : > { %v5269_v58 = vpack.c.bf16 %v4602_v53, %v4601_v52 }
 0x5fb   : > { %v4603_v59 = vmax.f32 %v2785_v56, 0.0  ;;  %v4604_v60 = vmax.f32 %v2994_v57, 0.0 }
 0x5fc   : > { %5781 = vst [vmem:[%s7428_s14 + $0xb20] sm:$0xff] %v5269_v58 }
 0x5fd   : > { %v5270_v61 = vpack.c.bf16 %v4604_v60, %v4603_v59  ;;  %6717 = vmatmul.msk.f32.gmra.mxu2 %vm319_vm1, %v7182_v62  ;;  %6782 = vmatmul.msk.f32.gmra.mxu3 %vm319_vm1, %v7182_v62  ;;  %v2369_v63 = vpop.f32.mrf.mxu0  ;;  %v2578_v0 = vpop.f32.mrf.mxu1 }
 0x5fe   : > { %v2370_v1 = vadd.f32 %v2369_v63, %v8851_v42  ;;  %v2579_v2 = vadd.f32 %v2578_v0, %v8853_v38 }
 0x5ff   : > { %5782 = vst [vmem:[%s7428_s14 + $0xb28] sm:$0xff] %v5270_v61 }
 0x600   : > { %v4617_v3 = vmax.f32 %v2370_v1, 0.0  ;;  %v4618_v4 = vmax.f32 %v2579_v2, 0.0  ;;  %v2787_v5 = vpop.f32.mrf.mxu2  ;;  %v2996_v6 = vpop.f32.mrf.mxu3  ;;  %6587 = vmatmul.msk.f32.gmra.mxu0 %vm319_vm1, %v7182_v62  ;;  %6652 = vmatmul.msk.f32.gmra.mxu1 %vm319_vm1, %v7182_v62  ;;  %v7186_v62 = vld [vmem:[%s7307_s28 + $0x8] sm:$0xff] }
 0x601   : > { %v2788_v7 = vadd.f32 %v2787_v5, %v8859_v43  ;;  %v2997_v8 = vadd.f32 %v2996_v6, %v8861_v44 }
 0x602   : > { %v5277_v9 = vpack.c.bf16 %v4618_v4, %v4617_v3 }
 0x603   : > { %v4619_v10 = vmax.f32 %v2788_v7, 0.0  ;;  %v4620_v11 = vmax.f32 %v2997_v8, 0.0 }
 0x604   : > { %5789 = vst [vmem:[%s7428_s14 + $0xb60] sm:$0xff] %v5277_v9 }
 0x605   : > { %v5278_v12 = vpack.c.bf16 %v4620_v11, %v4619_v10  ;;  %6718 = vmatmul.msk.f32.gmra.mxu2 %vm319_vm1, %v7183_v13  ;;  %6783 = vmatmul.msk.f32.gmra.mxu3 %vm319_vm1, %v7183_v13  ;;  %v2372_v14 = vpop.f32.mrf.mxu0  ;;  %v2581_v15 = vpop.f32.mrf.mxu1 }
 0x606   : > { %v2373_v16 = vadd.f32 %v2372_v14, %v8851_v42  ;;  %v2582_v17 = vadd.f32 %v2581_v15, %v8853_v38 }
 0x607   : > { %5790 = vst [vmem:[%s7428_s14 + $0xb68] sm:$0xff] %v5278_v12 }
 0x608   : > { %v4633_v18 = vmax.f32 %v2373_v16, 0.0  ;;  %v4634_v19 = vmax.f32 %v2582_v17, 0.0  ;;  %v2790_v20 = vpop.f32.mrf.mxu2  ;;  %v2999_v21 = vpop.f32.mrf.mxu3  ;;  %6588 = vmatmul.msk.f32.gmra.mxu0 %vm319_vm1, %v7183_v13  ;;  %6653 = vmatmul.msk.f32.gmra.mxu1 %vm319_vm1, %v7183_v13  ;;  %v7187_v13 = vld [vmem:[%s7307_s28 + $0x10] sm:$0xff] }
 0x609   : > { %v2791_v22 = vadd.f32 %v2790_v20, %v8859_v43  ;;  %v3000_v23 = vadd.f32 %v2999_v21, %v8861_v44 }
 0x60a   : > { %v5285_v24 = vpack.c.bf16 %v4634_v19, %v4633_v18 }
 0x60b   : > { %v4635_v25 = vmax.f32 %v2791_v22, 0.0  ;;  %v4636_v26 = vmax.f32 %v3000_v23, 0.0 }
 0x60c   : > { %5797 = vst [vmem:[%s7428_s14 + $0xba0] sm:$0xff] %v5285_v24 }
 0x60d   : > { %v5286_v27 = vpack.c.bf16 %v4636_v26, %v4635_v25  ;;  %6719 = vmatmul.msk.f32.gmra.mxu2 %vm319_vm1, %v7184_v28  ;;  %6784 = vmatmul.msk.f32.gmra.mxu3 %vm319_vm1, %v7184_v28  ;;  %v2375_v29 = vpop.f32.mrf.mxu0  ;;  %v2584_v30 = vpop.f32.mrf.mxu1 }
 0x60e   : > { %v2376_v31 = vadd.f32 %v2375_v29, %v8851_v42  ;;  %v2585_v32 = vadd.f32 %v2584_v30, %v8853_v38 }
 0x60f   : > { %5798 = vst [vmem:[%s7428_s14 + $0xba8] sm:$0xff] %v5286_v27 }
 0x610   : > { %v4649_v33 = vmax.f32 %v2376_v31, 0.0  ;;  %v4650_v34 = vmax.f32 %v2585_v32, 0.0  ;;  %v2793_v37 = vpop.f32.mrf.mxu2  ;;  %v3002_v40 = vpop.f32.mrf.mxu3  ;;  %6589 = vmatmul.msk.f32.gmra.mxu0 %vm319_vm1, %v7184_v28  ;;  %6654 = vmatmul.msk.f32.gmra.mxu1 %vm319_vm1, %v7184_v28  ;;  %v7188_v28 = vld [vmem:[%s7307_s28 + $0x18] sm:$0xff] }
 0x611   : > { %v2794_v41 = vadd.f32 %v2793_v37, %v8859_v43  ;;  %v3003_v35 = vadd.f32 %v3002_v40, %v8861_v44 }
 0x612   : > { %v5293_v36 = vpack.c.bf16 %v4650_v34, %v4649_v33 }
 0x613   : > { %v4651_v39 = vmax.f32 %v2794_v41, 0.0  ;;  %v4652_v45 = vmax.f32 %v3003_v35, 0.0 }
 0x614   : > { %5805 = vst [vmem:[%s7428_s14 + $0xbe0] sm:$0xff] %v5293_v36 }
 0x615   : > { %v5294_v46 = vpack.c.bf16 %v4652_v45, %v4651_v39  ;;  %6916 = vmatmul.msk.f32.vlgmr.msrb.gmra.mxu2 %vm319_vm1, %v7185_v47  ;;  %6981 = vmatmul.msk.f32.vlgmr.msrb.gmra.mxu3 %vm319_vm1, %v7185_v47  ;;  %v2378_v48 = vpop.f32.mrf.mxu0  ;;  %v2587_v49 = vpop.f32.mrf.mxu1 }
 0x616   : > { %v2379_v50 = vadd.f32 %v2378_v48, %v8851_v42  ;;  %v2588_v51 = vadd.f32 %v2587_v49, %v8853_v38 }
 0x617   : > { %5806 = vst [vmem:[%s7428_s14 + $0xbe8] sm:$0xff] %v5294_v46 }
 0x618   : > { %v4665_v52 = vmax.f32 %v2379_v50, 0.0  ;;  %v4666_v53 = vmax.f32 %v2588_v51, 0.0  ;;  %v2796_v54 = vpop.f32.mrf.mxu2  ;;  %v3005_v55 = vpop.f32.mrf.mxu3  ;;  %6786 = vmatmul.msk.f32.vlgmr.msrb.gmra.mxu0 %vm319_vm1, %v7185_v47  ;;  %6851 = vmatmul.msk.f32.vlgmr.msrb.gmra.mxu1 %vm319_vm1, %v7185_v47  ;;  %v7189_v47 = vld [vmem:[%s7307_s28 + $0x20] sm:$0xff] }
 0x619   : > { %v2797_v56 = vadd.f32 %v2796_v54, %v8859_v43  ;;  %v3006_v57 = vadd.f32 %v3005_v55, %v8861_v44 }
 0x61a   : > { %v5301_v58 = vpack.c.bf16 %v4666_v53, %v4665_v52 }
 0x61b   : > { %v4667_v59 = vmax.f32 %v2797_v56, 0.0  ;;  %v4668_v60 = vmax.f32 %v3006_v57, 0.0 }
 0x61c   : > { %5813 = vst [vmem:[%s7428_s14 + $0xc20] sm:$0xff] %v5301_v58 }
 0x61d   : > { %v5302_v61 = vpack.c.bf16 %v4668_v60, %v4667_v59  ;;  %6917 = vmatmul.msk.f32.gmra.mxu2 %vm319_vm1, %v7186_v62  ;;  %6982 = vmatmul.msk.f32.gmra.mxu3 %vm319_vm1, %v7186_v62  ;;  %v2381_v63 = vpop.f32.mrf.mxu0  ;;  %v2590_v0 = vpop.f32.mrf.mxu1 }
 0x61e   : > { %v2382_v1 = vadd.f32 %v2381_v63, %v8851_v42  ;;  %v2591_v2 = vadd.f32 %v2590_v0, %v8853_v38 }
 0x61f   : > { %5814 = vst [vmem:[%s7428_s14 + $0xc28] sm:$0xff] %v5302_v61 }
 0x620   : > { %v4681_v3 = vmax.f32 %v2382_v1, 0.0  ;;  %v4682_v4 = vmax.f32 %v2591_v2, 0.0  ;;  %v2799_v5 = vpop.f32.mrf.mxu2  ;;  %v3008_v6 = vpop.f32.mrf.mxu3  ;;  %6787 = vmatmul.msk.f32.gmra.mxu0 %vm319_vm1, %v7186_v62  ;;  %6852 = vmatmul.msk.f32.gmra.mxu1 %vm319_vm1, %v7186_v62  ;;  %v7190_v62 = vld [vmem:[%s7307_s28 + $0x28] sm:$0xff] }
 0x621   : > { %v2800_v7 = vadd.f32 %v2799_v5, %v8859_v43  ;;  %v3009_v8 = vadd.f32 %v3008_v6, %v8861_v44 }
 0x622   : > { %v5309_v9 = vpack.c.bf16 %v4682_v4, %v4681_v3 }
 0x623   : > { %v4683_v10 = vmax.f32 %v2800_v7, 0.0  ;;  %v4684_v11 = vmax.f32 %v3009_v8, 0.0 }
 0x624   : > { %5821 = vst [vmem:[%s7428_s14 + $0xc60] sm:$0xff] %v5309_v9 }
 0x625   : > { %v5310_v12 = vpack.c.bf16 %v4684_v11, %v4683_v10  ;;  %6918 = vmatmul.msk.f32.gmra.mxu2 %vm319_vm1, %v7187_v13  ;;  %6983 = vmatmul.msk.f32.gmra.mxu3 %vm319_vm1, %v7187_v13  ;;  %v2384_v14 = vpop.f32.mrf.mxu0  ;;  %v2593_v15 = vpop.f32.mrf.mxu1 }
 0x626   : > { %v2385_v16 = vadd.f32 %v2384_v14, %v8851_v42  ;;  %v2594_v17 = vadd.f32 %v2593_v15, %v8853_v38 }
 0x627   : > { %5822 = vst [vmem:[%s7428_s14 + $0xc68] sm:$0xff] %v5310_v12 }
 0x628   : > { %v4697_v18 = vmax.f32 %v2385_v16, 0.0  ;;  %v4698_v19 = vmax.f32 %v2594_v17, 0.0  ;;  %v2802_v20 = vpop.f32.mrf.mxu2  ;;  %v3011_v21 = vpop.f32.mrf.mxu3  ;;  %6788 = vmatmul.msk.f32.gmra.mxu0 %vm319_vm1, %v7187_v13  ;;  %6853 = vmatmul.msk.f32.gmra.mxu1 %vm319_vm1, %v7187_v13  ;;  %v7191_v13 = vld [vmem:[%s7307_s28 + $0x30] sm:$0xff] }
 0x629   : > { %v2803_v22 = vadd.f32 %v2802_v20, %v8859_v43  ;;  %v3012_v23 = vadd.f32 %v3011_v21, %v8861_v44 }
 0x62a   : > { %v5317_v24 = vpack.c.bf16 %v4698_v19, %v4697_v18 }
 0x62b   : > { %v4699_v25 = vmax.f32 %v2803_v22, 0.0  ;;  %v4700_v26 = vmax.f32 %v3012_v23, 0.0 }
 0x62c   : > { %5829 = vst [vmem:[%s7428_s14 + $0xca0] sm:$0xff] %v5317_v24 }
 0x62d   : > { %v5318_v27 = vpack.c.bf16 %v4700_v26, %v4699_v25  ;;  %6919 = vmatmul.msk.f32.gmra.mxu2 %vm319_vm1, %v7188_v28  ;;  %6984 = vmatmul.msk.f32.gmra.mxu3 %vm319_vm1, %v7188_v28  ;;  %v2387_v29 = vpop.f32.mrf.mxu0  ;;  %v2596_v30 = vpop.f32.mrf.mxu1 }
 0x62e   : > { %v2388_v31 = vadd.f32 %v2387_v29, %v8851_v42  ;;  %v2597_v32 = vadd.f32 %v2596_v30, %v8853_v38 }
 0x62f   : > { %5830 = vst [vmem:[%s7428_s14 + $0xca8] sm:$0xff] %v5318_v27 }
 0x630   : > { %v4713_v33 = vmax.f32 %v2388_v31, 0.0  ;;  %v4714_v34 = vmax.f32 %v2597_v32, 0.0  ;;  %v2805_v37 = vpop.f32.mrf.mxu2  ;;  %v3014_v40 = vpop.f32.mrf.mxu3  ;;  %6789 = vmatmul.msk.f32.gmra.mxu0 %vm319_vm1, %v7188_v28  ;;  %6854 = vmatmul.msk.f32.gmra.mxu1 %vm319_vm1, %v7188_v28  ;;  %v7192_v28 = vld [vmem:[%s7307_s28 + $0x38] sm:$0xff] }
 0x631   : > { %v2806_v41 = vadd.f32 %v2805_v37, %v8859_v43  ;;  %v3015_v35 = vadd.f32 %v3014_v40, %v8861_v44 }
 0x632   : > { %v5325_v36 = vpack.c.bf16 %v4714_v34, %v4713_v33 }
 0x633   : > { %v4715_v39 = vmax.f32 %v2806_v41, 0.0  ;;  %v4716_v45 = vmax.f32 %v3015_v35, 0.0 }
 0x634   : > { %5837 = vst [vmem:[%s7428_s14 + $0xce0] sm:$0xff] %v5325_v36 }
 0x635   : > { %v5326_v46 = vpack.c.bf16 %v4716_v45, %v4715_v39  ;;  %6920 = vmatmul.msk.f32.gmra.mxu2 %vm319_vm1, %v7189_v47  ;;  %6985 = vmatmul.msk.f32.gmra.mxu3 %vm319_vm1, %v7189_v47  ;;  %v2390_v48 = vpop.f32.mrf.mxu0  ;;  %v2599_v49 = vpop.f32.mrf.mxu1 }
 0x636   : > { %v2391_v50 = vadd.f32 %v2390_v48, %v8851_v42  ;;  %v2600_v51 = vadd.f32 %v2599_v49, %v8853_v38 }
 0x637   : > { %5838 = vst [vmem:[%s7428_s14 + $0xce8] sm:$0xff] %v5326_v46 }
 0x638   : > { %v4729_v52 = vmax.f32 %v2391_v50, 0.0  ;;  %v4730_v53 = vmax.f32 %v2600_v51, 0.0  ;;  %v2808_v54 = vpop.f32.mrf.mxu2  ;;  %v3017_v55 = vpop.f32.mrf.mxu3  ;;  %6790 = vmatmul.msk.f32.gmra.mxu0 %vm319_vm1, %v7189_v47  ;;  %6855 = vmatmul.msk.f32.gmra.mxu1 %vm319_vm1, %v7189_v47  ;;  %v7193_v47 = vld [vmem:[%s7307_s28 + $0x40] sm:$0xff] }
 0x639   : > { %v2809_v56 = vadd.f32 %v2808_v54, %v8859_v43  ;;  %v3018_v57 = vadd.f32 %v3017_v55, %v8861_v44 }
 0x63a   : > { %v5333_v58 = vpack.c.bf16 %v4730_v53, %v4729_v52 }
 0x63b   : > { %v4731_v59 = vmax.f32 %v2809_v56, 0.0  ;;  %v4732_v60 = vmax.f32 %v3018_v57, 0.0 }
 0x63c   : > { %5845 = vst [vmem:[%s7428_s14 + $0xd20] sm:$0xff] %v5333_v58 }
 0x63d   : > { %v5334_v61 = vpack.c.bf16 %v4732_v60, %v4731_v59  ;;  %6921 = vmatmul.msk.f32.gmra.mxu2 %vm319_vm1, %v7190_v62  ;;  %6986 = vmatmul.msk.f32.gmra.mxu3 %vm319_vm1, %v7190_v62  ;;  %v2393_v63 = vpop.f32.mrf.mxu0  ;;  %v2602_v0 = vpop.f32.mrf.mxu1 }
 0x63e   : > { %v2394_v1 = vadd.f32 %v2393_v63, %v8851_v42  ;;  %v2603_v2 = vadd.f32 %v2602_v0, %v8853_v38 }
 0x63f   : > { %5846 = vst [vmem:[%s7428_s14 + $0xd28] sm:$0xff] %v5334_v61 }
 0x640   : > { %v4745_v3 = vmax.f32 %v2394_v1, 0.0  ;;  %v4746_v4 = vmax.f32 %v2603_v2, 0.0  ;;  %v2811_v5 = vpop.f32.mrf.mxu2  ;;  %v3020_v6 = vpop.f32.mrf.mxu3  ;;  %6791 = vmatmul.msk.f32.gmra.mxu0 %vm319_vm1, %v7190_v62  ;;  %6856 = vmatmul.msk.f32.gmra.mxu1 %vm319_vm1, %v7190_v62  ;;  %v7194_v62 = vld [vmem:[%s7307_s28 + $0x48] sm:$0xff] }
 0x641   : > { %v2812_v7 = vadd.f32 %v2811_v5, %v8859_v43  ;;  %v3021_v8 = vadd.f32 %v3020_v6, %v8861_v44 }
 0x642   : > { %v5341_v9 = vpack.c.bf16 %v4746_v4, %v4745_v3 }
 0x643   : > { %v4747_v10 = vmax.f32 %v2812_v7, 0.0  ;;  %v4748_v11 = vmax.f32 %v3021_v8, 0.0 }
 0x644   : > { %5853 = vst [vmem:[%s7428_s14 + $0xd60] sm:$0xff] %v5341_v9 }
 0x645   : > { %v5342_v12 = vpack.c.bf16 %v4748_v11, %v4747_v10  ;;  %6922 = vmatmul.msk.f32.gmra.mxu2 %vm319_vm1, %v7191_v13  ;;  %6987 = vmatmul.msk.f32.gmra.mxu3 %vm319_vm1, %v7191_v13  ;;  %v2396_v14 = vpop.f32.mrf.mxu0  ;;  %v2605_v15 = vpop.f32.mrf.mxu1 }
 0x646   : > { %v2397_v16 = vadd.f32 %v2396_v14, %v8851_v42  ;;  %v2606_v17 = vadd.f32 %v2605_v15, %v8853_v38 }
 0x647   : > { %5854 = vst [vmem:[%s7428_s14 + $0xd68] sm:$0xff] %v5342_v12 }
 0x648   : > { %v4761_v18 = vmax.f32 %v2397_v16, 0.0  ;;  %v4762_v19 = vmax.f32 %v2606_v17, 0.0  ;;  %v2814_v20 = vpop.f32.mrf.mxu2  ;;  %v3023_v21 = vpop.f32.mrf.mxu3  ;;  %6792 = vmatmul.msk.f32.gmra.mxu0 %vm319_vm1, %v7191_v13  ;;  %6857 = vmatmul.msk.f32.gmra.mxu1 %vm319_vm1, %v7191_v13  ;;  %v7195_v13 = vld [vmem:[%s7307_s28 + $0x50] sm:$0xff] }
 0x649   : > { %v2815_v22 = vadd.f32 %v2814_v20, %v8859_v43  ;;  %v3024_v23 = vadd.f32 %v3023_v21, %v8861_v44 }
 0x64a   : > { %v5349_v24 = vpack.c.bf16 %v4762_v19, %v4761_v18 }
 0x64b   : > { %v4763_v25 = vmax.f32 %v2815_v22, 0.0  ;;  %v4764_v26 = vmax.f32 %v3024_v23, 0.0 }
 0x64c   : > { %5861 = vst [vmem:[%s7428_s14 + $0xda0] sm:$0xff] %v5349_v24 }
 0x64d   : > { %v5350_v27 = vpack.c.bf16 %v4764_v26, %v4763_v25  ;;  %6923 = vmatmul.msk.f32.gmra.mxu2 %vm319_vm1, %v7192_v28  ;;  %6988 = vmatmul.msk.f32.gmra.mxu3 %vm319_vm1, %v7192_v28  ;;  %v2399_v29 = vpop.f32.mrf.mxu0  ;;  %v2608_v30 = vpop.f32.mrf.mxu1 }
 0x64e   : > { %v2400_v31 = vadd.f32 %v2399_v29, %v8851_v42  ;;  %v2609_v32 = vadd.f32 %v2608_v30, %v8853_v38 }
 0x64f   : > { %5862 = vst [vmem:[%s7428_s14 + $0xda8] sm:$0xff] %v5350_v27 }
 0x650   : > { %v4777_v33 = vmax.f32 %v2400_v31, 0.0  ;;  %v4778_v34 = vmax.f32 %v2609_v32, 0.0  ;;  %v2817_v37 = vpop.f32.mrf.mxu2  ;;  %v3026_v40 = vpop.f32.mrf.mxu3  ;;  %6793 = vmatmul.msk.f32.gmra.mxu0 %vm319_vm1, %v7192_v28  ;;  %6858 = vmatmul.msk.f32.gmra.mxu1 %vm319_vm1, %v7192_v28  ;;  %v7196_v28 = vld [vmem:[%s7307_s28 + $0x58] sm:$0xff] }
 0x651   : > { %v2818_v41 = vadd.f32 %v2817_v37, %v8859_v43  ;;  %v3027_v35 = vadd.f32 %v3026_v40, %v8861_v44 }
 0x652   : > { %v5357_v36 = vpack.c.bf16 %v4778_v34, %v4777_v33 }
 0x653   : > { %v4779_v39 = vmax.f32 %v2818_v41, 0.0  ;;  %v4780_v45 = vmax.f32 %v3027_v35, 0.0 }
 0x654   : > { %5869 = vst [vmem:[%s7428_s14 + $0xde0] sm:$0xff] %v5357_v36 }
 0x655   : > { %v5358_v46 = vpack.c.bf16 %v4780_v45, %v4779_v39  ;;  %6924 = vmatmul.msk.f32.gmra.mxu2 %vm319_vm1, %v7193_v47  ;;  %6989 = vmatmul.msk.f32.gmra.mxu3 %vm319_vm1, %v7193_v47  ;;  %v2402_v48 = vpop.f32.mrf.mxu0  ;;  %v2611_v49 = vpop.f32.mrf.mxu1 }
 0x656   : > { %v2403_v50 = vadd.f32 %v2402_v48, %v8851_v42  ;;  %v2612_v51 = vadd.f32 %v2611_v49, %v8853_v38 }
 0x657   : > { %5870 = vst [vmem:[%s7428_s14 + $0xde8] sm:$0xff] %v5358_v46 }
 0x658   : > { %v4793_v52 = vmax.f32 %v2403_v50, 0.0  ;;  %v4794_v53 = vmax.f32 %v2612_v51, 0.0  ;;  %v2820_v54 = vpop.f32.mrf.mxu2  ;;  %v3029_v55 = vpop.f32.mrf.mxu3  ;;  %6794 = vmatmul.msk.f32.gmra.mxu0 %vm319_vm1, %v7193_v47  ;;  %6859 = vmatmul.msk.f32.gmra.mxu1 %vm319_vm1, %v7193_v47  ;;  %v7197_v47 = vld [vmem:[%s7307_s28 + $0x60] sm:$0xff] }
 0x659   : > { %v2821_v56 = vadd.f32 %v2820_v54, %v8859_v43  ;;  %v3030_v57 = vadd.f32 %v3029_v55, %v8861_v44 }
 0x65a   : > { %v5365_v58 = vpack.c.bf16 %v4794_v53, %v4793_v52 }
 0x65b   : > { %v4795_v59 = vmax.f32 %v2821_v56, 0.0  ;;  %v4796_v60 = vmax.f32 %v3030_v57, 0.0 }
 0x65c   : > { %5877 = vst [vmem:[%s7428_s14 + $0xe20] sm:$0xff] %v5365_v58 }
 0x65d   : > { %v5366_v61 = vpack.c.bf16 %v4796_v60, %v4795_v59  ;;  %6925 = vmatmul.msk.f32.gmra.mxu2 %vm319_vm1, %v7194_v62  ;;  %6990 = vmatmul.msk.f32.gmra.mxu3 %vm319_vm1, %v7194_v62  ;;  %v2405_v63 = vpop.f32.mrf.mxu0  ;;  %v2614_v0 = vpop.f32.mrf.mxu1 }
 0x65e   : > { %v2406_v1 = vadd.f32 %v2405_v63, %v8851_v42  ;;  %v2615_v2 = vadd.f32 %v2614_v0, %v8853_v38 }
 0x65f   : > { %5878 = vst [vmem:[%s7428_s14 + $0xe28] sm:$0xff] %v5366_v61 }
 0x660   : > { %v4809_v3 = vmax.f32 %v2406_v1, 0.0  ;;  %v4810_v4 = vmax.f32 %v2615_v2, 0.0  ;;  %v2823_v5 = vpop.f32.mrf.mxu2  ;;  %v3032_v6 = vpop.f32.mrf.mxu3  ;;  %6795 = vmatmul.msk.f32.gmra.mxu0 %vm319_vm1, %v7194_v62  ;;  %6860 = vmatmul.msk.f32.gmra.mxu1 %vm319_vm1, %v7194_v62  ;;  %v7198_v62 = vld [vmem:[%s7307_s28 + $0x68] sm:$0xff] }
 0x661   : > { %v2824_v7 = vadd.f32 %v2823_v5, %v8859_v43  ;;  %v3033_v8 = vadd.f32 %v3032_v6, %v8861_v44 }
 0x662   : > { %v5373_v9 = vpack.c.bf16 %v4810_v4, %v4809_v3 }
 0x663   : > { %v4811_v10 = vmax.f32 %v2824_v7, 0.0  ;;  %v4812_v11 = vmax.f32 %v3033_v8, 0.0 }
 0x664   : > { %5885 = vst [vmem:[%s7428_s14 + $0xe60] sm:$0xff] %v5373_v9 }
 0x665   : > { %v5374_v12 = vpack.c.bf16 %v4812_v11, %v4811_v10  ;;  %6926 = vmatmul.msk.f32.gmra.mxu2 %vm319_vm1, %v7195_v13  ;;  %6991 = vmatmul.msk.f32.gmra.mxu3 %vm319_vm1, %v7195_v13  ;;  %v2408_v14 = vpop.f32.mrf.mxu0  ;;  %v2617_v15 = vpop.f32.mrf.mxu1 }
 0x666   : > { %v2409_v16 = vadd.f32 %v2408_v14, %v8851_v42  ;;  %v2618_v17 = vadd.f32 %v2617_v15, %v8853_v38 }
 0x667   : > { %5886 = vst [vmem:[%s7428_s14 + $0xe68] sm:$0xff] %v5374_v12 }
 0x668   : > { %v4825_v18 = vmax.f32 %v2409_v16, 0.0  ;;  %v4826_v19 = vmax.f32 %v2618_v17, 0.0  ;;  %v2826_v20 = vpop.f32.mrf.mxu2  ;;  %v3035_v21 = vpop.f32.mrf.mxu3  ;;  %6796 = vmatmul.msk.f32.gmra.mxu0 %vm319_vm1, %v7195_v13  ;;  %6861 = vmatmul.msk.f32.gmra.mxu1 %vm319_vm1, %v7195_v13  ;;  %v7199_v13 = vld [vmem:[%s7307_s28 + $0x70] sm:$0xff] }
 0x669   : > { %v2827_v22 = vadd.f32 %v2826_v20, %v8859_v43  ;;  %v3036_v23 = vadd.f32 %v3035_v21, %v8861_v44 }
 0x66a   : > { %v5381_v24 = vpack.c.bf16 %v4826_v19, %v4825_v18 }
 0x66b   : > { %v4827_v25 = vmax.f32 %v2827_v22, 0.0  ;;  %v4828_v26 = vmax.f32 %v3036_v23, 0.0 }
 0x66c   : > { %5893 = vst [vmem:[%s7428_s14 + $0xea0] sm:$0xff] %v5381_v24 }
 0x66d   : > { %v5382_v27 = vpack.c.bf16 %v4828_v26, %v4827_v25  ;;  %6927 = vmatmul.msk.f32.gmra.mxu2 %vm319_vm1, %v7196_v28  ;;  %6992 = vmatmul.msk.f32.gmra.mxu3 %vm319_vm1, %v7196_v28  ;;  %v2411_v29 = vpop.f32.mrf.mxu0  ;;  %v2620_v30 = vpop.f32.mrf.mxu1 }
 0x66e   : > { %v2412_v31 = vadd.f32 %v2411_v29, %v8851_v42  ;;  %v2621_v32 = vadd.f32 %v2620_v30, %v8853_v38 }
 0x66f   : > { %5894 = vst [vmem:[%s7428_s14 + $0xea8] sm:$0xff] %v5382_v27 }
 0x670   : > { %v4841_v33 = vmax.f32 %v2412_v31, 0.0  ;;  %v4842_v34 = vmax.f32 %v2621_v32, 0.0  ;;  %v2829_v37 = vpop.f32.mrf.mxu2  ;;  %v3038_v40 = vpop.f32.mrf.mxu3  ;;  %6797 = vmatmul.msk.f32.gmra.mxu0 %vm319_vm1, %v7196_v28  ;;  %6862 = vmatmul.msk.f32.gmra.mxu1 %vm319_vm1, %v7196_v28  ;;  %v7200_v28 = vld [vmem:[%s7307_s28 + $0x78] sm:$0xff] }
 0x671   : > { %v2830_v41 = vadd.f32 %v2829_v37, %v8859_v43  ;;  %v3039_v35 = vadd.f32 %v3038_v40, %v8861_v44 }
 0x672   : > { %v5389_v36 = vpack.c.bf16 %v4842_v34, %v4841_v33 }
 0x673   : > { %v4843_v39 = vmax.f32 %v2830_v41, 0.0  ;;  %v4844_v45 = vmax.f32 %v3039_v35, 0.0 }
 0x674   : > { %5901 = vst [vmem:[%s7428_s14 + $0xee0] sm:$0xff] %v5389_v36 }
 0x675   : > { %v5390_v46 = vpack.c.bf16 %v4844_v45, %v4843_v39  ;;  %6928 = vmatmul.msk.f32.gmra.mxu2 %vm319_vm1, %v7197_v47  ;;  %6993 = vmatmul.msk.f32.gmra.mxu3 %vm319_vm1, %v7197_v47  ;;  %v2414_v48 = vpop.f32.mrf.mxu0  ;;  %v2623_v49 = vpop.f32.mrf.mxu1 }
 0x676   : > { %v2415_v50 = vadd.f32 %v2414_v48, %v8851_v42  ;;  %v2624_v51 = vadd.f32 %v2623_v49, %v8853_v38  ;;  %v7202_v48 = vld [vmem:[%s7307_s28 + $0x80] sm:$0xff] }
 0x677   : > { %5902 = vst [vmem:[%s7428_s14 + $0xee8] sm:$0xff] %v5390_v46 }
 0x678   : > { %v4857_v52 = vmax.f32 %v2415_v50, 0.0  ;;  %v4858_v53 = vmax.f32 %v2624_v51, 0.0  ;;  %v2832_v54 = vpop.f32.mrf.mxu2  ;;  %v3041_v55 = vpop.f32.mrf.mxu3  ;;  %6798 = vmatmul.msk.f32.gmra.mxu0 %vm319_vm1, %v7197_v47  ;;  %6863 = vmatmul.msk.f32.gmra.mxu1 %vm319_vm1, %v7197_v47 }
 0x679   : > { %v2833_v56 = vadd.f32 %v2832_v54, %v8859_v43  ;;  %v3042_v57 = vadd.f32 %v3041_v55, %v8861_v44 }
 0x67a   : > { %v5397_v58 = vpack.c.bf16 %v4858_v53, %v4857_v52 }
 0x67b   : > { %v4859_v59 = vmax.f32 %v2833_v56, 0.0  ;;  %v4860_v60 = vmax.f32 %v3042_v57, 0.0 }
 0x67c   : > { %5909 = vst [vmem:[%s7428_s14 + $0xf20] sm:$0xff] %v5397_v58 }
 0x67d   : > { %v5398_v61 = vpack.c.bf16 %v4860_v60, %v4859_v59  ;;  %6929 = vmatmul.msk.f32.gmra.mxu2 %vm319_vm1, %v7198_v62  ;;  %6994 = vmatmul.msk.f32.gmra.mxu3 %vm319_vm1, %v7198_v62  ;;  %v2417_v63 = vpop.f32.mrf.mxu0  ;;  %v2626_v0 = vpop.f32.mrf.mxu1 }
 0x67e   : > { %v2418_v1 = vadd.f32 %v2417_v63, %v8851_v42  ;;  %v2627_v2 = vadd.f32 %v2626_v0, %v8853_v38  ;;  %v7203_v63 = vld [vmem:[%s7307_s28 + $0x88] sm:$0xff] }
 0x67f   : > { %5910 = vst [vmem:[%s7428_s14 + $0xf28] sm:$0xff] %v5398_v61 }
 0x680   : > { %v4873_v3 = vmax.f32 %v2418_v1, 0.0  ;;  %v4874_v4 = vmax.f32 %v2627_v2, 0.0  ;;  %v2835_v5 = vpop.f32.mrf.mxu2  ;;  %v3044_v6 = vpop.f32.mrf.mxu3  ;;  %6799 = vmatmul.msk.f32.gmra.mxu0 %vm319_vm1, %v7198_v62  ;;  %6864 = vmatmul.msk.f32.gmra.mxu1 %vm319_vm1, %v7198_v62 }
 0x681   : > { %v2836_v7 = vadd.f32 %v2835_v5, %v8859_v43  ;;  %v3045_v8 = vadd.f32 %v3044_v6, %v8861_v44 }
 0x682   : > { %v5405_v9 = vpack.c.bf16 %v4874_v4, %v4873_v3 }
 0x683   : > { %v4875_v10 = vmax.f32 %v2836_v7, 0.0  ;;  %v4876_v11 = vmax.f32 %v3045_v8, 0.0 }
 0x684   : > { %5917 = vst [vmem:[%s7428_s14 + $0xf60] sm:$0xff] %v5405_v9 }
 0x685   : > { %v5406_v12 = vpack.c.bf16 %v4876_v11, %v4875_v10  ;;  %6930 = vmatmul.msk.f32.gmra.mxu2 %vm319_vm1, %v7199_v13  ;;  %6995 = vmatmul.msk.f32.gmra.mxu3 %vm319_vm1, %v7199_v13  ;;  %v2420_v14 = vpop.f32.mrf.mxu0  ;;  %v2629_v15 = vpop.f32.mrf.mxu1 }
 0x686   : > { %v2421_v16 = vadd.f32 %v2420_v14, %v8851_v42  ;;  %v2630_v17 = vadd.f32 %v2629_v15, %v8853_v38  ;;  %v7204_v14 = vld [vmem:[%s7307_s28 + $0x90] sm:$0xff] }
 0x687   : > { %5918 = vst [vmem:[%s7428_s14 + $0xf68] sm:$0xff] %v5406_v12 }
 0x688   : > { %v4889_v18 = vmax.f32 %v2421_v16, 0.0  ;;  %v4890_v19 = vmax.f32 %v2630_v17, 0.0  ;;  %v2838_v20 = vpop.f32.mrf.mxu2  ;;  %v3047_v21 = vpop.f32.mrf.mxu3  ;;  %6800 = vmatmul.msk.f32.gmra.mxu0 %vm319_vm1, %v7199_v13  ;;  %6865 = vmatmul.msk.f32.gmra.mxu1 %vm319_vm1, %v7199_v13 }
 0x689   : > { %v2839_v22 = vadd.f32 %v2838_v20, %v8859_v43  ;;  %v3048_v23 = vadd.f32 %v3047_v21, %v8861_v44 }
 0x68a   : > { %v5413_v24 = vpack.c.bf16 %v4890_v19, %v4889_v18 }
 0x68b   : > { %v4891_v25 = vmax.f32 %v2839_v22, 0.0  ;;  %v4892_v26 = vmax.f32 %v3048_v23, 0.0 }
 0x68c   : > { %5925 = vst [vmem:[%s7428_s14 + $0xfa0] sm:$0xff] %v5413_v24 }
 0x68d   : > { %v5414_v27 = vpack.c.bf16 %v4892_v26, %v4891_v25  ;;  %6931 = vmatmul.msk.f32.gmra.mxu2 %vm319_vm1, %v7200_v28  ;;  %6996 = vmatmul.msk.f32.gmra.mxu3 %vm319_vm1, %v7200_v28  ;;  %v2423_v29 = vpop.f32.mrf.mxu0  ;;  %v2632_v30 = vpop.f32.mrf.mxu1 }
 0x68e   : > { %v2424_v31 = vadd.f32 %v2423_v29, %v8851_v42  ;;  %v2633_v32 = vadd.f32 %v2632_v30, %v8853_v38  ;;  %v7201_v42 = vld [vmem:[%s10205_s2 + $0x8] sm:$0xff]  ;;  %v7205_v29 = vld [vmem:[%s7307_s28 + $0x98] sm:$0xff] }
 0x68f   : > { %5926 = vst [vmem:[%s7428_s14 + $0xfa8] sm:$0xff] %v5414_v27  ;;  %v9566_v38 = vperm.slane %v7201_v42, 4  ;;  %v9568_v39 = vperm.slane %v7201_v42, 5  ;;  %v9574_v49 = vperm.slane %v7201_v42, 6  ;;  %v9576_v50 = vperm.slane %v7201_v42, 7 }
 0x690   : > { %v4905_v33 = vmax.f32 %v2424_v31, 0.0  ;;  %v4906_v34 = vmax.f32 %v2633_v32, 0.0  ;;  %v2841_v37 = vpop.f32.mrf.mxu2  ;;  %v3050_v40 = vpop.f32.mrf.mxu3  ;;  %6801 = vmatmul.msk.f32.gmra.mxu0 %vm319_vm1, %v7200_v28  ;;  %6866 = vmatmul.msk.f32.gmra.mxu1 %vm319_vm1, %v7200_v28 }
 0x691   : > { %v2842_v41 = vadd.f32 %v2841_v37, %v8859_v43  ;;  %v3051_v35 = vadd.f32 %v3050_v40, %v8861_v44 }
 0x692   : > { %v5421_v36 = vpack.c.bf16 %v4906_v34, %v4905_v33 }
 0x693   : > { %v4907_v45 = vmax.f32 %v2842_v41, 0.0  ;;  %v4908_v46 = vmax.f32 %v3051_v35, 0.0 }
 0x694   : > { %5933 = vst [vmem:[%s7428_s14 + $0xfe0] sm:$0xff] %v5421_v36 }
 0x695   : > { %v5422_v47 = vpack.c.bf16 %v4908_v46, %v4907_v45  ;;  %6932 = vmatmul.msk.f32.gmra.mxu2 %vm319_vm1, %v7202_v48  ;;  %6997 = vmatmul.msk.f32.gmra.mxu3 %vm319_vm1, %v7202_v48  ;;  %v3070_v43 = vpop.f32.mrf.mxu0  ;;  %v3279_v44 = vpop.f32.mrf.mxu1 }
 0x696   : > { %v3071_v51 = vadd.f32 %v3070_v43, %v9566_v38  ;;  %v3280_v52 = vadd.f32 %v3279_v44, %v9568_v39 }
 0x697   : > { %5934 = vst [vmem:[%s7428_s14 + $0xfe8] sm:$0xff] %v5422_v47 }
 0x698   : > { %v3901_v53 = vmax.f32 %v3071_v51, 0.0  ;;  %v3902_v54 = vmax.f32 %v3280_v52, 0.0  ;;  %v3488_v55 = vpop.f32.mrf.mxu2  ;;  %v3697_v56 = vpop.f32.mrf.mxu3  ;;  %6802 = vmatmul.msk.f32.gmra.mxu0 %vm319_vm1, %v7202_v48  ;;  %6867 = vmatmul.msk.f32.gmra.mxu1 %vm319_vm1, %v7202_v48  ;;  %v7206_v48 = vld [vmem:[%s7307_s28 + $0xa0] sm:$0xff] }
 0x699   : > { %v3489_v57 = vadd.f32 %v3488_v55, %v9574_v49  ;;  %v3698_v58 = vadd.f32 %v3697_v56, %v9576_v50 }
 0x69a   : > { %v4919_v59 = vpack.c.bf16 %v3902_v54, %v3901_v53 }
 0x69b   : > { %v3903_v60 = vmax.f32 %v3489_v57, 0.0  ;;  %v3904_v61 = vmax.f32 %v3698_v58, 0.0 }
 0x69c   : > { %5431 = vst [vmem:[%s7428_s14 + $0x30] sm:$0xff] %v4919_v59 }
 0x69d   : > { %v4920_v62 = vpack.c.bf16 %v3904_v61, %v3903_v60  ;;  %6933 = vmatmul.msk.f32.gmra.mxu2 %vm319_vm1, %v7203_v63  ;;  %6998 = vmatmul.msk.f32.gmra.mxu3 %vm319_vm1, %v7203_v63  ;;  %v3073_v0 = vpop.f32.mrf.mxu0  ;;  %v3282_v1 = vpop.f32.mrf.mxu1 }
 0x69e   : > { %v3074_v2 = vadd.f32 %v3073_v0, %v9566_v38  ;;  %v3283_v3 = vadd.f32 %v3282_v1, %v9568_v39 }
 0x69f   : > { %5432 = vst [vmem:[%s7428_s14 + $0x38] sm:$0xff] %v4920_v62 }
 0x6a0   : > { %v3917_v4 = vmax.f32 %v3074_v2, 0.0  ;;  %v3918_v5 = vmax.f32 %v3283_v3, 0.0  ;;  %v3491_v6 = vpop.f32.mrf.mxu2  ;;  %v3700_v7 = vpop.f32.mrf.mxu3  ;;  %6803 = vmatmul.msk.f32.gmra.mxu0 %vm319_vm1, %v7203_v63  ;;  %6868 = vmatmul.msk.f32.gmra.mxu1 %vm319_vm1, %v7203_v63  ;;  %v7207_v63 = vld [vmem:[%s7307_s28 + $0xa8] sm:$0xff] }
 0x6a1   : > { %v3492_v8 = vadd.f32 %v3491_v6, %v9574_v49  ;;  %v3701_v9 = vadd.f32 %v3700_v7, %v9576_v50 }
 0x6a2   : > { %v4927_v10 = vpack.c.bf16 %v3918_v5, %v3917_v4 }
 0x6a3   : > { %v3919_v11 = vmax.f32 %v3492_v8, 0.0  ;;  %v3920_v12 = vmax.f32 %v3701_v9, 0.0 }
 0x6a4   : > { %5439 = vst [vmem:[%s7428_s14 + $0x70] sm:$0xff] %v4927_v10 }
 0x6a5   : > { %v4928_v13 = vpack.c.bf16 %v3920_v12, %v3919_v11  ;;  %6934 = vmatmul.msk.f32.gmra.mxu2 %vm319_vm1, %v7204_v14  ;;  %6999 = vmatmul.msk.f32.gmra.mxu3 %vm319_vm1, %v7204_v14  ;;  %v3076_v15 = vpop.f32.mrf.mxu0  ;;  %v3285_v16 = vpop.f32.mrf.mxu1 }
 0x6a6   : > { %v3077_v17 = vadd.f32 %v3076_v15, %v9566_v38  ;;  %v3286_v18 = vadd.f32 %v3285_v16, %v9568_v39 }
 0x6a7   : > { %5440 = vst [vmem:[%s7428_s14 + $0x78] sm:$0xff] %v4928_v13 }
 0x6a8   : > { %v3933_v19 = vmax.f32 %v3077_v17, 0.0  ;;  %v3934_v20 = vmax.f32 %v3286_v18, 0.0  ;;  %v3494_v21 = vpop.f32.mrf.mxu2  ;;  %v3703_v22 = vpop.f32.mrf.mxu3  ;;  %6804 = vmatmul.msk.f32.gmra.mxu0 %vm319_vm1, %v7204_v14  ;;  %6869 = vmatmul.msk.f32.gmra.mxu1 %vm319_vm1, %v7204_v14  ;;  %v7208_v14 = vld [vmem:[%s7307_s28 + $0xb0] sm:$0xff] }
 0x6a9   : > { %v3495_v23 = vadd.f32 %v3494_v21, %v9574_v49  ;;  %v3704_v24 = vadd.f32 %v3703_v22, %v9576_v50 }
 0x6aa   : > { %v4935_v25 = vpack.c.bf16 %v3934_v20, %v3933_v19 }
 0x6ab   : > { %v3935_v26 = vmax.f32 %v3495_v23, 0.0  ;;  %v3936_v27 = vmax.f32 %v3704_v24, 0.0 }
 0x6ac   : > { %5447 = vst [vmem:[%s7428_s14 + $0xb0] sm:$0xff] %v4935_v25 }
 0x6ad   : > { %v4936_v28 = vpack.c.bf16 %v3936_v27, %v3935_v26  ;;  %6935 = vmatmul.msk.f32.gmra.mxu2 %vm319_vm1, %v7205_v29  ;;  %7000 = vmatmul.msk.f32.gmra.mxu3 %vm319_vm1, %v7205_v29  ;;  %v3079_v30 = vpop.f32.mrf.mxu0  ;;  %v3288_v31 = vpop.f32.mrf.mxu1 }
 0x6ae   : > { %v3080_v32 = vadd.f32 %v3079_v30, %v9566_v38  ;;  %v3289_v33 = vadd.f32 %v3288_v31, %v9568_v39 }
 0x6af   : > { %5448 = vst [vmem:[%s7428_s14 + $0xb8] sm:$0xff] %v4936_v28 }
 0x6b0   : > { %v3949_v34 = vmax.f32 %v3080_v32, 0.0  ;;  %v3950_v37 = vmax.f32 %v3289_v33, 0.0  ;;  %v3497_v40 = vpop.f32.mrf.mxu2  ;;  %v3706_v41 = vpop.f32.mrf.mxu3  ;;  %6805 = vmatmul.msk.f32.gmra.mxu0 %vm319_vm1, %v7205_v29  ;;  %6870 = vmatmul.msk.f32.gmra.mxu1 %vm319_vm1, %v7205_v29  ;;  %v7209_v29 = vld [vmem:[%s7307_s28 + $0xb8] sm:$0xff] }
 0x6b1   : > { %v3498_v35 = vadd.f32 %v3497_v40, %v9574_v49  ;;  %v3707_v36 = vadd.f32 %v3706_v41, %v9576_v50 }
 0x6b2   : > { %v4943_v42 = vpack.c.bf16 %v3950_v37, %v3949_v34 }
 0x6b3   : > { %v3951_v45 = vmax.f32 %v3498_v35, 0.0  ;;  %v3952_v46 = vmax.f32 %v3707_v36, 0.0 }
 0x6b4   : > { %5455 = vst [vmem:[%s7428_s14 + $0xf0] sm:$0xff] %v4943_v42 }
 0x6b5   : > { %v4944_v47 = vpack.c.bf16 %v3952_v46, %v3951_v45  ;;  %6936 = vmatmul.msk.f32.gmra.mxu2 %vm319_vm1, %v7206_v48  ;;  %7001 = vmatmul.msk.f32.gmra.mxu3 %vm319_vm1, %v7206_v48  ;;  %v3082_v43 = vpop.f32.mrf.mxu0  ;;  %v3291_v44 = vpop.f32.mrf.mxu1 }
 0x6b6   : > { %v3083_v51 = vadd.f32 %v3082_v43, %v9566_v38  ;;  %v3292_v52 = vadd.f32 %v3291_v44, %v9568_v39 }
 0x6b7   : > { %5456 = vst [vmem:[%s7428_s14 + $0xf8] sm:$0xff] %v4944_v47 }
 0x6b8   : > { %v3965_v53 = vmax.f32 %v3083_v51, 0.0  ;;  %v3966_v54 = vmax.f32 %v3292_v52, 0.0  ;;  %v3500_v55 = vpop.f32.mrf.mxu2  ;;  %v3709_v56 = vpop.f32.mrf.mxu3  ;;  %6806 = vmatmul.msk.f32.gmra.mxu0 %vm319_vm1, %v7206_v48  ;;  %6871 = vmatmul.msk.f32.gmra.mxu1 %vm319_vm1, %v7206_v48  ;;  %v7210_v48 = vld [vmem:[%s7307_s28 + $0xc0] sm:$0xff] }
 0x6b9   : > { %v3501_v57 = vadd.f32 %v3500_v55, %v9574_v49  ;;  %v3710_v58 = vadd.f32 %v3709_v56, %v9576_v50 }
 0x6ba   : > { %v4951_v59 = vpack.c.bf16 %v3966_v54, %v3965_v53 }
 0x6bb   : > { %v3967_v60 = vmax.f32 %v3501_v57, 0.0  ;;  %v3968_v61 = vmax.f32 %v3710_v58, 0.0 }
 0x6bc   : > { %5463 = vst [vmem:[%s7428_s14 + $0x130] sm:$0xff] %v4951_v59 }
 0x6bd   : > { %v4952_v62 = vpack.c.bf16 %v3968_v61, %v3967_v60  ;;  %6937 = vmatmul.msk.f32.gmra.mxu2 %vm319_vm1, %v7207_v63  ;;  %7002 = vmatmul.msk.f32.gmra.mxu3 %vm319_vm1, %v7207_v63  ;;  %v3085_v0 = vpop.f32.mrf.mxu0  ;;  %v3294_v1 = vpop.f32.mrf.mxu1 }
 0x6be   : > { %v3086_v2 = vadd.f32 %v3085_v0, %v9566_v38  ;;  %v3295_v3 = vadd.f32 %v3294_v1, %v9568_v39 }
 0x6bf   : > { %5464 = vst [vmem:[%s7428_s14 + $0x138] sm:$0xff] %v4952_v62 }
 0x6c0   : > { %v3981_v4 = vmax.f32 %v3086_v2, 0.0  ;;  %v3982_v5 = vmax.f32 %v3295_v3, 0.0  ;;  %v3503_v6 = vpop.f32.mrf.mxu2  ;;  %v3712_v7 = vpop.f32.mrf.mxu3  ;;  %6807 = vmatmul.msk.f32.gmra.mxu0 %vm319_vm1, %v7207_v63  ;;  %6872 = vmatmul.msk.f32.gmra.mxu1 %vm319_vm1, %v7207_v63  ;;  %v7211_v63 = vld [vmem:[%s7307_s28 + $0xc8] sm:$0xff] }
 0x6c1   : > { %v3504_v8 = vadd.f32 %v3503_v6, %v9574_v49  ;;  %v3713_v9 = vadd.f32 %v3712_v7, %v9576_v50 }
 0x6c2   : > { %v4959_v10 = vpack.c.bf16 %v3982_v5, %v3981_v4 }
 0x6c3   : > { %v3983_v11 = vmax.f32 %v3504_v8, 0.0  ;;  %v3984_v12 = vmax.f32 %v3713_v9, 0.0 }
 0x6c4   : > { %5471 = vst [vmem:[%s7428_s14 + $0x170] sm:$0xff] %v4959_v10 }
 0x6c5   : > { %v4960_v13 = vpack.c.bf16 %v3984_v12, %v3983_v11  ;;  %6938 = vmatmul.msk.f32.gmra.mxu2 %vm319_vm1, %v7208_v14  ;;  %7003 = vmatmul.msk.f32.gmra.mxu3 %vm319_vm1, %v7208_v14  ;;  %v3088_v15 = vpop.f32.mrf.mxu0  ;;  %v3297_v16 = vpop.f32.mrf.mxu1 }
 0x6c6   : > { %v3089_v17 = vadd.f32 %v3088_v15, %v9566_v38  ;;  %v3298_v18 = vadd.f32 %v3297_v16, %v9568_v39 }
 0x6c7   : > { %5472 = vst [vmem:[%s7428_s14 + $0x178] sm:$0xff] %v4960_v13 }
 0x6c8   : > { %v3997_v19 = vmax.f32 %v3089_v17, 0.0  ;;  %v3998_v20 = vmax.f32 %v3298_v18, 0.0  ;;  %v3506_v21 = vpop.f32.mrf.mxu2  ;;  %v3715_v22 = vpop.f32.mrf.mxu3  ;;  %6808 = vmatmul.msk.f32.gmra.mxu0 %vm319_vm1, %v7208_v14  ;;  %6873 = vmatmul.msk.f32.gmra.mxu1 %vm319_vm1, %v7208_v14  ;;  %v7212_v14 = vld [vmem:[%s7307_s28 + $0xd0] sm:$0xff] }
 0x6c9   : > { %v3507_v23 = vadd.f32 %v3506_v21, %v9574_v49  ;;  %v3716_v24 = vadd.f32 %v3715_v22, %v9576_v50 }
 0x6ca   : > { %v4967_v25 = vpack.c.bf16 %v3998_v20, %v3997_v19 }
 0x6cb   : > { %v3999_v26 = vmax.f32 %v3507_v23, 0.0  ;;  %v4000_v27 = vmax.f32 %v3716_v24, 0.0 }
 0x6cc   : > { %5479 = vst [vmem:[%s7428_s14 + $0x1b0] sm:$0xff] %v4967_v25 }
 0x6cd   : > { %v4968_v28 = vpack.c.bf16 %v4000_v27, %v3999_v26  ;;  %6939 = vmatmul.msk.f32.gmra.mxu2 %vm319_vm1, %v7209_v29  ;;  %7004 = vmatmul.msk.f32.gmra.mxu3 %vm319_vm1, %v7209_v29  ;;  %v3091_v30 = vpop.f32.mrf.mxu0  ;;  %v3300_v31 = vpop.f32.mrf.mxu1 }
 0x6ce   : > { %v3092_v32 = vadd.f32 %v3091_v30, %v9566_v38  ;;  %v3301_v33 = vadd.f32 %v3300_v31, %v9568_v39 }
 0x6cf   : > { %5480 = vst [vmem:[%s7428_s14 + $0x1b8] sm:$0xff] %v4968_v28 }
 0x6d0   : > { %v4013_v34 = vmax.f32 %v3092_v32, 0.0  ;;  %v4014_v37 = vmax.f32 %v3301_v33, 0.0  ;;  %v3509_v40 = vpop.f32.mrf.mxu2  ;;  %v3718_v41 = vpop.f32.mrf.mxu3  ;;  %6809 = vmatmul.msk.f32.gmra.mxu0 %vm319_vm1, %v7209_v29  ;;  %6874 = vmatmul.msk.f32.gmra.mxu1 %vm319_vm1, %v7209_v29  ;;  %v7213_v29 = vld [vmem:[%s7307_s28 + $0xd8] sm:$0xff] }
 0x6d1   : > { %v3510_v35 = vadd.f32 %v3509_v40, %v9574_v49  ;;  %v3719_v36 = vadd.f32 %v3718_v41, %v9576_v50 }
 0x6d2   : > { %v4975_v42 = vpack.c.bf16 %v4014_v37, %v4013_v34 }
 0x6d3   : > { %v4015_v45 = vmax.f32 %v3510_v35, 0.0  ;;  %v4016_v46 = vmax.f32 %v3719_v36, 0.0 }
 0x6d4   : > { %5487 = vst [vmem:[%s7428_s14 + $0x1f0] sm:$0xff] %v4975_v42 }
 0x6d5   : > { %v4976_v47 = vpack.c.bf16 %v4016_v46, %v4015_v45  ;;  %6940 = vmatmul.msk.f32.gmra.mxu2 %vm319_vm1, %v7210_v48  ;;  %7005 = vmatmul.msk.f32.gmra.mxu3 %vm319_vm1, %v7210_v48  ;;  %v3094_v43 = vpop.f32.mrf.mxu0  ;;  %v3303_v44 = vpop.f32.mrf.mxu1 }
 0x6d6   : > { %v3095_v51 = vadd.f32 %v3094_v43, %v9566_v38  ;;  %v3304_v52 = vadd.f32 %v3303_v44, %v9568_v39 }
 0x6d7   : > { %5488 = vst [vmem:[%s7428_s14 + $0x1f8] sm:$0xff] %v4976_v47 }
 0x6d8   : > { %v4029_v53 = vmax.f32 %v3095_v51, 0.0  ;;  %v4030_v54 = vmax.f32 %v3304_v52, 0.0  ;;  %v3512_v55 = vpop.f32.mrf.mxu2  ;;  %v3721_v56 = vpop.f32.mrf.mxu3  ;;  %6810 = vmatmul.msk.f32.gmra.mxu0 %vm319_vm1, %v7210_v48  ;;  %6875 = vmatmul.msk.f32.gmra.mxu1 %vm319_vm1, %v7210_v48  ;;  %v7214_v48 = vld [vmem:[%s7307_s28 + $0xe0] sm:$0xff] }
 0x6d9   : > { %v3513_v57 = vadd.f32 %v3512_v55, %v9574_v49  ;;  %v3722_v58 = vadd.f32 %v3721_v56, %v9576_v50 }
 0x6da   : > { %v4983_v59 = vpack.c.bf16 %v4030_v54, %v4029_v53 }
 0x6db   : > { %v4031_v60 = vmax.f32 %v3513_v57, 0.0  ;;  %v4032_v61 = vmax.f32 %v3722_v58, 0.0 }
 0x6dc   : > { %5495 = vst [vmem:[%s7428_s14 + $0x230] sm:$0xff] %v4983_v59 }
 0x6dd   : > { %v4984_v62 = vpack.c.bf16 %v4032_v61, %v4031_v60  ;;  %6941 = vmatmul.msk.f32.gmra.mxu2 %vm319_vm1, %v7211_v63  ;;  %7006 = vmatmul.msk.f32.gmra.mxu3 %vm319_vm1, %v7211_v63  ;;  %v3097_v0 = vpop.f32.mrf.mxu0  ;;  %v3306_v1 = vpop.f32.mrf.mxu1 }
 0x6de   : > { %v3098_v2 = vadd.f32 %v3097_v0, %v9566_v38  ;;  %v3307_v3 = vadd.f32 %v3306_v1, %v9568_v39 }
 0x6df   : > { %5496 = vst [vmem:[%s7428_s14 + $0x238] sm:$0xff] %v4984_v62 }
 0x6e0   : > { %v4045_v4 = vmax.f32 %v3098_v2, 0.0  ;;  %v4046_v5 = vmax.f32 %v3307_v3, 0.0  ;;  %v3515_v6 = vpop.f32.mrf.mxu2  ;;  %v3724_v7 = vpop.f32.mrf.mxu3  ;;  %6811 = vmatmul.msk.f32.gmra.mxu0 %vm319_vm1, %v7211_v63  ;;  %6876 = vmatmul.msk.f32.gmra.mxu1 %vm319_vm1, %v7211_v63  ;;  %v7215_v63 = vld [vmem:[%s7307_s28 + $0xe8] sm:$0xff] }
 0x6e1   : > { %v3516_v8 = vadd.f32 %v3515_v6, %v9574_v49  ;;  %v3725_v9 = vadd.f32 %v3724_v7, %v9576_v50 }
 0x6e2   : > { %v4991_v10 = vpack.c.bf16 %v4046_v5, %v4045_v4 }
 0x6e3   : > { %v4047_v11 = vmax.f32 %v3516_v8, 0.0  ;;  %v4048_v12 = vmax.f32 %v3725_v9, 0.0 }
 0x6e4   : > { %5503 = vst [vmem:[%s7428_s14 + $0x270] sm:$0xff] %v4991_v10 }
 0x6e5   : > { %v4992_v13 = vpack.c.bf16 %v4048_v12, %v4047_v11  ;;  %6942 = vmatmul.msk.f32.gmra.mxu2 %vm319_vm1, %v7212_v14  ;;  %7007 = vmatmul.msk.f32.gmra.mxu3 %vm319_vm1, %v7212_v14  ;;  %v3100_v15 = vpop.f32.mrf.mxu0  ;;  %v3309_v16 = vpop.f32.mrf.mxu1 }
 0x6e6   : > { %v3101_v17 = vadd.f32 %v3100_v15, %v9566_v38  ;;  %v3310_v18 = vadd.f32 %v3309_v16, %v9568_v39 }
 0x6e7   : > { %5504 = vst [vmem:[%s7428_s14 + $0x278] sm:$0xff] %v4992_v13 }
 0x6e8   : > { %v4061_v19 = vmax.f32 %v3101_v17, 0.0  ;;  %v4062_v20 = vmax.f32 %v3310_v18, 0.0  ;;  %v3518_v21 = vpop.f32.mrf.mxu2  ;;  %v3727_v22 = vpop.f32.mrf.mxu3  ;;  %6812 = vmatmul.msk.f32.gmra.mxu0 %vm319_vm1, %v7212_v14  ;;  %6877 = vmatmul.msk.f32.gmra.mxu1 %vm319_vm1, %v7212_v14  ;;  %v7216_v14 = vld [vmem:[%s7307_s28 + $0xf0] sm:$0xff] }
 0x6e9   : > { %v3519_v23 = vadd.f32 %v3518_v21, %v9574_v49  ;;  %v3728_v24 = vadd.f32 %v3727_v22, %v9576_v50 }
 0x6ea   : > { %v4999_v25 = vpack.c.bf16 %v4062_v20, %v4061_v19 }
 0x6eb   : > { %v4063_v26 = vmax.f32 %v3519_v23, 0.0  ;;  %v4064_v27 = vmax.f32 %v3728_v24, 0.0 }
 0x6ec   : > { %5511 = vst [vmem:[%s7428_s14 + $0x2b0] sm:$0xff] %v4999_v25 }
 0x6ed   : > { %v5000_v28 = vpack.c.bf16 %v4064_v27, %v4063_v26  ;;  %6943 = vmatmul.msk.f32.gmra.mxu2 %vm319_vm1, %v7213_v29  ;;  %7008 = vmatmul.msk.f32.gmra.mxu3 %vm319_vm1, %v7213_v29  ;;  %v3103_v30 = vpop.f32.mrf.mxu0  ;;  %v3312_v31 = vpop.f32.mrf.mxu1 }
 0x6ee   : > { %v3104_v32 = vadd.f32 %v3103_v30, %v9566_v38  ;;  %v3313_v33 = vadd.f32 %v3312_v31, %v9568_v39 }
 0x6ef   : > { %5512 = vst [vmem:[%s7428_s14 + $0x2b8] sm:$0xff] %v5000_v28 }
 0x6f0   : > { %v4077_v34 = vmax.f32 %v3104_v32, 0.0  ;;  %v4078_v37 = vmax.f32 %v3313_v33, 0.0  ;;  %v3521_v40 = vpop.f32.mrf.mxu2  ;;  %v3730_v41 = vpop.f32.mrf.mxu3  ;;  %6813 = vmatmul.msk.f32.gmra.mxu0 %vm319_vm1, %v7213_v29  ;;  %6878 = vmatmul.msk.f32.gmra.mxu1 %vm319_vm1, %v7213_v29  ;;  %v7217_v29 = vld [vmem:[%s7307_s28 + $0xf8] sm:$0xff] }
 0x6f1   : > { %v3522_v35 = vadd.f32 %v3521_v40, %v9574_v49  ;;  %v3731_v36 = vadd.f32 %v3730_v41, %v9576_v50 }
 0x6f2   : > { %v5007_v42 = vpack.c.bf16 %v4078_v37, %v4077_v34 }
 0x6f3   : > { %v4079_v45 = vmax.f32 %v3522_v35, 0.0  ;;  %v4080_v46 = vmax.f32 %v3731_v36, 0.0 }
 0x6f4   : > { %5519 = vst [vmem:[%s7428_s14 + $0x2f0] sm:$0xff] %v5007_v42 }
 0x6f5   : > { %v5008_v47 = vpack.c.bf16 %v4080_v46, %v4079_v45  ;;  %6944 = vmatmul.msk.f32.gmra.mxu2 %vm319_vm1, %v7214_v48  ;;  %7009 = vmatmul.msk.f32.gmra.mxu3 %vm319_vm1, %v7214_v48  ;;  %v3106_v43 = vpop.f32.mrf.mxu0  ;;  %v3315_v44 = vpop.f32.mrf.mxu1 }
 0x6f6   : > { %v3107_v51 = vadd.f32 %v3106_v43, %v9566_v38  ;;  %v3316_v52 = vadd.f32 %v3315_v44, %v9568_v39 }
 0x6f7   : > { %5520 = vst [vmem:[%s7428_s14 + $0x2f8] sm:$0xff] %v5008_v47 }
 0x6f8   : > { %v4093_v53 = vmax.f32 %v3107_v51, 0.0  ;;  %v4094_v54 = vmax.f32 %v3316_v52, 0.0  ;;  %v3524_v55 = vpop.f32.mrf.mxu2  ;;  %v3733_v56 = vpop.f32.mrf.mxu3  ;;  %6814 = vmatmul.msk.f32.gmra.mxu0 %vm319_vm1, %v7214_v48  ;;  %6879 = vmatmul.msk.f32.gmra.mxu1 %vm319_vm1, %v7214_v48  ;;  %v7218_v48 = vld [vmem:[%s7307_s28 + $0x100] sm:$0xff] }
 0x6f9   : > { %v3525_v57 = vadd.f32 %v3524_v55, %v9574_v49  ;;  %v3734_v58 = vadd.f32 %v3733_v56, %v9576_v50 }
 0x6fa   : > { %v5015_v59 = vpack.c.bf16 %v4094_v54, %v4093_v53 }
 0x6fb   : > { %v4095_v60 = vmax.f32 %v3525_v57, 0.0  ;;  %v4096_v61 = vmax.f32 %v3734_v58, 0.0 }
 0x6fc   : > { %5527 = vst [vmem:[%s7428_s14 + $0x330] sm:$0xff] %v5015_v59 }
 0x6fd   : > { %v5016_v62 = vpack.c.bf16 %v4096_v61, %v4095_v60  ;;  %6945 = vmatmul.msk.f32.gmra.mxu2 %vm319_vm1, %v7215_v63  ;;  %7010 = vmatmul.msk.f32.gmra.mxu3 %vm319_vm1, %v7215_v63  ;;  %v3109_v0 = vpop.f32.mrf.mxu0  ;;  %v3318_v1 = vpop.f32.mrf.mxu1 }
 0x6fe   : > { %v3110_v2 = vadd.f32 %v3109_v0, %v9566_v38  ;;  %v3319_v3 = vadd.f32 %v3318_v1, %v9568_v39 }
 0x6ff   : > { %5528 = vst [vmem:[%s7428_s14 + $0x338] sm:$0xff] %v5016_v62 }
 0x700   : > { %v4109_v4 = vmax.f32 %v3110_v2, 0.0  ;;  %v4110_v5 = vmax.f32 %v3319_v3, 0.0  ;;  %v3527_v6 = vpop.f32.mrf.mxu2  ;;  %v3736_v7 = vpop.f32.mrf.mxu3  ;;  %6815 = vmatmul.msk.f32.gmra.mxu0 %vm319_vm1, %v7215_v63  ;;  %6880 = vmatmul.msk.f32.gmra.mxu1 %vm319_vm1, %v7215_v63  ;;  %v7219_v63 = vld [vmem:[%s7307_s28 + $0x108] sm:$0xff] }
 0x701   : > { %v3528_v8 = vadd.f32 %v3527_v6, %v9574_v49  ;;  %v3737_v9 = vadd.f32 %v3736_v7, %v9576_v50 }
 0x702   : > { %v5023_v10 = vpack.c.bf16 %v4110_v5, %v4109_v4 }
 0x703   : > { %v4111_v11 = vmax.f32 %v3528_v8, 0.0  ;;  %v4112_v12 = vmax.f32 %v3737_v9, 0.0 }
 0x704   : > { %5535 = vst [vmem:[%s7428_s14 + $0x370] sm:$0xff] %v5023_v10 }
 0x705   : > { %v5024_v13 = vpack.c.bf16 %v4112_v12, %v4111_v11  ;;  %6946 = vmatmul.msk.f32.gmra.mxu2 %vm319_vm1, %v7216_v14  ;;  %7011 = vmatmul.msk.f32.gmra.mxu3 %vm319_vm1, %v7216_v14  ;;  %v3112_v15 = vpop.f32.mrf.mxu0  ;;  %v3321_v16 = vpop.f32.mrf.mxu1 }
 0x706   : > { %v3113_v17 = vadd.f32 %v3112_v15, %v9566_v38  ;;  %v3322_v18 = vadd.f32 %v3321_v16, %v9568_v39 }
 0x707   : > { %5536 = vst [vmem:[%s7428_s14 + $0x378] sm:$0xff] %v5024_v13 }
 0x708   : > { %v4125_v19 = vmax.f32 %v3113_v17, 0.0  ;;  %v4126_v20 = vmax.f32 %v3322_v18, 0.0  ;;  %v3530_v21 = vpop.f32.mrf.mxu2  ;;  %v3739_v22 = vpop.f32.mrf.mxu3  ;;  %6816 = vmatmul.msk.f32.gmra.mxu0 %vm319_vm1, %v7216_v14  ;;  %6881 = vmatmul.msk.f32.gmra.mxu1 %vm319_vm1, %v7216_v14  ;;  %v7220_v14 = vld [vmem:[%s7307_s28 + $0x110] sm:$0xff] }
 0x709   : > { %v3531_v23 = vadd.f32 %v3530_v21, %v9574_v49  ;;  %v3740_v24 = vadd.f32 %v3739_v22, %v9576_v50 }
 0x70a   : > { %v5031_v25 = vpack.c.bf16 %v4126_v20, %v4125_v19 }
 0x70b   : > { %v4127_v26 = vmax.f32 %v3531_v23, 0.0  ;;  %v4128_v27 = vmax.f32 %v3740_v24, 0.0 }
 0x70c   : > { %5543 = vst [vmem:[%s7428_s14 + $0x3b0] sm:$0xff] %v5031_v25 }
 0x70d   : > { %v5032_v28 = vpack.c.bf16 %v4128_v27, %v4127_v26  ;;  %6947 = vmatmul.msk.f32.gmra.mxu2 %vm319_vm1, %v7217_v29  ;;  %7012 = vmatmul.msk.f32.gmra.mxu3 %vm319_vm1, %v7217_v29  ;;  %v3115_v30 = vpop.f32.mrf.mxu0  ;;  %v3324_v31 = vpop.f32.mrf.mxu1 }
 0x70e   : > { %v3116_v32 = vadd.f32 %v3115_v30, %v9566_v38  ;;  %v3325_v33 = vadd.f32 %v3324_v31, %v9568_v39 }
 0x70f   : > { %5544 = vst [vmem:[%s7428_s14 + $0x3b8] sm:$0xff] %v5032_v28 }
 0x710   : > { %v4141_v34 = vmax.f32 %v3116_v32, 0.0  ;;  %v4142_v37 = vmax.f32 %v3325_v33, 0.0  ;;  %v3533_v40 = vpop.f32.mrf.mxu2  ;;  %v3742_v41 = vpop.f32.mrf.mxu3  ;;  %6817 = vmatmul.msk.f32.gmra.mxu0 %vm319_vm1, %v7217_v29  ;;  %6882 = vmatmul.msk.f32.gmra.mxu1 %vm319_vm1, %v7217_v29  ;;  %v7221_v29 = vld [vmem:[%s7307_s28 + $0x118] sm:$0xff] }
 0x711   : > { %v3534_v35 = vadd.f32 %v3533_v40, %v9574_v49  ;;  %v3743_v36 = vadd.f32 %v3742_v41, %v9576_v50 }
 0x712   : > { %v5039_v42 = vpack.c.bf16 %v4142_v37, %v4141_v34 }
 0x713   : > { %v4143_v45 = vmax.f32 %v3534_v35, 0.0  ;;  %v4144_v46 = vmax.f32 %v3743_v36, 0.0 }
 0x714   : > { %5551 = vst [vmem:[%s7428_s14 + $0x3f0] sm:$0xff] %v5039_v42 }
 0x715   : > { %v5040_v47 = vpack.c.bf16 %v4144_v46, %v4143_v45  ;;  %6948 = vmatmul.msk.f32.gmra.mxu2 %vm319_vm1, %v7218_v48  ;;  %7013 = vmatmul.msk.f32.gmra.mxu3 %vm319_vm1, %v7218_v48  ;;  %v3118_v43 = vpop.f32.mrf.mxu0  ;;  %v3327_v44 = vpop.f32.mrf.mxu1 }
 0x716   : > { %v3119_v51 = vadd.f32 %v3118_v43, %v9566_v38  ;;  %v3328_v52 = vadd.f32 %v3327_v44, %v9568_v39 }
 0x717   : > { %5552 = vst [vmem:[%s7428_s14 + $0x3f8] sm:$0xff] %v5040_v47 }
 0x718   : > { %v4157_v53 = vmax.f32 %v3119_v51, 0.0  ;;  %v4158_v54 = vmax.f32 %v3328_v52, 0.0  ;;  %v3536_v55 = vpop.f32.mrf.mxu2  ;;  %v3745_v56 = vpop.f32.mrf.mxu3  ;;  %6818 = vmatmul.msk.f32.gmra.mxu0 %vm319_vm1, %v7218_v48  ;;  %6883 = vmatmul.msk.f32.gmra.mxu1 %vm319_vm1, %v7218_v48  ;;  %v7222_v48 = vld [vmem:[%s7307_s28 + $0x120] sm:$0xff] }
 0x719   : > { %v3537_v57 = vadd.f32 %v3536_v55, %v9574_v49  ;;  %v3746_v58 = vadd.f32 %v3745_v56, %v9576_v50 }
 0x71a   : > { %v5047_v59 = vpack.c.bf16 %v4158_v54, %v4157_v53 }
 0x71b   : > { %v4159_v60 = vmax.f32 %v3537_v57, 0.0  ;;  %v4160_v61 = vmax.f32 %v3746_v58, 0.0 }
 0x71c   : > { %5559 = vst [vmem:[%s7428_s14 + $0x430] sm:$0xff] %v5047_v59 }
 0x71d   : > { %v5048_v62 = vpack.c.bf16 %v4160_v61, %v4159_v60  ;;  %6949 = vmatmul.msk.f32.gmra.mxu2 %vm319_vm1, %v7219_v63  ;;  %7014 = vmatmul.msk.f32.gmra.mxu3 %vm319_vm1, %v7219_v63  ;;  %v3121_v0 = vpop.f32.mrf.mxu0  ;;  %v3330_v1 = vpop.f32.mrf.mxu1 }
 0x71e   : > { %v3122_v2 = vadd.f32 %v3121_v0, %v9566_v38  ;;  %v3331_v3 = vadd.f32 %v3330_v1, %v9568_v39 }
 0x71f   : > { %5560 = vst [vmem:[%s7428_s14 + $0x438] sm:$0xff] %v5048_v62 }
 0x720   : > { %v4173_v4 = vmax.f32 %v3122_v2, 0.0  ;;  %v4174_v5 = vmax.f32 %v3331_v3, 0.0  ;;  %v3539_v6 = vpop.f32.mrf.mxu2  ;;  %v3748_v7 = vpop.f32.mrf.mxu3  ;;  %6819 = vmatmul.msk.f32.gmra.mxu0 %vm319_vm1, %v7219_v63  ;;  %6884 = vmatmul.msk.f32.gmra.mxu1 %vm319_vm1, %v7219_v63  ;;  %v7223_v63 = vld [vmem:[%s7307_s28 + $0x128] sm:$0xff] }
 0x721   : > { %v3540_v8 = vadd.f32 %v3539_v6, %v9574_v49  ;;  %v3749_v9 = vadd.f32 %v3748_v7, %v9576_v50 }
 0x722   : > { %v5055_v10 = vpack.c.bf16 %v4174_v5, %v4173_v4 }
 0x723   : > { %v4175_v11 = vmax.f32 %v3540_v8, 0.0  ;;  %v4176_v12 = vmax.f32 %v3749_v9, 0.0 }
 0x724   : > { %5567 = vst [vmem:[%s7428_s14 + $0x470] sm:$0xff] %v5055_v10 }
 0x725   : > { %v5056_v13 = vpack.c.bf16 %v4176_v12, %v4175_v11  ;;  %6950 = vmatmul.msk.f32.gmra.mxu2 %vm319_vm1, %v7220_v14  ;;  %7015 = vmatmul.msk.f32.gmra.mxu3 %vm319_vm1, %v7220_v14  ;;  %v3124_v15 = vpop.f32.mrf.mxu0  ;;  %v3333_v16 = vpop.f32.mrf.mxu1 }
 0x726   : > { %v3125_v17 = vadd.f32 %v3124_v15, %v9566_v38  ;;  %v3334_v18 = vadd.f32 %v3333_v16, %v9568_v39 }
 0x727   : > { %5568 = vst [vmem:[%s7428_s14 + $0x478] sm:$0xff] %v5056_v13 }
 0x728   : > { %v4189_v19 = vmax.f32 %v3125_v17, 0.0  ;;  %v4190_v20 = vmax.f32 %v3334_v18, 0.0  ;;  %v3542_v21 = vpop.f32.mrf.mxu2  ;;  %v3751_v22 = vpop.f32.mrf.mxu3  ;;  %6820 = vmatmul.msk.f32.gmra.mxu0 %vm319_vm1, %v7220_v14  ;;  %6885 = vmatmul.msk.f32.gmra.mxu1 %vm319_vm1, %v7220_v14  ;;  %v7224_v14 = vld [vmem:[%s7307_s28 + $0x130] sm:$0xff] }
 0x729   : > { %v3543_v23 = vadd.f32 %v3542_v21, %v9574_v49  ;;  %v3752_v24 = vadd.f32 %v3751_v22, %v9576_v50 }
 0x72a   : > { %v5063_v25 = vpack.c.bf16 %v4190_v20, %v4189_v19 }
 0x72b   : > { %v4191_v26 = vmax.f32 %v3543_v23, 0.0  ;;  %v4192_v27 = vmax.f32 %v3752_v24, 0.0 }
 0x72c   : > { %5575 = vst [vmem:[%s7428_s14 + $0x4b0] sm:$0xff] %v5063_v25 }
 0x72d   : > { %v5064_v28 = vpack.c.bf16 %v4192_v27, %v4191_v26  ;;  %6951 = vmatmul.msk.f32.gmra.mxu2 %vm319_vm1, %v7221_v29  ;;  %7016 = vmatmul.msk.f32.gmra.mxu3 %vm319_vm1, %v7221_v29  ;;  %v3127_v30 = vpop.f32.mrf.mxu0  ;;  %v3336_v31 = vpop.f32.mrf.mxu1 }
 0x72e   : > { %v3128_v32 = vadd.f32 %v3127_v30, %v9566_v38  ;;  %v3337_v33 = vadd.f32 %v3336_v31, %v9568_v39 }
 0x72f   : > { %5576 = vst [vmem:[%s7428_s14 + $0x4b8] sm:$0xff] %v5064_v28 }
 0x730   : > { %v4205_v34 = vmax.f32 %v3128_v32, 0.0  ;;  %v4206_v37 = vmax.f32 %v3337_v33, 0.0  ;;  %v3545_v40 = vpop.f32.mrf.mxu2  ;;  %v3754_v41 = vpop.f32.mrf.mxu3  ;;  %6821 = vmatmul.msk.f32.gmra.mxu0 %vm319_vm1, %v7221_v29  ;;  %6886 = vmatmul.msk.f32.gmra.mxu1 %vm319_vm1, %v7221_v29  ;;  %v7225_v29 = vld [vmem:[%s7307_s28 + $0x138] sm:$0xff] }
 0x731   : > { %v3546_v35 = vadd.f32 %v3545_v40, %v9574_v49  ;;  %v3755_v36 = vadd.f32 %v3754_v41, %v9576_v50 }
 0x732   : > { %v5071_v42 = vpack.c.bf16 %v4206_v37, %v4205_v34 }
 0x733   : > { %v4207_v45 = vmax.f32 %v3546_v35, 0.0  ;;  %v4208_v46 = vmax.f32 %v3755_v36, 0.0 }
 0x734   : > { %5583 = vst [vmem:[%s7428_s14 + $0x4f0] sm:$0xff] %v5071_v42 }
 0x735   : > { %v5072_v47 = vpack.c.bf16 %v4208_v46, %v4207_v45  ;;  %6952 = vmatmul.msk.f32.gmra.mxu2 %vm319_vm1, %v7222_v48  ;;  %7017 = vmatmul.msk.f32.gmra.mxu3 %vm319_vm1, %v7222_v48  ;;  %v3130_v43 = vpop.f32.mrf.mxu0  ;;  %v3339_v44 = vpop.f32.mrf.mxu1 }
 0x736   : > { %v3131_v51 = vadd.f32 %v3130_v43, %v9566_v38  ;;  %v3340_v52 = vadd.f32 %v3339_v44, %v9568_v39 }
 0x737   : > { %5584 = vst [vmem:[%s7428_s14 + $0x4f8] sm:$0xff] %v5072_v47 }
 0x738   : > { %v4221_v53 = vmax.f32 %v3131_v51, 0.0  ;;  %v4222_v54 = vmax.f32 %v3340_v52, 0.0  ;;  %v3548_v55 = vpop.f32.mrf.mxu2  ;;  %v3757_v56 = vpop.f32.mrf.mxu3  ;;  %6822 = vmatmul.msk.f32.gmra.mxu0 %vm319_vm1, %v7222_v48  ;;  %6887 = vmatmul.msk.f32.gmra.mxu1 %vm319_vm1, %v7222_v48  ;;  %v7226_v48 = vld [vmem:[%s7307_s28 + $0x140] sm:$0xff] }
 0x739   : > { %v3549_v57 = vadd.f32 %v3548_v55, %v9574_v49  ;;  %v3758_v58 = vadd.f32 %v3757_v56, %v9576_v50 }
 0x73a   : > { %v5079_v59 = vpack.c.bf16 %v4222_v54, %v4221_v53 }
 0x73b   : > { %v4223_v60 = vmax.f32 %v3549_v57, 0.0  ;;  %v4224_v61 = vmax.f32 %v3758_v58, 0.0 }
 0x73c   : > { %5591 = vst [vmem:[%s7428_s14 + $0x530] sm:$0xff] %v5079_v59 }
 0x73d   : > { %v5080_v62 = vpack.c.bf16 %v4224_v61, %v4223_v60  ;;  %6953 = vmatmul.msk.f32.gmra.mxu2 %vm319_vm1, %v7223_v63  ;;  %7018 = vmatmul.msk.f32.gmra.mxu3 %vm319_vm1, %v7223_v63  ;;  %v3133_v0 = vpop.f32.mrf.mxu0  ;;  %v3342_v1 = vpop.f32.mrf.mxu1 }
 0x73e   : > { %v3134_v2 = vadd.f32 %v3133_v0, %v9566_v38  ;;  %v3343_v3 = vadd.f32 %v3342_v1, %v9568_v39 }
 0x73f   : > { %5592 = vst [vmem:[%s7428_s14 + $0x538] sm:$0xff] %v5080_v62 }
 0x740   : > { %v4237_v4 = vmax.f32 %v3134_v2, 0.0  ;;  %v4238_v5 = vmax.f32 %v3343_v3, 0.0  ;;  %v3551_v6 = vpop.f32.mrf.mxu2  ;;  %v3760_v7 = vpop.f32.mrf.mxu3  ;;  %6823 = vmatmul.msk.f32.gmra.mxu0 %vm319_vm1, %v7223_v63  ;;  %6888 = vmatmul.msk.f32.gmra.mxu1 %vm319_vm1, %v7223_v63  ;;  %v7227_v63 = vld [vmem:[%s7307_s28 + $0x148] sm:$0xff] }
 0x741   : > { %v3552_v8 = vadd.f32 %v3551_v6, %v9574_v49  ;;  %v3761_v9 = vadd.f32 %v3760_v7, %v9576_v50 }
 0x742   : > { %v5087_v10 = vpack.c.bf16 %v4238_v5, %v4237_v4 }
 0x743   : > { %v4239_v11 = vmax.f32 %v3552_v8, 0.0  ;;  %v4240_v12 = vmax.f32 %v3761_v9, 0.0 }
 0x744   : > { %5599 = vst [vmem:[%s7428_s14 + $0x570] sm:$0xff] %v5087_v10 }
 0x745   : > { %v5088_v13 = vpack.c.bf16 %v4240_v12, %v4239_v11  ;;  %6954 = vmatmul.msk.f32.gmra.mxu2 %vm319_vm1, %v7224_v14  ;;  %7019 = vmatmul.msk.f32.gmra.mxu3 %vm319_vm1, %v7224_v14  ;;  %v3136_v15 = vpop.f32.mrf.mxu0  ;;  %v3345_v16 = vpop.f32.mrf.mxu1 }
 0x746   : > { %v3137_v17 = vadd.f32 %v3136_v15, %v9566_v38  ;;  %v3346_v18 = vadd.f32 %v3345_v16, %v9568_v39 }
 0x747   : > { %5600 = vst [vmem:[%s7428_s14 + $0x578] sm:$0xff] %v5088_v13 }
 0x748   : > { %v4253_v19 = vmax.f32 %v3137_v17, 0.0  ;;  %v4254_v20 = vmax.f32 %v3346_v18, 0.0  ;;  %v3554_v21 = vpop.f32.mrf.mxu2  ;;  %v3763_v22 = vpop.f32.mrf.mxu3  ;;  %6824 = vmatmul.msk.f32.gmra.mxu0 %vm319_vm1, %v7224_v14  ;;  %6889 = vmatmul.msk.f32.gmra.mxu1 %vm319_vm1, %v7224_v14  ;;  %v7228_v14 = vld [vmem:[%s7307_s28 + $0x150] sm:$0xff] }
 0x749   : > { %v3555_v23 = vadd.f32 %v3554_v21, %v9574_v49  ;;  %v3764_v24 = vadd.f32 %v3763_v22, %v9576_v50 }
 0x74a   : > { %v5095_v25 = vpack.c.bf16 %v4254_v20, %v4253_v19 }
 0x74b   : > { %v4255_v26 = vmax.f32 %v3555_v23, 0.0  ;;  %v4256_v27 = vmax.f32 %v3764_v24, 0.0 }
 0x74c   : > { %5607 = vst [vmem:[%s7428_s14 + $0x5b0] sm:$0xff] %v5095_v25 }
 0x74d   : > { %v5096_v28 = vpack.c.bf16 %v4256_v27, %v4255_v26  ;;  %6955 = vmatmul.msk.f32.gmra.mxu2 %vm319_vm1, %v7225_v29  ;;  %7020 = vmatmul.msk.f32.gmra.mxu3 %vm319_vm1, %v7225_v29  ;;  %v3139_v30 = vpop.f32.mrf.mxu0  ;;  %v3348_v31 = vpop.f32.mrf.mxu1 }
 0x74e   : > { %v3140_v32 = vadd.f32 %v3139_v30, %v9566_v38  ;;  %v3349_v33 = vadd.f32 %v3348_v31, %v9568_v39 }
 0x74f   : > { %5608 = vst [vmem:[%s7428_s14 + $0x5b8] sm:$0xff] %v5096_v28 }
 0x750   : > { %v4269_v34 = vmax.f32 %v3140_v32, 0.0  ;;  %v4270_v37 = vmax.f32 %v3349_v33, 0.0  ;;  %v3557_v40 = vpop.f32.mrf.mxu2  ;;  %v3766_v41 = vpop.f32.mrf.mxu3  ;;  %6825 = vmatmul.msk.f32.gmra.mxu0 %vm319_vm1, %v7225_v29  ;;  %6890 = vmatmul.msk.f32.gmra.mxu1 %vm319_vm1, %v7225_v29  ;;  %v7229_v29 = vld [vmem:[%s7307_s28 + $0x158] sm:$0xff] }
 0x751   : > { %v3558_v35 = vadd.f32 %v3557_v40, %v9574_v49  ;;  %v3767_v36 = vadd.f32 %v3766_v41, %v9576_v50 }
 0x752   : > { %v5103_v42 = vpack.c.bf16 %v4270_v37, %v4269_v34 }
 0x753   : > { %v4271_v45 = vmax.f32 %v3558_v35, 0.0  ;;  %v4272_v46 = vmax.f32 %v3767_v36, 0.0 }
 0x754   : > { %5615 = vst [vmem:[%s7428_s14 + $0x5f0] sm:$0xff] %v5103_v42 }
 0x755   : > { %v5104_v47 = vpack.c.bf16 %v4272_v46, %v4271_v45  ;;  %6956 = vmatmul.msk.f32.gmra.mxu2 %vm319_vm1, %v7226_v48  ;;  %7021 = vmatmul.msk.f32.gmra.mxu3 %vm319_vm1, %v7226_v48  ;;  %v3142_v43 = vpop.f32.mrf.mxu0  ;;  %v3351_v44 = vpop.f32.mrf.mxu1 }
 0x756   : > { %v3143_v51 = vadd.f32 %v3142_v43, %v9566_v38  ;;  %v3352_v52 = vadd.f32 %v3351_v44, %v9568_v39 }
 0x757   : > { %5616 = vst [vmem:[%s7428_s14 + $0x5f8] sm:$0xff] %v5104_v47 }
 0x758   : > { %v4285_v53 = vmax.f32 %v3143_v51, 0.0  ;;  %v4286_v54 = vmax.f32 %v3352_v52, 0.0  ;;  %v3560_v55 = vpop.f32.mrf.mxu2  ;;  %v3769_v56 = vpop.f32.mrf.mxu3  ;;  %6826 = vmatmul.msk.f32.gmra.mxu0 %vm319_vm1, %v7226_v48  ;;  %6891 = vmatmul.msk.f32.gmra.mxu1 %vm319_vm1, %v7226_v48  ;;  %v7230_v48 = vld [vmem:[%s7307_s28 + $0x160] sm:$0xff] }
 0x759   : > { %v3561_v57 = vadd.f32 %v3560_v55, %v9574_v49  ;;  %v3770_v58 = vadd.f32 %v3769_v56, %v9576_v50 }
 0x75a   : > { %v5111_v59 = vpack.c.bf16 %v4286_v54, %v4285_v53 }
 0x75b   : > { %v4287_v60 = vmax.f32 %v3561_v57, 0.0  ;;  %v4288_v61 = vmax.f32 %v3770_v58, 0.0 }
 0x75c   : > { %5623 = vst [vmem:[%s7428_s14 + $0x630] sm:$0xff] %v5111_v59 }
 0x75d   : > { %v5112_v62 = vpack.c.bf16 %v4288_v61, %v4287_v60  ;;  %6957 = vmatmul.msk.f32.gmra.mxu2 %vm319_vm1, %v7227_v63  ;;  %7022 = vmatmul.msk.f32.gmra.mxu3 %vm319_vm1, %v7227_v63  ;;  %v3145_v0 = vpop.f32.mrf.mxu0  ;;  %v3354_v1 = vpop.f32.mrf.mxu1 }
 0x75e   : > { %v3146_v2 = vadd.f32 %v3145_v0, %v9566_v38  ;;  %v3355_v3 = vadd.f32 %v3354_v1, %v9568_v39 }
 0x75f   : > { %5624 = vst [vmem:[%s7428_s14 + $0x638] sm:$0xff] %v5112_v62 }
 0x760   : > { %v4301_v4 = vmax.f32 %v3146_v2, 0.0  ;;  %v4302_v5 = vmax.f32 %v3355_v3, 0.0  ;;  %v3563_v6 = vpop.f32.mrf.mxu2  ;;  %v3772_v7 = vpop.f32.mrf.mxu3  ;;  %6827 = vmatmul.msk.f32.gmra.mxu0 %vm319_vm1, %v7227_v63  ;;  %6892 = vmatmul.msk.f32.gmra.mxu1 %vm319_vm1, %v7227_v63  ;;  %v7231_v63 = vld [vmem:[%s7307_s28 + $0x168] sm:$0xff] }
 0x761   : > { %v3564_v8 = vadd.f32 %v3563_v6, %v9574_v49  ;;  %v3773_v9 = vadd.f32 %v3772_v7, %v9576_v50 }
 0x762   : > { %v5119_v10 = vpack.c.bf16 %v4302_v5, %v4301_v4 }
 0x763   : > { %v4303_v11 = vmax.f32 %v3564_v8, 0.0  ;;  %v4304_v12 = vmax.f32 %v3773_v9, 0.0 }
 0x764   : > { %5631 = vst [vmem:[%s7428_s14 + $0x670] sm:$0xff] %v5119_v10 }
 0x765   : > { %v5120_v13 = vpack.c.bf16 %v4304_v12, %v4303_v11  ;;  %6958 = vmatmul.msk.f32.gmra.mxu2 %vm319_vm1, %v7228_v14  ;;  %7023 = vmatmul.msk.f32.gmra.mxu3 %vm319_vm1, %v7228_v14  ;;  %v3148_v15 = vpop.f32.mrf.mxu0  ;;  %v3357_v16 = vpop.f32.mrf.mxu1 }
 0x766   : > { %v3149_v17 = vadd.f32 %v3148_v15, %v9566_v38  ;;  %v3358_v18 = vadd.f32 %v3357_v16, %v9568_v39 }
 0x767   : > { %5632 = vst [vmem:[%s7428_s14 + $0x678] sm:$0xff] %v5120_v13 }
 0x768   : > { %v4317_v19 = vmax.f32 %v3149_v17, 0.0  ;;  %v4318_v20 = vmax.f32 %v3358_v18, 0.0  ;;  %v3566_v21 = vpop.f32.mrf.mxu2  ;;  %v3775_v22 = vpop.f32.mrf.mxu3  ;;  %6828 = vmatmul.msk.f32.gmra.mxu0 %vm319_vm1, %v7228_v14  ;;  %6893 = vmatmul.msk.f32.gmra.mxu1 %vm319_vm1, %v7228_v14  ;;  %v7232_v14 = vld [vmem:[%s7307_s28 + $0x170] sm:$0xff] }
 0x769   : > { %v3567_v23 = vadd.f32 %v3566_v21, %v9574_v49  ;;  %v3776_v24 = vadd.f32 %v3775_v22, %v9576_v50 }
 0x76a   : > { %v5127_v25 = vpack.c.bf16 %v4318_v20, %v4317_v19 }
 0x76b   : > { %v4319_v26 = vmax.f32 %v3567_v23, 0.0  ;;  %v4320_v27 = vmax.f32 %v3776_v24, 0.0 }
 0x76c   : > { %5639 = vst [vmem:[%s7428_s14 + $0x6b0] sm:$0xff] %v5127_v25 }
 0x76d   : > { %v5128_v28 = vpack.c.bf16 %v4320_v27, %v4319_v26  ;;  %6959 = vmatmul.msk.f32.gmra.mxu2 %vm319_vm1, %v7229_v29  ;;  %7024 = vmatmul.msk.f32.gmra.mxu3 %vm319_vm1, %v7229_v29  ;;  %v3151_v30 = vpop.f32.mrf.mxu0  ;;  %v3360_v31 = vpop.f32.mrf.mxu1 }
 0x76e   : > { %v3152_v32 = vadd.f32 %v3151_v30, %v9566_v38  ;;  %v3361_v33 = vadd.f32 %v3360_v31, %v9568_v39 }
 0x76f   : > { %5640 = vst [vmem:[%s7428_s14 + $0x6b8] sm:$0xff] %v5128_v28 }
 0x770   : > { %v4333_v34 = vmax.f32 %v3152_v32, 0.0  ;;  %v4334_v37 = vmax.f32 %v3361_v33, 0.0  ;;  %v3569_v40 = vpop.f32.mrf.mxu2  ;;  %v3778_v41 = vpop.f32.mrf.mxu3  ;;  %6829 = vmatmul.msk.f32.gmra.mxu0 %vm319_vm1, %v7229_v29  ;;  %6894 = vmatmul.msk.f32.gmra.mxu1 %vm319_vm1, %v7229_v29  ;;  %v7233_v29 = vld [vmem:[%s7307_s28 + $0x178] sm:$0xff] }
 0x771   : > { %v3570_v35 = vadd.f32 %v3569_v40, %v9574_v49  ;;  %v3779_v36 = vadd.f32 %v3778_v41, %v9576_v50 }
 0x772   : > { %v5135_v42 = vpack.c.bf16 %v4334_v37, %v4333_v34 }
 0x773   : > { %v4335_v45 = vmax.f32 %v3570_v35, 0.0  ;;  %v4336_v46 = vmax.f32 %v3779_v36, 0.0 }
 0x774   : > { %5647 = vst [vmem:[%s7428_s14 + $0x6f0] sm:$0xff] %v5135_v42 }
 0x775   : > { %v5136_v47 = vpack.c.bf16 %v4336_v46, %v4335_v45  ;;  %6960 = vmatmul.msk.f32.gmra.mxu2 %vm319_vm1, %v7230_v48  ;;  %7025 = vmatmul.msk.f32.gmra.mxu3 %vm319_vm1, %v7230_v48  ;;  %v3154_v43 = vpop.f32.mrf.mxu0  ;;  %v3363_v44 = vpop.f32.mrf.mxu1 }
 0x776   : > { %v3155_v51 = vadd.f32 %v3154_v43, %v9566_v38  ;;  %v3364_v52 = vadd.f32 %v3363_v44, %v9568_v39 }
 0x777   : > { %5648 = vst [vmem:[%s7428_s14 + $0x6f8] sm:$0xff] %v5136_v47 }
 0x778   : > { %v4349_v53 = vmax.f32 %v3155_v51, 0.0  ;;  %v4350_v54 = vmax.f32 %v3364_v52, 0.0  ;;  %v3572_v55 = vpop.f32.mrf.mxu2  ;;  %v3781_v56 = vpop.f32.mrf.mxu3  ;;  %6830 = vmatmul.msk.f32.gmra.mxu0 %vm319_vm1, %v7230_v48  ;;  %6895 = vmatmul.msk.f32.gmra.mxu1 %vm319_vm1, %v7230_v48  ;;  %v7234_v48 = vld [vmem:[%s7307_s28 + $0x180] sm:$0xff] }
 0x779   : > { %v3573_v57 = vadd.f32 %v3572_v55, %v9574_v49  ;;  %v3782_v58 = vadd.f32 %v3781_v56, %v9576_v50 }
 0x77a   : > { %v5143_v59 = vpack.c.bf16 %v4350_v54, %v4349_v53 }
 0x77b   : > { %v4351_v60 = vmax.f32 %v3573_v57, 0.0  ;;  %v4352_v61 = vmax.f32 %v3782_v58, 0.0 }
 0x77c   : > { %5655 = vst [vmem:[%s7428_s14 + $0x730] sm:$0xff] %v5143_v59 }
 0x77d   : > { %v5144_v62 = vpack.c.bf16 %v4352_v61, %v4351_v60  ;;  %6961 = vmatmul.msk.f32.gmra.mxu2 %vm319_vm1, %v7231_v63  ;;  %7026 = vmatmul.msk.f32.gmra.mxu3 %vm319_vm1, %v7231_v63  ;;  %v3157_v0 = vpop.f32.mrf.mxu0  ;;  %v3366_v1 = vpop.f32.mrf.mxu1 }
 0x77e   : > { %v3158_v2 = vadd.f32 %v3157_v0, %v9566_v38  ;;  %v3367_v3 = vadd.f32 %v3366_v1, %v9568_v39 }
 0x77f   : > { %5656 = vst [vmem:[%s7428_s14 + $0x738] sm:$0xff] %v5144_v62 }
 0x780   : > { %v4365_v4 = vmax.f32 %v3158_v2, 0.0  ;;  %v4366_v5 = vmax.f32 %v3367_v3, 0.0  ;;  %v3575_v6 = vpop.f32.mrf.mxu2  ;;  %v3784_v7 = vpop.f32.mrf.mxu3  ;;  %6831 = vmatmul.msk.f32.gmra.mxu0 %vm319_vm1, %v7231_v63  ;;  %6896 = vmatmul.msk.f32.gmra.mxu1 %vm319_vm1, %v7231_v63  ;;  %v7235_v63 = vld [vmem:[%s7307_s28 + $0x188] sm:$0xff] }
 0x781   : > { %v3576_v8 = vadd.f32 %v3575_v6, %v9574_v49  ;;  %v3785_v9 = vadd.f32 %v3784_v7, %v9576_v50 }
 0x782   : > { %v5151_v10 = vpack.c.bf16 %v4366_v5, %v4365_v4 }
 0x783   : > { %v4367_v11 = vmax.f32 %v3576_v8, 0.0  ;;  %v4368_v12 = vmax.f32 %v3785_v9, 0.0 }
 0x784   : > { %5663 = vst [vmem:[%s7428_s14 + $0x770] sm:$0xff] %v5151_v10 }
 0x785   : > { %v5152_v13 = vpack.c.bf16 %v4368_v12, %v4367_v11  ;;  %6962 = vmatmul.msk.f32.gmra.mxu2 %vm319_vm1, %v7232_v14  ;;  %7027 = vmatmul.msk.f32.gmra.mxu3 %vm319_vm1, %v7232_v14  ;;  %v3160_v15 = vpop.f32.mrf.mxu0  ;;  %v3369_v16 = vpop.f32.mrf.mxu1 }
 0x786   : > { %v3161_v17 = vadd.f32 %v3160_v15, %v9566_v38  ;;  %v3370_v18 = vadd.f32 %v3369_v16, %v9568_v39 }
 0x787   : > { %5664 = vst [vmem:[%s7428_s14 + $0x778] sm:$0xff] %v5152_v13 }
 0x788   : > { %v4381_v19 = vmax.f32 %v3161_v17, 0.0  ;;  %v4382_v20 = vmax.f32 %v3370_v18, 0.0  ;;  %v3578_v21 = vpop.f32.mrf.mxu2  ;;  %v3787_v22 = vpop.f32.mrf.mxu3  ;;  %6832 = vmatmul.msk.f32.gmra.mxu0 %vm319_vm1, %v7232_v14  ;;  %6897 = vmatmul.msk.f32.gmra.mxu1 %vm319_vm1, %v7232_v14  ;;  %v7236_v14 = vld [vmem:[%s7307_s28 + $0x190] sm:$0xff] }
 0x789   : > { %v3579_v23 = vadd.f32 %v3578_v21, %v9574_v49  ;;  %v3788_v24 = vadd.f32 %v3787_v22, %v9576_v50 }
 0x78a   : > { %v5159_v25 = vpack.c.bf16 %v4382_v20, %v4381_v19 }
 0x78b   : > { %v4383_v26 = vmax.f32 %v3579_v23, 0.0  ;;  %v4384_v27 = vmax.f32 %v3788_v24, 0.0 }
 0x78c   : > { %5671 = vst [vmem:[%s7428_s14 + $0x7b0] sm:$0xff] %v5159_v25 }
 0x78d   : > { %v5160_v28 = vpack.c.bf16 %v4384_v27, %v4383_v26  ;;  %6963 = vmatmul.msk.f32.gmra.mxu2 %vm319_vm1, %v7233_v29  ;;  %7028 = vmatmul.msk.f32.gmra.mxu3 %vm319_vm1, %v7233_v29  ;;  %v3163_v30 = vpop.f32.mrf.mxu0  ;;  %v3372_v31 = vpop.f32.mrf.mxu1 }
 0x78e   : > { %v3164_v32 = vadd.f32 %v3163_v30, %v9566_v38  ;;  %v3373_v33 = vadd.f32 %v3372_v31, %v9568_v39 }
 0x78f   : > { %5672 = vst [vmem:[%s7428_s14 + $0x7b8] sm:$0xff] %v5160_v28 }
 0x790   : > { %v4397_v34 = vmax.f32 %v3164_v32, 0.0  ;;  %v4398_v37 = vmax.f32 %v3373_v33, 0.0  ;;  %v3581_v40 = vpop.f32.mrf.mxu2  ;;  %v3790_v41 = vpop.f32.mrf.mxu3  ;;  %6833 = vmatmul.msk.f32.gmra.mxu0 %vm319_vm1, %v7233_v29  ;;  %6898 = vmatmul.msk.f32.gmra.mxu1 %vm319_vm1, %v7233_v29  ;;  %v7237_v29 = vld [vmem:[%s7307_s28 + $0x198] sm:$0xff] }
 0x791   : > { %v3582_v35 = vadd.f32 %v3581_v40, %v9574_v49  ;;  %v3791_v36 = vadd.f32 %v3790_v41, %v9576_v50 }
 0x792   : > { %v5167_v42 = vpack.c.bf16 %v4398_v37, %v4397_v34 }
 0x793   : > { %v4399_v45 = vmax.f32 %v3582_v35, 0.0  ;;  %v4400_v46 = vmax.f32 %v3791_v36, 0.0 }
 0x794   : > { %5679 = vst [vmem:[%s7428_s14 + $0x7f0] sm:$0xff] %v5167_v42 }
 0x795   : > { %v5168_v47 = vpack.c.bf16 %v4400_v46, %v4399_v45  ;;  %6964 = vmatmul.msk.f32.gmra.mxu2 %vm319_vm1, %v7234_v48  ;;  %7029 = vmatmul.msk.f32.gmra.mxu3 %vm319_vm1, %v7234_v48  ;;  %v3166_v43 = vpop.f32.mrf.mxu0  ;;  %v3375_v44 = vpop.f32.mrf.mxu1 }
 0x796   : > { %v3167_v51 = vadd.f32 %v3166_v43, %v9566_v38  ;;  %v3376_v52 = vadd.f32 %v3375_v44, %v9568_v39 }
 0x797   : > { %5680 = vst [vmem:[%s7428_s14 + $0x7f8] sm:$0xff] %v5168_v47 }
 0x798   : > { %v4413_v53 = vmax.f32 %v3167_v51, 0.0  ;;  %v4414_v54 = vmax.f32 %v3376_v52, 0.0  ;;  %v3584_v55 = vpop.f32.mrf.mxu2  ;;  %v3793_v56 = vpop.f32.mrf.mxu3  ;;  %6834 = vmatmul.msk.f32.gmra.mxu0 %vm319_vm1, %v7234_v48  ;;  %6899 = vmatmul.msk.f32.gmra.mxu1 %vm319_vm1, %v7234_v48  ;;  %v7238_v48 = vld [vmem:[%s7307_s28 + $0x1a0] sm:$0xff] }
 0x799   : > { %v3585_v57 = vadd.f32 %v3584_v55, %v9574_v49  ;;  %v3794_v58 = vadd.f32 %v3793_v56, %v9576_v50 }
 0x79a   : > { %v5175_v59 = vpack.c.bf16 %v4414_v54, %v4413_v53 }
 0x79b   : > { %v4415_v60 = vmax.f32 %v3585_v57, 0.0  ;;  %v4416_v61 = vmax.f32 %v3794_v58, 0.0 }
 0x79c   : > { %5687 = vst [vmem:[%s7428_s14 + $0x830] sm:$0xff] %v5175_v59 }
 0x79d   : > { %v5176_v62 = vpack.c.bf16 %v4416_v61, %v4415_v60  ;;  %6965 = vmatmul.msk.f32.gmra.mxu2 %vm319_vm1, %v7235_v63  ;;  %7030 = vmatmul.msk.f32.gmra.mxu3 %vm319_vm1, %v7235_v63  ;;  %v3169_v0 = vpop.f32.mrf.mxu0  ;;  %v3378_v1 = vpop.f32.mrf.mxu1 }
 0x79e   : > { %v3170_v2 = vadd.f32 %v3169_v0, %v9566_v38  ;;  %v3379_v3 = vadd.f32 %v3378_v1, %v9568_v39 }
 0x79f   : > { %5688 = vst [vmem:[%s7428_s14 + $0x838] sm:$0xff] %v5176_v62 }
 0x7a0   : > { %v4429_v4 = vmax.f32 %v3170_v2, 0.0  ;;  %v4430_v5 = vmax.f32 %v3379_v3, 0.0  ;;  %v3587_v6 = vpop.f32.mrf.mxu2  ;;  %v3796_v7 = vpop.f32.mrf.mxu3  ;;  %6835 = vmatmul.msk.f32.gmra.mxu0 %vm319_vm1, %v7235_v63  ;;  %6900 = vmatmul.msk.f32.gmra.mxu1 %vm319_vm1, %v7235_v63  ;;  %v7239_v63 = vld [vmem:[%s7307_s28 + $0x1a8] sm:$0xff] }
 0x7a1   : > { %v3588_v8 = vadd.f32 %v3587_v6, %v9574_v49  ;;  %v3797_v9 = vadd.f32 %v3796_v7, %v9576_v50 }
 0x7a2   : > { %v5183_v10 = vpack.c.bf16 %v4430_v5, %v4429_v4 }
 0x7a3   : > { %v4431_v11 = vmax.f32 %v3588_v8, 0.0  ;;  %v4432_v12 = vmax.f32 %v3797_v9, 0.0 }
 0x7a4   : > { %5695 = vst [vmem:[%s7428_s14 + $0x870] sm:$0xff] %v5183_v10 }
 0x7a5   : > { %v5184_v13 = vpack.c.bf16 %v4432_v12, %v4431_v11  ;;  %6966 = vmatmul.msk.f32.gmra.mxu2 %vm319_vm1, %v7236_v14  ;;  %7031 = vmatmul.msk.f32.gmra.mxu3 %vm319_vm1, %v7236_v14  ;;  %v3172_v15 = vpop.f32.mrf.mxu0  ;;  %v3381_v16 = vpop.f32.mrf.mxu1 }
 0x7a6   : > { %v3173_v17 = vadd.f32 %v3172_v15, %v9566_v38  ;;  %v3382_v18 = vadd.f32 %v3381_v16, %v9568_v39 }
 0x7a7   : > { %5696 = vst [vmem:[%s7428_s14 + $0x878] sm:$0xff] %v5184_v13 }
 0x7a8   : > { %v4445_v19 = vmax.f32 %v3173_v17, 0.0  ;;  %v4446_v20 = vmax.f32 %v3382_v18, 0.0  ;;  %v3590_v21 = vpop.f32.mrf.mxu2  ;;  %v3799_v22 = vpop.f32.mrf.mxu3  ;;  %6836 = vmatmul.msk.f32.gmra.mxu0 %vm319_vm1, %v7236_v14  ;;  %6901 = vmatmul.msk.f32.gmra.mxu1 %vm319_vm1, %v7236_v14  ;;  %v7240_v14 = vld [vmem:[%s7307_s28 + $0x1b0] sm:$0xff] }
 0x7a9   : > { %v3591_v23 = vadd.f32 %v3590_v21, %v9574_v49  ;;  %v3800_v24 = vadd.f32 %v3799_v22, %v9576_v50 }
 0x7aa   : > { %v5191_v25 = vpack.c.bf16 %v4446_v20, %v4445_v19 }
 0x7ab   : > { %v4447_v26 = vmax.f32 %v3591_v23, 0.0  ;;  %v4448_v27 = vmax.f32 %v3800_v24, 0.0 }
 0x7ac   : > { %5703 = vst [vmem:[%s7428_s14 + $0x8b0] sm:$0xff] %v5191_v25 }
 0x7ad   : > { %v5192_v28 = vpack.c.bf16 %v4448_v27, %v4447_v26  ;;  %6967 = vmatmul.msk.f32.gmra.mxu2 %vm319_vm1, %v7237_v29  ;;  %7032 = vmatmul.msk.f32.gmra.mxu3 %vm319_vm1, %v7237_v29  ;;  %v3175_v30 = vpop.f32.mrf.mxu0  ;;  %v3384_v31 = vpop.f32.mrf.mxu1 }
 0x7ae   : > { %v3176_v32 = vadd.f32 %v3175_v30, %v9566_v38  ;;  %v3385_v33 = vadd.f32 %v3384_v31, %v9568_v39 }
 0x7af   : > { %5704 = vst [vmem:[%s7428_s14 + $0x8b8] sm:$0xff] %v5192_v28 }
 0x7b0   : > { %v4461_v34 = vmax.f32 %v3176_v32, 0.0  ;;  %v4462_v37 = vmax.f32 %v3385_v33, 0.0  ;;  %v3593_v40 = vpop.f32.mrf.mxu2  ;;  %v3802_v41 = vpop.f32.mrf.mxu3  ;;  %6837 = vmatmul.msk.f32.gmra.mxu0 %vm319_vm1, %v7237_v29  ;;  %6902 = vmatmul.msk.f32.gmra.mxu1 %vm319_vm1, %v7237_v29  ;;  %v7241_v29 = vld [vmem:[%s7307_s28 + $0x1b8] sm:$0xff] }
 0x7b1   : > { %v3594_v35 = vadd.f32 %v3593_v40, %v9574_v49  ;;  %v3803_v36 = vadd.f32 %v3802_v41, %v9576_v50 }
 0x7b2   : > { %v5199_v42 = vpack.c.bf16 %v4462_v37, %v4461_v34 }
 0x7b3   : > { %v4463_v45 = vmax.f32 %v3594_v35, 0.0  ;;  %v4464_v46 = vmax.f32 %v3803_v36, 0.0 }
 0x7b4   : > { %5711 = vst [vmem:[%s7428_s14 + $0x8f0] sm:$0xff] %v5199_v42 }
 0x7b5   : > { %v5200_v47 = vpack.c.bf16 %v4464_v46, %v4463_v45  ;;  %6968 = vmatmul.msk.f32.gmra.mxu2 %vm319_vm1, %v7238_v48  ;;  %7033 = vmatmul.msk.f32.gmra.mxu3 %vm319_vm1, %v7238_v48  ;;  %v3178_v43 = vpop.f32.mrf.mxu0  ;;  %v3387_v44 = vpop.f32.mrf.mxu1 }
 0x7b6   : > { %v3179_v51 = vadd.f32 %v3178_v43, %v9566_v38  ;;  %v3388_v52 = vadd.f32 %v3387_v44, %v9568_v39 }
 0x7b7   : > { %5712 = vst [vmem:[%s7428_s14 + $0x8f8] sm:$0xff] %v5200_v47 }
 0x7b8   : > { %v4477_v53 = vmax.f32 %v3179_v51, 0.0  ;;  %v4478_v54 = vmax.f32 %v3388_v52, 0.0  ;;  %v3596_v55 = vpop.f32.mrf.mxu2  ;;  %v3805_v56 = vpop.f32.mrf.mxu3  ;;  %6838 = vmatmul.msk.f32.gmra.mxu0 %vm319_vm1, %v7238_v48  ;;  %6903 = vmatmul.msk.f32.gmra.mxu1 %vm319_vm1, %v7238_v48  ;;  %v7242_v48 = vld [vmem:[%s7307_s28 + $0x1c0] sm:$0xff] }
 0x7b9   : > { %v3597_v57 = vadd.f32 %v3596_v55, %v9574_v49  ;;  %v3806_v58 = vadd.f32 %v3805_v56, %v9576_v50 }
 0x7ba   : > { %v5207_v59 = vpack.c.bf16 %v4478_v54, %v4477_v53 }
 0x7bb   : > { %v4479_v60 = vmax.f32 %v3597_v57, 0.0  ;;  %v4480_v61 = vmax.f32 %v3806_v58, 0.0 }
 0x7bc   : > { %5719 = vst [vmem:[%s7428_s14 + $0x930] sm:$0xff] %v5207_v59 }
 0x7bd   : > { %v5208_v62 = vpack.c.bf16 %v4480_v61, %v4479_v60  ;;  %6969 = vmatmul.msk.f32.gmra.mxu2 %vm319_vm1, %v7239_v63  ;;  %7034 = vmatmul.msk.f32.gmra.mxu3 %vm319_vm1, %v7239_v63  ;;  %v3181_v0 = vpop.f32.mrf.mxu0  ;;  %v3390_v1 = vpop.f32.mrf.mxu1 }
 0x7be   : > { %v3182_v2 = vadd.f32 %v3181_v0, %v9566_v38  ;;  %v3391_v3 = vadd.f32 %v3390_v1, %v9568_v39 }
 0x7bf   : > { %5720 = vst [vmem:[%s7428_s14 + $0x938] sm:$0xff] %v5208_v62 }
 0x7c0   : > { %v4493_v4 = vmax.f32 %v3182_v2, 0.0  ;;  %v4494_v5 = vmax.f32 %v3391_v3, 0.0  ;;  %v3599_v6 = vpop.f32.mrf.mxu2  ;;  %v3808_v7 = vpop.f32.mrf.mxu3  ;;  %6839 = vmatmul.msk.f32.gmra.mxu0 %vm319_vm1, %v7239_v63  ;;  %6904 = vmatmul.msk.f32.gmra.mxu1 %vm319_vm1, %v7239_v63  ;;  %v7243_v63 = vld [vmem:[%s7307_s28 + $0x1c8] sm:$0xff] }
 0x7c1   : > { %v3600_v8 = vadd.f32 %v3599_v6, %v9574_v49  ;;  %v3809_v9 = vadd.f32 %v3808_v7, %v9576_v50 }
 0x7c2   : > { %v5215_v10 = vpack.c.bf16 %v4494_v5, %v4493_v4 }
 0x7c3   : > { %v4495_v11 = vmax.f32 %v3600_v8, 0.0  ;;  %v4496_v12 = vmax.f32 %v3809_v9, 0.0 }
 0x7c4   : > { %5727 = vst [vmem:[%s7428_s14 + $0x970] sm:$0xff] %v5215_v10 }
 0x7c5   : > { %v5216_v13 = vpack.c.bf16 %v4496_v12, %v4495_v11  ;;  %6970 = vmatmul.msk.f32.gmra.mxu2 %vm319_vm1, %v7240_v14  ;;  %7035 = vmatmul.msk.f32.gmra.mxu3 %vm319_vm1, %v7240_v14  ;;  %v3184_v15 = vpop.f32.mrf.mxu0  ;;  %v3393_v16 = vpop.f32.mrf.mxu1 }
 0x7c6   : > { %v3185_v17 = vadd.f32 %v3184_v15, %v9566_v38  ;;  %v3394_v18 = vadd.f32 %v3393_v16, %v9568_v39 }
 0x7c7   : > { %5728 = vst [vmem:[%s7428_s14 + $0x978] sm:$0xff] %v5216_v13 }
 0x7c8   : > { %v4509_v19 = vmax.f32 %v3185_v17, 0.0  ;;  %v4510_v20 = vmax.f32 %v3394_v18, 0.0  ;;  %v3602_v21 = vpop.f32.mrf.mxu2  ;;  %v3811_v22 = vpop.f32.mrf.mxu3  ;;  %6840 = vmatmul.msk.f32.gmra.mxu0 %vm319_vm1, %v7240_v14  ;;  %6905 = vmatmul.msk.f32.gmra.mxu1 %vm319_vm1, %v7240_v14  ;;  %v7244_v14 = vld [vmem:[%s7307_s28 + $0x1d0] sm:$0xff] }
 0x7c9   : > { %v3603_v23 = vadd.f32 %v3602_v21, %v9574_v49  ;;  %v3812_v24 = vadd.f32 %v3811_v22, %v9576_v50 }
 0x7ca   : > { %v5223_v25 = vpack.c.bf16 %v4510_v20, %v4509_v19 }
 0x7cb   : > { %v4511_v26 = vmax.f32 %v3603_v23, 0.0  ;;  %v4512_v27 = vmax.f32 %v3812_v24, 0.0 }
 0x7cc   : > { %5735 = vst [vmem:[%s7428_s14 + $0x9b0] sm:$0xff] %v5223_v25 }
 0x7cd   : > { %v5224_v28 = vpack.c.bf16 %v4512_v27, %v4511_v26  ;;  %6971 = vmatmul.msk.f32.gmra.mxu2 %vm319_vm1, %v7241_v29  ;;  %7036 = vmatmul.msk.f32.gmra.mxu3 %vm319_vm1, %v7241_v29  ;;  %v3187_v30 = vpop.f32.mrf.mxu0  ;;  %v3396_v31 = vpop.f32.mrf.mxu1 }
 0x7ce   : > { %v3188_v32 = vadd.f32 %v3187_v30, %v9566_v38  ;;  %v3397_v33 = vadd.f32 %v3396_v31, %v9568_v39 }
 0x7cf   : > { %5736 = vst [vmem:[%s7428_s14 + $0x9b8] sm:$0xff] %v5224_v28 }
 0x7d0   : > { %v4525_v34 = vmax.f32 %v3188_v32, 0.0  ;;  %v4526_v37 = vmax.f32 %v3397_v33, 0.0  ;;  %v3605_v40 = vpop.f32.mrf.mxu2  ;;  %v3814_v41 = vpop.f32.mrf.mxu3  ;;  %6841 = vmatmul.msk.f32.gmra.mxu0 %vm319_vm1, %v7241_v29  ;;  %6906 = vmatmul.msk.f32.gmra.mxu1 %vm319_vm1, %v7241_v29  ;;  %v7245_v29 = vld [vmem:[%s7307_s28 + $0x1d8] sm:$0xff] }
 0x7d1   : > { %v3606_v35 = vadd.f32 %v3605_v40, %v9574_v49  ;;  %v3815_v36 = vadd.f32 %v3814_v41, %v9576_v50 }
 0x7d2   : > { %v5231_v42 = vpack.c.bf16 %v4526_v37, %v4525_v34 }
 0x7d3   : > { %v4527_v45 = vmax.f32 %v3606_v35, 0.0  ;;  %v4528_v46 = vmax.f32 %v3815_v36, 0.0 }
 0x7d4   : > { %5743 = vst [vmem:[%s7428_s14 + $0x9f0] sm:$0xff] %v5231_v42 }
 0x7d5   : > { %v5232_v47 = vpack.c.bf16 %v4528_v46, %v4527_v45  ;;  %6972 = vmatmul.msk.f32.gmra.mxu2 %vm319_vm1, %v7242_v48  ;;  %7037 = vmatmul.msk.f32.gmra.mxu3 %vm319_vm1, %v7242_v48  ;;  %v3190_v43 = vpop.f32.mrf.mxu0  ;;  %v3399_v44 = vpop.f32.mrf.mxu1 }
 0x7d6   : > { %v3191_v51 = vadd.f32 %v3190_v43, %v9566_v38  ;;  %v3400_v52 = vadd.f32 %v3399_v44, %v9568_v39 }
 0x7d7   : > { %5744 = vst [vmem:[%s7428_s14 + $0x9f8] sm:$0xff] %v5232_v47 }
 0x7d8   : > { %v4541_v53 = vmax.f32 %v3191_v51, 0.0  ;;  %v4542_v54 = vmax.f32 %v3400_v52, 0.0  ;;  %v3608_v55 = vpop.f32.mrf.mxu2  ;;  %v3817_v56 = vpop.f32.mrf.mxu3  ;;  %6842 = vmatmul.msk.f32.gmra.mxu0 %vm319_vm1, %v7242_v48  ;;  %6907 = vmatmul.msk.f32.gmra.mxu1 %vm319_vm1, %v7242_v48  ;;  %v7246_v48 = vld [vmem:[%s7307_s28 + $0x1e0] sm:$0xff] }
 0x7d9   : > { %v3609_v57 = vadd.f32 %v3608_v55, %v9574_v49  ;;  %v3818_v58 = vadd.f32 %v3817_v56, %v9576_v50 }
 0x7da   : > { %v5239_v59 = vpack.c.bf16 %v4542_v54, %v4541_v53 }
 0x7db   : > { %v4543_v60 = vmax.f32 %v3609_v57, 0.0  ;;  %v4544_v61 = vmax.f32 %v3818_v58, 0.0 }
 0x7dc   : > { %5751 = vst [vmem:[%s7428_s14 + $0xa30] sm:$0xff] %v5239_v59 }
 0x7dd   : > { %v5240_v62 = vpack.c.bf16 %v4544_v61, %v4543_v60  ;;  %6973 = vmatmul.msk.f32.gmra.mxu2 %vm319_vm1, %v7243_v63  ;;  %7038 = vmatmul.msk.f32.gmra.mxu3 %vm319_vm1, %v7243_v63  ;;  %v3193_v0 = vpop.f32.mrf.mxu0  ;;  %v3402_v1 = vpop.f32.mrf.mxu1 }
 0x7de   : > { %v3194_v2 = vadd.f32 %v3193_v0, %v9566_v38  ;;  %v3403_v3 = vadd.f32 %v3402_v1, %v9568_v39 }
 0x7df   : > { %5752 = vst [vmem:[%s7428_s14 + $0xa38] sm:$0xff] %v5240_v62 }
 0x7e0   : > { %v4557_v4 = vmax.f32 %v3194_v2, 0.0  ;;  %v4558_v5 = vmax.f32 %v3403_v3, 0.0  ;;  %v3611_v6 = vpop.f32.mrf.mxu2  ;;  %v3820_v7 = vpop.f32.mrf.mxu3  ;;  %6843 = vmatmul.msk.f32.gmra.mxu0 %vm319_vm1, %v7243_v63  ;;  %6908 = vmatmul.msk.f32.gmra.mxu1 %vm319_vm1, %v7243_v63  ;;  %v7247_v63 = vld [vmem:[%s7307_s28 + $0x1e8] sm:$0xff] }
 0x7e1   : > { %v3612_v8 = vadd.f32 %v3611_v6, %v9574_v49  ;;  %v3821_v9 = vadd.f32 %v3820_v7, %v9576_v50 }
 0x7e2   : > { %v5247_v10 = vpack.c.bf16 %v4558_v5, %v4557_v4 }
 0x7e3   : > { %v4559_v11 = vmax.f32 %v3612_v8, 0.0  ;;  %v4560_v12 = vmax.f32 %v3821_v9, 0.0 }
 0x7e4   : > { %5759 = vst [vmem:[%s7428_s14 + $0xa70] sm:$0xff] %v5247_v10 }
 0x7e5   : > { %v5248_v13 = vpack.c.bf16 %v4560_v12, %v4559_v11  ;;  %6974 = vmatmul.msk.f32.gmra.mxu2 %vm319_vm1, %v7244_v14  ;;  %7039 = vmatmul.msk.f32.gmra.mxu3 %vm319_vm1, %v7244_v14  ;;  %v3196_v15 = vpop.f32.mrf.mxu0  ;;  %v3405_v16 = vpop.f32.mrf.mxu1 }
 0x7e6   : > { %v3197_v17 = vadd.f32 %v3196_v15, %v9566_v38  ;;  %v3406_v18 = vadd.f32 %v3405_v16, %v9568_v39 }
 0x7e7   : > { %5760 = vst [vmem:[%s7428_s14 + $0xa78] sm:$0xff] %v5248_v13 }
 0x7e8   : > { %v4573_v19 = vmax.f32 %v3197_v17, 0.0  ;;  %v4574_v20 = vmax.f32 %v3406_v18, 0.0  ;;  %v3614_v21 = vpop.f32.mrf.mxu2  ;;  %v3823_v22 = vpop.f32.mrf.mxu3  ;;  %6844 = vmatmul.msk.f32.gmra.mxu0 %vm319_vm1, %v7244_v14  ;;  %6909 = vmatmul.msk.f32.gmra.mxu1 %vm319_vm1, %v7244_v14  ;;  %v7248_v14 = vld [vmem:[%s7307_s28 + $0x1f0] sm:$0xff] }
 0x7e9   : > { %v3615_v23 = vadd.f32 %v3614_v21, %v9574_v49  ;;  %v3824_v24 = vadd.f32 %v3823_v22, %v9576_v50 }
 0x7ea   : > { %v5255_v25 = vpack.c.bf16 %v4574_v20, %v4573_v19 }
 0x7eb   : > { %v4575_v26 = vmax.f32 %v3615_v23, 0.0  ;;  %v4576_v27 = vmax.f32 %v3824_v24, 0.0 }
 0x7ec   : > { %5767 = vst [vmem:[%s7428_s14 + $0xab0] sm:$0xff] %v5255_v25 }
 0x7ed   : > { %v5256_v28 = vpack.c.bf16 %v4576_v27, %v4575_v26  ;;  %6975 = vmatmul.msk.f32.gmra.mxu2 %vm319_vm1, %v7245_v29  ;;  %7040 = vmatmul.msk.f32.gmra.mxu3 %vm319_vm1, %v7245_v29  ;;  %v3199_v30 = vpop.f32.mrf.mxu0  ;;  %v3408_v31 = vpop.f32.mrf.mxu1 }
 0x7ee   : > { %v3200_v32 = vadd.f32 %v3199_v30, %v9566_v38  ;;  %v3409_v33 = vadd.f32 %v3408_v31, %v9568_v39 }
 0x7ef   : > { %5768 = vst [vmem:[%s7428_s14 + $0xab8] sm:$0xff] %v5256_v28 }
 0x7f0   : > { %v4589_v34 = vmax.f32 %v3200_v32, 0.0  ;;  %v4590_v37 = vmax.f32 %v3409_v33, 0.0  ;;  %v3617_v40 = vpop.f32.mrf.mxu2  ;;  %v3826_v41 = vpop.f32.mrf.mxu3  ;;  %6845 = vmatmul.msk.f32.gmra.mxu0 %vm319_vm1, %v7245_v29  ;;  %6910 = vmatmul.msk.f32.gmra.mxu1 %vm319_vm1, %v7245_v29  ;;  %v7249_v29 = vld [vmem:[%s7307_s28 + $0x1f8] sm:$0xff] }
 0x7f1   : > { %v3618_v35 = vadd.f32 %v3617_v40, %v9574_v49  ;;  %v3827_v36 = vadd.f32 %v3826_v41, %v9576_v50 }
 0x7f2   : > { %v5263_v42 = vpack.c.bf16 %v4590_v37, %v4589_v34 }
 0x7f3   : > { %v4591_v45 = vmax.f32 %v3618_v35, 0.0  ;;  %v4592_v46 = vmax.f32 %v3827_v36, 0.0 }
 0x7f4   : > { %5775 = vst [vmem:[%s7428_s14 + $0xaf0] sm:$0xff] %v5263_v42 }
 0x7f5   : > { %v5264_v47 = vpack.c.bf16 %v4592_v46, %v4591_v45  ;;  %6976 = vmatmul.msk.f32.gmra.mxu2 %vm319_vm1, %v7246_v48  ;;  %7041 = vmatmul.msk.f32.gmra.mxu3 %vm319_vm1, %v7246_v48  ;;  %v3202_v43 = vpop.f32.mrf.mxu0  ;;  %v3411_v44 = vpop.f32.mrf.mxu1 }
 0x7f6   : > { %v3203_v51 = vadd.f32 %v3202_v43, %v9566_v38  ;;  %v3412_v52 = vadd.f32 %v3411_v44, %v9568_v39 }
 0x7f7   : > { %5776 = vst [vmem:[%s7428_s14 + $0xaf8] sm:$0xff] %v5264_v47 }
 0x7f8   : > { %v4605_v53 = vmax.f32 %v3203_v51, 0.0  ;;  %v4606_v54 = vmax.f32 %v3412_v52, 0.0  ;;  %v3620_v55 = vpop.f32.mrf.mxu2  ;;  %v3829_v56 = vpop.f32.mrf.mxu3  ;;  %6846 = vmatmul.msk.f32.gmra.mxu0 %vm319_vm1, %v7246_v48  ;;  %6911 = vmatmul.msk.f32.gmra.mxu1 %vm319_vm1, %v7246_v48 }
 0x7f9   : > { %v3621_v57 = vadd.f32 %v3620_v55, %v9574_v49  ;;  %v3830_v58 = vadd.f32 %v3829_v56, %v9576_v50 }
 0x7fa   : > { %v5271_v59 = vpack.c.bf16 %v4606_v54, %v4605_v53 }
 0x7fb   : > { %v4607_v60 = vmax.f32 %v3621_v57, 0.0  ;;  %v4608_v61 = vmax.f32 %v3830_v58, 0.0 }
 0x7fc   : > { %5783 = vst [vmem:[%s7428_s14 + $0xb30] sm:$0xff] %v5271_v59 }
 0x7fd   : > { %v5272_v62 = vpack.c.bf16 %v4608_v61, %v4607_v60  ;;  %6977 = vmatmul.msk.f32.gmra.mxu2 %vm319_vm1, %v7247_v63  ;;  %7042 = vmatmul.msk.f32.gmra.mxu3 %vm319_vm1, %v7247_v63  ;;  %v3205_v0 = vpop.f32.mrf.mxu0  ;;  %v3414_v1 = vpop.f32.mrf.mxu1 }
 0x7fe   : > { %v3206_v2 = vadd.f32 %v3205_v0, %v9566_v38  ;;  %v3415_v3 = vadd.f32 %v3414_v1, %v9568_v39 }
 0x7ff   : > { %5784 = vst [vmem:[%s7428_s14 + $0xb38] sm:$0xff] %v5272_v62 }
 0x800   : > { %v4621_v4 = vmax.f32 %v3206_v2, 0.0  ;;  %v4622_v5 = vmax.f32 %v3415_v3, 0.0  ;;  %v3623_v6 = vpop.f32.mrf.mxu2  ;;  %v3832_v7 = vpop.f32.mrf.mxu3  ;;  %6847 = vmatmul.msk.f32.gmra.mxu0 %vm319_vm1, %v7247_v63  ;;  %6912 = vmatmul.msk.f32.gmra.mxu1 %vm319_vm1, %v7247_v63 }
 0x801   : > { %v3624_v8 = vadd.f32 %v3623_v6, %v9574_v49  ;;  %v3833_v9 = vadd.f32 %v3832_v7, %v9576_v50 }
 0x802   : > { %v5279_v10 = vpack.c.bf16 %v4622_v5, %v4621_v4 }
 0x803   : > { %v4623_v11 = vmax.f32 %v3624_v8, 0.0  ;;  %v4624_v12 = vmax.f32 %v3833_v9, 0.0 }
 0x804   : > { %5791 = vst [vmem:[%s7428_s14 + $0xb70] sm:$0xff] %v5279_v10 }
 0x805   : > { %v5280_v13 = vpack.c.bf16 %v4624_v12, %v4623_v11  ;;  %6978 = vmatmul.msk.f32.gmra.mxu2 %vm319_vm1, %v7248_v14  ;;  %7043 = vmatmul.msk.f32.gmra.mxu3 %vm319_vm1, %v7248_v14  ;;  %v3208_v15 = vpop.f32.mrf.mxu0  ;;  %v3417_v16 = vpop.f32.mrf.mxu1 }
 0x806   : > { %v3209_v17 = vadd.f32 %v3208_v15, %v9566_v38  ;;  %v3418_v18 = vadd.f32 %v3417_v16, %v9568_v39 }
 0x807   : > { %5792 = vst [vmem:[%s7428_s14 + $0xb78] sm:$0xff] %v5280_v13 }
 0x808   : > { %v4637_v19 = vmax.f32 %v3209_v17, 0.0  ;;  %v4638_v20 = vmax.f32 %v3418_v18, 0.0  ;;  %v3626_v21 = vpop.f32.mrf.mxu2  ;;  %v3835_v22 = vpop.f32.mrf.mxu3  ;;  %6848 = vmatmul.msk.f32.gmra.mxu0 %vm319_vm1, %v7248_v14  ;;  %6913 = vmatmul.msk.f32.gmra.mxu1 %vm319_vm1, %v7248_v14 }
 0x809   : > { %v3627_v23 = vadd.f32 %v3626_v21, %v9574_v49  ;;  %v3836_v24 = vadd.f32 %v3835_v22, %v9576_v50 }
 0x80a   : > { %v5287_v25 = vpack.c.bf16 %v4638_v20, %v4637_v19 }
 0x80b   : > { %v4639_v26 = vmax.f32 %v3627_v23, 0.0  ;;  %v4640_v27 = vmax.f32 %v3836_v24, 0.0 }
 0x80c   : > { %5799 = vst [vmem:[%s7428_s14 + $0xbb0] sm:$0xff] %v5287_v25 }
 0x80d   : > { %v5288_v28 = vpack.c.bf16 %v4640_v27, %v4639_v26  ;;  %6979 = vmatmul.msk.f32.gmra.mxu2 %vm319_vm1, %v7249_v29  ;;  %7044 = vmatmul.msk.f32.gmra.mxu3 %vm319_vm1, %v7249_v29  ;;  %v3211_v30 = vpop.f32.mrf.mxu0  ;;  %v3420_v31 = vpop.f32.mrf.mxu1 }
 0x80e   : > { %v3212_v32 = vadd.f32 %v3211_v30, %v9566_v38  ;;  %v3421_v33 = vadd.f32 %v3420_v31, %v9568_v39 }
 0x80f   : > { %5800 = vst [vmem:[%s7428_s14 + $0xbb8] sm:$0xff] %v5288_v28 }
 0x810   : > { %v4653_v34 = vmax.f32 %v3212_v32, 0.0  ;;  %v4654_v37 = vmax.f32 %v3421_v33, 0.0  ;;  %v3629_v40 = vpop.f32.mrf.mxu2  ;;  %v3838_v41 = vpop.f32.mrf.mxu3  ;;  %6849 = vmatmul.msk.f32.gmra.mxu0 %vm319_vm1, %v7249_v29  ;;  %6914 = vmatmul.msk.f32.gmra.mxu1 %vm319_vm1, %v7249_v29 }
 0x811   : > { %v3630_v35 = vadd.f32 %v3629_v40, %v9574_v49  ;;  %v3839_v36 = vadd.f32 %v3838_v41, %v9576_v50 }
 0x812   : > { %v5295_v42 = vpack.c.bf16 %v4654_v37, %v4653_v34 }
 0x813   : > { %v4655_v45 = vmax.f32 %v3630_v35, 0.0  ;;  %v4656_v46 = vmax.f32 %v3839_v36, 0.0 }
 0x814   : > { %5807 = vst [vmem:[%s7428_s14 + $0xbf0] sm:$0xff] %v5295_v42 }
 0x815   : > { %v5296_v47 = vpack.c.bf16 %v4656_v46, %v4655_v45  ;;  %v3214_v48 = vpop.f32.mrf.mxu0  ;;  %v3423_v43 = vpop.f32.mrf.mxu1 }
 0x816   : > { %v3215_v44 = vadd.f32 %v3214_v48, %v9566_v38  ;;  %v3424_v51 = vadd.f32 %v3423_v43, %v9568_v39 }
 0x817   : > { %5808 = vst [vmem:[%s7428_s14 + $0xbf8] sm:$0xff] %v5296_v47 }
 0x818   : > { %v4669_v52 = vmax.f32 %v3215_v44, 0.0  ;;  %v4670_v53 = vmax.f32 %v3424_v51, 0.0  ;;  %v3632_v54 = vpop.f32.mrf.mxu2  ;;  %v3841_v55 = vpop.f32.mrf.mxu3 }
 0x819   : > { %v3633_v56 = vadd.f32 %v3632_v54, %v9574_v49  ;;  %v3842_v57 = vadd.f32 %v3841_v55, %v9576_v50 }
 0x81a   : > { %v5303_v58 = vpack.c.bf16 %v4670_v53, %v4669_v52 }
 0x81b   : > { %v4671_v59 = vmax.f32 %v3633_v56, 0.0  ;;  %v4672_v60 = vmax.f32 %v3842_v57, 0.0 }
 0x81c   : > { %5815 = vst [vmem:[%s7428_s14 + $0xc30] sm:$0xff] %v5303_v58 }
 0x81d   : > { %v5304_v61 = vpack.c.bf16 %v4672_v60, %v4671_v59  ;;  %v3217_v62 = vpop.f32.mrf.mxu0  ;;  %v3426_v63 = vpop.f32.mrf.mxu1 }
 0x81e   : > { %v3218_v0 = vadd.f32 %v3217_v62, %v9566_v38  ;;  %v3427_v1 = vadd.f32 %v3426_v63, %v9568_v39 }
 0x81f   : > { %5816 = vst [vmem:[%s7428_s14 + $0xc38] sm:$0xff] %v5304_v61 }
 0x820   : > { %v4685_v2 = vmax.f32 %v3218_v0, 0.0  ;;  %v4686_v3 = vmax.f32 %v3427_v1, 0.0  ;;  %v3635_v4 = vpop.f32.mrf.mxu2  ;;  %v3844_v5 = vpop.f32.mrf.mxu3 }
 0x821   : > { %v3636_v6 = vadd.f32 %v3635_v4, %v9574_v49  ;;  %v3845_v7 = vadd.f32 %v3844_v5, %v9576_v50 }
 0x822   : > { %v5311_v8 = vpack.c.bf16 %v4686_v3, %v4685_v2 }
 0x823   : > { %v4687_v9 = vmax.f32 %v3636_v6, 0.0  ;;  %v4688_v10 = vmax.f32 %v3845_v7, 0.0 }
 0x824   : > { %5823 = vst [vmem:[%s7428_s14 + $0xc70] sm:$0xff] %v5311_v8 }
 0x825   : > { %v5312_v11 = vpack.c.bf16 %v4688_v10, %v4687_v9  ;;  %v3220_v12 = vpop.f32.mrf.mxu0  ;;  %v3429_v13 = vpop.f32.mrf.mxu1 }
 0x826   : > { %v3221_v14 = vadd.f32 %v3220_v12, %v9566_v38  ;;  %v3430_v15 = vadd.f32 %v3429_v13, %v9568_v39 }
 0x827   : > { %5824 = vst [vmem:[%s7428_s14 + $0xc78] sm:$0xff] %v5312_v11 }
 0x828   : > { %v4701_v16 = vmax.f32 %v3221_v14, 0.0  ;;  %v4702_v17 = vmax.f32 %v3430_v15, 0.0  ;;  %v3638_v18 = vpop.f32.mrf.mxu2  ;;  %v3847_v19 = vpop.f32.mrf.mxu3 }
 0x829   : > { %v3639_v20 = vadd.f32 %v3638_v18, %v9574_v49  ;;  %v3848_v21 = vadd.f32 %v3847_v19, %v9576_v50 }
 0x82a   : > { %v5319_v22 = vpack.c.bf16 %v4702_v17, %v4701_v16 }
 0x82b   : > { %v4703_v23 = vmax.f32 %v3639_v20, 0.0  ;;  %v4704_v24 = vmax.f32 %v3848_v21, 0.0 }
 0x82c   : > { %5831 = vst [vmem:[%s7428_s14 + $0xcb0] sm:$0xff] %v5319_v22 }
 0x82d   : > { %v5320_v25 = vpack.c.bf16 %v4704_v24, %v4703_v23  ;;  %v3223_v26 = vpop.f32.mrf.mxu0  ;;  %v3432_v27 = vpop.f32.mrf.mxu1 }
 0x82e   : > { %v3224_v28 = vadd.f32 %v3223_v26, %v9566_v38  ;;  %v3433_v29 = vadd.f32 %v3432_v27, %v9568_v39 }
 0x82f   : > { %5832 = vst [vmem:[%s7428_s14 + $0xcb8] sm:$0xff] %v5320_v25 }
 0x830   : > { %v4717_v30 = vmax.f32 %v3224_v28, 0.0  ;;  %v4718_v31 = vmax.f32 %v3433_v29, 0.0  ;;  %v3641_v32 = vpop.f32.mrf.mxu2  ;;  %v3850_v33 = vpop.f32.mrf.mxu3 }
 0x831   : > { %v3642_v34 = vadd.f32 %v3641_v32, %v9574_v49  ;;  %v3851_v37 = vadd.f32 %v3850_v33, %v9576_v50 }
 0x832   : > { %v5327_v40 = vpack.c.bf16 %v4718_v31, %v4717_v30 }
 0x833   : > { %v4719_v41 = vmax.f32 %v3642_v34, 0.0  ;;  %v4720_v35 = vmax.f32 %v3851_v37, 0.0 }
 0x834   : > { %5839 = vst [vmem:[%s7428_s14 + $0xcf0] sm:$0xff] %v5327_v40 }
 0x835   : > { %v5328_v36 = vpack.c.bf16 %v4720_v35, %v4719_v41  ;;  %v3226_v42 = vpop.f32.mrf.mxu0  ;;  %v3435_v45 = vpop.f32.mrf.mxu1 }
 0x836   : > { %v3227_v46 = vadd.f32 %v3226_v42, %v9566_v38  ;;  %v3436_v47 = vadd.f32 %v3435_v45, %v9568_v39 }
 0x837   : > { %5840 = vst [vmem:[%s7428_s14 + $0xcf8] sm:$0xff] %v5328_v36 }
 0x838   : > { %v4733_v48 = vmax.f32 %v3227_v46, 0.0  ;;  %v4734_v43 = vmax.f32 %v3436_v47, 0.0  ;;  %v3644_v44 = vpop.f32.mrf.mxu2  ;;  %v3853_v51 = vpop.f32.mrf.mxu3 }
 0x839   : > { %v3645_v52 = vadd.f32 %v3644_v44, %v9574_v49  ;;  %v3854_v53 = vadd.f32 %v3853_v51, %v9576_v50 }
 0x83a   : > { %v5335_v54 = vpack.c.bf16 %v4734_v43, %v4733_v48 }
 0x83b   : > { %v4735_v55 = vmax.f32 %v3645_v52, 0.0  ;;  %v4736_v56 = vmax.f32 %v3854_v53, 0.0 }
 0x83c   : > { %5847 = vst [vmem:[%s7428_s14 + $0xd30] sm:$0xff] %v5335_v54 }
 0x83d   : > { %v5336_v57 = vpack.c.bf16 %v4736_v56, %v4735_v55  ;;  %v3229_v58 = vpop.f32.mrf.mxu0  ;;  %v3438_v59 = vpop.f32.mrf.mxu1 }
 0x83e   : > { %v3230_v60 = vadd.f32 %v3229_v58, %v9566_v38  ;;  %v3439_v61 = vadd.f32 %v3438_v59, %v9568_v39 }
 0x83f   : > { %5848 = vst [vmem:[%s7428_s14 + $0xd38] sm:$0xff] %v5336_v57 }
 0x840   : > { %v4749_v62 = vmax.f32 %v3230_v60, 0.0  ;;  %v4750_v63 = vmax.f32 %v3439_v61, 0.0  ;;  %v3647_v0 = vpop.f32.mrf.mxu2  ;;  %v3856_v1 = vpop.f32.mrf.mxu3 }
 0x841   : > { %v3648_v2 = vadd.f32 %v3647_v0, %v9574_v49  ;;  %v3857_v3 = vadd.f32 %v3856_v1, %v9576_v50 }
 0x842   : > { %v5343_v4 = vpack.c.bf16 %v4750_v63, %v4749_v62 }
 0x843   : > { %v4751_v5 = vmax.f32 %v3648_v2, 0.0  ;;  %v4752_v6 = vmax.f32 %v3857_v3, 0.0 }
 0x844   : > { %5855 = vst [vmem:[%s7428_s14 + $0xd70] sm:$0xff] %v5343_v4 }
 0x845   : > { %v5344_v7 = vpack.c.bf16 %v4752_v6, %v4751_v5  ;;  %v3232_v8 = vpop.f32.mrf.mxu0  ;;  %v3441_v9 = vpop.f32.mrf.mxu1 }
 0x846   : > { %v3233_v10 = vadd.f32 %v3232_v8, %v9566_v38  ;;  %v3442_v11 = vadd.f32 %v3441_v9, %v9568_v39 }
 0x847   : > { %5856 = vst [vmem:[%s7428_s14 + $0xd78] sm:$0xff] %v5344_v7 }
 0x848   : > { %v4765_v12 = vmax.f32 %v3233_v10, 0.0  ;;  %v4766_v13 = vmax.f32 %v3442_v11, 0.0  ;;  %v3650_v14 = vpop.f32.mrf.mxu2  ;;  %v3859_v15 = vpop.f32.mrf.mxu3 }
 0x849   : > { %v3651_v16 = vadd.f32 %v3650_v14, %v9574_v49  ;;  %v3860_v17 = vadd.f32 %v3859_v15, %v9576_v50 }
 0x84a   : > { %v5351_v18 = vpack.c.bf16 %v4766_v13, %v4765_v12 }
 0x84b   : > { %v4767_v19 = vmax.f32 %v3651_v16, 0.0  ;;  %v4768_v20 = vmax.f32 %v3860_v17, 0.0 }
 0x84c   : > { %5863 = vst [vmem:[%s7428_s14 + $0xdb0] sm:$0xff] %v5351_v18 }
 0x84d   : > { %v5352_v21 = vpack.c.bf16 %v4768_v20, %v4767_v19  ;;  %v3235_v22 = vpop.f32.mrf.mxu0  ;;  %v3444_v23 = vpop.f32.mrf.mxu1 }
 0x84e   : > { %v3236_v24 = vadd.f32 %v3235_v22, %v9566_v38  ;;  %v3445_v25 = vadd.f32 %v3444_v23, %v9568_v39 }
 0x84f   : > { %5864 = vst [vmem:[%s7428_s14 + $0xdb8] sm:$0xff] %v5352_v21 }
 0x850   : > { %v4781_v26 = vmax.f32 %v3236_v24, 0.0  ;;  %v4782_v27 = vmax.f32 %v3445_v25, 0.0  ;;  %v3653_v28 = vpop.f32.mrf.mxu2  ;;  %v3862_v29 = vpop.f32.mrf.mxu3 }
 0x851   : > { %v3654_v30 = vadd.f32 %v3653_v28, %v9574_v49  ;;  %v3863_v31 = vadd.f32 %v3862_v29, %v9576_v50 }
 0x852   : > { %v5359_v32 = vpack.c.bf16 %v4782_v27, %v4781_v26 }
 0x853   : > { %v4783_v33 = vmax.f32 %v3654_v30, 0.0  ;;  %v4784_v34 = vmax.f32 %v3863_v31, 0.0 }
 0x854   : > { %5871 = vst [vmem:[%s7428_s14 + $0xdf0] sm:$0xff] %v5359_v32 }
 0x855   : > { %v5360_v37 = vpack.c.bf16 %v4784_v34, %v4783_v33  ;;  %v3238_v40 = vpop.f32.mrf.mxu0  ;;  %v3447_v41 = vpop.f32.mrf.mxu1 }
 0x856   : > { %v3239_v35 = vadd.f32 %v3238_v40, %v9566_v38  ;;  %v3448_v36 = vadd.f32 %v3447_v41, %v9568_v39 }
 0x857   : > { %5872 = vst [vmem:[%s7428_s14 + $0xdf8] sm:$0xff] %v5360_v37 }
 0x858   : > { %v4797_v42 = vmax.f32 %v3239_v35, 0.0  ;;  %v4798_v45 = vmax.f32 %v3448_v36, 0.0  ;;  %v3656_v46 = vpop.f32.mrf.mxu2  ;;  %v3865_v47 = vpop.f32.mrf.mxu3 }
 0x859   : > { %v3657_v48 = vadd.f32 %v3656_v46, %v9574_v49  ;;  %v3866_v43 = vadd.f32 %v3865_v47, %v9576_v50 }
 0x85a   : > { %v5367_v44 = vpack.c.bf16 %v4798_v45, %v4797_v42 }
 0x85b   : > { %v4799_v51 = vmax.f32 %v3657_v48, 0.0  ;;  %v4800_v52 = vmax.f32 %v3866_v43, 0.0 }
 0x85c   : > { %5879 = vst [vmem:[%s7428_s14 + $0xe30] sm:$0xff] %v5367_v44 }
 0x85d   : > { %v5368_v53 = vpack.c.bf16 %v4800_v52, %v4799_v51  ;;  %v3241_v54 = vpop.f32.mrf.mxu0  ;;  %v3450_v55 = vpop.f32.mrf.mxu1 }
 0x85e   : > { %v3242_v56 = vadd.f32 %v3241_v54, %v9566_v38  ;;  %v3451_v57 = vadd.f32 %v3450_v55, %v9568_v39 }
 0x85f   : > { %5880 = vst [vmem:[%s7428_s14 + $0xe38] sm:$0xff] %v5368_v53 }
 0x860   : > { %v4813_v58 = vmax.f32 %v3242_v56, 0.0  ;;  %v4814_v59 = vmax.f32 %v3451_v57, 0.0  ;;  %v3659_v60 = vpop.f32.mrf.mxu2  ;;  %v3868_v61 = vpop.f32.mrf.mxu3 }
 0x861   : > { %v3660_v62 = vadd.f32 %v3659_v60, %v9574_v49  ;;  %v3869_v63 = vadd.f32 %v3868_v61, %v9576_v50 }
 0x862   : > { %v5375_v0 = vpack.c.bf16 %v4814_v59, %v4813_v58 }
 0x863   : > { %v4815_v1 = vmax.f32 %v3660_v62, 0.0  ;;  %v4816_v2 = vmax.f32 %v3869_v63, 0.0 }
 0x864   : > { %5887 = vst [vmem:[%s7428_s14 + $0xe70] sm:$0xff] %v5375_v0 }
 0x865   : > { %v5376_v3 = vpack.c.bf16 %v4816_v2, %v4815_v1  ;;  %v3244_v4 = vpop.f32.mrf.mxu0  ;;  %v3453_v5 = vpop.f32.mrf.mxu1 }
 0x866   : > { %v3245_v6 = vadd.f32 %v3244_v4, %v9566_v38  ;;  %v3454_v7 = vadd.f32 %v3453_v5, %v9568_v39 }
 0x867   : > { %5888 = vst [vmem:[%s7428_s14 + $0xe78] sm:$0xff] %v5376_v3 }
 0x868   : > { %v4829_v8 = vmax.f32 %v3245_v6, 0.0  ;;  %v4830_v9 = vmax.f32 %v3454_v7, 0.0  ;;  %v3662_v10 = vpop.f32.mrf.mxu2  ;;  %v3871_v11 = vpop.f32.mrf.mxu3 }
 0x869   : > { %v3663_v12 = vadd.f32 %v3662_v10, %v9574_v49  ;;  %v3872_v13 = vadd.f32 %v3871_v11, %v9576_v50 }
 0x86a   : > { %v5383_v14 = vpack.c.bf16 %v4830_v9, %v4829_v8 }
 0x86b   : > { %v4831_v15 = vmax.f32 %v3663_v12, 0.0  ;;  %v4832_v16 = vmax.f32 %v3872_v13, 0.0 }
 0x86c   : > { %5895 = vst [vmem:[%s7428_s14 + $0xeb0] sm:$0xff] %v5383_v14 }
 0x86d   : > { %v5384_v17 = vpack.c.bf16 %v4832_v16, %v4831_v15  ;;  %v3247_v18 = vpop.f32.mrf.mxu0  ;;  %v3456_v19 = vpop.f32.mrf.mxu1 }
 0x86e   : > { %v3248_v20 = vadd.f32 %v3247_v18, %v9566_v38  ;;  %v3457_v21 = vadd.f32 %v3456_v19, %v9568_v39 }
 0x86f   : > { %5896 = vst [vmem:[%s7428_s14 + $0xeb8] sm:$0xff] %v5384_v17 }
 0x870   : > { %v4845_v22 = vmax.f32 %v3248_v20, 0.0  ;;  %v4846_v23 = vmax.f32 %v3457_v21, 0.0  ;;  %v3665_v24 = vpop.f32.mrf.mxu2  ;;  %v3874_v25 = vpop.f32.mrf.mxu3 }
 0x871   : > { %v3666_v26 = vadd.f32 %v3665_v24, %v9574_v49  ;;  %v3875_v27 = vadd.f32 %v3874_v25, %v9576_v50 }
 0x872   : > { %v5391_v28 = vpack.c.bf16 %v4846_v23, %v4845_v22 }
 0x873   : > { %v4847_v29 = vmax.f32 %v3666_v26, 0.0  ;;  %v4848_v30 = vmax.f32 %v3875_v27, 0.0 }
 0x874   : > { %5903 = vst [vmem:[%s7428_s14 + $0xef0] sm:$0xff] %v5391_v28 }
 0x875   : > { %v5392_v31 = vpack.c.bf16 %v4848_v30, %v4847_v29  ;;  %v3250_v32 = vpop.f32.mrf.mxu0  ;;  %v3459_v33 = vpop.f32.mrf.mxu1 }
 0x876   : > { %v3251_v34 = vadd.f32 %v3250_v32, %v9566_v38  ;;  %v3460_v37 = vadd.f32 %v3459_v33, %v9568_v39 }
 0x877   : > { %5904 = vst [vmem:[%s7428_s14 + $0xef8] sm:$0xff] %v5392_v31 }
 0x878   : > { %v4861_v40 = vmax.f32 %v3251_v34, 0.0  ;;  %v4862_v41 = vmax.f32 %v3460_v37, 0.0  ;;  %v3668_v35 = vpop.f32.mrf.mxu2  ;;  %v3877_v36 = vpop.f32.mrf.mxu3 }
 0x879   : > { %v3669_v42 = vadd.f32 %v3668_v35, %v9574_v49  ;;  %v3878_v45 = vadd.f32 %v3877_v36, %v9576_v50 }
 0x87a   : > { %v5399_v46 = vpack.c.bf16 %v4862_v41, %v4861_v40 }
 0x87b   : > { %v4863_v47 = vmax.f32 %v3669_v42, 0.0  ;;  %v4864_v48 = vmax.f32 %v3878_v45, 0.0 }
 0x87c   : > { %5911 = vst [vmem:[%s7428_s14 + $0xf30] sm:$0xff] %v5399_v46 }
 0x87d   : > { %v5400_v43 = vpack.c.bf16 %v4864_v48, %v4863_v47  ;;  %v3253_v44 = vpop.f32.mrf.mxu0  ;;  %v3462_v51 = vpop.f32.mrf.mxu1 }
 0x87e   : > { %v3254_v52 = vadd.f32 %v3253_v44, %v9566_v38  ;;  %v3463_v53 = vadd.f32 %v3462_v51, %v9568_v39 }
 0x87f   : > { %5912 = vst [vmem:[%s7428_s14 + $0xf38] sm:$0xff] %v5400_v43 }
 0x880   : > { %v4877_v54 = vmax.f32 %v3254_v52, 0.0  ;;  %v4878_v55 = vmax.f32 %v3463_v53, 0.0  ;;  %v3671_v56 = vpop.f32.mrf.mxu2  ;;  %v3880_v57 = vpop.f32.mrf.mxu3 }
 0x881   : > { %v3672_v58 = vadd.f32 %v3671_v56, %v9574_v49  ;;  %v3881_v59 = vadd.f32 %v3880_v57, %v9576_v50 }
 0x882   : > { %v5407_v60 = vpack.c.bf16 %v4878_v55, %v4877_v54 }
 0x883   : > { %v4879_v61 = vmax.f32 %v3672_v58, 0.0  ;;  %v4880_v62 = vmax.f32 %v3881_v59, 0.0 }
 0x884   : > { %5919 = vst [vmem:[%s7428_s14 + $0xf70] sm:$0xff] %v5407_v60 }
 0x885   : > { %v5408_v63 = vpack.c.bf16 %v4880_v62, %v4879_v61  ;;  %v3256_v0 = vpop.f32.mrf.mxu0  ;;  %v3465_v1 = vpop.f32.mrf.mxu1 }
 0x886   : > { %v3257_v2 = vadd.f32 %v3256_v0, %v9566_v38  ;;  %v3466_v3 = vadd.f32 %v3465_v1, %v9568_v39 }
 0x887   : > { %5920 = vst [vmem:[%s7428_s14 + $0xf78] sm:$0xff] %v5408_v63 }
 0x888   : > { %v4893_v4 = vmax.f32 %v3257_v2, 0.0  ;;  %v4894_v5 = vmax.f32 %v3466_v3, 0.0  ;;  %v3674_v6 = vpop.f32.mrf.mxu2  ;;  %v3883_v7 = vpop.f32.mrf.mxu3 }
 0x889   : > { %v3675_v8 = vadd.f32 %v3674_v6, %v9574_v49  ;;  %v3884_v9 = vadd.f32 %v3883_v7, %v9576_v50 }
 0x88a   : > { %v5415_v10 = vpack.c.bf16 %v4894_v5, %v4893_v4 }
 0x88b   : > { %v4895_v11 = vmax.f32 %v3675_v8, 0.0  ;;  %v4896_v12 = vmax.f32 %v3884_v9, 0.0 }
 0x88c   : > { %5927 = vst [vmem:[%s7428_s14 + $0xfb0] sm:$0xff] %v5415_v10 }
 0x88d   : > { %v5416_v13 = vpack.c.bf16 %v4896_v12, %v4895_v11  ;;  %v3259_v14 = vpop.f32.mrf.mxu0  ;;  %v3468_v15 = vpop.f32.mrf.mxu1 }
 0x88e   : > { %v3260_v16 = vadd.f32 %v3259_v14, %v9566_v38  ;;  %v3469_v17 = vadd.f32 %v3468_v15, %v9568_v39 }
 0x88f   : > { %5928 = vst [vmem:[%s7428_s14 + $0xfb8] sm:$0xff] %v5416_v13 }
 0x890   : > { %v4909_v18 = vmax.f32 %v3260_v16, 0.0  ;;  %v4910_v19 = vmax.f32 %v3469_v17, 0.0  ;;  %v3677_v20 = vpop.f32.mrf.mxu2  ;;  %v3886_v21 = vpop.f32.mrf.mxu3 }
 0x891   : > { %v3678_v22 = vadd.f32 %v3677_v20, %v9574_v49  ;;  %v3887_v23 = vadd.f32 %v3886_v21, %v9576_v50 }
 0x892   : > { %v5423_v24 = vpack.c.bf16 %v4910_v19, %v4909_v18 }
 0x893   : > { %v4911_v25 = vmax.f32 %v3678_v22, 0.0  ;;  %v4912_v26 = vmax.f32 %v3887_v23, 0.0 }
 0x894   : > { %5935 = vst [vmem:[%s7428_s14 + $0xff0] sm:$0xff] %v5423_v24 }
 0x895   : > { %v5424_v27 = vpack.c.bf16 %v4912_v26, %v4911_v25 }
 0x897   : > { %5936 = vst [vmem:[%s7428_s14 + $0xff8] sm:$0xff] %v5424_v27 }
 0x898 PF: > { %s13_s12 = sadd.s32 1, %s7256_s12  }
 0x899   : > { %p10_p4 = scmp.ge.s32.totalorder %s13_s12, 4  }
 0x89b   :  { %12 = sbr.rel (!%p10_p4) target bundleno = 1 (0x1), region = 65 }

</bundles_post_ra>
